<compile_context>
chip_gen: v5e
topology: v5e:2x2
jax: 0.10.0
libtpu: 0.0.40
codegen_flags: <defaults>
</compile_context>

<pallas_src>
import numpy as np
import jax
import jax.numpy as jnp
from jax import lax
from jax.experimental import pallas as pl
from jax.experimental.pallas import tpu as pltpu


# ------------------------------ JAX glue -------------------------------------
def _bilinear_align_corners(img, out_h, out_w):
    """PyTorch F.interpolate(mode='bilinear', align_corners=True) for NCHW."""
    n, c, h, w = img.shape
    ys = jnp.linspace(0.0, h - 1, out_h) if h > 1 else jnp.zeros((out_h,), jnp.float32)
    xs = jnp.linspace(0.0, w - 1, out_w) if w > 1 else jnp.zeros((out_w,), jnp.float32)
    y0 = jnp.clip(jnp.floor(ys).astype(jnp.int32), 0, h - 1)
    x0 = jnp.clip(jnp.floor(xs).astype(jnp.int32), 0, w - 1)
    y1 = jnp.minimum(y0 + 1, h - 1)
    x1 = jnp.minimum(x0 + 1, w - 1)
    wy = (ys - y0.astype(jnp.float32))[None, None, :, None]
    wx = (xs - x0.astype(jnp.float32))[None, None, None, :]

    def g(yi, xi):
        return img[:, :, yi, :][:, :, :, xi]

    return (g(y0, x0) * (1 - wy) * (1 - wx) + g(y0, x1) * (1 - wy) * wx
            + g(y1, x0) * wy * (1 - wx) + g(y1, x1) * wy * wx)


# off-centre 3x3 tap order (shared by the wrapper weight packing and the kernel)
_OFF_CENTER = tuple((kh, kw) for kh in range(3) for kw in range(3)
                    if not (kh == 1 and kw == 1))


def aspp_forward(x_nchw, edge_nchw, params, rates=(6, 12, 18)):
    """ASPP forward pass.

    Returns NHWC (N, H, W, 6*RD) bfloat16; `transpose(0, 3, 1, 2)` gives the
    PyTorch module's NCHW output (channel order: img_pool, edge, 1x1, d6, d12, d18).
    """
    n, cin, h, w = x_nchw.shape
    rd = params["w1"].shape[1]
    hw = h * w
    R = max(rates)                                 # halo for the dilated taps
    co = 6 * rd                                    # true output channels
    co_pad = ((co + 127) // 128) * 128             # lane-dense, 128-aligned
    # The fused final ReLU and the summed centre/1x1 weight matrix are only
    # valid because every branch owns a disjoint column block [k*rd,(k+1)*rd).
    assert 6 * rd <= co_pad, (rd, co_pad)

    # --- activations: NCHW -> NHWC once, cast to bf16, NO halo pre-pad in HBM -
    x_nhwc = jnp.transpose(x_nchw, (0, 2, 3, 1)).astype(jnp.bfloat16)   # (N,H,W,Cin)

    # edge: bilinear resize (align_corners=True) + flatten; tiny, kept in f32
    edge_r = _bilinear_align_corners(edge_nchw, h, w)                   # (N,1,H,W)
    edge_flat = jnp.transpose(edge_r, (0, 2, 3, 1)).reshape(n, hw, 1)

    # --- image-pooling branch hoisted to the wrapper, f32 end-to-end ----------
    pooled = jnp.mean(x_nchw.astype(jnp.float32), axis=(2, 3))          # (N,Cin)
    img_vec = pooled @ params["w_img"].astype(jnp.float32)              # (N,RD)
    img_row = jnp.pad(img_vec, ((0, 0), (0, co_pad - rd)))[:, None, :]  # (N,1,128)

    # --- weights: zero-pad every (Cin, RD) block into the shared 128-wide
    #     output-column layout so the kernel accumulates lane-dense. ----------
    def pad_cols(wm, col0):
        return jnp.pad(wm, ((0, 0), (col0, co_pad - col0 - wm.shape[1])))

    w_edge_p = pad_cols(params["w_edge"], 1 * rd).astype(jnp.float32)   # (1,128) VPU
    w_cen = (pad_cols(params["w1"], 2 * rd)                             # 1x1 branch
             + pad_cols(params["w6"][4], 3 * rd)                        # centre taps
             + pad_cols(params["w12"][4], 4 * rd)
             + pad_cols(params["w18"][4], 5 * rd)).astype(jnp.bfloat16) # (Cin,128)
    # Per rate: 8 off-centre taps stacked along the CONTRACTION dim -> 1 matmul.
    w_rate = []
    for ri, key in enumerate(("w6", "w12", "w18")):
        blocks = [pad_cols(params[key][kh * 3 + kw], (3 + ri) * rd)
                  for (kh, kw) in _OFF_CENTER]
        w_rate.append(jnp.concatenate(blocks, axis=0))                  # (8*Cin,128)
    w_taps = jnp.stack(w_rate, axis=0).astype(jnp.bfloat16)             # (3,8*Cin,128)

    hp, wp = h + 2 * R, w + 2 * R

    # ----------------------------- Pallas kernel -----------------------------
    def kernel(x_ref, edge_ref, img_ref, w_edge_ref, w_cen_ref, w_taps_ref,
               out_ref, xpad_ref, col_ref):
        # Zero-haloed copy of x lives only in VMEM (no HBM pre-pad / pad op).
        # (At realistic sizes only the halo frame needs re-zeroing per step.)
        xpad_ref[...] = jnp.zeros_like(xpad_ref)
        xpad_ref[R:R + h, R:R + w, :] = x_ref[0]

        # 1x1 branch + the centre tap of all three dilated branches: one matmul.
        xc = x_ref[0].reshape(hw, cin)
        acc = jnp.dot(xc, w_cen_ref[...], preferred_element_type=jnp.float32)

        # Dilated 3x3 branches: per rate, pack the 8 off-centre shifted windows
        # into an (H,W,8*Cin) im2col tile (8 plain slice copies + 1 reshape) and
        # contract them in ONE MXU matmul with K = 8*Cin.  4 accumulator passes
        # total instead of 25.
        for ri, r in enumerate(rates):
            for t, (kh, kw) in enumerate(_OFF_CENTER):
                ys = R + (kh - 1) * r
                xs = R + (kw - 1) * r
                col_ref[:, :, t * cin:(t + 1) * cin] = \
                    xpad_ref[ys:ys + h, xs:xs + w, :]
            acc = acc + jnp.dot(col_ref[...].reshape(hw, 8 * cin),
                                w_taps_ref[ri],
                                preferred_element_type=jnp.float32)

        # image-pooling branch: precomputed in the wrapper, broadcast-add.
        acc = acc + img_ref[0]                                           # (1,128)
        # edge branch: single input channel -> outer product on the VPU.
        acc = acc + edge_ref[0] * w_edge_ref[...]                        # (HW,1)*(1,128)

        # one fused ReLU (branch columns are disjoint) + one lane-dense bf16 store.
        out_ref[0] = jnp.maximum(acc, 0.0).astype(out_ref.dtype)

    out = pl.pallas_call(
        kernel,
        out_shape=jax.ShapeDtypeStruct((n, hw, co_pad), jnp.bfloat16),
        grid=(n,),
        in_specs=[
            pl.BlockSpec((1, h, w, cin), lambda b: (b, 0, 0, 0)),        # x (un-padded)
            pl.BlockSpec((1, hw, 1), lambda b: (b, 0, 0)),               # edge
            pl.BlockSpec((1, 1, co_pad), lambda b: (b, 0, 0)),           # img-pool row
            # grid-invariant weight blocks (fetched once across the grid)
            pl.BlockSpec((1, co_pad), lambda b: (0, 0)),                 # w_edge
            pl.BlockSpec((cin, co_pad), lambda b: (0, 0)),               # w_cen
            pl.BlockSpec((3, 8 * cin, co_pad), lambda b: (0, 0, 0)),     # w_taps
        ],
        out_specs=pl.BlockSpec((1, hw, co_pad), lambda b: (b, 0, 0)),
        scratch_shapes=[
            pltpu.VMEM((hp, wp, cin), jnp.bfloat16),      # zero-haloed input block
            pltpu.VMEM((h, w, 8 * cin), jnp.bfloat16),    # per-rate im2col tile
        ],
        compiler_params=pltpu.CompilerParams(
            dimension_semantics=("parallel",),
            vmem_limit_bytes=32 * 1024 * 1024,
        ),
    )(x_nhwc, edge_flat, img_row, w_edge_p, w_cen, w_taps)

    # slice the 128-pad back to 6*RD and unflatten; output stays channels-last.
    return out[:, :, :co].reshape(n, h, w, co)


# --------------------------- pure-JAX reference -------------------------------
def aspp_reference(x, edge, params, rates=(6, 12, 18)):
    n, cin, h, w = x.shape
    rd = params["w1"].shape[1]
    pooled = jnp.mean(x, axis=(2, 3), keepdims=True)                     # (N,Cin,1,1)
    img = jax.nn.relu(jnp.einsum('nchw,cd->ndhw', pooled, params["w_img"]))
    img = jnp.broadcast_to(img, (n, rd, h, w))
    edge_r = _bilinear_align_corners(edge, h, w)
    ef = jax.nn.relu(jnp.einsum('nchw,cd->ndhw', edge_r, params["w_edge"]))
    y1 = jax.nn.relu(jnp.einsum('nchw,cd->ndhw', x, params["w1"]))
    outs = [img, ef, y1]
    for r, key in zip(rates, ("w6", "w12", "w18")):
        w9 = params[key]                                                 # (9,Cin,RD)
        w_oihw = jnp.transpose(w9.reshape(3, 3, cin, rd), (3, 2, 0, 1))
        yd = lax.conv_general_dilated(
            x, w_oihw, window_strides=(1, 1), padding=[(r, r), (r, r)],
            rhs_dilation=(r, r), dimension_numbers=('NCHW', 'OIHW', 'NCHW'))
        outs.append(jax.nn.relu(yd))
    return jnp.concatenate(outs, axis=1)


# ---------------------------------- main --------------------------------------
if __name__ == "__main__":
    # Synthetic config: effective in_dim=8, reduction_dim=16, output_stride=16
    # -> rates 6/12/18.  NOTE: Cin=8 is a correctness-test size only; perf at
    # this shape (8 of 128 lanes used) does not predict the realistic Cin=256
    # regime on any of v5e/v6e/v7x.
    N, CIN, H, W = 2, 8, 16, 16
    RD = 16
    key = jax.random.PRNGKey(0)
    kx, ke, k0, k1, k2, k3, k4, k5 = jax.random.split(key, 8)

    x = jax.random.normal(kx, (N, CIN, H, W), jnp.float32)
    edge = jax.random.normal(ke, (N, 1, 8, 8), jnp.float32)

    params = {
        "w_img":  0.1 * jax.random.normal(k0, (CIN, RD), jnp.float32),
        "w_edge": 0.1 * jax.random.normal(k1, (1, RD), jnp.float32),
        "w1":     0.1 * jax.random.normal(k2, (CIN, RD), jnp.float32),
        "w6":     0.1 * jax.random.normal(k3, (9, CIN, RD), jnp.float32),
        "w12":    0.1 * jax.random.normal(k4, (9, CIN, RD), jnp.float32),
        "w18":    0.1 * jax.random.normal(k5, (9, CIN, RD), jnp.float32),
    }

    # The kernel runs x and the conv weights through bf16 (with f32 MXU
    # accumulation). Round-trip those tensors here so the f32 reference sees
    # the exact same values; remaining differences are accumulation order plus
    # the final bf16 output rounding.
    bf16 = lambda a: a.astype(jnp.bfloat16).astype(jnp.float32)
    x_q = bf16(x)
    params_q = {k: (v if k == "w_edge" else bf16(v)) for k, v in params.items()}

    out = jax.block_until_ready(aspp_forward(x_q, edge, params_q))        # NHWC bf16
    assert out.shape == (N, H, W, 6 * RD), out.shape
    assert out.dtype == jnp.bfloat16, out.dtype

    ref = jax.block_until_ready(aspp_reference(x_q, edge, params_q))      # NCHW f32
    ref_nhwc = jnp.transpose(ref, (0, 2, 3, 1))
    np.testing.assert_allclose(np.asarray(out.astype(jnp.float32)),
                               np.asarray(ref_nhwc), rtol=1e-2, atol=1e-2)
    print("KERNEL_OK")
</pallas_src>

<mosaic_0001>
module attributes {stable_mosaic.version = 11 : i64} {
  func.func @kernel(%arg0: i32, %arg1: memref<1x16x16x8xbf16, #tpu.memory_space<vmem>>, %arg2: memref<1x256x1xf32, #tpu.memory_space<vmem>>, %arg3: memref<1x1x128xf32, #tpu.memory_space<vmem>>, %arg4: memref<1x128xf32, #tpu.memory_space<vmem>>, %arg5: memref<8x128xbf16, #tpu.memory_space<vmem>>, %arg6: memref<3x64x128xbf16, #tpu.memory_space<vmem>>, %arg7: memref<1x256x128xbf16, #tpu.memory_space<vmem>>, %arg8: memref<52x52x8xbf16, #tpu.memory_space<vmem>>, %arg9: memref<16x16x64xbf16, #tpu.memory_space<vmem>>) attributes {dimension_semantics = [#tpu.dimension_semantics<parallel>], iteration_bounds = array<i64: 2>, scalar_prefetch = 0 : i64, scratch_operands = 2 : i64, tpu.core_type = #tpu.core_type<tc>, window_params = [{transform_indices = @transform_0, window_bounds = array<i64: 1, 16, 16, 8>}, {transform_indices = @transform_1, window_bounds = array<i64: 1, 256, 1>}, {transform_indices = @transform_2, window_bounds = array<i64: 1, 1, 128>}, {pipeline_mode = #tpu.pipeline_mode<synchronous>, transform_indices = @transform_3, window_bounds = array<i64: 1, 128>}, {pipeline_mode = #tpu.pipeline_mode<synchronous>, transform_indices = @transform_4, window_bounds = array<i64: 8, 128>}, {pipeline_mode = #tpu.pipeline_mode<synchronous>, transform_indices = @transform_5, window_bounds = array<i64: 3, 64, 128>}, {transform_indices = @transform_6, window_bounds = array<i64: 1, 256, 128>}]} {
    %cst = arith.constant 0.000000e+00 : bf16
    %0 = vector.broadcast %cst : bf16 to vector<52x52x8xbf16>
    %c0 = arith.constant 0 : index
    %c0_0 = arith.constant 0 : index
    %c0_1 = arith.constant 0 : index
    %1 = vector.load %arg8[%c0, %c0_0, %c0_1] : memref<52x52x8xbf16, #tpu.memory_space<vmem>>, vector<52x52x8xbf16>
    tpu.vector_store %arg8[%c0, %c0_0, %c0_1], %0 {strides = array<i32>} : memref<52x52x8xbf16, #tpu.memory_space<vmem>>, vector<52x52x8xbf16>,
    %c0_2 = arith.constant 0 : index
    %c0_3 = arith.constant 0 : index
    %c0_4 = arith.constant 0 : index
    %c0_5 = arith.constant 0 : index
    %2 = vector.load %arg1[%c0_2, %c0_3, %c0_4, %c0_5] : memref<1x16x16x8xbf16, #tpu.memory_space<vmem>>, vector<1x16x16x8xbf16>
    %3 = vector.shape_cast %2 : vector<1x16x16x8xbf16> to vector<16x16x8xbf16>
    %c18 = arith.constant 18 : index
    %c18_6 = arith.constant 18 : index
    %c0_7 = arith.constant 0 : index
    %4 = vector.load %arg8[%c18, %c18_6, %c0_7] : memref<52x52x8xbf16, #tpu.memory_space<vmem>>, vector<16x16x8xbf16>
    tpu.vector_store %arg8[%c18, %c18_6, %c0_7], %3 {strides = array<i32>} : memref<52x52x8xbf16, #tpu.memory_space<vmem>>, vector<16x16x8xbf16>,
    %c0_8 = arith.constant 0 : index
    %c0_9 = arith.constant 0 : index
    %c0_10 = arith.constant 0 : index
    %c0_11 = arith.constant 0 : index
    %5 = vector.load %arg1[%c0_8, %c0_9, %c0_10, %c0_11] : memref<1x16x16x8xbf16, #tpu.memory_space<vmem>>, vector<1x16x16x8xbf16>
    %6 = vector.shape_cast %5 : vector<1x16x16x8xbf16> to vector<16x16x8xbf16>
    %7 = vector.shape_cast %6 : vector<16x16x8xbf16> to vector<256x8xbf16>
    %c0_12 = arith.constant 0 : index
    %c0_13 = arith.constant 0 : index
    %8 = vector.load %arg5[%c0_12, %c0_13] : memref<8x128xbf16, #tpu.memory_space<vmem>>, vector<8x128xbf16>
    %cst_14 = arith.constant dense<0.000000e+00> : vector<256x128xf32>
    %9 = tpu.matmul %7, %8, %cst_14 {dimension_numbers = #tpu.dot_dimension_numbers<[1], [0], [0], [1], [0, 0, 1, 1], [], []>} : vector<256x8xbf16>, vector<8x128xbf16>, vector<256x128xf32> -> vector<256x128xf32>
    %c12 = arith.constant 12 : index
    %c12_15 = arith.constant 12 : index
    %c0_16 = arith.constant 0 : index
    %10 = vector.load %arg8[%c12, %c12_15, %c0_16] : memref<52x52x8xbf16, #tpu.memory_space<vmem>>, vector<16x16x8xbf16>
    %c0_17 = arith.constant 0 : index
    %c0_18 = arith.constant 0 : index
    %c0_19 = arith.constant 0 : index
    %11 = vector.load %arg9[%c0_17, %c0_18, %c0_19] : memref<16x16x64xbf16, #tpu.memory_space<vmem>>, vector<16x16x8xbf16>
    tpu.vector_store %arg9[%c0_17, %c0_18, %c0_19], %10 {strides = array<i32>} : memref<16x16x64xbf16, #tpu.memory_space<vmem>>, vector<16x16x8xbf16>,
    %c12_20 = arith.constant 12 : index
    %c18_21 = arith.constant 18 : index
    %c0_22 = arith.constant 0 : index
    %12 = vector.load %arg8[%c12_20, %c18_21, %c0_22] : memref<52x52x8xbf16, #tpu.memory_space<vmem>>, vector<16x16x8xbf16>
    %c0_23 = arith.constant 0 : index
    %c0_24 = arith.constant 0 : index
    %c8 = arith.constant 8 : index
    %13 = vector.load %arg9[%c0_23, %c0_24, %c8] : memref<16x16x64xbf16, #tpu.memory_space<vmem>>, vector<16x16x8xbf16>
    tpu.vector_store %arg9[%c0_23, %c0_24, %c8], %12 {strides = array<i32>} : memref<16x16x64xbf16, #tpu.memory_space<vmem>>, vector<16x16x8xbf16>,
    %c12_25 = arith.constant 12 : index
    %c24 = arith.constant 24 : index
    %c0_26 = arith.constant 0 : index
    %14 = vector.load %arg8[%c12_25, %c24, %c0_26] : memref<52x52x8xbf16, #tpu.memory_space<vmem>>, vector<16x16x8xbf16>
    %c0_27 = arith.constant 0 : index
    %c0_28 = arith.constant 0 : index
    %c16 = arith.constant 16 : index
    %15 = vector.load %arg9[%c0_27, %c0_28, %c16] : memref<16x16x64xbf16, #tpu.memory_space<vmem>>, vector<16x16x8xbf16>
    tpu.vector_store %arg9[%c0_27, %c0_28, %c16], %14 {strides = array<i32>} : memref<16x16x64xbf16, #tpu.memory_space<vmem>>, vector<16x16x8xbf16>,
    %c18_29 = arith.constant 18 : index
    %c12_30 = arith.constant 12 : index
    %c0_31 = arith.constant 0 : index
    %16 = vector.load %arg8[%c18_29, %c12_30, %c0_31] : memref<52x52x8xbf16, #tpu.memory_space<vmem>>, vector<16x16x8xbf16>
    %c0_32 = arith.constant 0 : index
    %c0_33 = arith.constant 0 : index
    %c24_34 = arith.constant 24 : index
    %17 = vector.load %arg9[%c0_32, %c0_33, %c24_34] : memref<16x16x64xbf16, #tpu.memory_space<vmem>>, vector<16x16x8xbf16>
    tpu.vector_store %arg9[%c0_32, %c0_33, %c24_34], %16 {strides = array<i32>} : memref<16x16x64xbf16, #tpu.memory_space<vmem>>, vector<16x16x8xbf16>,
    %c18_35 = arith.constant 18 : index
    %c24_36 = arith.constant 24 : index
    %c0_37 = arith.constant 0 : index
    %18 = vector.load %arg8[%c18_35, %c24_36, %c0_37] : memref<52x52x8xbf16, #tpu.memory_space<vmem>>, vector<16x16x8xbf16>
    %c0_38 = arith.constant 0 : index
    %c0_39 = arith.constant 0 : index
    %c32 = arith.constant 32 : index
    %19 = vector.load %arg9[%c0_38, %c0_39, %c32] : memref<16x16x64xbf16, #tpu.memory_space<vmem>>, vector<16x16x8xbf16>
    tpu.vector_store %arg9[%c0_38, %c0_39, %c32], %18 {strides = array<i32>} : memref<16x16x64xbf16, #tpu.memory_space<vmem>>, vector<16x16x8xbf16>,
    %c24_40 = arith.constant 24 : index
    %c12_41 = arith.constant 12 : index
    %c0_42 = arith.constant 0 : index
    %20 = vector.load %arg8[%c24_40, %c12_41, %c0_42] : memref<52x52x8xbf16, #tpu.memory_space<vmem>>, vector<16x16x8xbf16>
    %c0_43 = arith.constant 0 : index
    %c0_44 = arith.constant 0 : index
    %c40 = arith.constant 40 : index
    %21 = vector.load %arg9[%c0_43, %c0_44, %c40] : memref<16x16x64xbf16, #tpu.memory_space<vmem>>, vector<16x16x8xbf16>
    tpu.vector_store %arg9[%c0_43, %c0_44, %c40], %20 {strides = array<i32>} : memref<16x16x64xbf16, #tpu.memory_space<vmem>>, vector<16x16x8xbf16>,
    %c24_45 = arith.constant 24 : index
    %c18_46 = arith.constant 18 : index
    %c0_47 = arith.constant 0 : index
    %22 = vector.load %arg8[%c24_45, %c18_46, %c0_47] : memref<52x52x8xbf16, #tpu.memory_space<vmem>>, vector<16x16x8xbf16>
    %c0_48 = arith.constant 0 : index
    %c0_49 = arith.constant 0 : index
    %c48 = arith.constant 48 : index
    %23 = vector.load %arg9[%c0_48, %c0_49, %c48] : memref<16x16x64xbf16, #tpu.memory_space<vmem>>, vector<16x16x8xbf16>
    tpu.vector_store %arg9[%c0_48, %c0_49, %c48], %22 {strides = array<i32>} : memref<16x16x64xbf16, #tpu.memory_space<vmem>>, vector<16x16x8xbf16>,
    %c24_50 = arith.constant 24 : index
    %c24_51 = arith.constant 24 : index
    %c0_52 = arith.constant 0 : index
    %24 = vector.load %arg8[%c24_50, %c24_51, %c0_52] : memref<52x52x8xbf16, #tpu.memory_space<vmem>>, vector<16x16x8xbf16>
    %c0_53 = arith.constant 0 : index
    %c0_54 = arith.constant 0 : index
    %c56 = arith.constant 56 : index
    %25 = vector.load %arg9[%c0_53, %c0_54, %c56] : memref<16x16x64xbf16, #tpu.memory_space<vmem>>, vector<16x16x8xbf16>
    tpu.vector_store %arg9[%c0_53, %c0_54, %c56], %24 {strides = array<i32>} : memref<16x16x64xbf16, #tpu.memory_space<vmem>>, vector<16x16x8xbf16>,
    %c0_55 = arith.constant 0 : index
    %c0_56 = arith.constant 0 : index
    %c0_57 = arith.constant 0 : index
    %26 = vector.load %arg9[%c0_55, %c0_56, %c0_57] : memref<16x16x64xbf16, #tpu.memory_space<vmem>>, vector<16x16x64xbf16>
    %27 = vector.shape_cast %26 : vector<16x16x64xbf16> to vector<256x64xbf16>
    %c0_58 = arith.constant 0 : index
    %c0_59 = arith.constant 0 : index
    %c0_60 = arith.constant 0 : index
    %28 = vector.load %arg6[%c0_58, %c0_59, %c0_60] : memref<3x64x128xbf16, #tpu.memory_space<vmem>>, vector<1x64x128xbf16>
    %29 = vector.shape_cast %28 : vector<1x64x128xbf16> to vector<64x128xbf16>
    %cst_61 = arith.constant dense<0.000000e+00> : vector<256x128xf32>
    %30 = tpu.matmul %27, %29, %cst_61 {dimension_numbers = #tpu.dot_dimension_numbers<[1], [0], [0], [1], [0, 0, 1, 1], [], []>} : vector<256x64xbf16>, vector<64x128xbf16>, vector<256x128xf32> -> vector<256x128xf32>
    %31 = arith.addf %9, %30 : vector<256x128xf32>
    %c6 = arith.constant 6 : index
    %c6_62 = arith.constant 6 : index
    %c0_63 = arith.constant 0 : index
    %32 = vector.load %arg8[%c6, %c6_62, %c0_63] : memref<52x52x8xbf16, #tpu.memory_space<vmem>>, vector<16x16x8xbf16>
    %c0_64 = arith.constant 0 : index
    %c0_65 = arith.constant 0 : index
    %c0_66 = arith.constant 0 : index
    %33 = vector.load %arg9[%c0_64, %c0_65, %c0_66] : memref<16x16x64xbf16, #tpu.memory_space<vmem>>, vector<16x16x8xbf16>
    tpu.vector_store %arg9[%c0_64, %c0_65, %c0_66], %32 {strides = array<i32>} : memref<16x16x64xbf16, #tpu.memory_space<vmem>>, vector<16x16x8xbf16>,
    %c6_67 = arith.constant 6 : index
    %c18_68 = arith.constant 18 : index
    %c0_69 = arith.constant 0 : index
    %34 = vector.load %arg8[%c6_67, %c18_68, %c0_69] : memref<52x52x8xbf16, #tpu.memory_space<vmem>>, vector<16x16x8xbf16>
    %c0_70 = arith.constant 0 : index
    %c0_71 = arith.constant 0 : index
    %c8_72 = arith.constant 8 : index
    %35 = vector.load %arg9[%c0_70, %c0_71, %c8_72] : memref<16x16x64xbf16, #tpu.memory_space<vmem>>, vector<16x16x8xbf16>
    tpu.vector_store %arg9[%c0_70, %c0_71, %c8_72], %34 {strides = array<i32>} : memref<16x16x64xbf16, #tpu.memory_space<vmem>>, vector<16x16x8xbf16>,
    %c6_73 = arith.constant 6 : index
    %c30 = arith.constant 30 : index
    %c0_74 = arith.constant 0 : index
    %36 = vector.load %arg8[%c6_73, %c30, %c0_74] : memref<52x52x8xbf16, #tpu.memory_space<vmem>>, vector<16x16x8xbf16>
    %c0_75 = arith.constant 0 : index
    %c0_76 = arith.constant 0 : index
    %c16_77 = arith.constant 16 : index
    %37 = vector.load %arg9[%c0_75, %c0_76, %c16_77] : memref<16x16x64xbf16, #tpu.memory_space<vmem>>, vector<16x16x8xbf16>
    tpu.vector_store %arg9[%c0_75, %c0_76, %c16_77], %36 {strides = array<i32>} : memref<16x16x64xbf16, #tpu.memory_space<vmem>>, vector<16x16x8xbf16>,
    %c18_78 = arith.constant 18 : index
    %c6_79 = arith.constant 6 : index
    %c0_80 = arith.constant 0 : index
    %38 = vector.load %arg8[%c18_78, %c6_79, %c0_80] : memref<52x52x8xbf16, #tpu.memory_space<vmem>>, vector<16x16x8xbf16>
    %c0_81 = arith.constant 0 : index
    %c0_82 = arith.constant 0 : index
    %c24_83 = arith.constant 24 : index
    %39 = vector.load %arg9[%c0_81, %c0_82, %c24_83] : memref<16x16x64xbf16, #tpu.memory_space<vmem>>, vector<16x16x8xbf16>
    tpu.vector_store %arg9[%c0_81, %c0_82, %c24_83], %38 {strides = array<i32>} : memref<16x16x64xbf16, #tpu.memory_space<vmem>>, vector<16x16x8xbf16>,
    %c18_84 = arith.constant 18 : index
    %c30_85 = arith.constant 30 : index
    %c0_86 = arith.constant 0 : index
    %40 = vector.load %arg8[%c18_84, %c30_85, %c0_86] : memref<52x52x8xbf16, #tpu.memory_space<vmem>>, vector<16x16x8xbf16>
    %c0_87 = arith.constant 0 : index
    %c0_88 = arith.constant 0 : index
    %c32_89 = arith.constant 32 : index
    %41 = vector.load %arg9[%c0_87, %c0_88, %c32_89] : memref<16x16x64xbf16, #tpu.memory_space<vmem>>, vector<16x16x8xbf16>
    tpu.vector_store %arg9[%c0_87, %c0_88, %c32_89], %40 {strides = array<i32>} : memref<16x16x64xbf16, #tpu.memory_space<vmem>>, vector<16x16x8xbf16>,
    %c30_90 = arith.constant 30 : index
    %c6_91 = arith.constant 6 : index
    %c0_92 = arith.constant 0 : index
    %42 = vector.load %arg8[%c30_90, %c6_91, %c0_92] : memref<52x52x8xbf16, #tpu.memory_space<vmem>>, vector<16x16x8xbf16>
    %c0_93 = arith.constant 0 : index
    %c0_94 = arith.constant 0 : index
    %c40_95 = arith.constant 40 : index
    %43 = vector.load %arg9[%c0_93, %c0_94, %c40_95] : memref<16x16x64xbf16, #tpu.memory_space<vmem>>, vector<16x16x8xbf16>
    tpu.vector_store %arg9[%c0_93, %c0_94, %c40_95], %42 {strides = array<i32>} : memref<16x16x64xbf16, #tpu.memory_space<vmem>>, vector<16x16x8xbf16>,
    %c30_96 = arith.constant 30 : index
    %c18_97 = arith.constant 18 : index
    %c0_98 = arith.constant 0 : index
    %44 = vector.load %arg8[%c30_96, %c18_97, %c0_98] : memref<52x52x8xbf16, #tpu.memory_space<vmem>>, vector<16x16x8xbf16>
    %c0_99 = arith.constant 0 : index
    %c0_100 = arith.constant 0 : index
    %c48_101 = arith.constant 48 : index
    %45 = vector.load %arg9[%c0_99, %c0_100, %c48_101] : memref<16x16x64xbf16, #tpu.memory_space<vmem>>, vector<16x16x8xbf16>
    tpu.vector_store %arg9[%c0_99, %c0_100, %c48_101], %44 {strides = array<i32>} : memref<16x16x64xbf16, #tpu.memory_space<vmem>>, vector<16x16x8xbf16>,
    %c30_102 = arith.constant 30 : index
    %c30_103 = arith.constant 30 : index
    %c0_104 = arith.constant 0 : index
    %46 = vector.load %arg8[%c30_102, %c30_103, %c0_104] : memref<52x52x8xbf16, #tpu.memory_space<vmem>>, vector<16x16x8xbf16>
    %c0_105 = arith.constant 0 : index
    %c0_106 = arith.constant 0 : index
    %c56_107 = arith.constant 56 : index
    %47 = vector.load %arg9[%c0_105, %c0_106, %c56_107] : memref<16x16x64xbf16, #tpu.memory_space<vmem>>, vector<16x16x8xbf16>
    tpu.vector_store %arg9[%c0_105, %c0_106, %c56_107], %46 {strides = array<i32>} : memref<16x16x64xbf16, #tpu.memory_space<vmem>>, vector<16x16x8xbf16>,
    %c0_108 = arith.constant 0 : index
    %c0_109 = arith.constant 0 : index
    %c0_110 = arith.constant 0 : index
    %48 = vector.load %arg9[%c0_108, %c0_109, %c0_110] : memref<16x16x64xbf16, #tpu.memory_space<vmem>>, vector<16x16x64xbf16>
    %49 = vector.shape_cast %48 : vector<16x16x64xbf16> to vector<256x64xbf16>
    %c1 = arith.constant 1 : index
    %c0_111 = arith.constant 0 : index
    %c0_112 = arith.constant 0 : index
    %50 = vector.load %arg6[%c1, %c0_111, %c0_112] : memref<3x64x128xbf16, #tpu.memory_space<vmem>>, vector<1x64x128xbf16>
    %51 = vector.shape_cast %50 : vector<1x64x128xbf16> to vector<64x128xbf16>
    %cst_113 = arith.constant dense<0.000000e+00> : vector<256x128xf32>
    %52 = tpu.matmul %49, %51, %cst_113 {dimension_numbers = #tpu.dot_dimension_numbers<[1], [0], [0], [1], [0, 0, 1, 1], [], []>} : vector<256x64xbf16>, vector<64x128xbf16>, vector<256x128xf32> -> vector<256x128xf32>
    %53 = arith.addf %31, %52 : vector<256x128xf32>
    %c0_114 = arith.constant 0 : index
    %c0_115 = arith.constant 0 : index
    %c0_116 = arith.constant 0 : index
    %54 = vector.load %arg8[%c0_114, %c0_115, %c0_116] : memref<52x52x8xbf16, #tpu.memory_space<vmem>>, vector<16x16x8xbf16>
    %c0_117 = arith.constant 0 : index
    %c0_118 = arith.constant 0 : index
    %c0_119 = arith.constant 0 : index
    %55 = vector.load %arg9[%c0_117, %c0_118, %c0_119] : memref<16x16x64xbf16, #tpu.memory_space<vmem>>, vector<16x16x8xbf16>
    tpu.vector_store %arg9[%c0_117, %c0_118, %c0_119], %54 {strides = array<i32>} : memref<16x16x64xbf16, #tpu.memory_space<vmem>>, vector<16x16x8xbf16>,
    %c0_120 = arith.constant 0 : index
    %c18_121 = arith.constant 18 : index
    %c0_122 = arith.constant 0 : index
    %56 = vector.load %arg8[%c0_120, %c18_121, %c0_122] : memref<52x52x8xbf16, #tpu.memory_space<vmem>>, vector<16x16x8xbf16>
    %c0_123 = arith.constant 0 : index
    %c0_124 = arith.constant 0 : index
    %c8_125 = arith.constant 8 : index
    %57 = vector.load %arg9[%c0_123, %c0_124, %c8_125] : memref<16x16x64xbf16, #tpu.memory_space<vmem>>, vector<16x16x8xbf16>
    tpu.vector_store %arg9[%c0_123, %c0_124, %c8_125], %56 {strides = array<i32>} : memref<16x16x64xbf16, #tpu.memory_space<vmem>>, vector<16x16x8xbf16>,
    %c0_126 = arith.constant 0 : index
    %c36 = arith.constant 36 : index
    %c0_127 = arith.constant 0 : index
    %58 = vector.load %arg8[%c0_126, %c36, %c0_127] : memref<52x52x8xbf16, #tpu.memory_space<vmem>>, vector<16x16x8xbf16>
    %c0_128 = arith.constant 0 : index
    %c0_129 = arith.constant 0 : index
    %c16_130 = arith.constant 16 : index
    %59 = vector.load %arg9[%c0_128, %c0_129, %c16_130] : memref<16x16x64xbf16, #tpu.memory_space<vmem>>, vector<16x16x8xbf16>
    tpu.vector_store %arg9[%c0_128, %c0_129, %c16_130], %58 {strides = array<i32>} : memref<16x16x64xbf16, #tpu.memory_space<vmem>>, vector<16x16x8xbf16>,
    %c18_131 = arith.constant 18 : index
    %c0_132 = arith.constant 0 : index
    %c0_133 = arith.constant 0 : index
    %60 = vector.load %arg8[%c18_131, %c0_132, %c0_133] : memref<52x52x8xbf16, #tpu.memory_space<vmem>>, vector<16x16x8xbf16>
    %c0_134 = arith.constant 0 : index
    %c0_135 = arith.constant 0 : index
    %c24_136 = arith.constant 24 : index
    %61 = vector.load %arg9[%c0_134, %c0_135, %c24_136] : memref<16x16x64xbf16, #tpu.memory_space<vmem>>, vector<16x16x8xbf16>
    tpu.vector_store %arg9[%c0_134, %c0_135, %c24_136], %60 {strides = array<i32>} : memref<16x16x64xbf16, #tpu.memory_space<vmem>>, vector<16x16x8xbf16>,
    %c18_137 = arith.constant 18 : index
    %c36_138 = arith.constant 36 : index
    %c0_139 = arith.constant 0 : index
    %62 = vector.load %arg8[%c18_137, %c36_138, %c0_139] : memref<52x52x8xbf16, #tpu.memory_space<vmem>>, vector<16x16x8xbf16>
    %c0_140 = arith.constant 0 : index
    %c0_141 = arith.constant 0 : index
    %c32_142 = arith.constant 32 : index
    %63 = vector.load %arg9[%c0_140, %c0_141, %c32_142] : memref<16x16x64xbf16, #tpu.memory_space<vmem>>, vector<16x16x8xbf16>
    tpu.vector_store %arg9[%c0_140, %c0_141, %c32_142], %62 {strides = array<i32>} : memref<16x16x64xbf16, #tpu.memory_space<vmem>>, vector<16x16x8xbf16>,
    %c36_143 = arith.constant 36 : index
    %c0_144 = arith.constant 0 : index
    %c0_145 = arith.constant 0 : index
    %64 = vector.load %arg8[%c36_143, %c0_144, %c0_145] : memref<52x52x8xbf16, #tpu.memory_space<vmem>>, vector<16x16x8xbf16>
    %c0_146 = arith.constant 0 : index
    %c0_147 = arith.constant 0 : index
    %c40_148 = arith.constant 40 : index
    %65 = vector.load %arg9[%c0_146, %c0_147, %c40_148] : memref<16x16x64xbf16, #tpu.memory_space<vmem>>, vector<16x16x8xbf16>
    tpu.vector_store %arg9[%c0_146, %c0_147, %c40_148], %64 {strides = array<i32>} : memref<16x16x64xbf16, #tpu.memory_space<vmem>>, vector<16x16x8xbf16>,
    %c36_149 = arith.constant 36 : index
    %c18_150 = arith.constant 18 : index
    %c0_151 = arith.constant 0 : index
    %66 = vector.load %arg8[%c36_149, %c18_150, %c0_151] : memref<52x52x8xbf16, #tpu.memory_space<vmem>>, vector<16x16x8xbf16>
    %c0_152 = arith.constant 0 : index
    %c0_153 = arith.constant 0 : index
    %c48_154 = arith.constant 48 : index
    %67 = vector.load %arg9[%c0_152, %c0_153, %c48_154] : memref<16x16x64xbf16, #tpu.memory_space<vmem>>, vector<16x16x8xbf16>
    tpu.vector_store %arg9[%c0_152, %c0_153, %c48_154], %66 {strides = array<i32>} : memref<16x16x64xbf16, #tpu.memory_space<vmem>>, vector<16x16x8xbf16>,
    %c36_155 = arith.constant 36 : index
    %c36_156 = arith.constant 36 : index
    %c0_157 = arith.constant 0 : index
    %68 = vector.load %arg8[%c36_155, %c36_156, %c0_157] : memref<52x52x8xbf16, #tpu.memory_space<vmem>>, vector<16x16x8xbf16>
    %c0_158 = arith.constant 0 : index
    %c0_159 = arith.constant 0 : index
    %c56_160 = arith.constant 56 : index
    %69 = vector.load %arg9[%c0_158, %c0_159, %c56_160] : memref<16x16x64xbf16, #tpu.memory_space<vmem>>, vector<16x16x8xbf16>
    tpu.vector_store %arg9[%c0_158, %c0_159, %c56_160], %68 {strides = array<i32>} : memref<16x16x64xbf16, #tpu.memory_space<vmem>>, vector<16x16x8xbf16>,
    %c0_161 = arith.constant 0 : index
    %c0_162 = arith.constant 0 : index
    %c0_163 = arith.constant 0 : index
    %70 = vector.load %arg9[%c0_161, %c0_162, %c0_163] : memref<16x16x64xbf16, #tpu.memory_space<vmem>>, vector<16x16x64xbf16>
    %71 = vector.shape_cast %70 : vector<16x16x64xbf16> to vector<256x64xbf16>
    %c2 = arith.constant 2 : index
    %c0_164 = arith.constant 0 : index
    %c0_165 = arith.constant 0 : index
    %72 = vector.load %arg6[%c2, %c0_164, %c0_165] : memref<3x64x128xbf16, #tpu.memory_space<vmem>>, vector<1x64x128xbf16>
    %73 = vector.shape_cast %72 : vector<1x64x128xbf16> to vector<64x128xbf16>
    %cst_166 = arith.constant dense<0.000000e+00> : vector<256x128xf32>
    %74 = tpu.matmul %71, %73, %cst_166 {dimension_numbers = #tpu.dot_dimension_numbers<[1], [0], [0], [1], [0, 0, 1, 1], [], []>} : vector<256x64xbf16>, vector<64x128xbf16>, vector<256x128xf32> -> vector<256x128xf32>
    %75 = arith.addf %53, %74 : vector<256x128xf32>
    %c0_167 = arith.constant 0 : index
    %c0_168 = arith.constant 0 : index
    %c0_169 = arith.constant 0 : index
    %76 = vector.load %arg3[%c0_167, %c0_168, %c0_169] : memref<1x1x128xf32, #tpu.memory_space<vmem>>, vector<1x1x128xf32>
    %77 = vector.shape_cast %76 : vector<1x1x128xf32> to vector<1x128xf32>
    %78 = vector.broadcast %77 : vector<1x128xf32> to vector<256x128xf32>
    %79 = arith.addf %75, %78 : vector<256x128xf32>
    %c0_170 = arith.constant 0 : index
    %c0_171 = arith.constant 0 : index
    %c0_172 = arith.constant 0 : index
    %80 = vector.load %arg2[%c0_170, %c0_171, %c0_172] : memref<1x256x1xf32, #tpu.memory_space<vmem>>, vector<1x256x1xf32>
    %81 = vector.shape_cast %80 : vector<1x256x1xf32> to vector<256x1xf32>
    %c0_173 = arith.constant 0 : index
    %c0_174 = arith.constant 0 : index
    %82 = vector.load %arg4[%c0_173, %c0_174] : memref<1x128xf32, #tpu.memory_space<vmem>>, vector<1x128xf32>
    %83 = vector.broadcast %81 : vector<256x1xf32> to vector<256x128xf32>
    %84 = vector.broadcast %82 : vector<1x128xf32> to vector<256x128xf32>
    %85 = arith.mulf %83, %84 : vector<256x128xf32>
    %86 = arith.addf %79, %85 : vector<256x128xf32>
    %cst_175 = arith.constant 0.000000e+00 : f32
    %87 = vector.broadcast %cst_175 : f32 to vector<256x128xf32>
    %88 = arith.maximumf %86, %87 : vector<256x128xf32>
    %89 = arith.truncf %88 : vector<256x128xf32> to vector<256x128xbf16>
    %c0_176 = arith.constant 0 : index
    %c0_177 = arith.constant 0 : index
    %c0_178 = arith.constant 0 : index
    %90 = vector.load %arg7[%c0_176, %c0_177, %c0_178] : memref<1x256x128xbf16, #tpu.memory_space<vmem>>, vector<1x256x128xbf16>
    %91 = vector.shape_cast %90 : vector<1x256x128xbf16> to vector<256x128xbf16>
    %92 = vector.shape_cast %89 : vector<256x128xbf16> to vector<1x256x128xbf16>
    tpu.vector_store %arg7[%c0_176, %c0_177, %c0_178], %92 {strides = array<i32>} : memref<1x256x128xbf16, #tpu.memory_space<vmem>>, vector<1x256x128xbf16>,
    return
  }
  func.func @transform_0(%arg0: i32) -> (i32, i32, i32, i32) {
    %c0_i32 = arith.constant 0 : i32
    %c0_i32_0 = arith.constant 0 : i32
    %c0_i32_1 = arith.constant 0 : i32
    %c0_i32_2 = arith.constant 0 : i32
    return %arg0, %c0_i32, %c0_i32_0, %c0_i32_1 : i32, i32, i32, i32
  }
  func.func @transform_1(%arg0: i32) -> (i32, i32, i32) {
    %c0_i32 = arith.constant 0 : i32
    %c0_i32_0 = arith.constant 0 : i32
    %c0_i32_1 = arith.constant 0 : i32
    return %arg0, %c0_i32, %c0_i32_0 : i32, i32, i32
  }
  func.func @transform_2(%arg0: i32) -> (i32, i32, i32) {
    %c0_i32 = arith.constant 0 : i32
    %c0_i32_0 = arith.constant 0 : i32
    %c0_i32_1 = arith.constant 0 : i32
    return %arg0, %c0_i32, %c0_i32_0 : i32, i32, i32
  }
  func.func @transform_3(%arg0: i32) -> (i32, i32) {
    %c0_i32 = arith.constant 0 : i32
    %c0_i32_0 = arith.constant 0 : i32
    %c0_i32_1 = arith.constant 0 : i32
    return %c0_i32, %c0_i32_0 : i32, i32
  }
  func.func @transform_4(%arg0: i32) -> (i32, i32) {
    %c0_i32 = arith.constant 0 : i32
    %c0_i32_0 = arith.constant 0 : i32
    %c0_i32_1 = arith.constant 0 : i32
    return %c0_i32, %c0_i32_0 : i32, i32
  }
  func.func @transform_5(%arg0: i32) -> (i32, i32, i32) {
    %c0_i32 = arith.constant 0 : i32
    %c0_i32_0 = arith.constant 0 : i32
    %c0_i32_1 = arith.constant 0 : i32
    %c0_i32_2 = arith.constant 0 : i32
    return %c0_i32, %c0_i32_0, %c0_i32_1 : i32, i32, i32
  }
  func.func @transform_6(%arg0: i32) -> (i32, i32, i32) {
    %c0_i32 = arith.constant 0 : i32
    %c0_i32_0 = arith.constant 0 : i32
    %c0_i32_1 = arith.constant 0 : i32
    return %arg0, %c0_i32, %c0_i32_0 : i32, i32, i32
  }
}

</mosaic_0001>

<bundles_post_ra>
// kernel: tpu_custom_call.1
= control target key start
LH: loop header
LB: loop body
LE: loop exit
PB: predicated region body
PF: predicated region fallthrough
CT: control target
= control target key end

     0   :  { %11 = vsyncpa [#allocation5], 0  ;;  %s15016_s0 = inlined_call_operand.vmem [shape: bf16[2,16,16,8], index: 0, kind: input, shape index: {}]   ;;  %s15017_s1 = inlined_call_operand.vmem [shape: f32[2,256,1], index: 1, kind: input, shape index: {}]   ;;  %s15018_s2 = inlined_call_operand.vmem [shape: f32[2,1,128], index: 2, kind: input, shape index: {}]   ;;  %s15019_s3 = inlined_call_operand.vmem [shape: f32[1,128], index: 3, kind: input, shape index: {}]   ;;  %s15020_s4 = inlined_call_operand.vmem [shape: bf16[8,128], index: 4, kind: input, shape index: {}]   ;;  %s15021_s5 = inlined_call_operand.vmem [shape: bf16[3,64,128], index: 5, kind: input, shape index: {}]   ;;  %s15022_s6 = inlined_call_operand.hbm [shape: bf16[2,256,128], index: 6, kind: output, shape index: {}]  }
   0x1   :  { %13 = vsyncpa [#allocation5 + $0x1], 0  ;;  %s10538_s21 = smov 0   ;;  %s10540_s22 = smov 0  }
   0x2   :  { %s10542_s23 = smov 0   ;;  %s10544_s24 = smov 0  }
   0x3 LB: > { %s10559_s25 = sadd.s32 4294967295, %s10491_s24   ;;  %s9515_s26 = sadd.s32 4294967294, %s10491_s24   ;;  %s10491_s24 = sphi %s10544_s24, %s15034_s24   ;;  %s10487_s23 = sphi %s10542_s23, %s15033_s23   ;;  %s10483_s22 = sphi %s10540_s22, %s15032_s22   ;;  %s10479_s21 = sphi %s10538_s21, %s15031_s21  }
   0x4   : > { %s10563_s27 = sadd.s32 1, %s10491_s24   ;;  %s167_s28 = sadd.s32 1, %s10487_s23 }
   0x5   : > { %s164_s29 = ssub.s32 %s10491_s24, %s10563_s27  ;;  %p177_p0 = scmp.ne.s32.totalorder %s10487_s23, %s10483_s22 }
   0x6   : > { %p165_p1 = scmp.eq.s32.totalorder %s164_s29, 0  ;;  %p178_p2 = scmp.eq.s32.totalorder %s10559_s25, 1 }
   0x7   : > { %p183_p3 = scmp.ne.s32.totalorder %s10483_s22, %s10479_s21  ;;  %p184_p4 = scmp.eq.s32.totalorder %s9515_s26, 1 }
   0x8   : > { %s10574_s30 = scalar_select %p165_p1, %s10487_s23, %s167_s28  }
   0x9   : > { %p10576_p5 = por %p178_p2, %p177_p0  ;;  %p10580_p6 = por %p184_p4, %p183_p3 }
   0xa   : > { %p9518_p7 = scmp.ge.s32.totalorder %s10491_s24, 1  ;;  %p233_p8 = scmp.lt.s32.totalorder %s10491_s24, 3 }
   0xc   : > { %p234_p9 = pnand %p9518_p7, %p233_p8 }
   0xd   : > { %s10494_s9 = smov (!%p234_p9), 8   ;;  %p271_p10 = scmp.lt.s32.totalorder (!%p234_p9), %s10559_s25, 1 }
   0xe   : > { %237 = sbr.rel (%p234_p9) target bundleno = 2417 (0x971), region = 44  ;;  %s10495_s15 = smov (!%p234_p9), 16  }
   0xf   : > { %s10496_s16 = smov (!%p234_p9), 24   ;;  %s10497_s17 = smov (!%p234_p9), 32  }
  0x10   : > { %s10498_s18 = smov (!%p234_p9), 40   ;;  %s10499_s19 = smov (!%p234_p9), 48  }
  0x11   : > { %s10500_s20 = smov (!%p234_p9), 56   ;;  %s10279_s28 = sshll.u32 (!%p234_p9), %s10559_s25, 7 }
  0x13   : > { %vm285_vm0 = vcmask 60416   ;;  %v10493_v0 = vmov 0   ;;  %vm1302_vm1 = vcmask 1042432   ;;  %vm1303_vm2 = vcmask 1046532   ;;  %s11218_s10 = scalar_select %p271_p10, %s10559_s25, 1 }
  0x14   : > { %387 = vst.msk [vmem:[#allocation2 + $0x190] sm:$0xf] %vm285_vm0, %v10493_v0  ;;  %10426 = vset.pattern.permute.xlu2 %v10493_v0  ;;  %10425 = vset.pattern.permute.xlu1 %v10493_v0  ;;  %vm10607_vm3 = vmor %vm1302_vm1, %vm1303_vm2  ;;  %vm715_vm4 = vcmask 1040384   ;;  %vm716_vm5 = vcmask 1044484   ;;  %vm847_vm6 = vcmask 60417   ;;  %vm850_vm7 = vcmask 57344  }
  0x15   : > { %388 = vst.msk [vmem:[#allocation2 + $0x194] sm:$0xf] %vm285_vm0, %v10493_v0  ;;  %10424 = vset.pattern.permute.xlu0 %v10493_v0  ;;  %s10201_s11 = sshll.u32 %s11218_s10, 7  ;;  %vm11270_vm8 = vmor %vm715_vm4, %vm716_vm5  ;;  %vm1027_vm9 = vcmask 1041408   ;;  %vm1028_vm10 = vcmask 1045508   ;;  %vm1513_vm12 = vcmask 126016  }
  0x16   : > { %286 = vst.msk [vmem:[#allocation2] sm:$0xf] %vm285_vm0, %v10493_v0  ;;  %s11238_s14 = scalar_lea.vmem %s15016_s0, %s10201_s11  ;;  %vm11412_vm11 = vmor %vm1027_vm9, %vm1028_vm10  ;;  %vm1706_vm13 = vcmask 191616   ;;  %vm2043_vm14 = vcmask 257216   ;;  %vm2236_vm15 = vcmask 322816   ;;  %vm2574_vm1 = vcmask 388416  }
  0x17   : > { %287 = vst.msk [vmem:[#allocation2 + $0x4] sm:$0xf] %vm285_vm0, %v10493_v0  ;;  %v653_v56 = vld [vmem:[%s11238_s14 + $0x8] sm:$0xf]  ;;  %v651_v57 = vld [vmem:[%s11238_s14] sm:$0xf] }
  0x18   : > { %288 = vst.msk [vmem:[#allocation2 + $0x8] sm:$0xf] %vm285_vm0, %v10493_v0  ;;  %v652_v58 = vld [vmem:[%s11238_s14 + $0x4] sm:$0xf]  ;;  %v654_v59 = vld [vmem:[%s11238_s14 + $0xc] sm:$0xf] }
  0x19   : > { %289 = vst.msk [vmem:[#allocation2 + $0xc] sm:$0xf] %vm285_vm0, %v10493_v0  ;;  %v723_v60 = vrot.slane %v653_v56, 7  ;;  %v718_v61 = vrot.slane %v651_v57, 7  ;;  %v720_v62 = vrot.slane %v652_v58, 7  ;;  %vm2911_vm2 = vcmask 454016  }
  0x1a   : > { %290 = vst.msk [vmem:[#allocation2 + $0x10] sm:$0xf] %vm285_vm0, %v10493_v0  ;;  %v655_v63 = vld [vmem:[%s11238_s14 + $0x10] sm:$0xf]  ;;  %vm3104_vm4 = vcmask 519616   ;;  %vm3548_vm5 = vcmask 1043456  }
  0x1b   : > { %v1212_v1 = vld [vmem:[#allocation2 + $0x190] sm:$0xe]  ;;  %291 = vst.msk [vmem:[#allocation2 + $0x14] sm:$0xf] %vm285_vm0, %v10493_v0 }
  0x1c   : > { %v10605_v2 = vld [vmem:[#allocation2 + $0x194] sm:$0xf]  ;;  %v9542_v4 = vrot.slane %v1212_v1, 9  ;;  %294 = vst.msk [vmem:[#allocation2 + $0x1c] sm:$0xf] %vm285_vm0, %v10493_v0  ;;  %v725_v1 = vrot.slane %v654_v59, 7 }
  0x1d   : > { %v1321_v5 = vrot.slane %v10605_v2, 5  ;;  %295 = vst.msk [vmem:[#allocation2 + $0x20] sm:$0xf] %vm285_vm0, %v10493_v0  ;;  %v724_v2 = vrot.slane %v723_v60, 4 }
  0x1e   : > { %296 = vst.msk [vmem:[#allocation2 + $0x24] sm:$0xf] %vm285_vm0, %v10493_v0 }
  0x1f   : > { %v1322_v6 = vsel %vm10607_vm3, %v9542_v4, %v1321_v5  ;;  %297 = vst.msk [vmem:[#allocation2 + $0x28] sm:$0xf] %vm285_vm0, %v10493_v0  ;;  %v1323_v22 = vrot.slane %v1321_v5, 4  ;;  %v719_v4 = vrot.slane %v718_v61, 4  ;;  %v728_v5 = vrot.slane %v655_v63, 7 }
  0x20   : > { %1425 = vrot.lane.b32.xlu2 %v1322_v6, %s10494_s9  ;;  %298 = vst.msk [vmem:[#allocation2 + $0x2c] sm:$0xf] %vm285_vm0, %v10493_v0  ;;  %v722_v6 = vrot.slane %v720_v62, 4 }
  0x21   : > { %299 = vst.msk [vmem:[#allocation2 + $0x30] sm:$0xf] %vm285_vm0, %v10493_v0 }
  0x22   : > { %301 = vst.msk [vmem:[#allocation2 + $0x38] sm:$0xf] %vm285_vm0, %v10493_v0 }
  0x23   : > { %302 = vst.msk [vmem:[#allocation2 + $0x3c] sm:$0xf] %vm285_vm0, %v10493_v0 }
  0x24   : > { %303 = vst.msk [vmem:[#allocation2 + $0x40] sm:$0xf] %vm285_vm0, %v10493_v0 }
  0x25   : > { %304 = vst.msk [vmem:[#allocation2 + $0x44] sm:$0xf] %vm285_vm0, %v10493_v0 }
  0x26   : > { %305 = vst.msk [vmem:[#allocation2 + $0x48] sm:$0xf] %vm285_vm0, %v10493_v0 }
  0x27   : > { %306 = vst.msk [vmem:[#allocation2 + $0x4c] sm:$0xf] %vm285_vm0, %v10493_v0 }
  0x28   : > { %308 = vst.msk [vmem:[#allocation2 + $0x54] sm:$0xf] %vm285_vm0, %v10493_v0 }
  0x29   : > { %309 = vst.msk [vmem:[#allocation2 + $0x58] sm:$0xf] %vm285_vm0, %v10493_v0 }
  0x2a   : > { %310 = vst.msk [vmem:[#allocation2 + $0x5c] sm:$0xf] %vm285_vm0, %v10493_v0 }
  0x2b   : > { %311 = vst.msk [vmem:[#allocation2 + $0x60] sm:$0xf] %vm285_vm0, %v10493_v0 }
  0x2c   : > { %312 = vst.msk [vmem:[#allocation2 + $0x64] sm:$0xf] %vm285_vm0, %v10493_v0 }
  0x2d   : > { %313 = vst.msk [vmem:[#allocation2 + $0x68] sm:$0xf] %vm285_vm0, %v10493_v0 }
  0x2e   : > { %315 = vst.msk [vmem:[#allocation2 + $0x70] sm:$0xf] %vm285_vm0, %v10493_v0 }
  0x2f   : > { %316 = vst.msk [vmem:[#allocation2 + $0x74] sm:$0xf] %vm285_vm0, %v10493_v0 }
  0x30   : > { %317 = vst.msk [vmem:[#allocation2 + $0x78] sm:$0xf] %vm285_vm0, %v10493_v0 }
  0x31   : > { %318 = vst.msk [vmem:[#allocation2 + $0x7c] sm:$0xf] %vm285_vm0, %v10493_v0 }
  0x32   : > { %319 = vst.msk [vmem:[#allocation2 + $0x80] sm:$0xf] %vm285_vm0, %v10493_v0 }
  0x33   : > { %320 = vst.msk [vmem:[#allocation2 + $0x84] sm:$0xf] %vm285_vm0, %v10493_v0 }
  0x34   : > { %322 = vst.msk [vmem:[#allocation2 + $0x8c] sm:$0xf] %vm285_vm0, %v10493_v0 }
  0x35   : > { %323 = vst.msk [vmem:[#allocation2 + $0x90] sm:$0xf] %vm285_vm0, %v10493_v0 }
  0x36   : > { %324 = vst.msk [vmem:[#allocation2 + $0x94] sm:$0xf] %vm285_vm0, %v10493_v0 }
  0x37   : > { %325 = vst.msk [vmem:[#allocation2 + $0x98] sm:$0xf] %vm285_vm0, %v10493_v0 }
  0x38   : > { %326 = vst.msk [vmem:[#allocation2 + $0x9c] sm:$0xf] %vm285_vm0, %v10493_v0 }
  0x39   : > { %327 = vst.msk [vmem:[#allocation2 + $0xa0] sm:$0xf] %vm285_vm0, %v10493_v0 }
  0x3a   : > { %329 = vst.msk [vmem:[#allocation2 + $0xa8] sm:$0xf] %vm285_vm0, %v10493_v0 }
  0x3b   : > { %330 = vst.msk [vmem:[#allocation2 + $0xac] sm:$0xf] %vm285_vm0, %v10493_v0 }
  0x3c   : > { %331 = vst.msk [vmem:[#allocation2 + $0xb0] sm:$0xf] %vm285_vm0, %v10493_v0 }
  0x3d   : > { %332 = vst.msk [vmem:[#allocation2 + $0xb4] sm:$0xf] %vm285_vm0, %v10493_v0 }
  0x3e   : > { %333 = vst.msk [vmem:[#allocation2 + $0xb8] sm:$0xf] %vm285_vm0, %v10493_v0 }
  0x3f   : > { %334 = vst.msk [vmem:[#allocation2 + $0xbc] sm:$0xf] %vm285_vm0, %v10493_v0 }
  0x40   : > { %336 = vst.msk [vmem:[#allocation2 + $0xc4] sm:$0xf] %vm285_vm0, %v10493_v0 }
  0x41   : > { %337 = vst.msk [vmem:[#allocation2 + $0xc8] sm:$0xf] %vm285_vm0, %v10493_v0 }
  0x42   : > { %338 = vst.msk [vmem:[#allocation2 + $0xcc] sm:$0xf] %vm285_vm0, %v10493_v0 }
  0x43   : > { %339 = vst.msk [vmem:[#allocation2 + $0xd0] sm:$0xf] %vm285_vm0, %v10493_v0 }
  0x44   : > { %340 = vst.msk [vmem:[#allocation2 + $0xd4] sm:$0xf] %vm285_vm0, %v10493_v0 }
  0x45   : > { %341 = vst.msk [vmem:[#allocation2 + $0xd8] sm:$0xf] %vm285_vm0, %v10493_v0 }
  0x46   : > { %343 = vst.msk [vmem:[#allocation2 + $0xe0] sm:$0xf] %vm285_vm0, %v10493_v0 }
  0x47   : > { %344 = vst.msk [vmem:[#allocation2 + $0xe4] sm:$0xf] %vm285_vm0, %v10493_v0 }
  0x48   : > { %345 = vst.msk [vmem:[#allocation2 + $0xe8] sm:$0xf] %vm285_vm0, %v10493_v0 }
  0x49   : > { %346 = vst.msk [vmem:[#allocation2 + $0xec] sm:$0xf] %vm285_vm0, %v10493_v0 }
  0x4a   : > { %347 = vst.msk [vmem:[#allocation2 + $0xf0] sm:$0xf] %vm285_vm0, %v10493_v0 }
  0x4b   : > { %348 = vst.msk [vmem:[#allocation2 + $0xf4] sm:$0xf] %vm285_vm0, %v10493_v0 }
  0x4c   : > { %350 = vst.msk [vmem:[#allocation2 + $0xfc] sm:$0xf] %vm285_vm0, %v10493_v0 }
  0x4d   : > { %351 = vst.msk [vmem:[#allocation2 + $0x100] sm:$0xf] %vm285_vm0, %v10493_v0 }
  0x4e   : > { %352 = vst.msk [vmem:[#allocation2 + $0x104] sm:$0xf] %vm285_vm0, %v10493_v0 }
  0x4f   : > { %353 = vst.msk [vmem:[#allocation2 + $0x108] sm:$0xf] %vm285_vm0, %v10493_v0 }
  0x50   : > { %354 = vst.msk [vmem:[#allocation2 + $0x10c] sm:$0xf] %vm285_vm0, %v10493_v0 }
  0x51   : > { %355 = vst.msk [vmem:[#allocation2 + $0x110] sm:$0xf] %vm285_vm0, %v10493_v0 }
  0x52   : > { %357 = vst.msk [vmem:[#allocation2 + $0x118] sm:$0xf] %vm285_vm0, %v10493_v0 }
  0x53   : > { %358 = vst.msk [vmem:[#allocation2 + $0x11c] sm:$0xf] %vm285_vm0, %v10493_v0 }
  0x54   : > { %359 = vst.msk [vmem:[#allocation2 + $0x120] sm:$0xf] %vm285_vm0, %v10493_v0 }
  0x55   : > { %360 = vst.msk [vmem:[#allocation2 + $0x124] sm:$0xf] %vm285_vm0, %v10493_v0 }
  0x56   : > { %361 = vst.msk [vmem:[#allocation2 + $0x128] sm:$0xf] %vm285_vm0, %v10493_v0 }
  0x57   : > { %362 = vst.msk [vmem:[#allocation2 + $0x12c] sm:$0xf] %vm285_vm0, %v10493_v0 }
  0x58   : > { %364 = vst.msk [vmem:[#allocation2 + $0x134] sm:$0xf] %vm285_vm0, %v10493_v0 }
  0x59   : > { %365 = vst.msk [vmem:[#allocation2 + $0x138] sm:$0xf] %vm285_vm0, %v10493_v0 }
  0x5a   : > { %366 = vst.msk [vmem:[#allocation2 + $0x13c] sm:$0xf] %vm285_vm0, %v10493_v0 }
  0x5b   : > { %367 = vst.msk [vmem:[#allocation2 + $0x140] sm:$0xf] %vm285_vm0, %v10493_v0 }
  0x5c   : > { %368 = vst.msk [vmem:[#allocation2 + $0x144] sm:$0xf] %vm285_vm0, %v10493_v0 }
  0x5d   : > { %369 = vst.msk [vmem:[#allocation2 + $0x148] sm:$0xf] %vm285_vm0, %v10493_v0 }
  0x5e   : > { %371 = vst.msk [vmem:[#allocation2 + $0x150] sm:$0xf] %vm285_vm0, %v10493_v0 }
  0x5f   : > { %372 = vst.msk [vmem:[#allocation2 + $0x154] sm:$0xf] %vm285_vm0, %v10493_v0 }
  0x60   : > { %373 = vst.msk [vmem:[#allocation2 + $0x158] sm:$0xf] %vm285_vm0, %v10493_v0 }
  0x61   : > { %374 = vst.msk [vmem:[#allocation2 + $0x15c] sm:$0xf] %vm285_vm0, %v10493_v0 }
  0x62   : > { %375 = vst.msk [vmem:[#allocation2 + $0x160] sm:$0xf] %vm285_vm0, %v10493_v0 }
  0x63   : > { %376 = vst.msk [vmem:[#allocation2 + $0x164] sm:$0xf] %vm285_vm0, %v10493_v0 }
  0x64   : > { %378 = vst.msk [vmem:[#allocation2 + $0x16c] sm:$0xf] %vm285_vm0, %v10493_v0 }
  0x65   : > { %379 = vst.msk [vmem:[#allocation2 + $0x170] sm:$0xf] %vm285_vm0, %v10493_v0 }
  0x66   : > { %380 = vst.msk [vmem:[#allocation2 + $0x174] sm:$0xf] %vm285_vm0, %v10493_v0 }
  0x67   : > { %381 = vst.msk [vmem:[#allocation2 + $0x178] sm:$0xf] %vm285_vm0, %v10493_v0  ;;  %v1206_v7 = vld [vmem:[#allocation2 + $0x158] sm:$0xe] }
  0x68   : > { %382 = vst.msk [vmem:[#allocation2 + $0x17c] sm:$0xf] %vm285_vm0, %v10493_v0  ;;  %v1207_v8 = vld [vmem:[#allocation2 + $0x15c] sm:$0xf]  ;;  %v9540_v9 = vrot.slane %v1206_v7, 9 }
  0x69   : > { %383 = vst.msk [vmem:[#allocation2 + $0x180] sm:$0xf] %vm285_vm0, %v10493_v0  ;;  %v1307_v10 = vrot.slane %v1207_v8, 5  ;;  %v1208_v11 = vld [vmem:[#allocation2 + $0x160] sm:$0x1] }
  0x6a   : > { %385 = vst.msk [vmem:[#allocation2 + $0x188] sm:$0xf] %vm285_vm0, %v10493_v0  ;;  %v1310_v15 = vrot.slane %v1208_v11, 5  ;;  %v656_v7 = vld [vmem:[%s11238_s14 + $0x14] sm:$0xf] }
  0x6b   : > { %386 = vst.msk [vmem:[#allocation2 + $0x18c] sm:$0xf] %vm285_vm0, %v10493_v0  ;;  %v1308_v12 = vsel %vm10607_vm3, %v9540_v9, %v1307_v10  ;;  %v1309_v14 = vrot.slane %v1307_v10, 4  ;;  %v659_v9 = vld [vmem:[%s11238_s14 + $0x20] sm:$0xf] }
  0x6c   : > { %389 = vst.msk [vmem:[#allocation2 + $0x198] sm:$0xf] %vm285_vm0, %v10493_v0  ;;  %1417 = vrot.lane.b32.xlu0 %v1308_v12, %s10494_s9  ;;  %v11276_v10 = vld [vmem:[%s11238_s14 + $0x18] sm:$0xf]  ;;  %v658_v11 = vld [vmem:[%s11238_s14 + $0x1c] sm:$0xf] }
  0x6d   : > { %390 = vst.msk [vmem:[#allocation2 + $0x19c] sm:$0xf] %vm285_vm0, %v10493_v0  ;;  %v1209_v13 = vld [vmem:[#allocation2 + $0x174] sm:$0xe]  ;;  %v1311_v21 = vsel %vm10607_vm3, %v1309_v14, %v1310_v15  ;;  %v11282_v12 = vld [vmem:[%s11238_s14 + $0x28] sm:$0xf] }
  0x6e   : > { %392 = vst.msk [vmem:[#allocation2 + $0x1a4] sm:$0xf] %vm285_vm0, %v10493_v0  ;;  %v1210_v16 = vld [vmem:[#allocation2 + $0x178] sm:$0xf]  ;;  %v9541_v17 = vrot.slane %v1209_v13, 9  ;;  %v726_v13 = vsel %vm11270_vm8, %v724_v2, %v725_v1  ;;  %v729_v14 = vrot.slane %v728_v5, 4 }
  0x6f   : > { %393 = vst.msk [vmem:[#allocation2 + $0x1a8] sm:$0xf] %vm285_vm0, %v10493_v0  ;;  %v1314_v18 = vrot.slane %v1210_v16, 5  ;;  %v1211_v19 = vld [vmem:[#allocation2 + $0x17c] sm:$0x1]  ;;  %v730_v15 = vrot.slane %v656_v7, 7 }
  0x70   : > { %394 = vst.msk [vmem:[#allocation2 + $0x1ac] sm:$0xf] %vm285_vm0, %v10493_v0  ;;  %v1317_v25 = vrot.slane %v1211_v19, 5  ;;  %v662_v16 = vld [vmem:[%s11238_s14 + $0x2c] sm:$0xf]  ;;  %v733_v19 = vrot.slane %v11276_v10, 7 }
  0x71   : > { %395 = vst.msk [vmem:[#allocation2 + $0x1b0] sm:$0xf] %vm285_vm0, %v10493_v0  ;;  %v1315_v20 = vsel %vm10607_vm3, %v9541_v17, %v1314_v18  ;;  %v1316_v24 = vrot.slane %v1314_v18, 4  ;;  %v721_v17 = vsel %vm11270_vm8, %v719_v4, %v720_v62  ;;  %v738_v18 = vrot.slane %v659_v9, 7 }
  0x72   : > { %396 = vst.msk [vmem:[#allocation2 + $0x1b4] sm:$0xf] %vm285_vm0, %v10493_v0  ;;  %1421 = vrot.lane.b32.xlu1 %v1315_v20, %s10494_s9  ;;  %v11295_v20 = vld [vmem:[%s11238_s14 + $0x30] sm:$0xf] }
  0x73   : > { %397 = vst.msk [vmem:[#allocation2 + $0x1b8] sm:$0xf] %vm285_vm0, %v10493_v0  ;;  %v1214_v23 = vld [vmem:[#allocation2 + $0x198] sm:$0x1]  ;;  %v1318_v28 = vsel %vm10607_vm3, %v1316_v24, %v1317_v25  ;;  %v745_v24 = vrot.slane %v662_v16, 7  ;;  %v731_v25 = vsel %vm11270_vm8, %v729_v14, %v730_v15 }
  0x74   : > { %399 = vst.msk [vmem:[#allocation2 + $0x1c0] sm:$0xf] %vm285_vm0, %v10493_v0  ;;  %v1324_v26 = vrot.slane %v1214_v23, 5  ;;  %1419 = vrot.lane.b32.xlu0 %v1311_v21, %s10494_s9  ;;  %v660_v21 = vld [vmem:[%s11238_s14 + $0x24] sm:$0xf]  ;;  %v743_v23 = vrot.slane %v11282_v12, 7 }
  0x75   : > { %400 = vst.msk [vmem:[#allocation2 + $0x1c4] sm:$0xf] %vm285_vm0, %v10493_v0 }
  0x76   : > { %401 = vst.msk [vmem:[#allocation2 + $0x1c8] sm:$0xf] %vm285_vm0, %v10493_v0  ;;  %v1325_v27 = vsel %vm10607_vm3, %v1323_v22, %v1324_v26  ;;  %v735_v22 = vrot.slane %v658_v11, 7  ;;  %v732_v26 = vrot.slane %v730_v15, 4 }
  0x77   : > { %402 = vst.msk [vmem:[#allocation2 + $0x1cc] sm:$0xf] %vm285_vm0, %v10493_v0  ;;  %1427 = vrot.lane.b32.xlu2 %v1325_v27, %s10494_s9  ;;  %v1215_v29 = vld [vmem:[#allocation2 + $0x1ac] sm:$0xe]  ;;  %v748_v27 = vrot.slane %v11295_v20, 7 }
  0x78   : > { %403 = vst.msk [vmem:[#allocation2 + $0x1d0] sm:$0xf] %vm285_vm0, %v10493_v0  ;;  %v1216_v30 = vld [vmem:[#allocation2 + $0x1b0] sm:$0xf]  ;;  %v9543_v31 = vrot.slane %v1215_v29, 9  ;;  %v740_v29 = vrot.slane %v660_v21, 7 }
  0x79   : > { %404 = vst.msk [vmem:[#allocation2 + $0x1d4] sm:$0xf] %vm285_vm0, %v10493_v0  ;;  %v1217_v32 = vld [vmem:[#allocation2 + $0x1b4] sm:$0x1]  ;;  %v1328_v33 = vrot.slane %v1216_v30, 5 }
  0x7a   : > { %406 = vst.msk [vmem:[#allocation2 + $0x1dc] sm:$0xf] %vm285_vm0, %v10493_v0  ;;  %1423 = vrot.lane.b32.xlu1 %v1318_v28, %s10494_s9  ;;  %v1331_v35 = vrot.slane %v1217_v32, 5  ;;  %v739_v28 = vrot.slane %v738_v18, 4  ;;  %v11307_v30 = vld [vmem:[%s11238_s14 + $0x38] sm:$0xf] }
  0x7b   : > { %407 = vst.msk [vmem:[#allocation2 + $0x1e0] sm:$0xf] %vm285_vm0, %v10493_v0  ;;  %v1330_v34 = vrot.slane %v1328_v33, 4  ;;  %v1329_v36 = vsel %vm10607_vm3, %v9543_v31, %v1328_v33  ;;  %v727_v31 = vrot.slane %v725_v1, 4  ;;  %v734_v32 = vrot.slane %v733_v19, 4 }
  0x7c   : > { %408 = vst.msk [vmem:[#allocation2 + $0x1e4] sm:$0xf] %vm285_vm0, %v10493_v0  ;;  %1429 = vrot.lane.b32.xlu0 %v1329_v36, %s10494_s9  ;;  %v737_v33 = vrot.slane %v735_v22, 4  ;;  %v742_v36 = vrot.slane %v740_v29, 4 }
  0x7d   : > { %409 = vst.msk [vmem:[#allocation2 + $0x1e8] sm:$0xf] %vm285_vm0, %v10493_v0  ;;  %v1218_v37 = vld [vmem:[#allocation2 + $0x1c8] sm:$0xe]  ;;  %v1332_v41 = vsel %vm10607_vm3, %v1330_v34, %v1331_v35  ;;  %v744_v34 = vrot.slane %v743_v23, 4  ;;  %v747_v35 = vrot.slane %v745_v24, 4 }
  0x7e   : > { %410 = vst.msk [vmem:[#allocation2 + $0x1ec] sm:$0xf] %vm285_vm0, %v10493_v0  ;;  %v1219_v38 = vld [vmem:[#allocation2 + $0x1cc] sm:$0xf]  ;;  %v9544_v39 = vrot.slane %v1218_v37, 9 }
  0x7f   : > { %411 = vst.msk [vmem:[#allocation2 + $0x1f0] sm:$0xf] %vm285_vm0, %v10493_v0  ;;  %v1335_v40 = vrot.slane %v1219_v38, 5  ;;  %v1220_v42 = vld [vmem:[#allocation2 + $0x1d0] sm:$0x1]  ;;  %v753_v38 = vrot.slane %v11307_v30, 7  ;;  %v746_v58 = vsel %vm11270_vm8, %v744_v34, %v745_v24 }
  0x80   : > { %413 = vst.msk [vmem:[#allocation2 + $0x1f8] sm:$0xf] %vm285_vm0, %v10493_v0  ;;  %v1338_v43 = vrot.slane %v1220_v42, 5  ;;  %v664_v37 = vld [vmem:[%s11238_s14 + $0x34] sm:$0xf]  ;;  %v741_v42 = vsel %vm11270_vm8, %v739_v28, %v740_v29 }
  0x81   : > { %414 = vst.msk [vmem:[#allocation2 + $0x1fc] sm:$0xf] %vm285_vm0, %v10493_v0  ;;  %v1336_v44 = vsel %vm10607_vm3, %v9544_v39, %v1335_v40  ;;  %v1337_v45 = vrot.slane %v1335_v40, 4  ;;  %v749_v39 = vrot.slane %v748_v27, 4  ;;  %v11319_v40 = vld [vmem:[%s11238_s14 + $0x40] sm:$0xf] }
  0x82   : > { %415 = vst.msk [vmem:[#allocation2 + $0x200] sm:$0xf] %vm285_vm0, %v10493_v0  ;;  %1433 = vrot.lane.b32.xlu2 %v1336_v44, %s10494_s9  ;;  %1431 = vrot.lane.b32.xlu1 %v1332_v41, %s10494_s9 }
  0x83   : > { %416 = vst.msk [vmem:[#allocation2 + $0x204] sm:$0xf] %vm285_vm0, %v10493_v0  ;;  %v1221_v46 = vld [vmem:[#allocation2 + $0x1e4] sm:$0xe]  ;;  %v1339_v47 = vsel %vm10607_vm3, %v1337_v45, %v1338_v43  ;;  %v11325_v43 = vld [vmem:[%s11238_s14 + $0x3c] sm:$0xf] }
  0x84   : > { %417 = vst.msk [vmem:[#allocation2 + $0x208] sm:$0xf] %vm285_vm0, %v10493_v0  ;;  %v1222_v48 = vld [vmem:[#allocation2 + $0x1e8] sm:$0xf]  ;;  %v9545_v49 = vrot.slane %v1221_v46, 9  ;;  %1435 = vrot.lane.b32.xlu0 %v1339_v47, %s10494_s9  ;;  %v736_v46 = vsel %vm11270_vm8, %v734_v32, %v735_v22  ;;  %v750_v47 = vrot.slane %v664_v37, 7 }
  0x85   : > { %418 = vst.msk [vmem:[#allocation2 + $0x20c] sm:$0xf] %vm285_vm0, %v10493_v0  ;;  %v1223_v50 = vld [vmem:[#allocation2 + $0x1ec] sm:$0x1]  ;;  %v1342_v51 = vrot.slane %v1222_v48, 5  ;;  %v755_v59 = vrot.slane %v11325_v43, 7 }
  0x86   : > { %420 = vst.msk [vmem:[#allocation2 + $0x214] sm:$0xf] %vm285_vm0, %v10493_v0  ;;  %v1345_v52 = vrot.slane %v1223_v50, 5  ;;  %v668_v50 = vld [vmem:[%s11238_s14 + $0x44] sm:$0xf]  ;;  %v751_v22 = vsel %vm11270_vm8, %v749_v39, %v750_v47 }
  0x87   : > { %421 = vst.msk [vmem:[#allocation2 + $0x218] sm:$0xf] %vm285_vm0, %v10493_v0  ;;  %v1344_v53 = vrot.slane %v1342_v51, 4  ;;  %v1343_v54 = vsel %vm10607_vm3, %v9545_v49, %v1342_v51  ;;  %v758_v51 = vrot.slane %v11319_v40, 7  ;;  %v760_v9 = vrot.slane %v668_v50, 7 }
  0x88   : > { %422 = vst.msk [vmem:[#allocation2 + $0x21c] sm:$0xf] %vm285_vm0, %v10493_v0  ;;  %v757_v34 = vrot.slane %v755_v59, 4  ;;  %v669_v43 = vld [vmem:[%s11238_s14 + $0x48] sm:$0xf] }
  0x89   : > { %423 = vst.msk [vmem:[#allocation2 + $0x220] sm:$0xf] %vm285_vm0, %v10493_v0  ;;  %v1346_v55 = vsel %vm10607_vm3, %v1344_v53, %v1345_v52  ;;  %v759_v2 = vrot.slane %v758_v51, 4  ;;  %v763_v40 = vrot.slane %v669_v43, 7  ;;  %v11440_v43 = vld [vmem:[#allocation2 + $0x1c8] sm:$0xf] }
  0x8a   : > { %424 = vst.msk [vmem:[#allocation2 + $0x224] sm:$0xf] %vm285_vm0, %v10493_v0  ;;  %1439 = vrot.lane.b32.xlu2 %v1346_v55, %s10494_s9  ;;  %1437 = vrot.lane.b32.xlu1 %v1343_v54, %s10494_s9  ;;  %v754_v54 = vrot.slane %v753_v38, 4 }
  0x8b   : > { %425 = vst.msk [vmem:[#allocation2 + $0x228] sm:$0xf] %vm285_vm0, %v10493_v0 }
  0x8c   : > { %427 = vst.msk [vmem:[#allocation2 + $0x230] sm:$0xf] %vm285_vm0, %v10493_v0  ;;  %v756_v16 = vsel %vm11270_vm8, %v754_v54, %v755_v59 }
  0x8d   : > { %428 = vst.msk [vmem:[#allocation2 + $0x234] sm:$0xf] %vm285_vm0, %v10493_v0 }
  0x8e   : > { %429 = vst.msk [vmem:[#allocation2 + $0x238] sm:$0xf] %vm285_vm0, %v10493_v0 }
  0x8f   : > { %430 = vst.msk [vmem:[#allocation2 + $0x23c] sm:$0xf] %vm285_vm0, %v10493_v0 }
  0x90   : > { %431 = vst.msk [vmem:[#allocation2 + $0x240] sm:$0xf] %vm285_vm0, %v10493_v0 }
  0x91   : > { %432 = vst.msk [vmem:[#allocation2 + $0x244] sm:$0xf] %vm285_vm0, %v10493_v0 }
  0x92   : > { %434 = vst.msk [vmem:[#allocation2 + $0x24c] sm:$0xf] %vm285_vm0, %v10493_v0 }
  0x93   : > { %435 = vst.msk [vmem:[#allocation2 + $0x250] sm:$0xf] %vm285_vm0, %v10493_v0 }
  0x94   : > { %436 = vst.msk [vmem:[#allocation2 + $0x254] sm:$0xf] %vm285_vm0, %v10493_v0 }
  0x95   : > { %437 = vst.msk [vmem:[#allocation2 + $0x258] sm:$0xf] %vm285_vm0, %v10493_v0 }
  0x96   : > { %438 = vst.msk [vmem:[#allocation2 + $0x25c] sm:$0xf] %vm285_vm0, %v10493_v0 }
  0x97   : > { %439 = vst.msk [vmem:[#allocation2 + $0x260] sm:$0xf] %vm285_vm0, %v10493_v0 }
  0x98   : > { %441 = vst.msk [vmem:[#allocation2 + $0x268] sm:$0xf] %vm285_vm0, %v10493_v0 }
  0x99   : > { %442 = vst.msk [vmem:[#allocation2 + $0x26c] sm:$0xf] %vm285_vm0, %v10493_v0 }
  0x9a   : > { %443 = vst.msk [vmem:[#allocation2 + $0x270] sm:$0xf] %vm285_vm0, %v10493_v0 }
  0x9b   : > { %444 = vst.msk [vmem:[#allocation2 + $0x274] sm:$0xf] %vm285_vm0, %v10493_v0 }
  0x9c   : > { %445 = vst.msk [vmem:[#allocation2 + $0x278] sm:$0xf] %vm285_vm0, %v10493_v0 }
  0x9d   : > { %446 = vst.msk [vmem:[#allocation2 + $0x27c] sm:$0xf] %vm285_vm0, %v10493_v0 }
  0x9e   : > { %448 = vst.msk [vmem:[#allocation2 + $0x284] sm:$0xf] %vm285_vm0, %v10493_v0 }
  0x9f   : > { %449 = vst.msk [vmem:[#allocation2 + $0x288] sm:$0xf] %vm285_vm0, %v10493_v0 }
  0xa0   : > { %450 = vst.msk [vmem:[#allocation2 + $0x28c] sm:$0xf] %vm285_vm0, %v10493_v0 }
  0xa1   : > { %451 = vst.msk [vmem:[#allocation2 + $0x290] sm:$0xf] %vm285_vm0, %v10493_v0 }
  0xa2   : > { %452 = vst.msk [vmem:[#allocation2 + $0x294] sm:$0xf] %vm285_vm0, %v10493_v0 }
  0xa3   : > { %453 = vst.msk [vmem:[#allocation2 + $0x298] sm:$0xf] %vm285_vm0, %v10493_v0 }
  0xa4   : > { %455 = vst.msk [vmem:[#allocation2 + $0x2a0] sm:$0xf] %vm285_vm0, %v10493_v0 }
  0xa5   : > { %456 = vst.msk [vmem:[#allocation2 + $0x2a4] sm:$0xf] %vm285_vm0, %v10493_v0 }
  0xa6   : > { %457 = vst.msk [vmem:[#allocation2 + $0x2a8] sm:$0xf] %vm285_vm0, %v10493_v0 }
  0xa7   : > { %458 = vst.msk [vmem:[#allocation2 + $0x2ac] sm:$0xf] %vm285_vm0, %v10493_v0 }
  0xa8   : > { %459 = vst.msk [vmem:[#allocation2 + $0x2b0] sm:$0xf] %vm285_vm0, %v10493_v0 }
  0xa9   : > { %460 = vst.msk [vmem:[#allocation2 + $0x2b4] sm:$0xf] %vm285_vm0, %v10493_v0 }
  0xaa   : > { %462 = vst.msk [vmem:[#allocation2 + $0x2bc] sm:$0xf] %vm285_vm0, %v10493_v0 }
  0xab   : > { %463 = vst.msk [vmem:[#allocation2 + $0x2c0] sm:$0xf] %vm285_vm0, %v10493_v0 }
  0xac   : > { %464 = vst.msk [vmem:[#allocation2 + $0x2c4] sm:$0xf] %vm285_vm0, %v10493_v0 }
  0xad   : > { %465 = vst.msk [vmem:[#allocation2 + $0x2c8] sm:$0xf] %vm285_vm0, %v10493_v0 }
  0xae   : > { %466 = vst.msk [vmem:[#allocation2 + $0x2cc] sm:$0xf] %vm285_vm0, %v10493_v0 }
  0xaf   : > { %467 = vst.msk [vmem:[#allocation2 + $0x2d0] sm:$0xf] %vm285_vm0, %v10493_v0 }
  0xb0   : > { %469 = vst.msk [vmem:[#allocation2 + $0x2d8] sm:$0xf] %vm285_vm0, %v10493_v0 }
  0xb1   : > { %470 = vst.msk [vmem:[#allocation2 + $0x2dc] sm:$0xf] %vm285_vm0, %v10493_v0 }
  0xb2   : > { %471 = vst.msk [vmem:[#allocation2 + $0x2e0] sm:$0xf] %vm285_vm0, %v10493_v0 }
  0xb3   : > { %472 = vst.msk [vmem:[#allocation2 + $0x2e4] sm:$0xf] %vm285_vm0, %v10493_v0 }
  0xb4   : > { %473 = vst.msk [vmem:[#allocation2 + $0x2e8] sm:$0xf] %vm285_vm0, %v10493_v0 }
  0xb5   : > { %474 = vst.msk [vmem:[#allocation2 + $0x2ec] sm:$0xf] %vm285_vm0, %v10493_v0 }
  0xb6   : > { %476 = vst.msk [vmem:[#allocation2 + $0x2f4] sm:$0xf] %vm285_vm0, %v10493_v0 }
  0xb7   : > { %477 = vst.msk [vmem:[#allocation2 + $0x2f8] sm:$0xf] %vm285_vm0, %v10493_v0 }
  0xb8   : > { %478 = vst.msk [vmem:[#allocation2 + $0x2fc] sm:$0xf] %vm285_vm0, %v10493_v0 }
  0xb9   : > { %479 = vst.msk [vmem:[#allocation2 + $0x300] sm:$0xf] %vm285_vm0, %v10493_v0 }
  0xba   : > { %480 = vst.msk [vmem:[#allocation2 + $0x304] sm:$0xf] %vm285_vm0, %v10493_v0 }
  0xbb   : > { %481 = vst.msk [vmem:[#allocation2 + $0x308] sm:$0xf] %vm285_vm0, %v10493_v0 }
  0xbc   : > { %483 = vst.msk [vmem:[#allocation2 + $0x310] sm:$0xf] %vm285_vm0, %v10493_v0 }
  0xbd   : > { %484 = vst.msk [vmem:[#allocation2 + $0x314] sm:$0xf] %vm285_vm0, %v10493_v0 }
  0xbe   : > { %485 = vst.msk [vmem:[#allocation2 + $0x318] sm:$0xf] %vm285_vm0, %v10493_v0 }
  0xbf   : > { %486 = vst.msk [vmem:[#allocation2 + $0x31c] sm:$0xf] %vm285_vm0, %v10493_v0 }
  0xc0   : > { %487 = vst.msk [vmem:[#allocation2 + $0x320] sm:$0xf] %vm285_vm0, %v10493_v0 }
  0xc1   : > { %488 = vst.msk [vmem:[#allocation2 + $0x324] sm:$0xf] %vm285_vm0, %v10493_v0 }
  0xc2   : > { %490 = vst.msk [vmem:[#allocation2 + $0x32c] sm:$0xf] %vm285_vm0, %v10493_v0 }
  0xc3   : > { %491 = vst.msk [vmem:[#allocation2 + $0x330] sm:$0xf] %vm285_vm0, %v10493_v0 }
  0xc4   : > { %492 = vst.msk [vmem:[#allocation2 + $0x334] sm:$0xf] %vm285_vm0, %v10493_v0 }
  0xc5   : > { %493 = vst.msk [vmem:[#allocation2 + $0x338] sm:$0xf] %vm285_vm0, %v10493_v0 }
  0xc6   : > { %494 = vst.msk [vmem:[#allocation2 + $0x33c] sm:$0xf] %vm285_vm0, %v10493_v0 }
  0xc7   : > { %495 = vst.msk [vmem:[#allocation2 + $0x340] sm:$0xf] %vm285_vm0, %v10493_v0 }
  0xc8   : > { %497 = vst.msk [vmem:[#allocation2 + $0x348] sm:$0xf] %vm285_vm0, %v10493_v0 }
  0xc9   : > { %498 = vst.msk [vmem:[#allocation2 + $0x34c] sm:$0xf] %vm285_vm0, %v10493_v0 }
  0xca   : > { %499 = vst.msk [vmem:[#allocation2 + $0x350] sm:$0xf] %vm285_vm0, %v10493_v0 }
  0xcb   : > { %500 = vst.msk [vmem:[#allocation2 + $0x354] sm:$0xf] %vm285_vm0, %v10493_v0 }
  0xcc   : > { %501 = vst.msk [vmem:[#allocation2 + $0x358] sm:$0xf] %vm285_vm0, %v10493_v0 }
  0xcd   : > { %502 = vst.msk [vmem:[#allocation2 + $0x35c] sm:$0xf] %vm285_vm0, %v10493_v0 }
  0xce   : > { %504 = vst.msk [vmem:[#allocation2 + $0x364] sm:$0xf] %vm285_vm0, %v10493_v0 }
  0xcf   : > { %505 = vst.msk [vmem:[#allocation2 + $0x368] sm:$0xf] %vm285_vm0, %v10493_v0 }
  0xd0   : > { %506 = vst.msk [vmem:[#allocation2 + $0x36c] sm:$0xf] %vm285_vm0, %v10493_v0 }
  0xd1   : > { %507 = vst.msk [vmem:[#allocation2 + $0x370] sm:$0xf] %vm285_vm0, %v10493_v0 }
  0xd2   : > { %508 = vst.msk [vmem:[#allocation2 + $0x374] sm:$0xf] %vm285_vm0, %v10493_v0 }
  0xd3   : > { %509 = vst.msk [vmem:[#allocation2 + $0x378] sm:$0xf] %vm285_vm0, %v10493_v0 }
  0xd4   : > { %511 = vst.msk [vmem:[#allocation2 + $0x380] sm:$0xf] %vm285_vm0, %v10493_v0 }
  0xd5   : > { %512 = vst.msk [vmem:[#allocation2 + $0x384] sm:$0xf] %vm285_vm0, %v10493_v0 }
  0xd6   : > { %513 = vst.msk [vmem:[#allocation2 + $0x388] sm:$0xf] %vm285_vm0, %v10493_v0 }
  0xd7   : > { %514 = vst.msk [vmem:[#allocation2 + $0x38c] sm:$0xf] %vm285_vm0, %v10493_v0 }
  0xd8   : > { %515 = vst.msk [vmem:[#allocation2 + $0x390] sm:$0xf] %vm285_vm0, %v10493_v0 }
  0xd9   : > { %516 = vst.msk [vmem:[#allocation2 + $0x394] sm:$0xf] %vm285_vm0, %v10493_v0 }
  0xda   : > { %518 = vst.msk [vmem:[#allocation2 + $0x39c] sm:$0xf] %vm285_vm0, %v10493_v0 }
  0xdb   : > { %519 = vst.msk [vmem:[#allocation2 + $0x3a0] sm:$0xf] %vm285_vm0, %v10493_v0 }
  0xdc   : > { %520 = vst.msk [vmem:[#allocation2 + $0x3a4] sm:$0xf] %vm285_vm0, %v10493_v0 }
  0xdd   : > { %521 = vst.msk [vmem:[#allocation2 + $0x3a8] sm:$0xf] %vm285_vm0, %v10493_v0 }
  0xde   : > { %522 = vst.msk [vmem:[#allocation2 + $0x3ac] sm:$0xf] %vm285_vm0, %v10493_v0 }
  0xdf   : > { %523 = vst.msk [vmem:[#allocation2 + $0x3b0] sm:$0xf] %vm285_vm0, %v10493_v0 }
  0xe0   : > { %525 = vst.msk [vmem:[#allocation2 + $0x3b8] sm:$0xf] %vm285_vm0, %v10493_v0 }
  0xe1   : > { %526 = vst.msk [vmem:[#allocation2 + $0x3bc] sm:$0xf] %vm285_vm0, %v10493_v0 }
  0xe2   : > { %527 = vst.msk [vmem:[#allocation2 + $0x3c0] sm:$0xf] %vm285_vm0, %v10493_v0 }
  0xe3   : > { %528 = vst.msk [vmem:[#allocation2 + $0x3c4] sm:$0xf] %vm285_vm0, %v10493_v0 }
  0xe4   : > { %529 = vst.msk [vmem:[#allocation2 + $0x3c8] sm:$0xf] %vm285_vm0, %v10493_v0 }
  0xe5   : > { %530 = vst.msk [vmem:[#allocation2 + $0x3cc] sm:$0xf] %vm285_vm0, %v10493_v0 }
  0xe6   : > { %532 = vst.msk [vmem:[#allocation2 + $0x3d4] sm:$0xf] %vm285_vm0, %v10493_v0 }
  0xe7   : > { %533 = vst.msk [vmem:[#allocation2 + $0x3d8] sm:$0xf] %vm285_vm0, %v10493_v0 }
  0xe8   : > { %534 = vst.msk [vmem:[#allocation2 + $0x3dc] sm:$0xf] %vm285_vm0, %v10493_v0 }
  0xe9   : > { %535 = vst.msk [vmem:[#allocation2 + $0x3e0] sm:$0xf] %vm285_vm0, %v10493_v0 }
  0xea   : > { %536 = vst.msk [vmem:[#allocation2 + $0x3e4] sm:$0xf] %vm285_vm0, %v10493_v0 }
  0xeb   : > { %537 = vst.msk [vmem:[#allocation2 + $0x3e8] sm:$0xf] %vm285_vm0, %v10493_v0 }
  0xec   : > { %539 = vst.msk [vmem:[#allocation2 + $0x3f0] sm:$0xf] %vm285_vm0, %v10493_v0 }
  0xed   : > { %540 = vst.msk [vmem:[#allocation2 + $0x3f4] sm:$0xf] %vm285_vm0, %v10493_v0 }
  0xee   : > { %541 = vst.msk [vmem:[#allocation2 + $0x3f8] sm:$0xf] %vm285_vm0, %v10493_v0 }
  0xef   : > { %542 = vst.msk [vmem:[#allocation2 + $0x3fc] sm:$0xf] %vm285_vm0, %v10493_v0 }
  0xf0   : > { %543 = vst.msk [vmem:[#allocation2 + $0x400] sm:$0xf] %vm285_vm0, %v10493_v0 }
  0xf1   : > { %544 = vst.msk [vmem:[#allocation2 + $0x404] sm:$0xf] %vm285_vm0, %v10493_v0 }
  0xf2   : > { %546 = vst.msk [vmem:[#allocation2 + $0x40c] sm:$0xf] %vm285_vm0, %v10493_v0 }
  0xf3   : > { %547 = vst.msk [vmem:[#allocation2 + $0x410] sm:$0xf] %vm285_vm0, %v10493_v0 }
  0xf4   : > { %548 = vst.msk [vmem:[#allocation2 + $0x414] sm:$0xf] %vm285_vm0, %v10493_v0 }
  0xf5   : > { %549 = vst.msk [vmem:[#allocation2 + $0x418] sm:$0xf] %vm285_vm0, %v10493_v0 }
  0xf6   : > { %550 = vst.msk [vmem:[#allocation2 + $0x41c] sm:$0xf] %vm285_vm0, %v10493_v0 }
  0xf7   : > { %551 = vst.msk [vmem:[#allocation2 + $0x420] sm:$0xf] %vm285_vm0, %v10493_v0 }
  0xf8   : > { %553 = vst.msk [vmem:[#allocation2 + $0x428] sm:$0xf] %vm285_vm0, %v10493_v0 }
  0xf9   : > { %554 = vst.msk [vmem:[#allocation2 + $0x42c] sm:$0xf] %vm285_vm0, %v10493_v0 }
  0xfa   : > { %555 = vst.msk [vmem:[#allocation2 + $0x430] sm:$0xf] %vm285_vm0, %v10493_v0 }
  0xfb   : > { %556 = vst.msk [vmem:[#allocation2 + $0x434] sm:$0xf] %vm285_vm0, %v10493_v0 }
  0xfc   : > { %557 = vst.msk [vmem:[#allocation2 + $0x438] sm:$0xf] %vm285_vm0, %v10493_v0 }
  0xfd   : > { %558 = vst.msk [vmem:[#allocation2 + $0x43c] sm:$0xf] %vm285_vm0, %v10493_v0 }
  0xfe   : > { %560 = vst.msk [vmem:[#allocation2 + $0x444] sm:$0xf] %vm285_vm0, %v10493_v0 }
  0xff   : > { %561 = vst.msk [vmem:[#allocation2 + $0x448] sm:$0xf] %vm285_vm0, %v10493_v0 }
 0x100   : > { %562 = vst.msk [vmem:[#allocation2 + $0x44c] sm:$0xf] %vm285_vm0, %v10493_v0 }
 0x101   : > { %563 = vst.msk [vmem:[#allocation2 + $0x450] sm:$0xf] %vm285_vm0, %v10493_v0 }
 0x102   : > { %564 = vst.msk [vmem:[#allocation2 + $0x454] sm:$0xf] %vm285_vm0, %v10493_v0 }
 0x103   : > { %565 = vst.msk [vmem:[#allocation2 + $0x458] sm:$0xf] %vm285_vm0, %v10493_v0 }
 0x104   : > { %567 = vst.msk [vmem:[#allocation2 + $0x460] sm:$0xf] %vm285_vm0, %v10493_v0 }
 0x105   : > { %568 = vst.msk [vmem:[#allocation2 + $0x464] sm:$0xf] %vm285_vm0, %v10493_v0 }
 0x106   : > { %569 = vst.msk [vmem:[#allocation2 + $0x468] sm:$0xf] %vm285_vm0, %v10493_v0 }
 0x107   : > { %570 = vst.msk [vmem:[#allocation2 + $0x46c] sm:$0xf] %vm285_vm0, %v10493_v0 }
 0x108   : > { %571 = vst.msk [vmem:[#allocation2 + $0x470] sm:$0xf] %vm285_vm0, %v10493_v0 }
 0x109   : > { %572 = vst.msk [vmem:[#allocation2 + $0x474] sm:$0xf] %vm285_vm0, %v10493_v0 }
 0x10a   : > { %574 = vst.msk [vmem:[#allocation2 + $0x47c] sm:$0xf] %vm285_vm0, %v10493_v0 }
 0x10b   : > { %575 = vst.msk [vmem:[#allocation2 + $0x480] sm:$0xf] %vm285_vm0, %v10493_v0 }
 0x10c   : > { %576 = vst.msk [vmem:[#allocation2 + $0x484] sm:$0xf] %vm285_vm0, %v10493_v0 }
 0x10d   : > { %577 = vst.msk [vmem:[#allocation2 + $0x488] sm:$0xf] %vm285_vm0, %v10493_v0 }
 0x10e   : > { %578 = vst.msk [vmem:[#allocation2 + $0x48c] sm:$0xf] %vm285_vm0, %v10493_v0 }
 0x10f   : > { %579 = vst.msk [vmem:[#allocation2 + $0x490] sm:$0xf] %vm285_vm0, %v10493_v0 }
 0x110   : > { %581 = vst.msk [vmem:[#allocation2 + $0x498] sm:$0xf] %vm285_vm0, %v10493_v0 }
 0x111   : > { %582 = vst.msk [vmem:[#allocation2 + $0x49c] sm:$0xf] %vm285_vm0, %v10493_v0 }
 0x112   : > { %583 = vst.msk [vmem:[#allocation2 + $0x4a0] sm:$0xf] %vm285_vm0, %v10493_v0 }
 0x113   : > { %584 = vst.msk [vmem:[#allocation2 + $0x4a4] sm:$0xf] %vm285_vm0, %v10493_v0 }
 0x114   : > { %585 = vst.msk [vmem:[#allocation2 + $0x4a8] sm:$0xf] %vm285_vm0, %v10493_v0 }
 0x115   : > { %586 = vst.msk [vmem:[#allocation2 + $0x4ac] sm:$0xf] %vm285_vm0, %v10493_v0 }
 0x116   : > { %588 = vst.msk [vmem:[#allocation2 + $0x4b4] sm:$0xf] %vm285_vm0, %v10493_v0 }
 0x117   : > { %589 = vst.msk [vmem:[#allocation2 + $0x4b8] sm:$0xf] %vm285_vm0, %v10493_v0 }
 0x118   : > { %590 = vst.msk [vmem:[#allocation2 + $0x4bc] sm:$0xf] %vm285_vm0, %v10493_v0 }
 0x119   : > { %591 = vst.msk [vmem:[#allocation2 + $0x4c0] sm:$0xf] %vm285_vm0, %v10493_v0 }
 0x11a   : > { %592 = vst.msk [vmem:[#allocation2 + $0x4c4] sm:$0xf] %vm285_vm0, %v10493_v0 }
 0x11b   : > { %593 = vst.msk [vmem:[#allocation2 + $0x4c8] sm:$0xf] %vm285_vm0, %v10493_v0 }
 0x11c   : > { %595 = vst.msk [vmem:[#allocation2 + $0x4d0] sm:$0xf] %vm285_vm0, %v10493_v0 }
 0x11d   : > { %596 = vst.msk [vmem:[#allocation2 + $0x4d4] sm:$0xf] %vm285_vm0, %v10493_v0 }
 0x11e   : > { %597 = vst.msk [vmem:[#allocation2 + $0x4d8] sm:$0xf] %vm285_vm0, %v10493_v0 }
 0x11f   : > { %598 = vst.msk [vmem:[#allocation2 + $0x4dc] sm:$0xf] %vm285_vm0, %v10493_v0 }
 0x120   : > { %599 = vst.msk [vmem:[#allocation2 + $0x4e0] sm:$0xf] %vm285_vm0, %v10493_v0 }
 0x121   : > { %600 = vst.msk [vmem:[#allocation2 + $0x4e4] sm:$0xf] %vm285_vm0, %v10493_v0 }
 0x122   : > { %602 = vst.msk [vmem:[#allocation2 + $0x4ec] sm:$0xf] %vm285_vm0, %v10493_v0 }
 0x123   : > { %603 = vst.msk [vmem:[#allocation2 + $0x4f0] sm:$0xf] %vm285_vm0, %v10493_v0 }
 0x124   : > { %604 = vst.msk [vmem:[#allocation2 + $0x4f4] sm:$0xf] %vm285_vm0, %v10493_v0 }
 0x125   : > { %605 = vst.msk [vmem:[#allocation2 + $0x4f8] sm:$0xf] %vm285_vm0, %v10493_v0 }
 0x126   : > { %606 = vst.msk [vmem:[#allocation2 + $0x4fc] sm:$0xf] %vm285_vm0, %v10493_v0 }
 0x127   : > { %607 = vst.msk [vmem:[#allocation2 + $0x500] sm:$0xf] %vm285_vm0, %v10493_v0 }
 0x128   : > { %609 = vst.msk [vmem:[#allocation2 + $0x508] sm:$0xf] %vm285_vm0, %v10493_v0 }
 0x129   : > { %610 = vst.msk [vmem:[#allocation2 + $0x50c] sm:$0xf] %vm285_vm0, %v10493_v0 }
 0x12a   : > { %611 = vst.msk [vmem:[#allocation2 + $0x510] sm:$0xf] %vm285_vm0, %v10493_v0 }
 0x12b   : > { %612 = vst.msk [vmem:[#allocation2 + $0x514] sm:$0xf] %vm285_vm0, %v10493_v0 }
 0x12c   : > { %613 = vst.msk [vmem:[#allocation2 + $0x518] sm:$0xf] %vm285_vm0, %v10493_v0 }
 0x12d   : > { %614 = vst.msk [vmem:[#allocation2 + $0x51c] sm:$0xf] %vm285_vm0, %v10493_v0 }
 0x12e   : > { %616 = vst.msk [vmem:[#allocation2 + $0x524] sm:$0xf] %vm285_vm0, %v10493_v0 }
 0x12f   : > { %617 = vst.msk [vmem:[#allocation2 + $0x528] sm:$0xf] %vm285_vm0, %v10493_v0 }
 0x130   : > { %618 = vst.msk [vmem:[#allocation2 + $0x52c] sm:$0xf] %vm285_vm0, %v10493_v0 }
 0x131   : > { %619 = vst.msk [vmem:[#allocation2 + $0x530] sm:$0xf] %vm285_vm0, %v10493_v0 }
 0x132   : > { %620 = vst.msk [vmem:[#allocation2 + $0x534] sm:$0xf] %vm285_vm0, %v10493_v0 }
 0x133   : > { %621 = vst.msk [vmem:[#allocation2 + $0x538] sm:$0xf] %vm285_vm0, %v10493_v0 }
 0x134   : > { %623 = vst.msk [vmem:[#allocation2 + $0x540] sm:$0xf] %vm285_vm0, %v10493_v0 }
 0x135   : > { %624 = vst.msk [vmem:[#allocation2 + $0x544] sm:$0xf] %vm285_vm0, %v10493_v0 }
 0x136   : > { %625 = vst.msk [vmem:[#allocation2 + $0x548] sm:$0xf] %vm285_vm0, %v10493_v0 }
 0x137   : > { %626 = vst.msk [vmem:[#allocation2 + $0x54c] sm:$0xf] %vm285_vm0, %v10493_v0 }
 0x138   : > { %627 = vst.msk [vmem:[#allocation2 + $0x550] sm:$0xf] %vm285_vm0, %v10493_v0 }
 0x139   : > { %628 = vst.msk [vmem:[#allocation2 + $0x554] sm:$0xf] %vm285_vm0, %v10493_v0 }
 0x13a   : > { %630 = vst.msk [vmem:[#allocation2 + $0x55c] sm:$0xf] %vm285_vm0, %v10493_v0 }
 0x13b   : > { %631 = vst.msk [vmem:[#allocation2 + $0x560] sm:$0xf] %vm285_vm0, %v10493_v0 }
 0x13c   : > { %632 = vst.msk [vmem:[#allocation2 + $0x564] sm:$0xf] %vm285_vm0, %v10493_v0 }
 0x13d   : > { %633 = vst.msk [vmem:[#allocation2 + $0x568] sm:$0xf] %vm285_vm0, %v10493_v0 }
 0x13e   : > { %634 = vst.msk [vmem:[#allocation2 + $0x56c] sm:$0xf] %vm285_vm0, %v10493_v0 }
 0x13f   : > { %635 = vst.msk [vmem:[#allocation2 + $0x570] sm:$0xf] %vm285_vm0, %v10493_v0 }
 0x140   : > { %637 = vst.msk [vmem:[#allocation2 + $0x578] sm:$0xf] %vm285_vm0, %v10493_v0 }
 0x141   : > { %638 = vst.msk [vmem:[#allocation2 + $0x57c] sm:$0xf] %vm285_vm0, %v10493_v0 }
 0x142   : > { %639 = vst.msk [vmem:[#allocation2 + $0x580] sm:$0xf] %vm285_vm0, %v10493_v0 }
 0x143   : > { %640 = vst.msk [vmem:[#allocation2 + $0x584] sm:$0xf] %vm285_vm0, %v10493_v0 }
 0x144   : > { %641 = vst.msk [vmem:[#allocation2 + $0x588] sm:$0xf] %vm285_vm0, %v10493_v0 }
 0x145   : > { %642 = vst.msk [vmem:[#allocation2 + $0x58c] sm:$0xf] %vm285_vm0, %v10493_v0 }
 0x146   : > { %644 = vst.msk [vmem:[#allocation2 + $0x594] sm:$0xf] %vm285_vm0, %v10493_v0 }
 0x147   : > { %645 = vst.msk [vmem:[#allocation2 + $0x598] sm:$0xf] %vm285_vm0, %v10493_v0 }
 0x148   : > { %646 = vst.msk [vmem:[#allocation2 + $0x59c] sm:$0xf] %vm285_vm0, %v10493_v0 }
 0x149   : > { %647 = vst.msk [vmem:[#allocation2 + $0x5a0] sm:$0xf] %vm285_vm0, %v10493_v0 }
 0x14a   : > { %648 = vst.msk [vmem:[#allocation2 + $0x5a4] sm:$0xf] %vm285_vm0, %v10493_v0 }
 0x14b   : > { %649 = vst.msk [vmem:[#allocation2 + $0x5a8] sm:$0xf] %vm285_vm0, %v10493_v0 }
 0x14c   : > { %852 = vst.msk [vmem:[#allocation2 + $0x21c] sm:$0xe] %vm847_vm6, %v723_v60 }
 0x14d   : > { %853 = vst.msk [vmem:[#allocation2 + $0x220] sm:$0xf] %vm285_vm0, %v726_v13 }
 0x14e   : > { %849 = vst.msk [vmem:[#allocation2 + $0x204] sm:$0xf] %vm285_vm0, %v721_v17  ;;  %v752_v17 = vrot.slane %v750_v47, 4  ;;  %v670_v47 = vld [vmem:[%s11238_s14 + $0x4c] sm:$0xf] }
 0x14f   : > { %851 = vst.msk [vmem:[#allocation2 + $0x208] sm:$0x1] %vm850_vm7, %v722_v6 }
 0x150   : > { %848 = vst.msk [vmem:[#allocation2 + $0x200] sm:$0xe] %vm847_vm6, %v718_v61 }
 0x151   : > { %856 = vst.msk [vmem:[#allocation2 + $0x23c] sm:$0xf] %vm285_vm0, %v731_v25  ;;  %v762_v25 = vrot.slane %v760_v9, 4 }
 0x152   : > { %857 = vst.msk [vmem:[#allocation2 + $0x240] sm:$0x1] %vm850_vm7, %v732_v26 }
 0x153   : > { %v1227_v41 = vld [vmem:[#allocation2 + $0x21c] sm:$0xe]  ;;  %855 = vst.msk [vmem:[#allocation2 + $0x238] sm:$0xe] %vm847_vm6, %v728_v5 }
 0x154   : > { %v1228_v44 = vld [vmem:[#allocation2 + $0x220] sm:$0xf]  ;;  %v9547_v45 = vrot.slane %v1227_v41, 9  ;;  %854 = vst.msk [vmem:[#allocation2 + $0x224] sm:$0x1] %vm850_vm7, %v727_v31 }
 0x155   : > { %v1356_v48 = vrot.slane %v1228_v44, 5  ;;  %v1225_v49 = vld [vmem:[#allocation2 + $0x204] sm:$0xf]  ;;  %861 = vst.msk [vmem:[#allocation2 + $0x270] sm:$0xe] %vm847_vm6, %v738_v18 }
 0x156   : > { %v1226_v52 = vld [vmem:[#allocation2 + $0x208] sm:$0x1]  ;;  %v1349_v53 = vrot.slane %v1225_v49, 5  ;;  %862 = vst.msk [vmem:[#allocation2 + $0x274] sm:$0xf] %vm285_vm0, %v741_v42 }
 0x157   : > { %v1357_v55 = vsel %vm10607_vm3, %v9547_v45, %v1356_v48  ;;  %v1352_v56 = vrot.slane %v1226_v52, 5  ;;  %v1224_v57 = vld [vmem:[#allocation2 + $0x200] sm:$0xe]  ;;  %859 = vst.msk [vmem:[#allocation2 + $0x258] sm:$0xf] %vm285_vm0, %v736_v46  ;;  %v1358_v14 = vrot.slane %v1356_v48, 4 }
 0x158   : > { %1445 = vrot.lane.b32.xlu2 %v1357_v55, %s10494_s9  ;;  %v1351_v60 = vrot.slane %v1349_v53, 4  ;;  %v9546_v61 = vrot.slane %v1224_v57, 9  ;;  %v1231_v62 = vld [vmem:[#allocation2 + $0x23c] sm:$0xf]  ;;  %860 = vst.msk [vmem:[#allocation2 + $0x25c] sm:$0x1] %vm850_vm7, %v737_v33 }
 0x159   : > { %v1232_v63 = vld [vmem:[#allocation2 + $0x240] sm:$0x1]  ;;  %v1363_v1 = vrot.slane %v1231_v62, 5  ;;  %858 = vst.msk [vmem:[#allocation2 + $0x254] sm:$0xe] %vm847_vm6, %v733_v19  ;;  %v765_v48 = vrot.slane %v670_v47, 7 }
 0x15a   : > { %v1353_v4 = vsel %vm10607_vm3, %v1351_v60, %v1352_v56  ;;  %v1350_v5 = vsel %vm10607_vm3, %v9546_v61, %v1349_v53  ;;  %v1366_v6 = vrot.slane %v1232_v63, 5  ;;  %v1230_v7 = vld [vmem:[#allocation2 + $0x238] sm:$0xe]  ;;  %865 = vst.msk [vmem:[#allocation2 + $0x290] sm:$0xf] %vm285_vm0, %v746_v58  ;;  %v764_v52 = vrot.slane %v763_v40, 4 }
 0x15b   : > { %1443 = vrot.lane.b32.xlu1 %v1353_v4, %s10494_s9  ;;  %1441 = vrot.lane.b32.xlu0 %v1350_v5, %s10494_s9  ;;  %v1365_v10 = vrot.slane %v1363_v1, 4  ;;  %v9548_v11 = vrot.slane %v1230_v7, 9  ;;  %v1229_v13 = vld [vmem:[#allocation2 + $0x224] sm:$0x1]  ;;  %866 = vst.msk [vmem:[#allocation2 + $0x294] sm:$0x1] %vm850_vm7, %v747_v35 }
 0x15c   : > { %v1359_v15 = vrot.slane %v1229_v13, 5  ;;  %864 = vst.msk [vmem:[#allocation2 + $0x28c] sm:$0xe] %vm847_vm6, %v743_v23  ;;  %v1236_v19 = vld [vmem:[#allocation2 + $0x270] sm:$0xe]  ;;  %v761_v23 = vsel %vm11270_vm8, %v759_v2, %v760_v9  ;;  %v767_v55 = vrot.slane %v765_v48, 4  ;;  %v766_v58 = vsel %vm11270_vm8, %v764_v52, %v765_v48 }
 0x15d   : > { %v1367_v18 = vsel %vm10607_vm3, %v1365_v10, %v1366_v6  ;;  %v1237_v21 = vld [vmem:[#allocation2 + $0x274] sm:$0xf]  ;;  %863 = vst.msk [vmem:[#allocation2 + $0x278] sm:$0x1] %vm850_vm7, %v742_v36  ;;  %v1364_v12 = vsel %vm10607_vm3, %v9548_v11, %v1363_v1  ;;  %v9550_v28 = vrot.slane %v1236_v19, 9  ;;  %v1426_v6 = vpop.permute.xlu2 %1425  ;;  %v1060_v47 = vrot.slane %v11440_v43, 6 }
 0x15e   : > { %v1234_v24 = vld [vmem:[#allocation2 + $0x258] sm:$0xf]  ;;  %870 = vst.msk [vmem:[#allocation2 + $0x2c4] sm:$0xe] %vm847_vm6, %v753_v38  ;;  %v1360_v26 = vsel %vm10607_vm3, %v1358_v14, %v1359_v15  ;;  %v1377_v29 = vrot.slane %v1237_v21, 5 }
 0x15f   : > { %871 = vst.msk [vmem:[#allocation2 + $0x2c8] sm:$0xf] %vm285_vm0, %v756_v16  ;;  %v1370_v30 = vrot.slane %v1234_v24, 5  ;;  %v1235_v31 = vld [vmem:[#allocation2 + $0x25c] sm:$0x1] }
 0x160   : > { %1451 = vrot.lane.b32.xlu2 %v1367_v18, %s10494_s9  ;;  %868 = vst.msk [vmem:[#allocation2 + $0x2ac] sm:$0xf] %vm285_vm0, %v751_v22  ;;  %v1233_v32 = vld [vmem:[#allocation2 + $0x254] sm:$0xe]  ;;  %v1373_v36 = vrot.slane %v1235_v31, 5  ;;  %v1378_v38 = vsel %vm10607_vm3, %v9550_v28, %v1377_v29  ;;  %v1379_v50 = vrot.slane %v1377_v29, 4 }
 0x161   : > { %869 = vst.msk [vmem:[#allocation2 + $0x2b0] sm:$0x1] %vm850_vm7, %v752_v17  ;;  %v1240_v33 = vld [vmem:[#allocation2 + $0x290] sm:$0xf]  ;;  %v1372_v35 = vrot.slane %v1370_v30, 4  ;;  %v9549_v37 = vrot.slane %v1233_v32, 9 }
 0x162   : > { %867 = vst.msk [vmem:[#allocation2 + $0x2a8] sm:$0xe] %vm847_vm6, %v748_v27  ;;  %v1384_v20 = vrot.slane %v1240_v33, 5  ;;  %v1241_v27 = vld [vmem:[#allocation2 + $0x294] sm:$0x1] }
 0x163   : > { %1449 = vrot.lane.b32.xlu1 %v1364_v12, %s10494_s9  ;;  %1447 = vrot.lane.b32.xlu0 %v1360_v26, %s10494_s9  ;;  %874 = vst.msk [vmem:[#allocation2 + $0x2e4] sm:$0xf] %vm285_vm0, %v761_v23  ;;  %v1374_v39 = vsel %vm10607_vm3, %v1372_v35, %v1373_v36  ;;  %v1371_v41 = vsel %vm10607_vm3, %v9549_v37, %v1370_v30  ;;  %v1239_v42 = vld [vmem:[#allocation2 + $0x28c] sm:$0xe]  ;;  %v1387_v45 = vrot.slane %v1241_v27, 5 }
 0x164   : > { %875 = vst.msk [vmem:[#allocation2 + $0x2e8] sm:$0x1] %vm850_vm7, %v762_v25  ;;  %v1386_v44 = vrot.slane %v1384_v20, 4  ;;  %v1238_v46 = vld [vmem:[#allocation2 + $0x278] sm:$0x1]  ;;  %v9551_v49 = vrot.slane %v1239_v42, 9 }
 0x165   : > { %873 = vst.msk [vmem:[#allocation2 + $0x2e0] sm:$0xe] %vm847_vm6, %v758_v51  ;;  %v1380_v51 = vrot.slane %v1238_v46, 5  ;;  %v1245_v56 = vld [vmem:[#allocation2 + $0x2c4] sm:$0xe]  ;;  %v1428_v35 = vpop.permute.xlu2 %1427 }
 0x166   : > { %872 = vst.msk [vmem:[#allocation2 + $0x2cc] sm:$0x1] %vm850_vm7, %v757_v34  ;;  %v1388_v53 = vsel %vm10607_vm3, %v1386_v44, %v1387_v45  ;;  %v1246_v57 = vld [vmem:[#allocation2 + $0x2c8] sm:$0xf]  ;;  %v1385_v59 = vsel %vm10607_vm3, %v9551_v49, %v1384_v20  ;;  %v9553_v63 = vrot.slane %v1245_v56, 9 }
 0x167   : > { %876 = vst.msk [vmem:[#allocation2 + $0x2fc] sm:$0xe] %vm847_vm6, %v763_v40  ;;  %v1243_v54 = vld [vmem:[#allocation2 + $0x2ac] sm:$0xf]  ;;  %v1381_v60 = vsel %vm10607_vm3, %v1379_v50, %v1380_v51  ;;  %v1398_v1 = vrot.slane %v1246_v57, 5 }
 0x168   : > { %1457 = vrot.lane.b32.xlu2 %v1378_v38, %s10494_s9  ;;  %877 = vst.msk [vmem:[#allocation2 + $0x300] sm:$0xf] %vm285_vm0, %v766_v58  ;;  %v1244_v61 = vld [vmem:[#allocation2 + $0x2b0] sm:$0x1]  ;;  %v1391_v62 = vrot.slane %v1243_v54, 5 }
 0x169   : > { %878 = vst.msk [vmem:[#allocation2 + $0x304] sm:$0x1] %vm850_vm7, %v767_v55  ;;  %v1242_v2 = vld [vmem:[#allocation2 + $0x2a8] sm:$0xe]  ;;  %v1394_v5 = vrot.slane %v1244_v61, 5  ;;  %v1399_v13 = vsel %vm10607_vm3, %v9553_v63, %v1398_v1  ;;  %v1400_v30 = vrot.slane %v1398_v1, 4 }
 0x16a   : > { %v1249_v4 = vld [vmem:[#allocation2 + $0x2e4] sm:$0xf]  ;;  %v1393_v7 = vrot.slane %v1391_v62, 4  ;;  %v9552_v9 = vrot.slane %v1242_v2, 9  ;;  %v937_v10 = vld [vmem:[#allocation2 + $0x18c] sm:$0xc] }
 0x16b   : > { %1455 = vrot.lane.b32.xlu1 %v1374_v39, %s10494_s9  ;;  %1453 = vrot.lane.b32.xlu0 %v1371_v41, %s10494_s9  ;;  %v938_v11 = vld [vmem:[#allocation2 + $0x190] sm:$0xf]  ;;  %v1405_v14 = vrot.slane %v1249_v4, 5  ;;  %v9526_v15 = vrot.slane %v937_v10, 10  ;;  %v1250_v17 = vld [vmem:[#allocation2 + $0x2e8] sm:$0x1]  ;;  %v1418_v4 = vpop.permute.xlu0 %1417 }
 0x16c   : > { %v1046_v16 = vrot.slane %v938_v11, 6  ;;  %v1395_v21 = vsel %vm10607_vm3, %v1393_v7, %v1394_v5  ;;  %v1392_v22 = vsel %vm10607_vm3, %v9552_v9, %v1391_v62  ;;  %v1248_v24 = vld [vmem:[#allocation2 + $0x2e0] sm:$0xe]  ;;  %v1408_v23 = vrot.slane %v1250_v17, 5  ;;  %v939_v26 = vld [vmem:[#allocation2 + $0x194] sm:$0x3] }
 0x16d   : > { %v1407_v12 = vrot.slane %v1405_v14, 4  ;;  %v1247_v25 = vld [vmem:[#allocation2 + $0x2cc] sm:$0x1]  ;;  %v9554_v29 = vrot.slane %v1248_v24, 9  ;;  %v1049_v32 = vrot.slane %v939_v26, 6  ;;  %v1434_v49 = vpop.permute.xlu2 %1433 }
 0x16e   : > { %v1047_v19 = vsel %vm11412_vm11, %v9526_v15, %v1046_v16  ;;  %v1048_v28 = vrot.slane %v1046_v16, 4  ;;  %v1401_v31 = vrot.slane %v1247_v25, 5  ;;  %v1251_v27 = vld [vmem:[#allocation2 + $0x2fc] sm:$0xe]  ;;  %v943_v42 = vld [vmem:[#allocation2 + $0x1c4] sm:$0xc] }
 0x16f   : > { %1178 = vst.msk [vmem:[#allocation3 + $0x10] sm:$0xf] %vm285_vm0, %v1047_v19  ;;  %v1409_v33 = vsel %vm10607_vm3, %v1407_v12, %v1408_v23  ;;  %v1252_v34 = vld [vmem:[#allocation2 + $0x300] sm:$0xf]  ;;  %v1406_v37 = vsel %vm10607_vm3, %v9554_v29, %v1405_v14  ;;  %v9555_v41 = vrot.slane %v1251_v27, 9  ;;  %v9528_v46 = vrot.slane %v943_v42, 10 }
 0x170   : > { %1463 = vrot.lane.b32.xlu2 %v1388_v53, %s10494_s9  ;;  %1518 = vst.msk [vmem:[#allocation3 + $0x10] sm:$0xf] %vm1513_vm12, %v1426_v6  ;;  %v1050_v36 = vsel %vm11412_vm11, %v1048_v28, %v1049_v32  ;;  %v1402_v38 = vsel %vm10607_vm3, %v1400_v30, %v1401_v31  ;;  %v1412_v20 = vrot.slane %v1252_v34, 5  ;;  %v1253_v39 = vld [vmem:[#allocation2 + $0x304] sm:$0x1] }
 0x171   : > { %1179 = vst.msk [vmem:[#allocation3 + $0x14] sm:$0xf] %vm285_vm0, %v1050_v36  ;;  %v1415_v45 = vrot.slane %v1253_v39, 5  ;;  %v1546_v40 = vld [vmem:[#allocation2 + $0x15c] sm:$0xf]  ;;  %v1061_v48 = vsel %vm11412_vm11, %v9528_v46, %v1060_v47 }
 0x172   : > { %1519 = vst.msk [vmem:[#allocation3 + $0x14] sm:$0xf] %vm1513_vm12, %v1428_v35  ;;  %v1414_v44 = vrot.slane %v1412_v20, 4  ;;  %v1413_v51 = vsel %vm10607_vm3, %v9555_v41, %v1412_v20  ;;  %v934_v52 = vld [vmem:[#allocation2 + $0x170] sm:$0xc] }
 0x173   : > { %1461 = vrot.lane.b32.xlu1 %v1385_v59, %s10494_s9  ;;  %1459 = vrot.lane.b32.xlu0 %v1381_v60, %s10494_s9  ;;  %1182 = vst.msk [vmem:[#allocation3 + $0x20] sm:$0xf] %vm285_vm0, %v1061_v48  ;;  %v935_v53 = vld [vmem:[#allocation2 + $0x174] sm:$0xf]  ;;  %v9525_v55 = vrot.slane %v934_v52, 10  ;;  %v1422_v60 = vpop.permute.xlu1 %1421  ;;  %v1420_v25 = vpop.permute.xlu0 %1419 }
 0x174   : > { %v1416_v50 = vsel %vm10607_vm3, %v1414_v44, %v1415_v45  ;;  %1522 = vst.msk [vmem:[#allocation3 + $0x20] sm:$0xf] %vm1513_vm12, %v1434_v49  ;;  %v931_v54 = vld [vmem:[#allocation2 + $0x154] sm:$0xc]  ;;  %v1039_v56 = vrot.slane %v935_v53, 6 }
 0x175   : > { %v932_v57 = vld [vmem:[#allocation2 + $0x158] sm:$0xf]  ;;  %v11456_v58 = vld [vmem:[#allocation2 + $0x1e4] sm:$0xf]  ;;  %v948_v59 = vld [vmem:[#allocation2 + $0x1e8] sm:$0x3] }
 0x176   : > { %v9524_v61 = vrot.slane %v931_v54, 10  ;;  %v1032_v62 = vrot.slane %v932_v57, 6  ;;  %v1067_v63 = vrot.slane %v11456_v58, 6  ;;  %v1070_v1 = vrot.slane %v948_v59, 6  ;;  %v1549_v5 = vld [vmem:[#allocation2 + $0x17c] sm:$0xf] }
 0x177   : > { %v1040_v2 = vsel %vm11412_vm11, %v9525_v55, %v1039_v56  ;;  %v1548_v9 = vld [vmem:[#allocation2 + $0x178] sm:$0xf]  ;;  %v1547_v10 = vld [vmem:[#allocation2 + $0x160] sm:$0xf]  ;;  %v933_v15 = vld [vmem:[#allocation2 + $0x15c] sm:$0x3] }
 0x178   : > { %1469 = vrot.lane.b32.xlu2 %v1399_v13, %s10494_s9  ;;  %1176 = vst.msk [vmem:[#allocation3 + $0x8] sm:$0xf] %vm285_vm0, %v1040_v2  ;;  %v1033_v6 = vsel %vm11412_vm11, %v9524_v61, %v1032_v62  ;;  %v1069_v7 = vrot.slane %v1067_v63, 4  ;;  %v1440_v13 = vpop.permute.xlu2 %1439  ;;  %v936_v14 = vld [vmem:[#allocation2 + $0x178] sm:$0x3]  ;;  %v1041_v17 = vrot.slane %v1039_v56, 4 }
 0x179   : > { %1516 = vst.msk [vmem:[#allocation3 + $0x8] sm:$0xf] %vm1513_vm12, %v1422_v60  ;;  %v1042_v16 = vrot.slane %v936_v14, 6  ;;  %v952_v24 = vld [vmem:[#allocation2 + $0x218] sm:$0xc]  ;;  %v1062_v57 = vrot.slane %v1060_v47, 4 }
 0x17a   : > { %1174 = vst.msk [vmem:[#allocation3] sm:$0xf] %vm285_vm0, %v1033_v6  ;;  %v1071_v11 = vsel %vm11412_vm11, %v1069_v7, %v1070_v1  ;;  %v11476_v12 = vld [vmem:[#allocation2 + $0x21c] sm:$0xf]  ;;  %v9531_v26 = vrot.slane %v952_v24, 10 }
 0x17b   : > { %1467 = vrot.lane.b32.xlu1 %v1395_v21, %s10494_s9  ;;  %1465 = vrot.lane.b32.xlu0 %v1392_v22, %s10494_s9  ;;  %1514 = vst.msk [vmem:[#allocation3] sm:$0xf] %vm1513_vm12, %v1418_v4  ;;  %v1424_v19 = vpop.permute.xlu1 %1423  ;;  %v1035_v21 = vrot.slane %v933_v15, 6  ;;  %v1034_v22 = vrot.slane %v1032_v62, 4  ;;  %v1043_v23 = vsel %vm11412_vm11, %v1041_v17, %v1042_v16  ;;  %v1081_v28 = vrot.slane %v11476_v12, 6  ;;  %v1430_v46 = vpop.permute.xlu0 %1429 }
 0x17c   : > { %1185 = vst.msk [vmem:[#allocation3 + $0x2c] sm:$0xf] %vm285_vm0, %v1071_v11  ;;  %v1552_v29 = vld [vmem:[#allocation2 + $0x1b0] sm:$0xf]  ;;  %v1551_v32 = vld [vmem:[#allocation2 + $0x198] sm:$0xf] }
 0x17d   : > { %1525 = vst.msk [vmem:[#allocation3 + $0x2c] sm:$0xf] %vm1513_vm12, %v1440_v13  ;;  %v1036_v30 = vsel %vm11412_vm11, %v1034_v22, %v1035_v21  ;;  %v1082_v31 = vsel %vm11412_vm11, %v9531_v26, %v1081_v28  ;;  %v1550_v34 = vld [vmem:[#allocation2 + $0x194] sm:$0xf]  ;;  %v942_v36 = vld [vmem:[#allocation2 + $0x1b0] sm:$0x3] }
 0x17e   : > { %1177 = vst.msk [vmem:[#allocation3 + $0xc] sm:$0xf] %vm285_vm0, %v1043_v23  ;;  %v1056_v20 = vrot.slane %v942_v36, 6  ;;  %v11495_v41 = vld [vmem:[#allocation2 + $0x238] sm:$0xf] }
 0x17f   : > { %1517 = vst.msk [vmem:[#allocation3 + $0xc] sm:$0xf] %vm1513_vm12, %v1424_v19  ;;  %v957_v42 = vld [vmem:[#allocation2 + $0x23c] sm:$0x3]  ;;  %v1555_v49 = vld [vmem:[#allocation2 + $0x1d0] sm:$0xf] }
 0x180   : > { %1475 = vrot.lane.b32.xlu2 %v1409_v33, %s10494_s9  ;;  %1175 = vst.msk [vmem:[#allocation3 + $0x4] sm:$0xf] %vm285_vm0, %v1036_v30  ;;  %v941_v33 = vld [vmem:[#allocation2 + $0x1ac] sm:$0xf]  ;;  %v1091_v48 = vrot.slane %v957_v42, 6 }
 0x181   : > { %1515 = vst.msk [vmem:[#allocation3 + $0x4] sm:$0xf] %vm1513_vm12, %v1420_v25  ;;  %v1053_v35 = vrot.slane %v941_v33, 6  ;;  %v1553_v52 = vld [vmem:[#allocation2 + $0x1b4] sm:$0xf] }
 0x182   : > { %1188 = vst.msk [vmem:[#allocation3 + $0x38] sm:$0xf] %vm285_vm0, %v1082_v31  ;;  %v946_v54 = vld [vmem:[#allocation2 + $0x1e0] sm:$0xc]  ;;  %v945_v55 = vld [vmem:[#allocation2 + $0x1cc] sm:$0x3] }
 0x183   : > { %1473 = vrot.lane.b32.xlu1 %v1406_v37, %s10494_s9  ;;  %1471 = vrot.lane.b32.xlu0 %v1402_v38, %s10494_s9  ;;  %v940_v37 = vld [vmem:[#allocation2 + $0x1a8] sm:$0xc]  ;;  %v1055_v38 = vrot.slane %v1053_v35, 4  ;;  %v1432_v39 = vpop.permute.xlu1 %1431  ;;  %v9529_v56 = vrot.slane %v946_v54, 10  ;;  %v1063_v59 = vrot.slane %v945_v55, 6 }
 0x184   : > { %v9527_v27 = vrot.slane %v940_v37, 10  ;;  %v961_v61 = vld [vmem:[#allocation2 + $0x26c] sm:$0xc]  ;;  %v11516_v62 = vld [vmem:[#allocation2 + $0x270] sm:$0xf] }
 0x185   : > { %v1057_v44 = vsel %vm11412_vm11, %v1055_v38, %v1056_v20  ;;  %v1068_v1 = vsel %vm11412_vm11, %v9529_v56, %v1067_v63  ;;  %v1064_v2 = vsel %vm11412_vm11, %v1062_v57, %v1063_v59  ;;  %v9534_v4 = vrot.slane %v961_v61, 10  ;;  %v1558_v47 = vld [vmem:[#allocation2 + $0x204] sm:$0xf]  ;;  %v1557_v6 = vld [vmem:[#allocation2 + $0x1ec] sm:$0xf] }
 0x186   : > { %v1054_v45 = vsel %vm11412_vm11, %v9527_v27, %v1053_v35  ;;  %1181 = vst.msk [vmem:[#allocation3 + $0x1c] sm:$0xf] %vm285_vm0, %v1057_v44  ;;  %v1102_v43 = vrot.slane %v11516_v62, 6  ;;  %v950_v63 = vld [vmem:[#allocation2 + $0x200] sm:$0xf]  ;;  %v1083_v38 = vrot.slane %v1081_v28, 4 }
 0x187   : > { %1521 = vst.msk [vmem:[#allocation3 + $0x1c] sm:$0xf] %vm1513_vm12, %v1432_v39  ;;  %v1556_v7 = vld [vmem:[#allocation2 + $0x1e8] sm:$0xf]  ;;  %v949_v11 = vld [vmem:[#allocation2 + $0x1fc] sm:$0xc] }
 0x188   : > { %1610 = vrot.lane.b32.xlu2 %v1546_v40, %s10495_s15  ;;  %v1088_v40 = vrot.slane %v11495_v41, 6  ;;  %1180 = vst.msk [vmem:[#allocation3 + $0x18] sm:$0xf] %vm285_vm0, %v1054_v45  ;;  %v1103_v58 = vsel %vm11412_vm11, %v9534_v4, %v1102_v43  ;;  %v9530_v15 = vrot.slane %v949_v11, 10  ;;  %v11537_v16 = vld [vmem:[#allocation2 + $0x28c] sm:$0xf] }
 0x189   : > { %1520 = vst.msk [vmem:[#allocation3 + $0x18] sm:$0xf] %vm1513_vm12, %v1430_v46  ;;  %v966_v17 = vld [vmem:[#allocation2 + $0x290] sm:$0x3]  ;;  %v1109_v19 = vrot.slane %v11537_v16, 6 }
 0x18a   : > { %1184 = vst.msk [vmem:[#allocation3 + $0x28] sm:$0xf] %vm285_vm0, %v1068_v1  ;;  %v1112_v21 = vrot.slane %v966_v17, 6  ;;  %v1561_v23 = vld [vmem:[#allocation2 + $0x224] sm:$0xf] }
 0x18b   : > { %1479 = vrot.lane.b32.xlu1 %v1416_v50, %s10494_s9  ;;  %1477 = vrot.lane.b32.xlu0 %v1413_v51, %s10494_s9  ;;  %v1090_v50 = vrot.slane %v1088_v40, 4  ;;  %v1554_v51 = vld [vmem:[#allocation2 + $0x1cc] sm:$0xf]  ;;  %v1438_v60 = vpop.permute.xlu1 %1437  ;;  %1183 = vst.msk [vmem:[#allocation3 + $0x24] sm:$0xf] %vm285_vm0, %v1064_v2  ;;  %v1111_v25 = vrot.slane %v1109_v19, 4 }
 0x18c   : > { %1524 = vst.msk [vmem:[#allocation3 + $0x28] sm:$0xf] %vm1513_vm12, %v1438_v60  ;;  %v1560_v26 = vld [vmem:[#allocation2 + $0x220] sm:$0xf]  ;;  %v11555_v35 = vld [vmem:[#allocation2 + $0x2c4] sm:$0xf] }
 0x18d   : > { %v1092_v53 = vsel %vm11412_vm11, %v1090_v50, %v1091_v48  ;;  %1194 = vst.msk [vmem:[#allocation3 + $0x50] sm:$0xf] %vm285_vm0, %v1103_v58  ;;  %v1113_v30 = vsel %vm11412_vm11, %v1111_v25, %v1112_v21  ;;  %v954_v33 = vld [vmem:[#allocation2 + $0x220] sm:$0x3]  ;;  %v1564_v27 = vld [vmem:[#allocation2 + $0x258] sm:$0xf] }
 0x18e   : > { %1191 = vst.msk [vmem:[#allocation3 + $0x44] sm:$0xf] %vm285_vm0, %v1092_v53  ;;  %v1084_v20 = vrot.slane %v954_v33, 6  ;;  %v1123_v39 = vrot.slane %v11555_v35, 6  ;;  %v1563_v45 = vld [vmem:[#allocation2 + $0x240] sm:$0xf] }
 0x18f   : > { %1197 = vst.msk [vmem:[#allocation3 + $0x5c] sm:$0xf] %vm285_vm0, %v1113_v30  ;;  %v1562_v12 = vld [vmem:[#allocation2 + $0x23c] sm:$0xf]  ;;  %v959_v28 = vld [vmem:[#allocation2 + $0x254] sm:$0xf] }
 0x190   : > { %1616 = vrot.lane.b32.xlu2 %v1549_v5, %s10495_s15  ;;  %v1436_v5 = vpop.permute.xlu0 %1435  ;;  %v1085_v44 = vsel %vm11412_vm11, %v1083_v38, %v1084_v20  ;;  %v1095_v41 = vrot.slane %v959_v28, 6  ;;  %v960_v48 = vld [vmem:[#allocation2 + $0x258] sm:$0x3]  ;;  %v11577_v50 = vld [vmem:[#allocation2 + $0x2e0] sm:$0xf]  ;;  %v1125_v38 = vrot.slane %v1123_v39, 4 }
 0x191   : > { %1523 = vst.msk [vmem:[#allocation3 + $0x24] sm:$0xf] %vm1513_vm12, %v1436_v5  ;;  %v1098_v54 = vrot.slane %v960_v48, 6  ;;  %v1567_v56 = vld [vmem:[#allocation2 + $0x278] sm:$0xf] }
 0x192   : > { %1189 = vst.msk [vmem:[#allocation3 + $0x3c] sm:$0xf] %vm285_vm0, %v1085_v44  ;;  %v1097_v53 = vrot.slane %v1095_v41, 4  ;;  %v1566_v1 = vld [vmem:[#allocation2 + $0x274] sm:$0xf] }
 0x193   : > { %1614 = vrot.lane.b32.xlu1 %v1548_v9, %s10495_s15  ;;  %1612 = vrot.lane.b32.xlu0 %v1547_v10, %s10495_s15  ;;  %v1074_v9 = vrot.slane %v950_v63, 6  ;;  %v951_v10 = vld [vmem:[#allocation2 + $0x204] sm:$0x3]  ;;  %v1565_v2 = vld [vmem:[#allocation2 + $0x25c] sm:$0xf]  ;;  %v1104_v63 = vrot.slane %v1102_v43, 4 }
 0x194   : > { %v1077_v14 = vrot.slane %v951_v10, 6  ;;  %v1099_v60 = vsel %vm11412_vm11, %v1097_v53, %v1098_v54  ;;  %v964_v5 = vld [vmem:[#allocation2 + $0x288] sm:$0xc]  ;;  %v963_v58 = vld [vmem:[#allocation2 + $0x274] sm:$0x3] }
 0x195   : > { %v1076_v13 = vrot.slane %v1074_v9, 4  ;;  %v1075_v24 = vsel %vm11412_vm11, %v9530_v15, %v1074_v9  ;;  %1193 = vst.msk [vmem:[#allocation3 + $0x4c] sm:$0xf] %vm285_vm0, %v1099_v60  ;;  %v1570_v9 = vld [vmem:[#allocation2 + $0x2ac] sm:$0xf] }
 0x196   : > { %1186 = vst.msk [vmem:[#allocation3 + $0x30] sm:$0xf] %vm285_vm0, %v1075_v24  ;;  %v968_v62 = vld [vmem:[#allocation2 + $0x2a8] sm:$0xf]  ;;  %v969_v15 = vld [vmem:[#allocation2 + $0x2ac] sm:$0x3] }
 0x197   : > { %v1078_v22 = vsel %vm11412_vm11, %v1076_v13, %v1077_v14  ;;  %v1569_v13 = vld [vmem:[#allocation2 + $0x294] sm:$0xf]  ;;  %v1568_v14 = vld [vmem:[#allocation2 + $0x290] sm:$0xf]  ;;  %v1116_v17 = vrot.slane %v968_v62, 6  ;;  %v1119_v16 = vrot.slane %v969_v15, 6 }
 0x198   : > { %1622 = vrot.lane.b32.xlu2 %v1552_v29, %s10495_s15  ;;  %1187 = vst.msk [vmem:[#allocation3 + $0x34] sm:$0xf] %vm285_vm0, %v1078_v22  ;;  %v1559_v29 = vld [vmem:[#allocation2 + $0x208] sm:$0xf]  ;;  %v1573_v25 = vld [vmem:[#allocation2 + $0x2cc] sm:$0xf] }
 0x199   : > { %v1118_v21 = vrot.slane %v1116_v17, 4  ;;  %v1572_v30 = vld [vmem:[#allocation2 + $0x2c8] sm:$0xf]  ;;  %v1740_v33 = vld [vmem:[#allocation2 + $0x200] sm:$0xf] }
 0x19a   : > { %v1576_v44 = vld [vmem:[#allocation2 + $0x300] sm:$0xf]  ;;  %v1575_v35 = vld [vmem:[#allocation2 + $0x2e8] sm:$0xf] }
 0x19b   : > { %1620 = vrot.lane.b32.xlu1 %v1551_v32, %s10495_s15  ;;  %1618 = vrot.lane.b32.xlu0 %v1550_v34, %s10495_s15  ;;  %v955_v32 = vld [vmem:[#allocation2 + $0x234] sm:$0xc]  ;;  %v970_v34 = vld [vmem:[#allocation2 + $0x2c0] sm:$0xc] }
 0x19c   : > { %v9537_v36 = vrot.slane %v970_v34, 10  ;;  %v9532_v37 = vrot.slane %v955_v32, 10  ;;  %v973_v34 = vld [vmem:[#allocation2 + $0x2dc] sm:$0xc] }
 0x19e   : > { %v1089_v42 = vsel %vm11412_vm11, %v9532_v37, %v1088_v40  ;;  %v1124_v46 = vsel %vm11412_vm11, %v9537_v36, %v1123_v39  ;;  %v972_v36 = vld [vmem:[#allocation2 + $0x2c8] sm:$0x3]  ;;  %v9538_v37 = vrot.slane %v973_v34, 10  ;;  %v1574_v39 = vld [vmem:[#allocation2 + $0x2e4] sm:$0xf] }
 0x19f   : > { %1190 = vst.msk [vmem:[#allocation3 + $0x40] sm:$0xf] %vm285_vm0, %v1089_v42  ;;  %v1126_v20 = vrot.slane %v972_v36, 6 }
 0x1a0   : > { %1628 = vrot.lane.b32.xlu2 %v1555_v49, %s10495_s15  ;;  %1200 = vst.msk [vmem:[#allocation3 + $0x68] sm:$0xf] %vm285_vm0, %v1124_v46  ;;  %v958_v49 = vld [vmem:[#allocation2 + $0x250] sm:$0xc] }
 0x1a1   : > { %v9533_v55 = vrot.slane %v958_v49, 10  ;;  %v1127_v28 = vsel %vm11412_vm11, %v1125_v38, %v1126_v20 }
 0x1a2   : > { %1201 = vst.msk [vmem:[#allocation3 + $0x6c] sm:$0xf] %vm285_vm0, %v1127_v28  ;;  %v11672_v28 = vld [vmem:[%s11238_s14 + $0x54] sm:$0xf] }
 0x1a3   : > { %1626 = vrot.lane.b32.xlu1 %v1554_v51, %s10495_s15  ;;  %1624 = vrot.lane.b32.xlu0 %v1553_v52, %s10495_s15  ;;  %v975_v51 = vld [vmem:[#allocation2 + $0x2e4] sm:$0x3]  ;;  %v1130_v52 = vrot.slane %v11577_v50, 6  ;;  %v1096_v61 = vsel %vm11412_vm11, %v9533_v55, %v1095_v41  ;;  %v1739_v41 = vld [vmem:[#allocation2 + $0x1fc] sm:$0xc] }
 0x1a4   : > { %v1133_v57 = vrot.slane %v975_v51, 6  ;;  %1192 = vst.msk [vmem:[#allocation3 + $0x48] sm:$0xf] %vm285_vm0, %v1096_v61  ;;  %v977_v50 = vld [vmem:[#allocation2 + $0x2fc] sm:$0xf] }
 0x1a5   : > { %v1132_v59 = vrot.slane %v1130_v52, 4  ;;  %v1131_v46 = vsel %vm11412_vm11, %v9538_v37, %v1130_v52  ;;  %v978_v51 = vld [vmem:[#allocation2 + $0x300] sm:$0x3]  ;;  %v9556_v52 = vrot.slane %v1739_v41, 10  ;;  %v1137_v53 = vrot.slane %v977_v50, 6 }
 0x1a6   : > { %1202 = vst.msk [vmem:[#allocation3 + $0x70] sm:$0xf] %vm285_vm0, %v1131_v46  ;;  %v1140_v54 = vrot.slane %v978_v51, 6  ;;  %v1743_v55 = vld [vmem:[#allocation2 + $0x21c] sm:$0xf] }
 0x1a7   : > { %v1134_v4 = vsel %vm11412_vm11, %v1132_v59, %v1133_v57  ;;  %v1745_v61 = vld [vmem:[#allocation2 + $0x234] sm:$0xc]  ;;  %v673_v46 = vld [vmem:[%s11238_s14 + $0x58] sm:$0xf]  ;;  %v1753_v41 = vld [vmem:[#allocation2 + $0x274] sm:$0x3] }
 0x1a8   : > { %1634 = vrot.lane.b32.xlu2 %v1558_v47, %s10495_s15  ;;  %1203 = vst.msk [vmem:[#allocation3 + $0x74] sm:$0xf] %vm285_vm0, %v1134_v4 }
 0x1ab   : > { %1632 = vrot.lane.b32.xlu1 %v1557_v6, %s10495_s15  ;;  %1630 = vrot.lane.b32.xlu0 %v1556_v7, %s10495_s15  ;;  %v9535_v6 = vrot.slane %v964_v5, 10  ;;  %v1105_v7 = vrot.slane %v963_v58, 6  ;;  %v1577_v5 = vld [vmem:[#allocation2 + $0x304] sm:$0xf] }
 0x1ad   : > { %v1110_v10 = vsel %vm11412_vm11, %v9535_v6, %v1109_v19  ;;  %v1106_v11 = vsel %vm11412_vm11, %v1104_v63, %v1105_v7  ;;  %v967_v19 = vld [vmem:[#allocation2 + $0x2a4] sm:$0xc]  ;;  %v9558_v63 = vrot.slane %v1745_v61, 10 }
 0x1ae   : > { %1196 = vst.msk [vmem:[#allocation3 + $0x58] sm:$0xf] %vm285_vm0, %v1110_v10  ;;  %v9536_v22 = vrot.slane %v967_v19, 10  ;;  %v1744_v10 = vld [vmem:[#allocation2 + $0x220] sm:$0x3] }
 0x1af   : > { %1195 = vst.msk [vmem:[#allocation3 + $0x54] sm:$0xf] %vm285_vm0, %v1106_v11  ;;  %v1742_v11 = vld [vmem:[#allocation2 + $0x218] sm:$0xc] }
 0x1b0   : > { %1640 = vrot.lane.b32.xlu2 %v1561_v23, %s10495_s15  ;;  %v9557_v15 = vrot.slane %v1742_v11, 10 }
 0x1b2   : > { %v1446_v31 = vpop.permute.xlu2 %1445 }
 0x1b3   : > { %1638 = vrot.lane.b32.xlu1 %v1560_v26, %s10495_s15  ;;  %1636 = vrot.lane.b32.xlu0 %v1559_v29, %s10495_s15  ;;  %1528 = vst.msk [vmem:[#allocation3 + $0x38] sm:$0xf] %vm1513_vm12, %v1446_v31  ;;  %v1120_v26 = vsel %vm11412_vm11, %v1118_v21, %v1119_v16  ;;  %v1117_v29 = vsel %vm11412_vm11, %v9536_v22, %v1116_v17  ;;  %v1571_v31 = vld [vmem:[#allocation2 + $0x2b0] sm:$0xf]  ;;  %v1750_v22 = vld [vmem:[#allocation2 + $0x258] sm:$0x3] }
 0x1b4   : > { %1199 = vst.msk [vmem:[#allocation3 + $0x64] sm:$0xf] %vm285_vm0, %v1120_v26  ;;  %v1861_v26 = vrot.slane %v1750_v22, 6 }
 0x1b5   : > { %1198 = vst.msk [vmem:[#allocation3 + $0x60] sm:$0xf] %vm285_vm0, %v1117_v29  ;;  %v1748_v29 = vld [vmem:[#allocation2 + $0x250] sm:$0xc] }
 0x1b8   : > { %1646 = vrot.lane.b32.xlu2 %v1564_v27, %s10495_s15 }
 0x1ba   : > { %v1452_v40 = vpop.permute.xlu2 %1451 }
 0x1bb   : > { %1644 = vrot.lane.b32.xlu1 %v1563_v45, %s10495_s15  ;;  %1642 = vrot.lane.b32.xlu0 %v1562_v12, %s10495_s15  ;;  %1531 = vst.msk [vmem:[#allocation3 + $0x44] sm:$0xf] %vm1513_vm12, %v1452_v40  ;;  %v1837_v45 = vrot.slane %v1740_v33, 6  ;;  %v1741_v12 = vld [vmem:[#allocation2 + $0x204] sm:$0x3]  ;;  %v9559_v33 = vrot.slane %v1748_v29, 10 }
 0x1bc   : > { %v1840_v48 = vrot.slane %v1741_v12, 6  ;;  %v773_v12 = vrot.slane %v673_v46, 7  ;;  %v1760_v46 = vld [vmem:[#allocation2 + $0x2c0] sm:$0xc] }
 0x1bd   : > { %v1839_v40 = vrot.slane %v1837_v45, 4 }
 0x1be   : > { %882 = vst.msk [vmem:[#allocation2 + $0x334] sm:$0xe] %vm847_vm6, %v773_v12 }
 0x1bf   : > { %v1841_v60 = vsel %vm11412_vm11, %v1839_v40, %v1840_v48  ;;  %v1751_v48 = vld [vmem:[#allocation2 + $0x26c] sm:$0xc] }
 0x1c0   : > { %1652 = vrot.lane.b32.xlu2 %v1567_v56, %s10495_s15  ;;  %v976_v56 = vld [vmem:[#allocation2 + $0x2f8] sm:$0xc] }
 0x1c1   : > { %v9539_v4 = vrot.slane %v976_v56, 10  ;;  %v9560_v56 = vrot.slane %v1751_v48, 10 }
 0x1c2   : > { %v1458_v47 = vpop.permute.xlu2 %1457 }
 0x1c3   : > { %1650 = vrot.lane.b32.xlu1 %v1566_v1, %s10495_s15  ;;  %1648 = vrot.lane.b32.xlu0 %v1565_v2, %s10495_s15  ;;  %1534 = vst.msk [vmem:[#allocation3 + $0x50] sm:$0xf] %vm1513_vm12, %v1458_v47  ;;  %v1746_v1 = vld [vmem:[#allocation2 + $0x238] sm:$0xf]  ;;  %v1139_v2 = vrot.slane %v1137_v53, 4  ;;  %v1838_v47 = vsel %vm11412_vm11, %v9556_v52, %v1837_v45  ;;  %v1138_v6 = vsel %vm11412_vm11, %v9539_v4, %v1137_v53 }
 0x1c4   : > { %v1851_v7 = vrot.slane %v1746_v1, 6  ;;  %1204 = vst.msk [vmem:[#allocation3 + $0x78] sm:$0xf] %vm285_vm0, %v1138_v6  ;;  %v1755_v45 = vld [vmem:[#allocation2 + $0x28c] sm:$0xf] }
 0x1c5   : > { %v1141_v58 = vsel %vm11412_vm11, %v1139_v2, %v1140_v54  ;;  %v1872_v51 = vrot.slane %v1755_v45, 6  ;;  %v11679_v52 = vld [vmem:[#allocation2 + $0x2a8] sm:$0xf]  ;;  %v770_v54 = vrot.slane %v11672_v28, 7  ;;  %v11700_v6 = vld [vmem:[%s11238_s14 + $0x5c] sm:$0xf] }
 0x1c6   : > { %1205 = vst.msk [vmem:[#allocation3 + $0x7c] sm:$0xf] %vm285_vm0, %v1141_v58  ;;  %v1852_v19 = vsel %vm11412_vm11, %v9558_v63, %v1851_v7  ;;  %v1853_v34 = vrot.slane %v1851_v7, 4  ;;  %v1879_v61 = vrot.slane %v11679_v52, 6  ;;  %v11697_v58 = vld [vmem:[%s11238_s14 + $0x64] sm:$0xf] }
 0x1c7   : > { %v774_v63 = vrot.slane %v773_v12, 4  ;;  %v1874_v22 = vrot.slane %v1872_v51, 4  ;;  %v1762_v45 = vld [vmem:[#allocation2 + $0x2c8] sm:$0x3]  ;;  %v681_v52 = vld [vmem:[%s11238_s14 + $0x78] sm:$0xf] }
 0x1c8   : > { %1658 = vrot.lane.b32.xlu2 %v1570_v9, %s10495_s15  ;;  %v1844_v9 = vrot.slane %v1743_v55, 6  ;;  %v1868_v55 = vrot.slane %v1753_v41, 6  ;;  %v2086_v28 = vld [vmem:[#allocation2 + $0x290] sm:$0xf] }
 0x1ca   : > { %v1464_v43 = vpop.permute.xlu2 %1463  ;;  %v1846_v62 = vrot.slane %v1844_v9, 4 }
 0x1cb   : > { %1656 = vrot.lane.b32.xlu1 %v1569_v13, %s10495_s15  ;;  %1654 = vrot.lane.b32.xlu0 %v1568_v14, %s10495_s15  ;;  %1537 = vst.msk [vmem:[#allocation3 + $0x5c] sm:$0xf] %vm1513_vm12, %v1464_v43  ;;  %v1749_v14 = vld [vmem:[#allocation2 + $0x254] sm:$0xf]  ;;  %v1847_v43 = vrot.slane %v1744_v10, 6  ;;  %v775_v10 = vrot.slane %v11700_v6, 7 }
 0x1cc   : > { %v1858_v21 = vrot.slane %v1749_v14, 6  ;;  %v1757_v14 = vld [vmem:[#allocation2 + $0x2a4] sm:$0xc] }
 0x1cd   : > { %v1444_v24 = vpop.permute.xlu1 %1443  ;;  %v1442_v23 = vpop.permute.xlu0 %1441 }
 0x1ce   : > { %1527 = vst.msk [vmem:[#allocation3 + $0x34] sm:$0xf] %vm1513_vm12, %v1444_v24  ;;  %v1848_v24 = vsel %vm11412_vm11, %v1846_v62, %v1847_v43  ;;  %v1881_v43 = vrot.slane %v1879_v61, 4 }
 0x1cf   : > { %1526 = vst.msk [vmem:[#allocation3 + $0x30] sm:$0xf] %vm1513_vm12, %v1442_v23  ;;  %v1845_v23 = vsel %vm11412_vm11, %v9557_v15, %v1844_v9  ;;  %v780_v9 = vrot.slane %v11697_v58, 7  ;;  %v2088_v58 = vld [vmem:[#allocation2 + $0x2ac] sm:$0xf] }
 0x1d0   : > { %1664 = vrot.lane.b32.xlu2 %v1573_v25, %s10495_s15  ;;  %v1860_v25 = vrot.slane %v1858_v21, 4 }
 0x1d2   : > { %v1470_v32 = vpop.permute.xlu2 %1469 }
 0x1d3   : > { %1662 = vrot.lane.b32.xlu1 %v1572_v30, %s10495_s15  ;;  %1660 = vrot.lane.b32.xlu0 %v1571_v31, %s10495_s15  ;;  %1540 = vst.msk [vmem:[#allocation3 + $0x68] sm:$0xf] %vm1513_vm12, %v1470_v32  ;;  %v1747_v30 = vld [vmem:[#allocation2 + $0x23c] sm:$0x3]  ;;  %v671_v32 = vld [vmem:[%s11238_s14 + $0x50] sm:$0xf] }
 0x1d4   : > { %v1854_v36 = vrot.slane %v1747_v30, 6  ;;  %v768_v37 = vrot.slane %v671_v32, 7  ;;  %v1763_v32 = vld [vmem:[#allocation2 + $0x2dc] sm:$0xc] }
 0x1d5   : > { %v1450_v27 = vpop.permute.xlu1 %1449  ;;  %v1448_v42 = vpop.permute.xlu0 %1447  ;;  %v9564_v12 = vrot.slane %v1763_v32, 10 }
 0x1d6   : > { %1530 = vst.msk [vmem:[#allocation3 + $0x40] sm:$0xf] %vm1513_vm12, %v1450_v27  ;;  %v1862_v27 = vsel %vm11412_vm11, %v1860_v25, %v1861_v26  ;;  %v1761_v25 = vld [vmem:[#allocation2 + $0x2c4] sm:$0xf] }
 0x1d7   : > { %1529 = vst.msk [vmem:[#allocation3 + $0x3c] sm:$0xf] %vm1513_vm12, %v1448_v42  ;;  %v1754_v42 = vld [vmem:[#allocation2 + $0x288] sm:$0xc] }
 0x1d8   : > { %1670 = vrot.lane.b32.xlu2 %v1576_v44, %s10495_s15  ;;  %v1752_v44 = vld [vmem:[#allocation2 + $0x270] sm:$0xf]  ;;  %v9561_v50 = vrot.slane %v1754_v42, 10  ;;  %879 = vst.msk [vmem:[#allocation2 + $0x318] sm:$0xe] %vm847_vm6, %v768_v37 }
 0x1d9   : > { %v1865_v40 = vrot.slane %v1752_v44, 6 }
 0x1da   : > { %v1476_v49 = vpop.permute.xlu2 %1475 }
 0x1db   : > { %1668 = vrot.lane.b32.xlu1 %v1575_v35, %s10495_s15  ;;  %1666 = vrot.lane.b32.xlu0 %v1574_v39, %s10495_s15  ;;  %1543 = vst.msk [vmem:[#allocation3 + $0x74] sm:$0xf] %vm1513_vm12, %v1476_v49  ;;  %v1859_v35 = vsel %vm11412_vm11, %v9559_v33, %v1858_v21  ;;  %v1855_v39 = vsel %vm11412_vm11, %v1853_v34, %v1854_v36  ;;  %v769_v49 = vrot.slane %v768_v37, 4  ;;  %v9562_v21 = vrot.slane %v1757_v14, 10  ;;  %v1764_v33 = vld [vmem:[#allocation2 + $0x2e0] sm:$0xf] }
 0x1dc   : > { %v11729_v34 = vld [vmem:[%s11238_s14 + $0x6c] sm:$0xf]  ;;  %v679_v36 = vld [vmem:[%s11238_s14 + $0x70] sm:$0xf] }
 0x1dd   : > { %v1456_v57 = vpop.permute.xlu1 %1455  ;;  %v1454_v59 = vpop.permute.xlu0 %1453  ;;  %v771_v1 = vsel %vm11270_vm8, %v769_v49, %v770_v54  ;;  %v1880_v42 = vsel %vm11412_vm11, %v9562_v21, %v1879_v61  ;;  %v1889_v49 = vrot.slane %v1762_v45, 6  ;;  %v11757_v61 = vld [vmem:[%s11238_s14 + $0x74] sm:$0xf] }
 0x1de   : > { %1533 = vst.msk [vmem:[#allocation3 + $0x4c] sm:$0xf] %vm1513_vm12, %v1456_v57  ;;  %v675_v57 = vld [vmem:[%s11238_s14 + $0x60] sm:$0xf] }
 0x1df   : > { %1532 = vst.msk [vmem:[#allocation3 + $0x48] sm:$0xf] %vm1513_vm12, %v1454_v59  ;;  %v1867_v59 = vrot.slane %v1865_v40, 4  ;;  %v778_v2 = vrot.slane %v675_v57, 7 }
 0x1e0   : > { %1949 = vrot.lane.b32.xlu2 %v1841_v60, %s10496_s16  ;;  %v1759_v60 = vld [vmem:[#allocation2 + $0x2ac] sm:$0x3]  ;;  %880 = vst.msk [vmem:[#allocation2 + $0x31c] sm:$0xf] %vm285_vm0, %v771_v1 }
 0x1e1   : > { %v779_v7 = vrot.slane %v778_v2, 4  ;;  %v1869_v11 = vsel %vm11412_vm11, %v1867_v59, %v1868_v55  ;;  %v1882_v15 = vrot.slane %v1759_v60, 6  ;;  %885 = vst.msk [vmem:[#allocation2 + $0x350] sm:$0xe] %vm847_vm6, %v778_v2  ;;  %v11754_v59 = vld [vmem:[%s11238_s14 + $0x7c] sm:$0xf] }
 0x1e2   : > { %v1611_v13 = vpop.permute.xlu2 %1610  ;;  %v793_v60 = vrot.slane %v681_v52, 7  ;;  %v795_v2 = vrot.slane %v11754_v59, 7  ;;  %v2094_v59 = vld [vmem:[#allocation2 + $0x300] sm:$0xf] }
 0x1e3   : > { %1947 = vrot.lane.b32.xlu1 %v1838_v47, %s10496_s16  ;;  %1672 = vrot.lane.b32.xlu0 %v1577_v5, %s10495_s15  ;;  %1707 = vst.msk [vmem:[#allocation3] sm:$0xf] %vm1706_vm13, %v1611_v13  ;;  %v1873_v5 = vsel %vm11412_vm11, %v9561_v50, %v1872_v51  ;;  %v1866_v13 = vsel %vm11412_vm11, %v9560_v56, %v1865_v40  ;;  %v1767_v40 = vld [vmem:[#allocation2 + $0x2fc] sm:$0xf]  ;;  %v9563_v50 = vrot.slane %v1760_v46, 10 }
 0x1e4   : > { %v781_v62 = vsel %vm11270_vm8, %v779_v7, %v780_v9  ;;  %v1768_v51 = vld [vmem:[#allocation2 + $0x300] sm:$0x3]  ;;  %v1900_v57 = vrot.slane %v1767_v40, 6  ;;  %v794_v7 = vrot.slane %v793_v60, 4  ;;  %894 = vst.msk [vmem:[#allocation2 + $0x3a4] sm:$0xe] %vm847_vm6, %v793_v60 }
 0x1e5   : > { %v1462_v17 = vpop.permute.xlu1 %1461  ;;  %v1460_v16 = vpop.permute.xlu0 %1459  ;;  %886 = vst.msk [vmem:[#allocation2 + $0x354] sm:$0xf] %vm285_vm0, %v781_v62  ;;  %v1903_v14 = vrot.slane %v1768_v51, 6  ;;  %v1765_v62 = vld [vmem:[#allocation2 + $0x2e4] sm:$0x3] }
 0x1e6   : > { %1536 = vst.msk [vmem:[#allocation3 + $0x58] sm:$0xf] %vm1513_vm12, %v1462_v17  ;;  %v1756_v17 = vld [vmem:[#allocation2 + $0x290] sm:$0x3]  ;;  %v1775_v51 = vld [vmem:[#allocation2 + $0x34c] sm:$0xc] }
 0x1e7   : > { %1535 = vst.msk [vmem:[#allocation3 + $0x54] sm:$0xf] %vm1513_vm12, %v1460_v16  ;;  %v776_v16 = vsel %vm11270_vm8, %v774_v63, %v775_v10  ;;  %v1766_v63 = vld [vmem:[#allocation2 + $0x2f8] sm:$0xc] }
 0x1e8   : > { %1955 = vrot.lane.b32.xlu2 %v1852_v19, %s10496_s16  ;;  %883 = vst.msk [vmem:[#allocation2 + $0x338] sm:$0xf] %vm285_vm0, %v776_v16 }
 0x1ea   : > { %v1617_v31 = vpop.permute.xlu2 %1616 }
 0x1eb   : > { %1953 = vrot.lane.b32.xlu1 %v1848_v24, %s10496_s16  ;;  %1951 = vrot.lane.b32.xlu0 %v1845_v23, %s10496_s16  ;;  %1710 = vst.msk [vmem:[#allocation3 + $0xc] sm:$0xf] %vm1706_vm13, %v1617_v31  ;;  %v677_v24 = vld [vmem:[%s11238_s14 + $0x68] sm:$0xf]  ;;  %v1875_v23 = vrot.slane %v1756_v17, 6  ;;  %v1883_v31 = vsel %vm11412_vm11, %v1881_v43, %v1882_v15  ;;  %v796_v15 = vsel %vm11270_vm8, %v794_v7, %v795_v2  ;;  %v9565_v17 = vrot.slane %v1766_v63, 10 }
 0x1ec   : > { %v783_v26 = vrot.slane %v677_v24, 7  ;;  %895 = vst.msk [vmem:[#allocation2 + $0x3a8] sm:$0xf] %vm285_vm0, %v796_v15  ;;  %v1781_v63 = vld [vmem:[#allocation2 + $0x384] sm:$0xc] }
 0x1ed   : > { %v1468_v38 = vpop.permute.xlu1 %1467  ;;  %v1466_v20 = vpop.permute.xlu0 %1465  ;;  %v1876_v44 = vsel %vm11412_vm11, %v1874_v22, %v1875_v23  ;;  %v1770_v23 = vld [vmem:[#allocation2 + $0x318] sm:$0xf] }
 0x1ee   : > { %1539 = vst.msk [vmem:[#allocation3 + $0x64] sm:$0xf] %vm1513_vm12, %v1468_v38  ;;  %v784_v37 = vrot.slane %v783_v26, 4  ;;  %v785_v38 = vrot.slane %v11729_v34, 7  ;;  %v2092_v34 = vld [vmem:[#allocation2 + $0x2e4] sm:$0xf] }
 0x1ef   : > { %1538 = vst.msk [vmem:[#allocation3 + $0x60] sm:$0xf] %vm1513_vm12, %v1466_v20  ;;  %v1886_v20 = vrot.slane %v1761_v25, 6  ;;  %v1772_v25 = vld [vmem:[#allocation2 + $0x330] sm:$0xc] }
 0x1f0   : > { %1961 = vrot.lane.b32.xlu2 %v1862_v27, %s10496_s16  ;;  %v788_v27 = vrot.slane %v679_v36, 7  ;;  %888 = vst.msk [vmem:[#allocation2 + $0x36c] sm:$0xe] %vm847_vm6, %v783_v26  ;;  %v1773_v26 = vld [vmem:[#allocation2 + $0x334] sm:$0xf]  ;;  %v9567_v32 = vrot.slane %v1772_v25, 10 }
 0x1f1   : > { %v1888_v48 = vrot.slane %v1886_v20, 4  ;;  %v1771_v36 = vld [vmem:[#allocation2 + $0x31c] sm:$0x3]  ;;  %v1774_v52 = vld [vmem:[#allocation2 + $0x338] sm:$0x3] }
 0x1f2   : > { %v1623_v53 = vpop.permute.xlu2 %1622  ;;  %891 = vst.msk [vmem:[#allocation2 + $0x388] sm:$0xe] %vm847_vm6, %v788_v27  ;;  %v789_v1 = vrot.slane %v788_v27, 4  ;;  %v1776_v27 = vld [vmem:[#allocation2 + $0x350] sm:$0xf]  ;;  %vm3499_vm6 = vcmask 64512  }
 0x1f3   : > { %1959 = vrot.lane.b32.xlu1 %v1859_v35, %s10496_s16  ;;  %1957 = vrot.lane.b32.xlu0 %v1855_v39, %s10496_s16  ;;  %1713 = vst.msk [vmem:[#allocation3 + $0x18] sm:$0xf] %vm1706_vm13, %v1623_v53  ;;  %v1893_v35 = vrot.slane %v1764_v33, 6  ;;  %v786_v39 = vsel %vm11270_vm8, %v784_v37, %v785_v38  ;;  %v1914_v33 = vrot.slane %v1773_v26, 6  ;;  %v1769_v37 = vld [vmem:[#allocation2 + $0x314] sm:$0xc] }
 0x1f4   : > { %889 = vst.msk [vmem:[#allocation2 + $0x370] sm:$0xf] %vm285_vm0, %v786_v39  ;;  %v9566_v45 = vrot.slane %v1769_v37, 10  ;;  %v1921_v39 = vrot.slane %v1776_v27, 6  ;;  %v1784_v37 = vld [vmem:[#allocation2 + $0x3a0] sm:$0xc] }
 0x1f5   : > { %v1474_v4 = vpop.permute.xlu1 %1473  ;;  %v1472_v47 = vpop.permute.xlu0 %1471  ;;  %v1894_v56 = vsel %vm11412_vm11, %v9564_v12, %v1893_v35  ;;  %v1895_v16 = vrot.slane %v1893_v35, 4  ;;  %v1915_v35 = vsel %vm11412_vm11, %v9567_v32, %v1914_v33 }
 0x1f6   : > { %1542 = vst.msk [vmem:[#allocation3 + $0x70] sm:$0xf] %vm1513_vm12, %v1474_v4  ;;  %v790_v4 = vrot.slane %v11757_v61, 7 }
 0x1f7   : > { %1541 = vst.msk [vmem:[#allocation3 + $0x6c] sm:$0xf] %vm1513_vm12, %v1472_v47  ;;  %v1890_v47 = vsel %vm11412_vm11, %v1888_v48, %v1889_v49  ;;  %v1923_v49 = vrot.slane %v1921_v39, 4 }
 0x1f8   : > { %1967 = vrot.lane.b32.xlu2 %v1873_v5, %s10496_s16  ;;  %v1887_v5 = vsel %vm11412_vm11, %v9563_v50, %v1886_v20 }
 0x1f9   : > { %v1782_v7 = vld [vmem:[#allocation2 + $0x388] sm:$0xf] }
 0x1fa   : > { %v1629_v19 = vpop.permute.xlu2 %1628 }
 0x1fb   : > { %1965 = vrot.lane.b32.xlu1 %v1869_v11, %s10496_s16  ;;  %1963 = vrot.lane.b32.xlu0 %v1866_v13, %s10496_s16  ;;  %1716 = vst.msk [vmem:[#allocation3 + $0x24] sm:$0xf] %vm1706_vm13, %v1629_v19  ;;  %v791_v11 = vsel %vm11270_vm8, %v789_v1, %v790_v4  ;;  %v1902_v13 = vrot.slane %v1900_v57, 4  ;;  %v1896_v19 = vrot.slane %v1765_v62, 6  ;;  %v9570_v62 = vrot.slane %v1781_v63, 10 }
 0x1fc   : > { %892 = vst.msk [vmem:[#allocation2 + $0x38c] sm:$0xf] %vm285_vm0, %v791_v11  ;;  %v1780_v15 = vld [vmem:[#allocation2 + $0x370] sm:$0x3] }
 0x1fd   : > { %v1480_v29 = vpop.permute.xlu1 %1479  ;;  %v1478_v30 = vpop.permute.xlu0 %1477  ;;  %v1904_v24 = vsel %vm11412_vm11, %v1902_v13, %v1903_v14 }
 0x1fe   : > { %1545 = vst.msk [vmem:[#allocation3 + $0x7c] sm:$0xf] %vm1513_vm12, %v1480_v29  ;;  %v1901_v29 = vsel %vm11412_vm11, %v9565_v17, %v1900_v57  ;;  %v1917_v57 = vrot.slane %v1774_v52, 6  ;;  %v1778_v17 = vld [vmem:[#allocation2 + $0x368] sm:$0xc] }
 0x1ff   : > { %1544 = vst.msk [vmem:[#allocation3 + $0x78] sm:$0xf] %vm1513_vm12, %v1478_v30  ;;  %v1897_v30 = vsel %vm11412_vm11, %v1895_v16, %v1896_v19  ;;  %v1785_v19 = vld [vmem:[#allocation2 + $0x3a4] sm:$0xf] }
 0x200   : > { %1973 = vrot.lane.b32.xlu2 %v1883_v31, %s10496_s16  ;;  %v1907_v31 = vrot.slane %v1770_v23, 6  ;;  %v2076_v52 = vld [vmem:[#allocation2 + $0x204] sm:$0xf] }
 0x202   : > { %v1635_v41 = vpop.permute.xlu2 %1634  ;;  %v1908_v48 = vsel %vm11412_vm11, %v9566_v45, %v1907_v31 }
 0x203   : > { %1971 = vrot.lane.b32.xlu1 %v1880_v42, %s10496_s16  ;;  %1969 = vrot.lane.b32.xlu0 %v1876_v44, %s10496_s16  ;;  %1719 = vst.msk [vmem:[#allocation3 + $0x30] sm:$0xf] %vm1706_vm13, %v1635_v41  ;;  %v1909_v42 = vrot.slane %v1907_v31, 4  ;;  %v1910_v44 = vrot.slane %v1771_v36, 6  ;;  %v1777_v41 = vld [vmem:[#allocation2 + $0x354] sm:$0x3] }
 0x204   : > { %v1924_v50 = vrot.slane %v1777_v41, 6 }
 0x205   : > { %v1615_v53 = vpop.permute.xlu1 %1614  ;;  %v1613_v55 = vpop.permute.xlu0 %1612  ;;  %v1911_v40 = vsel %vm11412_vm11, %v1909_v42, %v1910_v44  ;;  %v9571_v42 = vrot.slane %v1784_v37, 10 }
 0x206   : > { %1709 = vst.msk [vmem:[#allocation3 + $0x8] sm:$0xf] %vm1706_vm13, %v1615_v53 }
 0x207   : > { %1708 = vst.msk [vmem:[#allocation3 + $0x4] sm:$0xf] %vm1706_vm13, %v1613_v55  ;;  %v9568_v55 = vrot.slane %v1775_v51, 10  ;;  %v2077_v51 = vld [vmem:[#allocation2 + $0x208] sm:$0xf] }
 0x208   : > { %1979 = vrot.lane.b32.xlu2 %v1894_v56, %s10496_s16  ;;  %v1916_v56 = vrot.slane %v1914_v33, 4 }
 0x209   : > { %v1922_v11 = vsel %vm11412_vm11, %v9568_v55, %v1921_v39 }
 0x20a   : > { %v1641_v43 = vpop.permute.xlu2 %1640  ;;  %v1918_v13 = vsel %vm11412_vm11, %v1916_v56, %v1917_v57  ;;  %v2081_v57 = vld [vmem:[#allocation2 + $0x240] sm:$0xf] }
 0x20b   : > { %1977 = vrot.lane.b32.xlu1 %v1890_v47, %s10496_s16  ;;  %1975 = vrot.lane.b32.xlu0 %v1887_v5, %s10496_s16  ;;  %1722 = vst.msk [vmem:[#allocation3 + $0x3c] sm:$0xf] %vm1706_vm13, %v1641_v43  ;;  %v1925_v47 = vsel %vm11412_vm11, %v1923_v49, %v1924_v50  ;;  %v1779_v5 = vld [vmem:[#allocation2 + $0x36c] sm:$0xf]  ;;  %v1935_v43 = vrot.slane %v1782_v7, 6 }
 0x20c   : > { %v1928_v14 = vrot.slane %v1779_v5, 6  ;;  %v2078_v50 = vld [vmem:[#allocation2 + $0x220] sm:$0xf]  ;;  %v2084_v7 = vld [vmem:[#allocation2 + $0x274] sm:$0xf] }
 0x20d   : > { %v1621_v21 = vpop.permute.xlu1 %1620  ;;  %v1619_v22 = vpop.permute.xlu0 %1618  ;;  %v1936_v26 = vsel %vm11412_vm11, %v9570_v62, %v1935_v43  ;;  %v1937_v44 = vrot.slane %v1935_v43, 4  ;;  %v777_v62 = vrot.slane %v775_v10, 4  ;;  %v772_v43 = vrot.slane %v770_v54, 4  ;;  %v2085_v54 = vld [vmem:[#allocation2 + $0x278] sm:$0xf] }
 0x20e   : > { %1712 = vst.msk [vmem:[#allocation3 + $0x14] sm:$0xf] %vm1706_vm13, %v1621_v21  ;;  %v1930_v21 = vrot.slane %v1928_v14, 4  ;;  %v782_v10 = vrot.slane %v780_v9, 4 }
 0x20f   : > { %1711 = vst.msk [vmem:[#allocation3 + $0x10] sm:$0xf] %vm1706_vm13, %v1619_v22  ;;  %v1931_v22 = vrot.slane %v1780_v15, 6 }
 0x210   : > { %1985 = vrot.lane.b32.xlu2 %v1904_v24, %s10496_s16  ;;  %v9569_v24 = vrot.slane %v1778_v17, 10  ;;  %884 = vst.msk [vmem:[#allocation2 + $0x33c] sm:$0x1] %vm850_vm7, %v777_v62 }
 0x211   : > { %v1932_v31 = vsel %vm11412_vm11, %v1930_v21, %v1931_v22  ;;  %881 = vst.msk [vmem:[#allocation2 + $0x320] sm:$0x1] %vm850_vm7, %v772_v43  ;;  %v2090_v22 = vld [vmem:[#allocation2 + $0x2c8] sm:$0xf] }
 0x212   : > { %v1647_v20 = vpop.permute.xlu2 %1646  ;;  %v1929_v32 = vsel %vm11412_vm11, %v9569_v24, %v1928_v14  ;;  %887 = vst.msk [vmem:[#allocation2 + $0x358] sm:$0x1] %vm850_vm7, %v782_v10  ;;  %v2089_v24 = vld [vmem:[#allocation2 + $0x2b0] sm:$0xf] }
 0x213   : > { %1983 = vrot.lane.b32.xlu1 %v1901_v29, %s10496_s16  ;;  %1981 = vrot.lane.b32.xlu0 %v1897_v30, %s10496_s16  ;;  %1725 = vst.msk [vmem:[#allocation3 + $0x48] sm:$0xf] %vm1706_vm13, %v1647_v20  ;;  %v1942_v29 = vrot.slane %v1785_v19, 6  ;;  %v1786_v30 = vld [vmem:[#allocation2 + $0x3a8] sm:$0x3] }
 0x214   : > { %v1945_v36 = vrot.slane %v1786_v30, 6  ;;  %v1783_v20 = vld [vmem:[#allocation2 + $0x38c] sm:$0x3]  ;;  %v2093_v30 = vld [vmem:[#allocation2 + $0x2e8] sm:$0xf] }
 0x215   : > { %v1627_v46 = vpop.permute.xlu1 %1626  ;;  %v1625_v12 = vpop.permute.xlu0 %1624  ;;  %v1944_v33 = vrot.slane %v1942_v29, 4  ;;  %v1938_v45 = vrot.slane %v1783_v20, 6  ;;  %v1943_v39 = vsel %vm11412_vm11, %v9571_v42, %v1942_v29  ;;  %v2098_v42 = vld [vmem:[#allocation2 + $0x338] sm:$0xf] }
 0x216   : > { %1715 = vst.msk [vmem:[#allocation3 + $0x20] sm:$0xf] %vm1706_vm13, %v1627_v46 }
 0x217   : > { %1714 = vst.msk [vmem:[#allocation3 + $0x1c] sm:$0xf] %vm1706_vm13, %v1625_v12  ;;  %v1939_v41 = vsel %vm11412_vm11, %v1937_v44, %v1938_v45 }
 0x218   : > { %1991 = vrot.lane.b32.xlu2 %v1915_v35, %s10496_s16  ;;  %v1946_v35 = vsel %vm11412_vm11, %v1944_v33, %v1945_v36  ;;  %v2096_v33 = vld [vmem:[#allocation2 + $0x31c] sm:$0xf]  ;;  %v2095_v36 = vld [vmem:[#allocation2 + $0x304] sm:$0xf]  ;;  %v2097_v44 = vld [vmem:[#allocation2 + $0x320] sm:$0xf] }
 0x21a   : > { %v1653_v53 = vpop.permute.xlu2 %1652 }
 0x21b   : > { %1989 = vrot.lane.b32.xlu1 %v1911_v40, %s10496_s16  ;;  %1987 = vrot.lane.b32.xlu0 %v1908_v48, %s10496_s16  ;;  %1728 = vst.msk [vmem:[#allocation3 + $0x54] sm:$0xf] %vm1706_vm13, %v1653_v53 }
 0x21d   : > { %v1633_v60 = vpop.permute.xlu1 %1632  ;;  %v1631_v1 = vpop.permute.xlu0 %1630 }
 0x21e   : > { %1718 = vst.msk [vmem:[#allocation3 + $0x2c] sm:$0xf] %vm1706_vm13, %v1633_v60  ;;  %v2080_v60 = vld [vmem:[#allocation2 + $0x23c] sm:$0xf] }
 0x21f   : > { %1717 = vst.msk [vmem:[#allocation3 + $0x28] sm:$0xf] %vm1706_vm13, %v1631_v1  ;;  %v2079_v1 = vld [vmem:[#allocation2 + $0x224] sm:$0xf] }
 0x220   : > { %1997 = vrot.lane.b32.xlu2 %v1925_v47, %s10496_s16 }
 0x222   : > { %v1659_v16 = vpop.permute.xlu2 %1658 }
 0x223   : > { %1995 = vrot.lane.b32.xlu1 %v1922_v11, %s10496_s16  ;;  %1993 = vrot.lane.b32.xlu0 %v1918_v13, %s10496_s16  ;;  %1731 = vst.msk [vmem:[#allocation3 + $0x60] sm:$0xf] %vm1706_vm13, %v1659_v16  ;;  %v2083_v11 = vld [vmem:[#allocation2 + $0x25c] sm:$0xf]  ;;  %v2082_v13 = vld [vmem:[#allocation2 + $0x258] sm:$0xf] }
 0x224   : > { %v2087_v16 = vld [vmem:[#allocation2 + $0x294] sm:$0xf] }
 0x225   : > { %v1639_v23 = vpop.permute.xlu1 %1638  ;;  %v1637_v25 = vpop.permute.xlu0 %1636 }
 0x226   : > { %1721 = vst.msk [vmem:[#allocation3 + $0x38] sm:$0xf] %vm1706_vm13, %v1639_v23  ;;  %v792_v23 = vrot.slane %v790_v4, 4  ;;  %v797_v4 = vrot.slane %v795_v2, 4 }
 0x227   : > { %1720 = vst.msk [vmem:[#allocation3 + $0x34] sm:$0xf] %vm1706_vm13, %v1637_v25  ;;  %v787_v25 = vrot.slane %v785_v38, 4  ;;  %v2091_v38 = vld [vmem:[#allocation2 + $0x2cc] sm:$0xf] }
 0x228   : > { %2003 = vrot.lane.b32.xlu2 %v1936_v26, %s10496_s16  ;;  %893 = vst.msk [vmem:[#allocation2 + $0x390] sm:$0x1] %vm850_vm7, %v792_v23 }
 0x229   : > { %890 = vst.msk [vmem:[#allocation2 + $0x374] sm:$0x1] %vm850_vm7, %v787_v25 }
 0x22a   : > { %v1665_v27 = vpop.permute.xlu2 %1664  ;;  %896 = vst.msk [vmem:[#allocation2 + $0x3ac] sm:$0x1] %vm850_vm7, %v797_v4  ;;  %vm3281_vm7 = vcmask 523264  }
 0x22b   : > { %2001 = vrot.lane.b32.xlu1 %v1932_v31, %s10496_s16  ;;  %1999 = vrot.lane.b32.xlu0 %v1929_v32, %s10496_s16  ;;  %1734 = vst.msk [vmem:[#allocation3 + $0x6c] sm:$0xf] %vm1706_vm13, %v1665_v27  ;;  %v2099_v27 = vld [vmem:[#allocation2 + $0x33c] sm:$0xf] }
 0x22d   : > { %v1645_v46 = vpop.permute.xlu1 %1644  ;;  %v1643_v12 = vpop.permute.xlu0 %1642 }
 0x22e   : > { %1724 = vst.msk [vmem:[#allocation3 + $0x44] sm:$0xf] %vm1706_vm13, %v1645_v46 }
 0x22f   : > { %1723 = vst.msk [vmem:[#allocation3 + $0x40] sm:$0xf] %vm1706_vm13, %v1643_v12 }
 0x230   : > { %2009 = vrot.lane.b32.xlu2 %v1946_v35, %s10496_s16  ;;  %v2102_v35 = vld [vmem:[#allocation2 + $0x370] sm:$0xf] }
 0x232   : > { %v1671_v40 = vpop.permute.xlu2 %1670 }
 0x233   : > { %2007 = vrot.lane.b32.xlu1 %v1943_v39, %s10496_s16  ;;  %2005 = vrot.lane.b32.xlu0 %v1939_v41, %s10496_s16  ;;  %1737 = vst.msk [vmem:[#allocation3 + $0x78] sm:$0xf] %vm1706_vm13, %v1671_v40  ;;  %v2101_v39 = vld [vmem:[#allocation2 + $0x358] sm:$0xf]  ;;  %v2100_v41 = vld [vmem:[#allocation2 + $0x354] sm:$0xf] }
 0x235   : > { %v1651_v48 = vpop.permute.xlu1 %1650  ;;  %v1649_v49 = vpop.permute.xlu0 %1648 }
 0x236   : > { %1727 = vst.msk [vmem:[#allocation3 + $0x50] sm:$0xf] %vm1706_vm13, %v1651_v48 }
 0x237   : > { %1726 = vst.msk [vmem:[#allocation3 + $0x4c] sm:$0xf] %vm1706_vm13, %v1649_v49 }
 0x238   : > { %2144 = vrot.lane.b32.xlu2 %v2078_v50, %s10497_s17  ;;  %v2105_v50 = vld [vmem:[#allocation2 + $0x390] sm:$0xf] }
 0x23a   : > { %v1950_v53 = vpop.permute.xlu2 %1949 }
 0x23b   : > { %2142 = vrot.lane.b32.xlu1 %v2077_v51, %s10497_s17  ;;  %2140 = vrot.lane.b32.xlu0 %v2076_v52, %s10497_s17  ;;  %2045 = vst.msk [vmem:[#allocation3 + $0x4] sm:$0xf] %vm2043_vm14, %v1950_v53  ;;  %v2270_v51 = vld [vmem:[#allocation2 + $0x2a4] sm:$0xc]  ;;  %v2271_v52 = vld [vmem:[#allocation2 + $0x2a8] sm:$0xf] }
 0x23c   : > { %v2104_v53 = vld [vmem:[#allocation2 + $0x38c] sm:$0xf] }
 0x23d   : > { %v1657_v55 = vpop.permute.xlu1 %1656  ;;  %v1655_v56 = vpop.permute.xlu0 %1654 }
 0x23e   : > { %1730 = vst.msk [vmem:[#allocation3 + $0x5c] sm:$0xf] %vm1706_vm13, %v1657_v55  ;;  %v2103_v55 = vld [vmem:[#allocation2 + $0x374] sm:$0xf] }
 0x23f   : > { %1729 = vst.msk [vmem:[#allocation3 + $0x58] sm:$0xf] %vm1706_vm13, %v1655_v56  ;;  %v9572_v56 = vrot.slane %v2270_v51, 10  ;;  %v2288_v51 = vld [vmem:[#allocation2 + $0x34c] sm:$0xc] }
 0x240   : > { %2150 = vrot.lane.b32.xlu2 %v2081_v57, %s10497_s17  ;;  %v2368_v57 = vrot.slane %v2271_v52, 6  ;;  %v2289_v52 = vld [vmem:[#allocation2 + $0x350] sm:$0xf] }
 0x242   : > { %v1956_v47 = vpop.permute.xlu2 %1955 }
 0x243   : > { %2148 = vrot.lane.b32.xlu1 %v2080_v60, %s10497_s17  ;;  %2146 = vrot.lane.b32.xlu0 %v2079_v1, %s10497_s17  ;;  %2048 = vst.msk [vmem:[#allocation3 + $0x10] sm:$0xf] %vm2043_vm14, %v1956_v47  ;;  %v2274_v1 = vld [vmem:[#allocation2 + $0x2c4] sm:$0xf] }
 0x245   : > { %v1663_v5 = vpop.permute.xlu1 %1662  ;;  %v1661_v63 = vpop.permute.xlu0 %1660 }
 0x246   : > { %1733 = vst.msk [vmem:[#allocation3 + $0x68] sm:$0xf] %vm1706_vm13, %v1663_v5 }
 0x247   : > { %1732 = vst.msk [vmem:[#allocation3 + $0x64] sm:$0xf] %vm1706_vm13, %v1661_v63  ;;  %v2369_v63 = vsel %vm11412_vm11, %v9572_v56, %v2368_v57 }
 0x248   : > { %2156 = vrot.lane.b32.xlu2 %v2084_v7, %s10497_s17  ;;  %v2375_v7 = vrot.slane %v2274_v1, 6  ;;  %v2287_v1 = vld [vmem:[#allocation2 + $0x338] sm:$0x3] }
 0x24a   : > { %v1962_v14 = vpop.permute.xlu2 %1961  ;;  %v2377_v62 = vrot.slane %v2375_v7, 4 }
 0x24b   : > { %2154 = vrot.lane.b32.xlu1 %v2083_v11, %s10497_s17  ;;  %2152 = vrot.lane.b32.xlu0 %v2082_v13, %s10497_s17  ;;  %2051 = vst.msk [vmem:[#allocation3 + $0x1c] sm:$0xf] %vm2043_vm14, %v1962_v14  ;;  %v2275_v11 = vld [vmem:[#allocation2 + $0x2c8] sm:$0x3]  ;;  %v2107_v13 = vld [vmem:[#allocation2 + $0x3ac] sm:$0xf] }
 0x24c   : > { %v2106_v14 = vld [vmem:[#allocation2 + $0x3a8] sm:$0xf]  ;;  %v2378_v43 = vrot.slane %v2275_v11, 6  ;;  %v2406_v11 = vrot.slane %v2287_v1, 6  ;;  %v2307_v1 = vld [vmem:[#allocation2 + $0x3f8] sm:$0xf] }
 0x24d   : > { %v1669_v15 = vpop.permute.xlu1 %1668  ;;  %v1667_v17 = vpop.permute.xlu0 %1666 }
 0x24e   : > { %1736 = vst.msk [vmem:[#allocation3 + $0x74] sm:$0xf] %vm1706_vm13, %v1669_v15  ;;  %v2273_v15 = vld [vmem:[#allocation2 + $0x2c0] sm:$0xc] }
 0x24f   : > { %1735 = vst.msk [vmem:[#allocation3 + $0x70] sm:$0xf] %vm1706_vm13, %v1667_v17  ;;  %v2272_v17 = vld [vmem:[#allocation2 + $0x2ac] sm:$0x3] }
 0x250   : > { %2162 = vrot.lane.b32.xlu2 %v2087_v16, %s10497_s17 }
 0x252   : > { %v1968_v6 = vpop.permute.xlu2 %1967 }
 0x253   : > { %2160 = vrot.lane.b32.xlu1 %v2086_v28, %s10497_s17  ;;  %2158 = vrot.lane.b32.xlu0 %v2085_v54, %s10497_s17  ;;  %2054 = vst.msk [vmem:[#allocation3 + $0x28] sm:$0xf] %vm2043_vm14, %v1968_v6  ;;  %v9573_v28 = vrot.slane %v2273_v15, 10  ;;  %v2370_v54 = vrot.slane %v2368_v57, 4  ;;  %v2371_v6 = vrot.slane %v2272_v17, 6  ;;  %v9578_v57 = vrot.slane %v2288_v51, 10 }
 0x254   : > { %v2293_v17 = vld [vmem:[#allocation2 + $0x370] sm:$0x3] }
 0x255   : > { %v1948_v19 = vpop.permute.xlu1 %1947  ;;  %v1673_v21 = vpop.permute.xlu0 %1672  ;;  %v2372_v23 = vsel %vm11412_vm11, %v2370_v54, %v2371_v6  ;;  %v2420_v6 = vrot.slane %v2293_v17, 6 }
 0x256   : > { %2044 = vst.msk [vmem:[#allocation3] sm:$0xf] %vm2043_vm14, %v1948_v19 }
 0x257   : > { %1738 = vst.msk [vmem:[#allocation3 + $0x7c] sm:$0xf] %vm1706_vm13, %v1673_v21  ;;  %v2379_v21 = vsel %vm11412_vm11, %v2377_v62, %v2378_v43 }
 0x258   : > { %2168 = vrot.lane.b32.xlu2 %v2090_v22, %s10497_s17  ;;  %v2277_v22 = vld [vmem:[#allocation2 + $0x2e0] sm:$0xf] }
 0x259   : > { %v2382_v25 = vrot.slane %v2277_v22, 6 }
 0x25a   : > { %v1974_v9 = vpop.permute.xlu2 %1973 }
 0x25b   : > { %2166 = vrot.lane.b32.xlu1 %v2089_v24, %s10497_s17  ;;  %2164 = vrot.lane.b32.xlu0 %v2088_v58, %s10497_s17  ;;  %2057 = vst.msk [vmem:[#allocation3 + $0x34] sm:$0xf] %vm2043_vm14, %v1974_v9  ;;  %v2279_v24 = vld [vmem:[#allocation2 + $0x2f8] sm:$0xc]  ;;  %v2280_v58 = vld [vmem:[#allocation2 + $0x2fc] sm:$0xf]  ;;  %v2376_v9 = vsel %vm11412_vm11, %v9573_v28, %v2375_v7 }
 0x25c   : > { %v2384_v4 = vrot.slane %v2382_v25, 4 }
 0x25d   : > { %v1954_v26 = vpop.permute.xlu1 %1953  ;;  %v1952_v29 = vpop.permute.xlu0 %1951 }
 0x25e   : > { %2047 = vst.msk [vmem:[#allocation3 + $0xc] sm:$0xf] %vm2043_vm14, %v1954_v26  ;;  %v9575_v26 = vrot.slane %v2279_v24, 10 }
 0x25f   : > { %2046 = vst.msk [vmem:[#allocation3 + $0x8] sm:$0xf] %vm2043_vm14, %v1952_v29  ;;  %v2389_v29 = vrot.slane %v2280_v58, 6 }
 0x260   : > { %2174 = vrot.lane.b32.xlu2 %v2093_v30, %s10497_s17  ;;  %v2278_v30 = vld [vmem:[#allocation2 + $0x2e4] sm:$0x3] }
 0x262   : > { %v1980_v61 = vpop.permute.xlu2 %1979 }
 0x263   : > { %2172 = vrot.lane.b32.xlu1 %v2092_v34, %s10497_s17  ;;  %2170 = vrot.lane.b32.xlu0 %v2091_v38, %s10497_s17  ;;  %2060 = vst.msk [vmem:[#allocation3 + $0x40] sm:$0xf] %vm2043_vm14, %v1980_v61  ;;  %v2276_v34 = vld [vmem:[#allocation2 + $0x2dc] sm:$0xc]  ;;  %v2283_v61 = vld [vmem:[#allocation2 + $0x318] sm:$0xf] }
 0x265   : > { %v1960_v31 = vpop.permute.xlu1 %1959  ;;  %v1958_v32 = vpop.permute.xlu0 %1957 }
 0x266   : > { %2050 = vst.msk [vmem:[#allocation3 + $0x18] sm:$0xf] %vm2043_vm14, %v1960_v31  ;;  %v2385_v31 = vrot.slane %v2278_v30, 6  ;;  %v2298_v30 = vld [vmem:[#allocation2 + $0x3a4] sm:$0xf] }
 0x267   : > { %2049 = vst.msk [vmem:[#allocation3 + $0x14] sm:$0xf] %vm2043_vm14, %v1958_v32  ;;  %v9574_v32 = vrot.slane %v2276_v34, 10 }
 0x268   : > { %2180 = vrot.lane.b32.xlu2 %v2096_v33, %s10497_s17 }
 0x26a   : > { %v1986_v2 = vpop.permute.xlu2 %1985 }
 0x26b   : > { %2178 = vrot.lane.b32.xlu1 %v2095_v36, %s10497_s17  ;;  %2176 = vrot.lane.b32.xlu0 %v2094_v59, %s10497_s17  ;;  %2063 = vst.msk [vmem:[#allocation3 + $0x4c] sm:$0xf] %vm2043_vm14, %v1986_v2  ;;  %v2390_v59 = vsel %vm11412_vm11, %v9575_v26, %v2389_v29  ;;  %v2396_v2 = vrot.slane %v2283_v61, 6  ;;  %v2295_v26 = vld [vmem:[#allocation2 + $0x388] sm:$0xf] }
 0x26c   : > { %v2424_v61 = vrot.slane %v2295_v26, 6 }
 0x26d   : > { %v1966_v37 = vpop.permute.xlu1 %1965  ;;  %v1964_v20 = vpop.permute.xlu0 %1963 }
 0x26e   : > { %2053 = vst.msk [vmem:[#allocation3 + $0x24] sm:$0xf] %vm2043_vm14, %v1966_v37  ;;  %v2284_v37 = vld [vmem:[#allocation2 + $0x31c] sm:$0x3] }
 0x26f   : > { %2052 = vst.msk [vmem:[#allocation3 + $0x20] sm:$0xf] %vm2043_vm14, %v1964_v20  ;;  %v2386_v20 = vsel %vm11412_vm11, %v2384_v4, %v2385_v31  ;;  %v2431_v31 = vrot.slane %v2298_v30, 6 }
 0x270   : > { %2186 = vrot.lane.b32.xlu2 %v2099_v27, %s10497_s17  ;;  %v2383_v27 = vsel %vm11412_vm11, %v9574_v32, %v2382_v25  ;;  %v2296_v32 = vld [vmem:[#allocation2 + $0x38c] sm:$0x3] }
 0x271   : > { %v2433_v51 = vrot.slane %v2431_v31, 4 }
 0x272   : > { %v1992_v45 = vpop.permute.xlu2 %1991 }
 0x273   : > { %2184 = vrot.lane.b32.xlu1 %v2098_v42, %s10497_s17  ;;  %2182 = vrot.lane.b32.xlu0 %v2097_v44, %s10497_s17  ;;  %2066 = vst.msk [vmem:[#allocation3 + $0x58] sm:$0xf] %vm2043_vm14, %v1992_v45  ;;  %v2398_v42 = vrot.slane %v2396_v2, 4  ;;  %v2399_v44 = vrot.slane %v2284_v37, 6  ;;  %v2282_v45 = vld [vmem:[#allocation2 + $0x314] sm:$0xc] }
 0x274   : > { %v2427_v37 = vrot.slane %v2296_v32, 6  ;;  %v2316_v32 = vld [vmem:[#allocation2 + $0x44c] sm:$0xf] }
 0x275   : > { %v1972_v46 = vpop.permute.xlu1 %1971  ;;  %v1970_v12 = vpop.permute.xlu0 %1969 }
 0x276   : > { %2056 = vst.msk [vmem:[#allocation3 + $0x30] sm:$0xf] %vm2043_vm14, %v1972_v46  ;;  %v2281_v46 = vld [vmem:[#allocation2 + $0x300] sm:$0x3] }
 0x277   : > { %2055 = vst.msk [vmem:[#allocation3 + $0x2c] sm:$0xf] %vm2043_vm14, %v1970_v12 }
 0x278   : > { %2192 = vrot.lane.b32.xlu2 %v2102_v35, %s10497_s17  ;;  %v9576_v35 = vrot.slane %v2282_v45, 10 }
 0x27a   : > { %v1998_v40 = vpop.permute.xlu2 %1997 }
 0x27b   : > { %2190 = vrot.lane.b32.xlu1 %v2101_v39, %s10497_s17  ;;  %2188 = vrot.lane.b32.xlu0 %v2100_v41, %s10497_s17  ;;  %2069 = vst.msk [vmem:[#allocation3 + $0x64] sm:$0xf] %vm2043_vm14, %v1998_v40  ;;  %v2391_v39 = vrot.slane %v2389_v29, 4  ;;  %v2392_v41 = vrot.slane %v2281_v46, 6  ;;  %v2297_v29 = vld [vmem:[#allocation2 + $0x3a0] sm:$0xc] }
 0x27c   : > { %v9581_v4 = vrot.slane %v2297_v29, 10  ;;  %v2302_v46 = vld [vmem:[#allocation2 + $0x3c4] sm:$0x3] }
 0x27d   : > { %v1978_v48 = vpop.permute.xlu1 %1977  ;;  %v1976_v49 = vpop.permute.xlu0 %1975 }
 0x27e   : > { %2059 = vst.msk [vmem:[#allocation3 + $0x3c] sm:$0xf] %vm2043_vm14, %v1978_v48 }
 0x27f   : > { %2058 = vst.msk [vmem:[#allocation3 + $0x38] sm:$0xf] %vm2043_vm14, %v1976_v49  ;;  %v2400_v49 = vsel %vm11412_vm11, %v2398_v42, %v2399_v44  ;;  %v2432_v44 = vsel %vm11412_vm11, %v9581_v4, %v2431_v31  ;;  %v2313_v4 = vld [vmem:[#allocation2 + $0x430] sm:$0xf]  ;;  %v2315_v31 = vld [vmem:[#allocation2 + $0x448] sm:$0xc] }
 0x280   : > { %2198 = vrot.lane.b32.xlu2 %v2105_v50, %s10497_s17  ;;  %v2286_v50 = vld [vmem:[#allocation2 + $0x334] sm:$0xf] }
 0x281   : > { %v2403_v56 = vrot.slane %v2286_v50, 6 }
 0x282   : > { %v2004_v60 = vpop.permute.xlu2 %2003 }
 0x283   : > { %2196 = vrot.lane.b32.xlu1 %v2104_v53, %s10497_s17  ;;  %2194 = vrot.lane.b32.xlu0 %v2103_v55, %s10497_s17  ;;  %2072 = vst.msk [vmem:[#allocation3 + $0x70] sm:$0xf] %vm2043_vm14, %v2004_v60  ;;  %v2397_v53 = vsel %vm11412_vm11, %v9576_v35, %v2396_v2  ;;  %v2393_v55 = vsel %vm11412_vm11, %v2391_v39, %v2392_v41  ;;  %v2410_v60 = vrot.slane %v2289_v52, 6  ;;  %v2405_v7 = vrot.slane %v2403_v56, 4 }
 0x284   : > { %v2426_v2 = vrot.slane %v2424_v61, 4  ;;  %v2441_v41 = vrot.slane %v2302_v46, 6 }
 0x285   : > { %v1984_v47 = vpop.permute.xlu1 %1983  ;;  %v1982_v5 = vpop.permute.xlu0 %1981  ;;  %v2411_v43 = vsel %vm11412_vm11, %v9578_v57, %v2410_v60  ;;  %v2412_v24 = vrot.slane %v2410_v60, 4  ;;  %v2304_v57 = vld [vmem:[#allocation2 + $0x3dc] sm:$0xf]  ;;  %v2306_v60 = vld [vmem:[#allocation2 + $0x3f4] sm:$0xc] }
 0x286   : > { %2062 = vst.msk [vmem:[#allocation3 + $0x48] sm:$0xf] %vm2043_vm14, %v1984_v47  ;;  %v2285_v47 = vld [vmem:[#allocation2 + $0x330] sm:$0xc] }
 0x287   : > { %2061 = vst.msk [vmem:[#allocation3 + $0x44] sm:$0xf] %vm2043_vm14, %v1982_v5 }
 0x288   : > { %2478 = vrot.lane.b32.xlu2 %v2369_v63, %s10498_s18  ;;  %v2292_v63 = vld [vmem:[#allocation2 + $0x36c] sm:$0xf] }
 0x289   : > { %v2417_v15 = vrot.slane %v2292_v63, 6  ;;  %v2445_v63 = vrot.slane %v2304_v57, 6 }
 0x28a   : > { %v2010_v16 = vpop.permute.xlu2 %2009 }
 0x28b   : > { %2202 = vrot.lane.b32.xlu1 %v2107_v13, %s10497_s17  ;;  %2200 = vrot.lane.b32.xlu0 %v2106_v14, %s10497_s17  ;;  %2075 = vst.msk [vmem:[#allocation3 + $0x7c] sm:$0xf] %vm2043_vm14, %v2010_v16  ;;  %v9577_v13 = vrot.slane %v2285_v47, 10  ;;  %v2407_v16 = vsel %vm11412_vm11, %v2405_v7, %v2406_v11  ;;  %v2419_v54 = vrot.slane %v2417_v15, 4  ;;  %v9584_v7 = vrot.slane %v2306_v60, 10 }
 0x28c   : > { %v2452_v11 = vrot.slane %v2307_v1, 6 }
 0x28d   : > { %v1990_v10 = vpop.permute.xlu1 %1989  ;;  %v1988_v19 = vpop.permute.xlu0 %1987  ;;  %v2404_v28 = vsel %vm11412_vm11, %v9577_v13, %v2403_v56  ;;  %v2421_v25 = vsel %vm11412_vm11, %v2419_v54, %v2420_v6  ;;  %v2305_v13 = vld [vmem:[#allocation2 + $0x3e0] sm:$0x3] }
 0x28e   : > { %2065 = vst.msk [vmem:[#allocation3 + $0x54] sm:$0xf] %vm2043_vm14, %v1990_v10  ;;  %v2291_v10 = vld [vmem:[#allocation2 + $0x368] sm:$0xc]  ;;  %v2448_v17 = vrot.slane %v2305_v13, 6  ;;  %v2453_v6 = vsel %vm11412_vm11, %v9584_v7, %v2452_v11  ;;  %v2454_v29 = vrot.slane %v2452_v11, 4 }
 0x28f   : > { %2064 = vst.msk [vmem:[#allocation3 + $0x50] sm:$0xf] %vm2043_vm14, %v1988_v19  ;;  %v2290_v19 = vld [vmem:[#allocation2 + $0x354] sm:$0x3]  ;;  %v9579_v22 = vrot.slane %v2291_v10, 10 }
 0x290   : > { %2484 = vrot.lane.b32.xlu2 %v2379_v21, %s10498_s18  ;;  %v2413_v58 = vrot.slane %v2290_v19, 6  ;;  %v2311_v19 = vld [vmem:[#allocation2 + $0x418] sm:$0x3]  ;;  %v2611_v7 = vld [vmem:[#allocation2 + $0x2c8] sm:$0xf] }
 0x291   : > { %v2418_v34 = vsel %vm11412_vm11, %v9579_v22, %v2417_v15  ;;  %v2447_v15 = vrot.slane %v2445_v63, 4  ;;  %v2613_v11 = vld [vmem:[#allocation2 + $0x2e0] sm:$0xe]  ;;  %v2614_v13 = vld [vmem:[#allocation2 + $0x2e4] sm:$0xf] }
 0x292   : > { %v2145_v38 = vpop.permute.xlu2 %2144 }
 0x293   : > { %2482 = vrot.lane.b32.xlu1 %v2376_v9, %s10498_s18  ;;  %2480 = vrot.lane.b32.xlu0 %v2372_v23, %s10498_s18  ;;  %2239 = vst.msk [vmem:[#allocation3 + $0x8] sm:$0xf] %vm2236_vm15, %v2145_v38  ;;  %v2414_v38 = vsel %vm11412_vm11, %v2412_v24, %v2413_v58  ;;  %v2462_v58 = vrot.slane %v2311_v19, 6 }
 0x295   : > { %v1996_v33 = vpop.permute.xlu1 %1995  ;;  %v1994_v36 = vpop.permute.xlu0 %1993 }
 0x296   : > { %2068 = vst.msk [vmem:[#allocation3 + $0x60] sm:$0xf] %vm2043_vm14, %v1996_v33  ;;  %v2294_v33 = vld [vmem:[#allocation2 + $0x384] sm:$0xc] }
 0x297   : > { %2067 = vst.msk [vmem:[#allocation3 + $0x5c] sm:$0xf] %vm2043_vm14, %v1994_v36 }
 0x298   : > { %2490 = vrot.lane.b32.xlu2 %v2390_v59, %s10498_s18  ;;  %v2301_v59 = vld [vmem:[#allocation2 + $0x3c0] sm:$0xf] }
 0x299   : > { %v2438_v45 = vrot.slane %v2301_v59, 6  ;;  %v2466_v59 = vrot.slane %v2313_v4, 6 }
 0x29a   : > { %v2151_v12 = vpop.permute.xlu2 %2150 }
 0x29b   : > { %2488 = vrot.lane.b32.xlu1 %v2386_v20, %s10498_s18  ;;  %2486 = vrot.lane.b32.xlu0 %v2383_v27, %s10498_s18  ;;  %2242 = vst.msk [vmem:[#allocation3 + $0x14] sm:$0xf] %vm2236_vm15, %v2151_v12  ;;  %v9580_v20 = vrot.slane %v2294_v33, 10  ;;  %v2428_v12 = vsel %vm11412_vm11, %v2426_v2, %v2427_v37  ;;  %v2440_v39 = vrot.slane %v2438_v45, 4  ;;  %v9587_v2 = vrot.slane %v2315_v31, 10 }
 0x29c   : > { %v2473_v37 = vrot.slane %v2316_v32, 6 }
 0x29d   : > { %v2002_v40 = vpop.permute.xlu1 %2001  ;;  %v2000_v48 = vpop.permute.xlu0 %1999  ;;  %v2425_v35 = vsel %vm11412_vm11, %v9580_v20, %v2424_v61  ;;  %v2442_v56 = vsel %vm11412_vm11, %v2440_v39, %v2441_v41  ;;  %v2314_v20 = vld [vmem:[#allocation2 + $0x434] sm:$0x3] }
 0x29e   : > { %2071 = vst.msk [vmem:[#allocation3 + $0x6c] sm:$0xf] %vm2043_vm14, %v2002_v40  ;;  %v2300_v40 = vld [vmem:[#allocation2 + $0x3bc] sm:$0xc]  ;;  %v2469_v46 = vrot.slane %v2314_v20, 6  ;;  %v2474_v41 = vsel %vm11412_vm11, %v9587_v2, %v2473_v37  ;;  %v2475_v60 = vrot.slane %v2473_v37, 4 }
 0x29f   : > { %2070 = vst.msk [vmem:[#allocation3 + $0x68] sm:$0xf] %vm2043_vm14, %v2000_v48  ;;  %v2299_v48 = vld [vmem:[#allocation2 + $0x3a8] sm:$0x3]  ;;  %v9582_v50 = vrot.slane %v2300_v40, 10 }
 0x2a0   : > { %2496 = vrot.lane.b32.xlu2 %v2400_v49, %s10498_s18  ;;  %v2434_v52 = vrot.slane %v2299_v48, 6  ;;  %v2609_v48 = vld [vmem:[#allocation2 + $0x2b0] sm:$0x1]  ;;  %v2620_v2 = vld [vmem:[#allocation2 + $0x31c] sm:$0xf] }
 0x2a1   : > { %v2439_v47 = vsel %vm11412_vm11, %v9582_v50, %v2438_v45  ;;  %v2468_v45 = vrot.slane %v2466_v59, 4  ;;  %v2622_v37 = vld [vmem:[#allocation2 + $0x334] sm:$0xe]  ;;  %v2623_v20 = vld [vmem:[#allocation2 + $0x338] sm:$0xf] }
 0x2a2   : > { %v2157_v5 = vpop.permute.xlu2 %2156 }
 0x2a3   : > { %2494 = vrot.lane.b32.xlu1 %v2397_v53, %s10498_s18  ;;  %2492 = vrot.lane.b32.xlu0 %v2393_v55, %s10498_s18  ;;  %2245 = vst.msk [vmem:[#allocation3 + $0x20] sm:$0xf] %vm2236_vm15, %v2157_v5  ;;  %v2435_v5 = vsel %vm11412_vm11, %v2433_v51, %v2434_v52  ;;  %v2708_v52 = vrot.slane %v2609_v48, 5 }
 0x2a5   : > { %v2008_v14 = vpop.permute.xlu1 %2007  ;;  %v2006_v62 = vpop.permute.xlu0 %2005 }
 0x2a6   : > { %2074 = vst.msk [vmem:[#allocation3 + $0x78] sm:$0xf] %vm2043_vm14, %v2008_v14  ;;  %v2303_v14 = vld [vmem:[#allocation2 + $0x3d8] sm:$0xc] }
 0x2a7   : > { %2073 = vst.msk [vmem:[#allocation3 + $0x74] sm:$0xf] %vm2043_vm14, %v2006_v62 }
 0x2a8   : > { %2502 = vrot.lane.b32.xlu2 %v2411_v43, %s10498_s18  ;;  %v2310_v43 = vld [vmem:[#allocation2 + $0x414] sm:$0xf] }
 0x2a9   : > { %v2459_v10 = vrot.slane %v2310_v43, 6  ;;  %v2712_v43 = vrot.slane %v2611_v7, 5 }
 0x2aa   : > { %v2163_v21 = vpop.permute.xlu2 %2162 }
 0x2ab   : > { %2500 = vrot.lane.b32.xlu1 %v2407_v16, %s10498_s18  ;;  %2498 = vrot.lane.b32.xlu0 %v2404_v28, %s10498_s18  ;;  %2248 = vst.msk [vmem:[#allocation3 + $0x2c] sm:$0xf] %vm2236_vm15, %v2163_v21  ;;  %v9583_v16 = vrot.slane %v2303_v14, 10  ;;  %v2449_v21 = vsel %vm11412_vm11, %v2447_v15, %v2448_v17  ;;  %v2461_v24 = vrot.slane %v2459_v10, 4  ;;  %v9590_v15 = vrot.slane %v2613_v11, 9 }
 0x2ac   : > { %v2719_v17 = vrot.slane %v2614_v13, 5 }
 0x2ad   : > { %v2143_v9 = vpop.permute.xlu1 %2142  ;;  %v2141_v23 = vpop.permute.xlu0 %2140  ;;  %v2446_v22 = vsel %vm11412_vm11, %v9583_v16, %v2445_v63  ;;  %v2463_v61 = vsel %vm11412_vm11, %v2461_v24, %v2462_v58  ;;  %v2612_v16 = vld [vmem:[#allocation2 + $0x2cc] sm:$0x1] }
 0x2ae   : > { %2238 = vst.msk [vmem:[#allocation3 + $0x4] sm:$0xf] %vm2236_vm15, %v2143_v9  ;;  %v2309_v9 = vld [vmem:[#allocation2 + $0x410] sm:$0xc]  ;;  %v2715_v19 = vrot.slane %v2612_v16, 5  ;;  %v2720_v58 = vsel %vm10607_vm3, %v9590_v15, %v2719_v17  ;;  %v2721_v31 = vrot.slane %v2719_v17, 4 }
 0x2af   : > { %2237 = vst.msk [vmem:[#allocation3] sm:$0xf] %vm2236_vm15, %v2141_v23  ;;  %v2308_v23 = vld [vmem:[#allocation2 + $0x3fc] sm:$0x3]  ;;  %v9585_v26 = vrot.slane %v2309_v9, 10 }
 0x2b0   : > { %2508 = vrot.lane.b32.xlu2 %v2421_v25, %s10498_s18  ;;  %v2455_v30 = vrot.slane %v2308_v23, 6  ;;  %v2618_v23 = vld [vmem:[#allocation2 + $0x304] sm:$0x1]  ;;  %v2629_v15 = vld [vmem:[#allocation2 + $0x370] sm:$0xf] }
 0x2b1   : > { %v2460_v33 = vsel %vm11412_vm11, %v9585_v26, %v2459_v10  ;;  %v2714_v10 = vrot.slane %v2712_v43, 4  ;;  %v2631_v17 = vld [vmem:[#allocation2 + $0x388] sm:$0xe]  ;;  %v2632_v16 = vld [vmem:[#allocation2 + $0x38c] sm:$0xf] }
 0x2b2   : > { %v2169_v36 = vpop.permute.xlu2 %2168 }
 0x2b3   : > { %2506 = vrot.lane.b32.xlu1 %v2418_v34, %s10498_s18  ;;  %2504 = vrot.lane.b32.xlu0 %v2414_v38, %s10498_s18  ;;  %2251 = vst.msk [vmem:[#allocation3 + $0x38] sm:$0xf] %vm2236_vm15, %v2169_v36  ;;  %v2456_v36 = vsel %vm11412_vm11, %v2454_v29, %v2455_v30  ;;  %v2729_v30 = vrot.slane %v2618_v23, 5 }
 0x2b5   : > { %v2149_v27 = vpop.permute.xlu1 %2148  ;;  %v2147_v42 = vpop.permute.xlu0 %2146 }
 0x2b6   : > { %2241 = vst.msk [vmem:[#allocation3 + $0x10] sm:$0xf] %vm2236_vm15, %v2149_v27  ;;  %v2312_v27 = vld [vmem:[#allocation2 + $0x42c] sm:$0xc] }
 0x2b7   : > { %2240 = vst.msk [vmem:[#allocation3 + $0xc] sm:$0xf] %vm2236_vm15, %v2147_v42 }
 0x2b8   : > { %2514 = vrot.lane.b32.xlu2 %v2432_v44, %s10498_s18  ;;  %v2608_v44 = vld [vmem:[#allocation2 + $0x2ac] sm:$0xf] }
 0x2b9   : > { %v2705_v40 = vrot.slane %v2608_v44, 5  ;;  %v2733_v44 = vrot.slane %v2620_v2, 5 }
 0x2ba   : > { %v2175_v49 = vpop.permute.xlu2 %2174 }
 0x2bb   : > { %2512 = vrot.lane.b32.xlu1 %v2428_v12, %s10498_s18  ;;  %2510 = vrot.lane.b32.xlu0 %v2425_v35, %s10498_s18  ;;  %2254 = vst.msk [vmem:[#allocation3 + $0x44] sm:$0xf] %vm2236_vm15, %v2175_v49  ;;  %v9586_v12 = vrot.slane %v2312_v27, 10  ;;  %v2470_v49 = vsel %vm11412_vm11, %v2468_v45, %v2469_v46  ;;  %v2707_v51 = vrot.slane %v2705_v40, 4  ;;  %v9593_v45 = vrot.slane %v2622_v37, 9 }
 0x2bc   : > { %v2740_v46 = vrot.slane %v2623_v20, 5 }
 0x2bd   : > { %v2155_v53 = vpop.permute.xlu1 %2154  ;;  %v2153_v55 = vpop.permute.xlu0 %2152  ;;  %v2467_v50 = vsel %vm11412_vm11, %v9586_v12, %v2466_v59  ;;  %v2709_v63 = vsel %vm10607_vm3, %v2707_v51, %v2708_v52  ;;  %v2621_v12 = vld [vmem:[#allocation2 + $0x320] sm:$0x1] }
 0x2be   : > { %2244 = vst.msk [vmem:[#allocation3 + $0x1c] sm:$0xf] %vm2236_vm15, %v2155_v53  ;;  %v2607_v53 = vld [vmem:[#allocation2 + $0x2a8] sm:$0xe]  ;;  %v2736_v48 = vrot.slane %v2621_v12, 5  ;;  %v2741_v52 = vsel %vm10607_vm3, %v9593_v45, %v2740_v46  ;;  %v2742_v11 = vrot.slane %v2740_v46, 4 }
 0x2bf   : > { %2243 = vst.msk [vmem:[#allocation3 + $0x18] sm:$0xf] %vm2236_vm15, %v2153_v55  ;;  %v2317_v55 = vld [vmem:[#allocation2 + $0x450] sm:$0x3]  ;;  %v9588_v57 = vrot.slane %v2607_v53, 9 }
 0x2c0   : > { %2520 = vrot.lane.b32.xlu2 %v2442_v56, %s10498_s18  ;;  %v2476_v1 = vrot.slane %v2317_v55, 6  ;;  %v2627_v55 = vld [vmem:[#allocation2 + $0x358] sm:$0x1]  ;;  %v2638_v45 = vld [vmem:[#allocation2 + $0x3c4] sm:$0xf] }
 0x2c1   : > { %v2706_v14 = vsel %vm10607_vm3, %v9588_v57, %v2705_v40  ;;  %v2735_v40 = vrot.slane %v2733_v44, 4  ;;  %v2640_v46 = vld [vmem:[#allocation2 + $0x3dc] sm:$0xe]  ;;  %v2641_v12 = vld [vmem:[#allocation2 + $0x3e0] sm:$0xf] }
 0x2c2   : > { %v2181_v62 = vpop.permute.xlu2 %2180 }
 0x2c3   : > { %2518 = vrot.lane.b32.xlu1 %v2439_v47, %s10498_s18  ;;  %2516 = vrot.lane.b32.xlu0 %v2435_v5, %s10498_s18  ;;  %2257 = vst.msk [vmem:[#allocation3 + $0x50] sm:$0xf] %vm2236_vm15, %v2181_v62  ;;  %v2477_v62 = vsel %vm11412_vm11, %v2475_v60, %v2476_v1  ;;  %v2750_v1 = vrot.slane %v2627_v55, 5 }
 0x2c5   : > { %v2161_v28 = vpop.permute.xlu1 %2160  ;;  %v2159_v54 = vpop.permute.xlu0 %2158 }
 0x2c6   : > { %2247 = vst.msk [vmem:[#allocation3 + $0x28] sm:$0xf] %vm2236_vm15, %v2161_v28  ;;  %v2610_v28 = vld [vmem:[#allocation2 + $0x2c4] sm:$0xe] }
 0x2c7   : > { %2246 = vst.msk [vmem:[#allocation3 + $0x24] sm:$0xf] %vm2236_vm15, %v2159_v54 }
 0x2c8   : > { %2526 = vrot.lane.b32.xlu2 %v2453_v6, %s10498_s18  ;;  %v2617_v6 = vld [vmem:[#allocation2 + $0x300] sm:$0xf] }
 0x2c9   : > { %v2726_v9 = vrot.slane %v2617_v6, 5  ;;  %v2754_v6 = vrot.slane %v2629_v15, 5 }
 0x2ca   : > { %v2187_v25 = vpop.permute.xlu2 %2186 }
 0x2cb   : > { %2524 = vrot.lane.b32.xlu1 %v2449_v21, %s10498_s18  ;;  %2522 = vrot.lane.b32.xlu0 %v2446_v22, %s10498_s18  ;;  %2260 = vst.msk [vmem:[#allocation3 + $0x5c] sm:$0xf] %vm2236_vm15, %v2187_v25  ;;  %v9589_v21 = vrot.slane %v2610_v28, 9  ;;  %v2716_v25 = vsel %vm10607_vm3, %v2714_v10, %v2715_v19  ;;  %v2728_v29 = vrot.slane %v2726_v9, 4  ;;  %v9596_v10 = vrot.slane %v2631_v17, 9 }
 0x2cc   : > { %v2761_v19 = vrot.slane %v2632_v16, 5 }
 0x2cd   : > { %v2167_v34 = vpop.permute.xlu1 %2166  ;;  %v2165_v38 = vpop.permute.xlu0 %2164  ;;  %v2713_v26 = vsel %vm10607_vm3, %v9589_v21, %v2712_v43  ;;  %v2730_v59 = vsel %vm10607_vm3, %v2728_v29, %v2729_v30  ;;  %v2630_v21 = vld [vmem:[#allocation2 + $0x374] sm:$0x1] }
 0x2ce   : > { %2250 = vst.msk [vmem:[#allocation3 + $0x34] sm:$0xf] %vm2236_vm15, %v2167_v34  ;;  %v2616_v34 = vld [vmem:[#allocation2 + $0x2fc] sm:$0xe]  ;;  %v2757_v23 = vrot.slane %v2630_v21, 5  ;;  %v2762_v30 = vsel %vm10607_vm3, %v9596_v10, %v2761_v19  ;;  %v2763_v37 = vrot.slane %v2761_v19, 4 }
 0x2cf   : > { %2249 = vst.msk [vmem:[#allocation3 + $0x30] sm:$0xf] %vm2236_vm15, %v2165_v38  ;;  %v2615_v38 = vld [vmem:[#allocation2 + $0x2e8] sm:$0x1]  ;;  %v9591_v4 = vrot.slane %v2616_v34, 9 }
 0x2d0   : > { %2532 = vrot.lane.b32.xlu2 %v2463_v61, %s10498_s18  ;;  %v2722_v32 = vrot.slane %v2615_v38, 5  ;;  %v2636_v38 = vld [vmem:[#allocation2 + $0x3ac] sm:$0x1]  ;;  %v2647_v10 = vld [vmem:[#allocation2 + $0x418] sm:$0xf] }
 0x2d1   : > { %v2727_v27 = vsel %vm10607_vm3, %v9591_v4, %v2726_v9  ;;  %v2756_v9 = vrot.slane %v2754_v6, 4  ;;  %v2649_v19 = vld [vmem:[#allocation2 + $0x430] sm:$0xe]  ;;  %v2650_v21 = vld [vmem:[#allocation2 + $0x434] sm:$0xf] }
 0x2d2   : > { %v2193_v42 = vpop.permute.xlu2 %2192 }
 0x2d3   : > { %2530 = vrot.lane.b32.xlu1 %v2460_v33, %s10498_s18  ;;  %2528 = vrot.lane.b32.xlu0 %v2456_v36, %s10498_s18  ;;  %2263 = vst.msk [vmem:[#allocation3 + $0x68] sm:$0xf] %vm2236_vm15, %v2193_v42  ;;  %v2723_v42 = vsel %vm10607_vm3, %v2721_v31, %v2722_v32  ;;  %v2771_v32 = vrot.slane %v2636_v38, 5 }
 0x2d5   : > { %v2173_v35 = vpop.permute.xlu1 %2172  ;;  %v2171_v39 = vpop.permute.xlu0 %2170 }
 0x2d6   : > { %2253 = vst.msk [vmem:[#allocation3 + $0x40] sm:$0xf] %vm2236_vm15, %v2173_v35  ;;  %v2619_v35 = vld [vmem:[#allocation2 + $0x318] sm:$0xe] }
 0x2d7   : > { %2252 = vst.msk [vmem:[#allocation3 + $0x3c] sm:$0xf] %vm2236_vm15, %v2171_v39 }
 0x2d8   : > { %2538 = vrot.lane.b32.xlu2 %v2474_v41, %s10498_s18  ;;  %v2626_v41 = vld [vmem:[#allocation2 + $0x354] sm:$0xf] }
 0x2d9   : > { %v2747_v53 = vrot.slane %v2626_v41, 5  ;;  %v2775_v41 = vrot.slane %v2638_v45, 5 }
 0x2da   : > { %v2199_v56 = vpop.permute.xlu2 %2198 }
 0x2db   : > { %2536 = vrot.lane.b32.xlu1 %v2470_v49, %s10498_s18  ;;  %2534 = vrot.lane.b32.xlu0 %v2467_v50, %s10498_s18  ;;  %2266 = vst.msk [vmem:[#allocation3 + $0x74] sm:$0xf] %vm2236_vm15, %v2199_v56  ;;  %v9592_v49 = vrot.slane %v2619_v35, 9  ;;  %v2737_v56 = vsel %vm10607_vm3, %v2735_v40, %v2736_v48  ;;  %v2749_v60 = vrot.slane %v2747_v53, 4  ;;  %v9599_v40 = vrot.slane %v2640_v46, 9 }
 0x2dc   : > { %v2782_v48 = vrot.slane %v2641_v12, 5 }
 0x2dd   : > { %v2179_v47 = vpop.permute.xlu1 %2178  ;;  %v2177_v5 = vpop.permute.xlu0 %2176  ;;  %v2734_v57 = vsel %vm10607_vm3, %v9592_v49, %v2733_v44  ;;  %v2751_v43 = vsel %vm10607_vm3, %v2749_v60, %v2750_v1  ;;  %v2639_v49 = vld [vmem:[#allocation2 + $0x3c8] sm:$0x1] }
 0x2de   : > { %2256 = vst.msk [vmem:[#allocation3 + $0x4c] sm:$0xf] %vm2236_vm15, %v2179_v47  ;;  %v2625_v47 = vld [vmem:[#allocation2 + $0x350] sm:$0xe]  ;;  %v2778_v55 = vrot.slane %v2639_v49, 5  ;;  %v2783_v1 = vsel %vm10607_vm3, %v9599_v40, %v2782_v48  ;;  %v2784_v17 = vrot.slane %v2782_v48, 4 }
 0x2df   : > { %2255 = vst.msk [vmem:[#allocation3 + $0x48] sm:$0xf] %vm2236_vm15, %v2177_v5  ;;  %v2624_v5 = vld [vmem:[#allocation2 + $0x33c] sm:$0x1]  ;;  %v9594_v7 = vrot.slane %v2625_v47, 9 }
 0x2e0   : > { %2817 = vrot.lane.b32.xlu2 %v2709_v63, %s10499_s19  ;;  %v2743_v13 = vrot.slane %v2624_v5, 5  ;;  %v2645_v5 = vld [vmem:[#allocation2 + $0x400] sm:$0x1] }
 0x2e1   : > { %v2748_v28 = vsel %vm10607_vm3, %v9594_v7, %v2747_v53  ;;  %v2777_v53 = vrot.slane %v2775_v41, 4 }
 0x2e2   : > { %v2479_v54 = vpop.permute.xlu2 %2478 }
 0x2e3   : > { %2815 = vrot.lane.b32.xlu1 %v2706_v14, %s10499_s19  ;;  %2540 = vrot.lane.b32.xlu0 %v2477_v62, %s10498_s18  ;;  %2575 = vst.msk [vmem:[#allocation3] sm:$0xf] %vm2574_vm1, %v2479_v54  ;;  %v2744_v54 = vsel %vm10607_vm3, %v2742_v11, %v2743_v13  ;;  %v2792_v13 = vrot.slane %v2645_v5, 5  ;;  %v2947_v5 = vld [vmem:[#allocation2 + $0x2cc] sm:$0xf] }
 0x2e5   : > { %v2185_v22 = vpop.permute.xlu1 %2184  ;;  %v2183_v24 = vpop.permute.xlu0 %2182 }
 0x2e6   : > { %2259 = vst.msk [vmem:[#allocation3 + $0x58] sm:$0xf] %vm2236_vm15, %v2185_v22  ;;  %v2628_v22 = vld [vmem:[#allocation2 + $0x36c] sm:$0xe] }
 0x2e7   : > { %2258 = vst.msk [vmem:[#allocation3 + $0x54] sm:$0xf] %vm2236_vm15, %v2183_v24 }
 0x2e8   : > { %2823 = vrot.lane.b32.xlu2 %v2720_v58, %s10499_s19  ;;  %v2635_v58 = vld [vmem:[#allocation2 + $0x3a8] sm:$0xf] }
 0x2e9   : > { %v2768_v34 = vrot.slane %v2635_v58, 5  ;;  %v2796_v58 = vrot.slane %v2647_v10, 5 }
 0x2ea   : > { %v2485_v61 = vpop.permute.xlu2 %2484 }
 0x2eb   : > { %2821 = vrot.lane.b32.xlu1 %v2716_v25, %s10499_s19  ;;  %2819 = vrot.lane.b32.xlu0 %v2713_v26, %s10499_s19  ;;  %2578 = vst.msk [vmem:[#allocation3 + $0xc] sm:$0xf] %vm2574_vm1, %v2485_v61  ;;  %v9595_v25 = vrot.slane %v2628_v22, 9  ;;  %v2758_v61 = vsel %vm10607_vm3, %v2756_v9, %v2757_v23  ;;  %v2770_v31 = vrot.slane %v2768_v34, 4  ;;  %v9602_v9 = vrot.slane %v2649_v19, 9 }
 0x2ec   : > { %v2803_v23 = vrot.slane %v2650_v21, 5  ;;  %v2958_v21 = vld [vmem:[#allocation2 + $0x370] sm:$0xf] }
 0x2ed   : > { %v2191_v33 = vpop.permute.xlu1 %2190  ;;  %v2189_v36 = vpop.permute.xlu0 %2188  ;;  %v2755_v4 = vsel %vm10607_vm3, %v9595_v25, %v2754_v6  ;;  %v2772_v44 = vsel %vm10607_vm3, %v2770_v31, %v2771_v32  ;;  %v2648_v25 = vld [vmem:[#allocation2 + $0x41c] sm:$0x1] }
 0x2ee   : > { %2262 = vst.msk [vmem:[#allocation3 + $0x64] sm:$0xf] %vm2236_vm15, %v2191_v33  ;;  %v2634_v33 = vld [vmem:[#allocation2 + $0x3a4] sm:$0xe]  ;;  %v2799_v38 = vrot.slane %v2648_v25, 5  ;;  %v2804_v32 = vsel %vm10607_vm3, %v9602_v9, %v2803_v23  ;;  %v2805_v46 = vrot.slane %v2803_v23, 4 }
 0x2ef   : > { %2261 = vst.msk [vmem:[#allocation3 + $0x60] sm:$0xf] %vm2236_vm15, %v2189_v36  ;;  %v2633_v36 = vld [vmem:[#allocation2 + $0x390] sm:$0x1]  ;;  %v9597_v2 = vrot.slane %v2634_v33, 9 }
 0x2f0   : > { %2829 = vrot.lane.b32.xlu2 %v2730_v59, %s10499_s19  ;;  %v2764_v20 = vrot.slane %v2633_v36, 5  ;;  %v2654_v36 = vld [vmem:[#allocation2 + $0x454] sm:$0x1]  ;;  %v2961_v25 = vld [vmem:[#allocation2 + $0x390] sm:$0xf] }
 0x2f1   : > { %v2769_v35 = vsel %vm10607_vm3, %v9597_v2, %v2768_v34  ;;  %v2798_v34 = vrot.slane %v2796_v58, 4 }
 0x2f2   : > { %v2491_v39 = vpop.permute.xlu2 %2490 }
 0x2f3   : > { %2827 = vrot.lane.b32.xlu1 %v2727_v27, %s10499_s19  ;;  %2825 = vrot.lane.b32.xlu0 %v2723_v42, %s10499_s19  ;;  %2581 = vst.msk [vmem:[#allocation3 + $0x18] sm:$0xf] %vm2574_vm1, %v2491_v39  ;;  %v2765_v39 = vsel %vm10607_vm3, %v2763_v37, %v2764_v20  ;;  %v2813_v20 = vrot.slane %v2654_v36, 5 }
 0x2f5   : > { %v2197_v50 = vpop.permute.xlu1 %2196  ;;  %v2195_v51 = vpop.permute.xlu0 %2194 }
 0x2f6   : > { %2265 = vst.msk [vmem:[#allocation3 + $0x70] sm:$0xf] %vm2236_vm15, %v2197_v50  ;;  %v2637_v50 = vld [vmem:[#allocation2 + $0x3c0] sm:$0xe] }
 0x2f7   : > { %2264 = vst.msk [vmem:[#allocation3 + $0x6c] sm:$0xf] %vm2236_vm15, %v2195_v51 }
 0x2f8   : > { %2835 = vrot.lane.b32.xlu2 %v2741_v52, %s10499_s19  ;;  %v2644_v52 = vld [vmem:[#allocation2 + $0x3fc] sm:$0xf] }
 0x2f9   : > { %v2789_v47 = vrot.slane %v2644_v52, 5  ;;  %v2946_v52 = vld [vmem:[#allocation2 + $0x2c8] sm:$0xf] }
 0x2fa   : > { %v2497_v63 = vpop.permute.xlu2 %2496 }
 0x2fb   : > { %2833 = vrot.lane.b32.xlu1 %v2737_v56, %s10499_s19  ;;  %2831 = vrot.lane.b32.xlu0 %v2734_v57, %s10499_s19  ;;  %2584 = vst.msk [vmem:[#allocation3 + $0x24] sm:$0xf] %vm2574_vm1, %v2497_v63  ;;  %v9598_v56 = vrot.slane %v2637_v50, 9  ;;  %v2779_v63 = vsel %vm10607_vm3, %v2777_v53, %v2778_v55  ;;  %v2791_v11 = vrot.slane %v2789_v47, 4  ;;  %v2945_v53 = vld [vmem:[#allocation2 + $0x2b0] sm:$0xf] }
 0x2fc   : > { %v2944_v55 = vld [vmem:[#allocation2 + $0x2ac] sm:$0xf] }
 0x2fd   : > { %v2203_v14 = vpop.permute.xlu1 %2202  ;;  %v2201_v62 = vpop.permute.xlu0 %2200  ;;  %v2776_v7 = vsel %vm10607_vm3, %v9598_v56, %v2775_v41  ;;  %v2793_v6 = vsel %vm10607_vm3, %v2791_v11, %v2792_v13  ;;  %v2952_v13 = vld [vmem:[#allocation2 + $0x31c] sm:$0xf] }
 0x2fe   : > { %2268 = vst.msk [vmem:[#allocation3 + $0x7c] sm:$0xf] %vm2236_vm15, %v2203_v14  ;;  %v2643_v14 = vld [vmem:[#allocation2 + $0x3f8] sm:$0xe] }
 0x2ff   : > { %2267 = vst.msk [vmem:[#allocation3 + $0x78] sm:$0xf] %vm2236_vm15, %v2201_v62  ;;  %v2642_v62 = vld [vmem:[#allocation2 + $0x3e4] sm:$0x1]  ;;  %v9600_v15 = vrot.slane %v2643_v14, 9 }
 0x300   : > { %2841 = vrot.lane.b32.xlu2 %v2751_v43, %s10499_s19  ;;  %v2785_v16 = vrot.slane %v2642_v62, 5  ;;  %v2951_v14 = vld [vmem:[#allocation2 + $0x304] sm:$0xf]  ;;  %v2950_v62 = vld [vmem:[#allocation2 + $0x300] sm:$0xf] }
 0x301   : > { %v2790_v22 = vsel %vm10607_vm3, %v9600_v15, %v2789_v47  ;;  %v2948_v47 = vld [vmem:[#allocation2 + $0x2e4] sm:$0xf] }
 0x302   : > { %v2503_v24 = vpop.permute.xlu2 %2502 }
 0x303   : > { %2839 = vrot.lane.b32.xlu1 %v2748_v28, %s10499_s19  ;;  %2837 = vrot.lane.b32.xlu0 %v2744_v54, %s10499_s19  ;;  %2587 = vst.msk [vmem:[#allocation3 + $0x30] sm:$0xf] %vm2574_vm1, %v2503_v24  ;;  %v2786_v24 = vsel %vm10607_vm3, %v2784_v17, %v2785_v16  ;;  %v2955_v16 = vld [vmem:[#allocation2 + $0x33c] sm:$0xf] }
 0x305   : > { %v2483_v26 = vpop.permute.xlu1 %2482  ;;  %v2481_v29 = vpop.permute.xlu0 %2480 }
 0x306   : > { %2577 = vst.msk [vmem:[#allocation3 + $0x8] sm:$0xf] %vm2574_vm1, %v2483_v26  ;;  %v2646_v26 = vld [vmem:[#allocation2 + $0x414] sm:$0xe] }
 0x307   : > { %2576 = vst.msk [vmem:[#allocation3 + $0x4] sm:$0xf] %vm2574_vm1, %v2481_v29 }
 0x308   : > { %2847 = vrot.lane.b32.xlu2 %v2762_v30, %s10499_s19  ;;  %v2653_v30 = vld [vmem:[#allocation2 + $0x450] sm:$0xf] }
 0x309   : > { %v2810_v33 = vrot.slane %v2653_v30, 5 }
 0x30a   : > { %v2509_v59 = vpop.permute.xlu2 %2508 }
 0x30b   : > { %2845 = vrot.lane.b32.xlu1 %v2758_v61, %s10499_s19  ;;  %2843 = vrot.lane.b32.xlu0 %v2755_v4, %s10499_s19  ;;  %2590 = vst.msk [vmem:[#allocation3 + $0x3c] sm:$0xf] %vm2574_vm1, %v2509_v59  ;;  %v9601_v61 = vrot.slane %v2646_v26, 9  ;;  %v2800_v59 = vsel %vm10607_vm3, %v2798_v34, %v2799_v38  ;;  %v2812_v37 = vrot.slane %v2810_v33, 4  ;;  %v2960_v26 = vld [vmem:[#allocation2 + $0x38c] sm:$0xf] }
 0x30d   : > { %v2489_v27 = vpop.permute.xlu1 %2488  ;;  %v2487_v42 = vpop.permute.xlu0 %2486  ;;  %v2797_v2 = vsel %vm10607_vm3, %v9601_v61, %v2796_v58  ;;  %v2814_v41 = vsel %vm10607_vm3, %v2812_v37, %v2813_v20  ;;  %v2964_v61 = vld [vmem:[#allocation2 + $0x3c4] sm:$0xf]  ;;  %v2965_v37 = vld [vmem:[#allocation2 + $0x3c8] sm:$0xf] }
 0x30e   : > { %2580 = vst.msk [vmem:[#allocation3 + $0x14] sm:$0xf] %vm2574_vm1, %v2489_v27  ;;  %v2652_v27 = vld [vmem:[#allocation2 + $0x44c] sm:$0xe] }
 0x30f   : > { %2579 = vst.msk [vmem:[#allocation3 + $0x10] sm:$0xf] %vm2574_vm1, %v2487_v42  ;;  %v2651_v42 = vld [vmem:[#allocation2 + $0x438] sm:$0x1]  ;;  %v9603_v45 = vrot.slane %v2652_v27, 9 }
 0x310   : > { %2853 = vrot.lane.b32.xlu2 %v2772_v44, %s10499_s19  ;;  %v2806_v12 = vrot.slane %v2651_v42, 5 }
 0x311   : > { %v2811_v40 = vsel %vm10607_vm3, %v9603_v45, %v2810_v33  ;;  %v2969_v45 = vld [vmem:[#allocation2 + $0x400] sm:$0xf] }
 0x312   : > { %v2515_v51 = vpop.permute.xlu2 %2514  ;;  %v2807_v48 = vsel %vm10607_vm3, %v2805_v46, %v2806_v12  ;;  %v2968_v46 = vld [vmem:[#allocation2 + $0x3fc] sm:$0xf] }
 0x313   : > { %2851 = vrot.lane.b32.xlu1 %v2769_v35, %s10499_s19  ;;  %2849 = vrot.lane.b32.xlu0 %v2765_v39, %s10499_s19  ;;  %2593 = vst.msk [vmem:[#allocation3 + $0x48] sm:$0xf] %vm2574_vm1, %v2515_v51 }
 0x315   : > { %v2495_v57 = vpop.permute.xlu1 %2494  ;;  %v2493_v60 = vpop.permute.xlu0 %2492 }
 0x316   : > { %2583 = vst.msk [vmem:[#allocation3 + $0x20] sm:$0xf] %vm2574_vm1, %v2495_v57 }
 0x317   : > { %2582 = vst.msk [vmem:[#allocation3 + $0x1c] sm:$0xf] %vm2574_vm1, %v2493_v60 }
 0x318   : > { %2859 = vrot.lane.b32.xlu2 %v2783_v1, %s10499_s19  ;;  %v2949_v1 = vld [vmem:[#allocation2 + $0x2e8] sm:$0xf] }
 0x31a   : > { %v2521_v43 = vpop.permute.xlu2 %2520 }
 0x31b   : > { %2857 = vrot.lane.b32.xlu1 %v2779_v63, %s10499_s19  ;;  %2855 = vrot.lane.b32.xlu0 %v2776_v7, %s10499_s19  ;;  %2596 = vst.msk [vmem:[#allocation3 + $0x54] sm:$0xf] %vm2574_vm1, %v2521_v43 }
 0x31d   : > { %v2501_v28 = vpop.permute.xlu1 %2500  ;;  %v2499_v54 = vpop.permute.xlu0 %2498 }
 0x31e   : > { %2586 = vst.msk [vmem:[#allocation3 + $0x2c] sm:$0xf] %vm2574_vm1, %v2501_v28  ;;  %v2954_v28 = vld [vmem:[#allocation2 + $0x338] sm:$0xf] }
 0x31f   : > { %2585 = vst.msk [vmem:[#allocation3 + $0x28] sm:$0xf] %vm2574_vm1, %v2499_v54  ;;  %v2953_v54 = vld [vmem:[#allocation2 + $0x320] sm:$0xf] }
 0x320   : > { %2865 = vrot.lane.b32.xlu2 %v2793_v6, %s10499_s19 }
 0x322   : > { %v2527_v29 = vpop.permute.xlu2 %2526 }
 0x323   : > { %2863 = vrot.lane.b32.xlu1 %v2790_v22, %s10499_s19  ;;  %2861 = vrot.lane.b32.xlu0 %v2786_v24, %s10499_s19  ;;  %2599 = vst.msk [vmem:[#allocation3 + $0x60] sm:$0xf] %vm2574_vm1, %v2527_v29  ;;  %v2957_v22 = vld [vmem:[#allocation2 + $0x358] sm:$0xf]  ;;  %v2956_v24 = vld [vmem:[#allocation2 + $0x354] sm:$0xf] }
 0x324   : > { %v2959_v29 = vld [vmem:[#allocation2 + $0x374] sm:$0xf] }
 0x325   : > { %v2507_v4 = vpop.permute.xlu1 %2506  ;;  %v2505_v31 = vpop.permute.xlu0 %2504 }
 0x326   : > { %2589 = vst.msk [vmem:[#allocation3 + $0x38] sm:$0xf] %vm2574_vm1, %v2507_v4  ;;  %v2963_v4 = vld [vmem:[#allocation2 + $0x3ac] sm:$0xf] }
 0x327   : > { %2588 = vst.msk [vmem:[#allocation3 + $0x34] sm:$0xf] %vm2574_vm1, %v2505_v31  ;;  %v2962_v31 = vld [vmem:[#allocation2 + $0x3a8] sm:$0xf] }
 0x328   : > { %2871 = vrot.lane.b32.xlu2 %v2804_v32, %s10499_s19 }
 0x32a   : > { %v2533_v44 = vpop.permute.xlu2 %2532 }
 0x32b   : > { %2869 = vrot.lane.b32.xlu1 %v2800_v59, %s10499_s19  ;;  %2867 = vrot.lane.b32.xlu0 %v2797_v2, %s10499_s19  ;;  %2602 = vst.msk [vmem:[#allocation3 + $0x6c] sm:$0xf] %vm2574_vm1, %v2533_v44  ;;  %v2967_v59 = vld [vmem:[#allocation2 + $0x3e4] sm:$0xf]  ;;  %v2966_v2 = vld [vmem:[#allocation2 + $0x3e0] sm:$0xf] }
 0x32c   : > { %v2970_v44 = vld [vmem:[#allocation2 + $0x418] sm:$0xf] }
 0x32d   : > { %v2513_v35 = vpop.permute.xlu1 %2512  ;;  %v2511_v39 = vpop.permute.xlu0 %2510 }
 0x32e   : > { %2592 = vst.msk [vmem:[#allocation3 + $0x44] sm:$0xf] %vm2574_vm1, %v2513_v35 }
 0x32f   : > { %2591 = vst.msk [vmem:[#allocation3 + $0x40] sm:$0xf] %vm2574_vm1, %v2511_v39 }
 0x330   : > { %2877 = vrot.lane.b32.xlu2 %v2814_v41, %s10499_s19  ;;  %v2973_v41 = vld [vmem:[#allocation2 + $0x438] sm:$0xf] }
 0x332   : > { %v2539_v49 = vpop.permute.xlu2 %2538 }
 0x333   : > { %2875 = vrot.lane.b32.xlu1 %v2811_v40, %s10499_s19  ;;  %2873 = vrot.lane.b32.xlu0 %v2807_v48, %s10499_s19  ;;  %2605 = vst.msk [vmem:[#allocation3 + $0x78] sm:$0xf] %vm2574_vm1, %v2539_v49  ;;  %v3914_v40 = vld [vmem:[#allocation2 + $0xb0] sm:$0xe]  ;;  %v3915_v48 = vld [vmem:[#allocation2 + $0xb4] sm:$0xf] }
 0x334   : > { %v2972_v49 = vld [vmem:[#allocation2 + $0x434] sm:$0xf] }
 0x335   : > { %v2519_v50 = vpop.permute.xlu1 %2518  ;;  %v2517_v51 = vpop.permute.xlu0 %2516 }
 0x336   : > { %2595 = vst.msk [vmem:[#allocation3 + $0x50] sm:$0xf] %vm2574_vm1, %v2519_v50  ;;  %v2971_v50 = vld [vmem:[#allocation2 + $0x41c] sm:$0xf] }
 0x337   : > { %2594 = vst.msk [vmem:[#allocation3 + $0x4c] sm:$0xf] %vm2574_vm1, %v2517_v51  ;;  %v9796_v51 = vrot.slane %v3914_v40, 9  ;;  %v3926_v40 = vld [vmem:[#allocation2 + $0x120] sm:$0xe] }
 0x338   : > { %3012 = vrot.lane.b32.xlu2 %v2946_v52, %s10500_s20  ;;  %v4012_v52 = vrot.slane %v3915_v48, 5 }
 0x33a   : > { %v2818_v56 = vpop.permute.xlu2 %2817 }
 0x33b   : > { %3010 = vrot.lane.b32.xlu1 %v2945_v53, %s10500_s20  ;;  %3008 = vrot.lane.b32.xlu0 %v2944_v55, %s10500_s20  ;;  %2913 = vst.msk [vmem:[#allocation3 + $0x4] sm:$0xf] %vm2911_vm2, %v2818_v56  ;;  %v3918_v55 = vld [vmem:[#allocation2 + $0xd0] sm:$0xf] }
 0x33d   : > { %v2525_v57 = vpop.permute.xlu1 %2524  ;;  %v2523_v60 = vpop.permute.xlu0 %2522 }
 0x33e   : > { %2598 = vst.msk [vmem:[#allocation3 + $0x5c] sm:$0xf] %vm2574_vm1, %v2525_v57 }
 0x33f   : > { %2597 = vst.msk [vmem:[#allocation3 + $0x58] sm:$0xf] %vm2574_vm1, %v2523_v60  ;;  %v4013_v60 = vsel %vm10607_vm3, %v9796_v51, %v4012_v52  ;;  %v3925_v51 = vld [vmem:[#allocation2 + $0x10c] sm:$0x1] }
 0x340   : > { %3018 = vrot.lane.b32.xlu2 %v2949_v1, %s10500_s20  ;;  %v4019_v1 = vrot.slane %v3918_v55, 5  ;;  %v3650_v55 = vld [vmem:[#allocation2 + $0xe8] sm:$0x7] }
 0x342   : > { %v2824_v63 = vpop.permute.xlu2 %2823 }
 0x343   : > { %3016 = vrot.lane.b32.xlu1 %v2948_v47, %s10500_s20  ;;  %3014 = vrot.lane.b32.xlu0 %v2947_v5, %s10500_s20  ;;  %2916 = vst.msk [vmem:[#allocation3 + $0x10] sm:$0xf] %vm2911_vm2, %v2824_v63  ;;  %v3919_v47 = vld [vmem:[#allocation2 + $0xd4] sm:$0x1]  ;;  %v2974_v63 = vld [vmem:[#allocation2 + $0x450] sm:$0xf] }
 0x344   : > { %v2975_v5 = vld [vmem:[#allocation2 + $0x454] sm:$0xf] }
 0x345   : > { %v2531_v7 = vpop.permute.xlu1 %2530  ;;  %v2529_v11 = vpop.permute.xlu0 %2528 }
 0x346   : > { %2601 = vst.msk [vmem:[#allocation3 + $0x68] sm:$0xf] %vm2574_vm1, %v2531_v7  ;;  %v10238_v7 = vld [vmem:[%s15021_s5 + $0x18] sm:$0xff] }
 0x347   : > { %2600 = vst.msk [vmem:[#allocation3 + $0x64] sm:$0xf] %vm2574_vm1, %v2529_v11  ;;  %v4021_v11 = vrot.slane %v4019_v1, 4  ;;  %3334 = vmatpush.bf16.msra.mxu0 %v10238_v7 }
 0x348   : > { %3024 = vrot.lane.b32.xlu2 %v2952_v13, %s10500_s20  ;;  %v4022_v13 = vrot.slane %v3919_v47, 5 }
 0x34a   : > { %v2830_v43 = vpop.permute.xlu2 %2829 }
 0x34b   : > { %3022 = vrot.lane.b32.xlu1 %v2951_v14, %s10500_s20  ;;  %3020 = vrot.lane.b32.xlu0 %v2950_v62, %s10500_s20  ;;  %2919 = vst.msk [vmem:[#allocation3 + $0x1c] sm:$0xf] %vm2911_vm2, %v2830_v43  ;;  %v3917_v14 = vld [vmem:[#allocation2 + $0xcc] sm:$0xe]  ;;  %v3916_v62 = vld [vmem:[#allocation2 + $0xb8] sm:$0x1] }
 0x34d   : > { %v2537_v15 = vpop.permute.xlu1 %2536  ;;  %v2535_v17 = vpop.permute.xlu0 %2534 }
 0x34e   : > { %2604 = vst.msk [vmem:[#allocation3 + $0x74] sm:$0xf] %vm2574_vm1, %v2537_v15  ;;  %v10237_v15 = vld [vmem:[%s15021_s5 + $0x10] sm:$0xff] }
 0x34f   : > { %2603 = vst.msk [vmem:[#allocation3 + $0x70] sm:$0xf] %vm2574_vm1, %v2535_v17  ;;  %v9797_v17 = vrot.slane %v3917_v14, 9  ;;  %3335 = vmatpush.bf16.msra.mxu0 %v10237_v15  ;;  %v3932_v14 = vld [vmem:[#allocation2 + $0x158] sm:$0xe] }
 0x350   : > { %3030 = vrot.lane.b32.xlu2 %v2955_v16, %s10500_s20  ;;  %v4014_v16 = vrot.slane %v4012_v52, 4  ;;  %v10203_v52 = vld [vmem:[%s11238_s14] sm:$0xff] }
 0x352   : > { %v2836_v6 = vpop.permute.xlu2 %2835 }
 0x353   : > { %3028 = vrot.lane.b32.xlu1 %v2954_v28, %s10500_s20  ;;  %3026 = vrot.lane.b32.xlu0 %v2953_v54, %s10500_s20  ;;  %2922 = vst.msk [vmem:[#allocation3 + $0x28] sm:$0xf] %vm2911_vm2, %v2836_v6  ;;  %v4015_v28 = vrot.slane %v3916_v62, 5  ;;  %v3933_v62 = vld [vmem:[#allocation2 + $0x15c] sm:$0xf] }
 0x355   : > { %v2816_v10 = vpop.permute.xlu1 %2815  ;;  %v2541_v19 = vpop.permute.xlu0 %2540 }
 0x356   : > { %2912 = vst.msk [vmem:[#allocation3] sm:$0xf] %vm2911_vm2, %v2816_v10  ;;  %v4023_v10 = vsel %vm10607_vm3, %v4021_v11, %v4022_v13  ;;  %v3930_v13 = vld [vmem:[#allocation2 + $0x140] sm:$0xf] }
 0x357   : > { %2606 = vst.msk [vmem:[#allocation3 + $0x7c] sm:$0xf] %vm2574_vm1, %v2541_v19  ;;  %v3921_v19 = vld [vmem:[#allocation2 + $0xec] sm:$0xf] }
 0x358   : > { %3036 = vrot.lane.b32.xlu2 %v2958_v21, %s10500_s20  ;;  %v3923_v21 = vld [vmem:[#allocation2 + $0x104] sm:$0xe] }
 0x35a   : > { %v2842_v58 = vpop.permute.xlu2 %2841 }
 0x35b   : > { %3034 = vrot.lane.b32.xlu1 %v2957_v22, %s10500_s20  ;;  %3032 = vrot.lane.b32.xlu0 %v2956_v24, %s10500_s20  ;;  %2925 = vst.msk [vmem:[#allocation3 + $0x34] sm:$0xf] %vm2911_vm2, %v2842_v58  ;;  %v3924_v22 = vld [vmem:[#allocation2 + $0x108] sm:$0xf]  ;;  %v4020_v24 = vsel %vm10607_vm3, %v9797_v17, %v4019_v1  ;;  %v4016_v58 = vsel %vm10607_vm3, %v4014_v16, %v4015_v28  ;;  %v4036_v1 = vrot.slane %v3925_v51, 5  ;;  %v4047_v28 = vrot.slane %v3930_v13, 5 }
 0x35c   : > { %v3654_v17 = vld [vmem:[#allocation2 + $0x118] sm:$0x8]  ;;  %v12313_v16 = vld [vmem:[#allocation2 + $0x11c] sm:$0xf]  ;;  %v12357_v13 = vld [vmem:[#allocation2 + $0x170] sm:$0xf] }
 0x35d   : > { %v2822_v9 = vpop.permute.xlu1 %2821  ;;  %v2820_v23 = vpop.permute.xlu0 %2819 }
 0x35e   : > { %2915 = vst.msk [vmem:[#allocation3 + $0xc] sm:$0xf] %vm2911_vm2, %v2822_v9  ;;  %v3645_v9 = vld [vmem:[#allocation2 + $0xc4] sm:$0x8] }
 0x35f   : > { %2914 = vst.msk [vmem:[#allocation3 + $0x8] sm:$0xf] %vm2911_vm2, %v2820_v23  ;;  %v12263_v23 = vld [vmem:[#allocation2 + $0xc8] sm:$0xf] }
 0x360   : > { %3042 = vrot.lane.b32.xlu2 %v2961_v25, %s10500_s20  ;;  %v4026_v25 = vrot.slane %v3921_v19, 5  ;;  %v3931_v19 = vld [vmem:[#allocation2 + $0x144] sm:$0x1] }
 0x362   : > { %v2848_v30 = vpop.permute.xlu2 %2847 }
 0x363   : > { %3040 = vrot.lane.b32.xlu1 %v2960_v26, %s10500_s20  ;;  %3038 = vrot.lane.b32.xlu0 %v2959_v29, %s10500_s20  ;;  %2928 = vst.msk [vmem:[#allocation3 + $0x40] sm:$0xf] %vm2911_vm2, %v2848_v30  ;;  %v10236_v26 = vld [vmem:[%s15021_s5 + $0x8] sm:$0xff]  ;;  %v9799_v29 = vrot.slane %v3923_v21, 9  ;;  %v4033_v30 = vrot.slane %v3924_v22, 5 }
 0x364   : > { %3336 = vmatpush.bf16.msra.mxu0 %v10236_v26  ;;  %v3929_v21 = vld [vmem:[#allocation2 + $0x13c] sm:$0xe]  ;;  %v3768_v26 = vrot.slane %v12313_v16, 7 }
 0x365   : > { %v2828_v34 = vpop.permute.xlu1 %2827  ;;  %v2826_v38 = vpop.permute.xlu0 %2825 }
 0x366   : > { %2918 = vst.msk [vmem:[#allocation3 + $0x18] sm:$0xf] %vm2911_vm2, %v2828_v34  ;;  %v3922_v34 = vld [vmem:[#allocation2 + $0xf0] sm:$0x1] }
 0x367   : > { %2917 = vst.msk [vmem:[#allocation3 + $0x14] sm:$0xf] %vm2911_vm2, %v2826_v38  ;;  %v3920_v38 = vld [vmem:[#allocation2 + $0xe8] sm:$0xe] }
 0x368   : > { %3048 = vrot.lane.b32.xlu2 %v2964_v61, %s10500_s20 }
 0x36a   : > { %v2854_v32 = vpop.permute.xlu2 %2853 }
 0x36b   : > { %3046 = vrot.lane.b32.xlu1 %v2963_v4, %s10500_s20  ;;  %3044 = vrot.lane.b32.xlu0 %v2962_v31, %s10500_s20  ;;  %2931 = vst.msk [vmem:[#allocation3 + $0x4c] sm:$0xf] %vm2911_vm2, %v2854_v32  ;;  %v3927_v4 = vld [vmem:[#allocation2 + $0x124] sm:$0xf]  ;;  %v9781_v31 = vrot.slane %v3645_v9, 11  ;;  %v3747_v32 = vrot.slane %v12263_v23, 7 }
 0x36d   : > { %v2834_v33 = vpop.permute.xlu1 %2833  ;;  %v2832_v36 = vpop.permute.xlu0 %2831 }
 0x36e   : > { %2921 = vst.msk [vmem:[#allocation3 + $0x24] sm:$0xf] %vm2911_vm2, %v2834_v33  ;;  %v4028_v33 = vrot.slane %v4026_v25, 4 }
 0x36f   : > { %2920 = vst.msk [vmem:[#allocation3 + $0x20] sm:$0xf] %vm2911_vm2, %v2832_v36  ;;  %v4029_v36 = vrot.slane %v3922_v34, 5  ;;  %v9801_v34 = vrot.slane %v3929_v21, 9  ;;  %v3789_v21 = vrot.slane %v12357_v13, 7 }
 0x370   : > { %3054 = vrot.lane.b32.xlu2 %v2967_v59, %s10500_s20  ;;  %v9798_v59 = vrot.slane %v3920_v38, 9 }
 0x372   : > { %v2860_v20 = vpop.permute.xlu2 %2859 }
 0x373   : > { %3052 = vrot.lane.b32.xlu1 %v2966_v2, %s10500_s20  ;;  %3050 = vrot.lane.b32.xlu0 %v2965_v37, %s10500_s20  ;;  %2934 = vst.msk [vmem:[#allocation3 + $0x58] sm:$0xf] %vm2911_vm2, %v2860_v20  ;;  %v10235_v2 = vld [vmem:[%s15021_s5] sm:$0xff] }
 0x374   : > { %3337 = vmatpush.bf16.msra.mxu0 %v10235_v2  ;;  %v3659_v2 = vld [vmem:[#allocation2 + $0x13c] sm:$0x7] }
 0x375   : > { %v2840_v27 = vpop.permute.xlu1 %2839  ;;  %v2838_v42 = vpop.permute.xlu0 %2837 }
 0x376   : > { %2924 = vst.msk [vmem:[#allocation3 + $0x30] sm:$0xf] %vm2911_vm2, %v2840_v27  ;;  %v4034_v27 = vsel %vm10607_vm3, %v9799_v29, %v4033_v30  ;;  %v4049_v29 = vrot.slane %v4047_v28, 4 }
 0x377   : > { %2923 = vst.msk [vmem:[#allocation3 + $0x2c] sm:$0xf] %vm2911_vm2, %v2838_v42  ;;  %v12277_v42 = vld [vmem:[#allocation2 + $0xe4] sm:$0xf] }
 0x378   : > { %3060 = vrot.lane.b32.xlu2 %v2970_v44, %s10500_s20  ;;  %v4040_v44 = vrot.slane %v3927_v4, 5  ;;  %v3754_v48 = vrot.slane %v12277_v42, 7  ;;  %v12443_v42 = vld [vmem:[#allocation2 + $0x134] sm:$0x8] }
 0x37a   : > { %v2866_v12 = vpop.permute.xlu2 %2865  ;;  %v3756_v47 = vrot.slane %v3754_v48, 4 }
 0x37b   : > { %3058 = vrot.lane.b32.xlu1 %v2969_v45, %s10500_s20  ;;  %3056 = vrot.lane.b32.xlu0 %v2968_v46, %s10500_s20  ;;  %2937 = vst.msk [vmem:[#allocation3 + $0x64] sm:$0xf] %vm2911_vm2, %v2866_v12  ;;  %v929_v45 = vld [vmem:[%s15020_s4] sm:$0xf]  ;;  %v3928_v46 = vld [vmem:[#allocation2 + $0x128] sm:$0x1] }
 0x37c   : > { %v3550_v12 = vsel %vm3548_vm5, %v929_v45, 0  ;;  %v3935_v45 = vld [vmem:[#allocation2 + $0x174] sm:$0xe] }
 0x37d   : > { %v2846_v35 = vpop.permute.xlu1 %2845  ;;  %v2844_v39 = vpop.permute.xlu0 %2843  ;;  %3559 = vmatpush.bf16.msra.mxu1 %v3550_v12 }
 0x37e   : > { %2927 = vst.msk [vmem:[#allocation3 + $0x3c] sm:$0xf] %vm2911_vm2, %v2846_v35  ;;  %v3748_v35 = vsel %vm11270_vm8, %v9781_v31, %v3747_v32 }
 0x37f   : > { %2926 = vst.msk [vmem:[#allocation3 + $0x38] sm:$0xf] %vm2911_vm2, %v2844_v39  ;;  %v4030_v39 = vsel %vm10607_vm3, %v4028_v33, %v4029_v36  ;;  %v12330_v36 = vld [vmem:[#allocation2 + $0xac] sm:$0xf] }
 0x380   : > { %3066 = vrot.lane.b32.xlu2 %v2973_v41, %s10500_s20  ;;  %v4027_v41 = vsel %vm10607_vm3, %v9798_v59, %v4026_v25  ;;  %9764 = vmatmul.msk.bf16.vlgmr.msra.gmra.mxu1 %vm3499_vm6, %v10203_v52  ;;  %v9784_v25 = vrot.slane %v3654_v17, 11  ;;  %v3937_v59 = vld [vmem:[#allocation2 + $0x17c] sm:$0x1]  ;;  %v3740_v12 = vrot.slane %v12330_v36, 7  ;;  %v12348_v52 = vld [vmem:[#allocation2 + $0x194] sm:$0xf] }
 0x382   : > { %v2872_v53 = vpop.permute.xlu2 %2871 }
 0x383   : > { %3064 = vrot.lane.b32.xlu1 %v2972_v49, %s10500_s20  ;;  %3062 = vrot.lane.b32.xlu0 %v2971_v50, %s10500_s20  ;;  %2940 = vst.msk [vmem:[#allocation3 + $0x70] sm:$0xf] %vm2911_vm2, %v2872_v53  ;;  %v4042_v49 = vrot.slane %v4040_v44, 4  ;;  %v4043_v50 = vrot.slane %v3928_v46, 5  ;;  %v3934_v46 = vld [vmem:[#allocation2 + $0x160] sm:$0x1] }
 0x385   : > { %v2852_v56 = vpop.permute.xlu1 %2851  ;;  %v2850_v57 = vpop.permute.xlu0 %2849  ;;  %v4044_v11 = vsel %vm10607_vm3, %v4042_v49, %v4043_v50  ;;  %v3778_v50 = vrot.slane %v3659_v2, 7  ;;  %v3647_v2 = vld [vmem:[#allocation2 + $0xcc] sm:$0x7] }
 0x386   : > { %2930 = vst.msk [vmem:[#allocation3 + $0x48] sm:$0xf] %vm2911_vm2, %v2852_v56 }
 0x387   : > { %2929 = vst.msk [vmem:[#allocation3 + $0x44] sm:$0xf] %vm2911_vm2, %v2850_v57  ;;  %v9800_v57 = vrot.slane %v3926_v40, 9 }
 0x388   : > { %4122 = vrot.lane.b32.xlu2 %v4013_v60, %s10494_s9  ;;  %v4035_v60 = vrot.slane %v4033_v30, 4  ;;  %v4050_v30 = vrot.slane %v3931_v19, 5 }
 0x38a   : > { %v2878_v43 = vpop.permute.xlu2 %2877  ;;  %v4037_v15 = vsel %vm10607_vm3, %v4035_v60, %v4036_v1  ;;  %v4057_v60 = vrot.slane %v3934_v46, 5  ;;  %v3642_v1 = vld [vmem:[#allocation2 + $0xa8] sm:$0x8] }
 0x38b   : > { %3070 = vrot.lane.b32.xlu1 %v2975_v5, %s10500_s20  ;;  %3068 = vrot.lane.b32.xlu0 %v2974_v63, %s10500_s20  ;;  %2943 = vst.msk [vmem:[#allocation3 + $0x7c] sm:$0xf] %vm2911_vm2, %v2878_v43  ;;  %v3757_v5 = vrot.slane %v3650_v55, 7  ;;  %v4041_v43 = vsel %vm10607_vm3, %v9800_v57, %v4040_v44  ;;  %v3644_v44 = vld [vmem:[#allocation2 + $0xb0] sm:$0x7] }
 0x38c   : > { %v3743_v55 = vrot.slane %v3644_v44, 7 }
 0x38d   : > { %v2858_v54 = vpop.permute.xlu1 %2857  ;;  %v2856_v6 = vpop.permute.xlu0 %2855 }
 0x38e   : > { %2933 = vst.msk [vmem:[#allocation3 + $0x54] sm:$0xf] %vm2911_vm2, %v2858_v54  ;;  %v3758_v54 = vsel %vm11270_vm8, %v3756_v47, %v3757_v5  ;;  %v3663_v47 = vld [vmem:[#allocation2 + $0x16c] sm:$0x8]  ;;  %v3742_v5 = vrot.slane %v3740_v12, 4 }
 0x38f   : > { %2932 = vst.msk [vmem:[#allocation3 + $0x50] sm:$0xf] %vm2911_vm2, %v2856_v6  ;;  %v9802_v6 = vrot.slane %v3932_v14, 9  ;;  %v3941_v14 = vld [vmem:[#allocation2 + $0x1ac] sm:$0xe]  ;;  %v9787_v19 = vrot.slane %v3663_v47, 11 }
 0x390   : > { %4128 = vrot.lane.b32.xlu2 %v4023_v10, %s10494_s9  ;;  %v4054_v10 = vrot.slane %v3933_v62, 5  ;;  %v4068_v62 = vrot.slane %v12348_v52, 5  ;;  %v3749_v52 = vrot.slane %v3747_v32, 4  ;;  %v3943_v32 = vld [vmem:[#allocation2 + $0x1b4] sm:$0x1] }
 0x392   : > { %v3013_v61 = vpop.permute.xlu2 %3012  ;;  %v4055_v4 = vsel %vm10607_vm3, %v9802_v6, %v4054_v10  ;;  %v4056_v57 = vrot.slane %v4054_v10, 4  ;;  %v3938_v6 = vld [vmem:[#allocation2 + $0x190] sm:$0xe]  ;;  %v9780_v10 = vrot.slane %v3642_v1, 11 }
 0x393   : > { %4126 = vrot.lane.b32.xlu1 %v4020_v24, %s10494_s9  ;;  %4124 = vrot.lane.b32.xlu0 %v4016_v58, %s10494_s9  ;;  %3107 = vst.msk [vmem:[#allocation3 + $0x8] sm:$0xf] %vm3104_vm4, %v3013_v61  ;;  %v12317_v24 = vld [vmem:[#allocation2 + $0x138] sm:$0xf] }
 0x394   : > { %v3936_v58 = vld [vmem:[#allocation2 + $0x178] sm:$0xf]  ;;  %v3775_v31 = vrot.slane %v12317_v24, 7 }
 0x395   : > { %v2864_v37 = vpop.permute.xlu1 %2863  ;;  %v2862_v20 = vpop.permute.xlu0 %2861  ;;  %v4061_v33 = vrot.slane %v3936_v58, 5  ;;  %v9805_v58 = vrot.slane %v3941_v14, 9  ;;  %v12532_v24 = vld [vmem:[#allocation2 + $0x218] sm:$0xf] }
 0x396   : > { %2936 = vst.msk [vmem:[#allocation3 + $0x60] sm:$0xf] %vm2911_vm2, %v2864_v37  ;;  %v3769_v37 = vsel %vm11270_vm8, %v9784_v25, %v3768_v26  ;;  %v3777_v49 = vrot.slane %v3775_v31, 4 }
 0x397   : > { %2935 = vst.msk [vmem:[#allocation3 + $0x5c] sm:$0xf] %vm2911_vm2, %v2862_v20  ;;  %v4051_v20 = vsel %vm10607_vm3, %v4049_v29, %v4050_v30  ;;  %v12375_v29 = vld [vmem:[#allocation2 + $0x18c] sm:$0xf] }
 0x398   : > { %4134 = vrot.lane.b32.xlu2 %v4034_v27, %s10494_s9  ;;  %v4048_v27 = vsel %vm10607_vm3, %v9801_v34, %v4047_v28  ;;  %v4058_v28 = vsel %vm10607_vm3, %v4056_v57, %v4057_v60  ;;  %v12377_v30 = vld [vmem:[#allocation2 + $0x1cc] sm:$0xf] }
 0x399   : > { %v4082_v44 = vrot.slane %v12377_v30, 5  ;;  %v9785_v30 = vrot.slane %v12443_v42, 11 }
 0x39a   : > { %v12295_v53 = vld [vmem:[#allocation3 + $0x8] sm:$0xf]  ;;  %v3019_v56 = vpop.permute.xlu2 %3018 }
 0x39b   : > { %3884 = vst.msk [vmem:[#allocation3 + $0x8] sm:$0xf] %vm285_vm0, %v3748_v35  ;;  %4132 = vrot.lane.b32.xlu1 %v4030_v39, %s10494_s9  ;;  %4130 = vrot.lane.b32.xlu0 %v4027_v41, %s10494_s9  ;;  %v4063_v35 = vrot.slane %v4061_v33, 4  ;;  %v4064_v39 = vrot.slane %v3937_v59, 5  ;;  %v10204_v41 = vld [vmem:[%s11238_s14 + $0x8] sm:$0xff]  ;;  %v3744_v59 = vsel %vm11270_vm8, %v3742_v5, %v3743_v55  ;;  %v3750_v55 = vrot.slane %v3647_v2, 7 }
 0x39c   : > { %3110 = vst.msk [vmem:[#allocation3 + $0x14] sm:$0xf] %vm3104_vm4, %v3019_v56  ;;  %v9803_v56 = vrot.slane %v3935_v45, 9  ;;  %9765 = vmatmul.msk.bf16.gmra.mxu1 %vm3499_vm6, %v10204_v41  ;;  %v3946_v41 = vld [vmem:[#allocation2 + $0x1d0] sm:$0x1]  ;;  %v4084_v47 = vrot.slane %v4082_v44, 4 }
 0x39d   : > { %v2870_v63 = vpop.permute.xlu1 %2869  ;;  %v2868_v7 = vpop.permute.xlu0 %2867  ;;  %v4085_v23 = vrot.slane %v3946_v41, 5 }
 0x39e   : > { %2939 = vst.msk [vmem:[#allocation3 + $0x6c] sm:$0xf] %vm2911_vm2, %v2870_v63  ;;  %v4062_v17 = vsel %vm10607_vm3, %v9803_v56, %v4061_v33  ;;  %v9804_v33 = vrot.slane %v3938_v6, 9  ;;  %v3950_v6 = vld [vmem:[#allocation2 + $0x200] sm:$0xe] }
 0x39f   : > { %2938 = vst.msk [vmem:[#allocation3 + $0x68] sm:$0xf] %vm2911_vm2, %v2868_v7 }
 0x3a0   : > { %4140 = vrot.lane.b32.xlu2 %v4044_v11, %s10494_s9  ;;  %v4065_v11 = vsel %vm10607_vm3, %v4063_v35, %v4064_v39  ;;  %v4069_v1 = vsel %vm10607_vm3, %v9804_v33, %v4068_v62  ;;  %v12438_v33 = vld [vmem:[#allocation2 + $0x1c4] sm:$0xf] }
 0x3a2   : > { %v3025_v22 = vpop.permute.xlu2 %3024 }
 0x3a3   : > { %v12319_v9 = vld [vmem:[#allocation3 + $0x10] sm:$0xf0]  ;;  %4138 = vrot.lane.b32.xlu1 %v4041_v43, %s10494_s9  ;;  %4136 = vrot.lane.b32.xlu0 %v4037_v15, %s10494_s9  ;;  %3113 = vst.msk [vmem:[#allocation3 + $0x20] sm:$0xf] %vm3104_vm4, %v3025_v22  ;;  %v12361_v43 = vld [vmem:[#allocation2 + $0xe0] sm:$0x8]  ;;  %v3779_v22 = vsel %vm11270_vm8, %v3777_v49, %v3778_v50 }
 0x3a4   : > { %3887 = vst.msk [vmem:[#allocation3 + $0x14] sm:$0xf] %vm285_vm0, %v3758_v54  ;;  %v12363_v15 = vld [vmem:[#allocation2 + $0x1b0] sm:$0xf]  ;;  %v3940_v54 = vld [vmem:[#allocation2 + $0x198] sm:$0x1] }
 0x3a5   : > { %v2876_v38 = vpop.permute.xlu1 %2875  ;;  %v2874_v61 = vpop.permute.xlu0 %2873  ;;  %v4075_v25 = vrot.slane %v12363_v15, 5  ;;  %v3944_v49 = vld [vmem:[#allocation2 + $0x1c8] sm:$0xe]  ;;  %v3651_v15 = vld [vmem:[#allocation2 + $0xfc] sm:$0x8] }
 0x3a6   : > { %2942 = vst.msk [vmem:[#allocation3 + $0x78] sm:$0xf] %vm2911_vm2, %v2876_v38  ;;  %v9782_v38 = vrot.slane %v12361_v43, 11  ;;  %v9783_v2 = vrot.slane %v3651_v15, 11 }
 0x3a7   : > { %2941 = vst.msk [vmem:[#allocation3 + $0x74] sm:$0xf] %vm2911_vm2, %v2874_v61  ;;  %v4070_v61 = vrot.slane %v4068_v62, 4  ;;  %v4076_v39 = vsel %vm10607_vm3, %v9805_v58, %v4075_v25  ;;  %v3653_v62 = vld [vmem:[#allocation2 + $0x104] sm:$0x7] }
 0x3a8   : > { %4146 = vrot.lane.b32.xlu2 %v4055_v4, %s10494_s9  ;;  %v4071_v4 = vrot.slane %v3940_v54, 5  ;;  %v12426_v54 = vld [vmem:[#allocation2 + $0x1e8] sm:$0xf]  ;;  %v3764_v58 = vrot.slane %v3653_v62, 7  ;;  %v3955_v62 = vld [vmem:[#allocation2 + $0x224] sm:$0x1] }
 0x3aa   : > { %v12344_v40 = vld [vmem:[#allocation3 + $0x20] sm:$0xf]  ;;  %v3031_v51 = vpop.permute.xlu2 %3030  ;;  %v4072_v60 = vsel %vm10607_vm3, %v4070_v61, %v4071_v4  ;;  %v3672_v4 = vld [vmem:[#allocation2 + $0x1c0] sm:$0x8] }
 0x3ab   : > { %3890 = vst.msk [vmem:[#allocation3 + $0x20] sm:$0xf] %vm285_vm0, %v3769_v37  ;;  %4144 = vrot.lane.b32.xlu1 %v4051_v20, %s10494_s9  ;;  %4142 = vrot.lane.b32.xlu0 %v4048_v27, %s10494_s9  ;;  %v3741_v37 = vsel %vm11270_vm8, %v9780_v10, %v3740_v12  ;;  %v12390_v20 = vld [vmem:[#allocation2 + $0x190] sm:$0x7]  ;;  %v3796_v27 = vrot.slane %v12375_v29, 7  ;;  %v3790_v12 = vsel %vm11270_vm8, %v9787_v19, %v3789_v21 }
 0x3ac   : > { %3116 = vst.msk [vmem:[#allocation3 + $0x2c] sm:$0xf] %vm3104_vm4, %v3031_v51  ;;  %v12401_v51 = vld [vmem:[#allocation2 + $0x100] sm:$0xf]  ;;  %v3799_v57 = vrot.slane %v12390_v20, 7  ;;  %v3755_v19 = vsel %vm11270_vm8, %v9782_v38, %v3754_v48  ;;  %v4089_v48 = vrot.slane %v12426_v54, 5 }
 0x3ad   : > { %v3011_v63 = vpop.permute.xlu1 %3010  ;;  %v3009_v7 = vpop.permute.xlu0 %3008  ;;  %v3798_v5 = vrot.slane %v3796_v27, 4  ;;  %v12429_v10 = vld [vmem:[#allocation2 + $0x204] sm:$0xf] }
 0x3ae   : > { %3106 = vst.msk [vmem:[#allocation3 + $0x4] sm:$0xf] %vm3104_vm4, %v3011_v63  ;;  %v3761_v63 = vrot.slane %v12401_v51, 7  ;;  %v4096_v20 = vrot.slane %v12429_v10, 5  ;;  %v3810_v51 = vrot.slane %v12438_v33, 7 }
 0x3af   : > { %3105 = vst.msk [vmem:[#allocation3] sm:$0xf] %vm3104_vm4, %v3009_v7  ;;  %v9806_v7 = vrot.slane %v3944_v49, 9  ;;  %v3800_v41 = vsel %vm11270_vm8, %v3798_v5, %v3799_v57  ;;  %v3947_v49 = vld [vmem:[#allocation2 + $0x1e4] sm:$0xe] }
 0x3b0   : > { %4152 = vrot.lane.b32.xlu2 %v4065_v11, %s10494_s9  ;;  %v10205_v11 = vld [vmem:[%s11238_s14 + $0x10] sm:$0xff]  ;;  %v3957_v10 = vld [vmem:[#allocation2 + $0x23c] sm:$0xf] }
 0x3b1   : > { %9766 = vmatmul.msk.bf16.gmra.mxu1 %vm3499_vm6, %v10205_v11 }
 0x3b2   : > { %v3037_v34 = vpop.permute.xlu2 %3036 }
 0x3b3   : > { %v12380_v36 = vld [vmem:[#allocation3 + $0x28] sm:$0xf0]  ;;  %4150 = vrot.lane.b32.xlu1 %v4062_v17, %s10494_s9  ;;  %4148 = vrot.lane.b32.xlu0 %v4058_v28, %s10494_s9  ;;  %3119 = vst.msk [vmem:[#allocation3 + $0x38] sm:$0xf] %vm3104_vm4, %v3037_v34  ;;  %v4077_v17 = vrot.slane %v4075_v25, 4  ;;  %v4078_v28 = vrot.slane %v3943_v32, 5  ;;  %v4086_v25 = vsel %vm10607_vm3, %v4084_v47, %v4085_v23 }
 0x3b4   : > { %3893 = vst.msk [vmem:[#allocation3 + $0x2c] sm:$0xf] %vm285_vm0, %v3779_v22  ;;  %v3763_v22 = vrot.slane %v3761_v63, 4  ;;  %v12475_v47 = vld [vmem:[#allocation2 + $0x1e0] sm:$0xf] }
 0x3b5   : > { %v10219_v45 = vld [vmem:[#allocation3] sm:$0xf0]  ;;  %v3017_v46 = vpop.permute.xlu1 %3016  ;;  %v3015_v35 = vpop.permute.xlu0 %3014 }
 0x3b6   : > { %3883 = vst.msk [vmem:[#allocation3 + $0x4] sm:$0xf] %vm285_vm0, %v3744_v59  ;;  %v9606_v50 = vld [vmem:[#allocation3] sm:$0xf]  ;;  %v3751_v59 = vsel %vm11270_vm8, %v3749_v52, %v3750_v55 }
 0x3b7   : > { %3882 = vst.msk [vmem:[#allocation3] sm:$0xf] %vm285_vm0, %v3741_v37  ;;  %v9607_v56 = vor.u32 %v10219_v45, %v9606_v50  ;;  %v9808_v37 = vrot.slane %v3950_v6, 9  ;;  %v12461_v50 = vld [vmem:[#allocation2 + $0x220] sm:$0xf] }
 0x3b8   : > { %3109 = vst.msk [vmem:[#allocation3 + $0x10] sm:$0xf] %vm3104_vm4, %v3017_v46  ;;  %4158 = vrot.lane.b32.xlu2 %v4076_v39, %s10494_s9  ;;  %v4083_v46 = vsel %vm10607_vm3, %v9806_v7, %v4082_v44  ;;  %v3949_v39 = vld [vmem:[#allocation2 + $0x1ec] sm:$0x1]  ;;  %v3765_v44 = vsel %vm11270_vm8, %v3763_v22, %v3764_v58  ;;  %v4103_v23 = vrot.slane %v12461_v50, 5 }
 0x3b9   : > { %3108 = vst.msk [vmem:[#allocation3 + $0xc] sm:$0xf] %vm3104_vm4, %v3015_v35  ;;  %9684 = vmatmul.msk.bf16.vlgmr.msra.gmra.mxu0 %vm3281_vm7, %v9607_v56  ;;  %v4079_v35 = vsel %vm10607_vm3, %v4077_v17, %v4078_v28  ;;  %v4091_v56 = vrot.slane %v4089_v48, 4  ;;  %v4092_v57 = vrot.slane %v3949_v39, 5  ;;  %v3656_v7 = vld [vmem:[#allocation2 + $0x120] sm:$0x7] }
 0x3ba   : > { %v12421_v14 = vld [vmem:[#allocation3 + $0x38] sm:$0xf]  ;;  %v3043_v43 = vpop.permute.xlu2 %3042  ;;  %v3770_v28 = vrot.slane %v3768_v26, 4  ;;  %v3677_v6 = vld [vmem:[#allocation2 + $0x1e4] sm:$0x7]  ;;  %v4105_v16 = vrot.slane %v4103_v23, 4 }
 0x3bb   : > { %3896 = vst.msk [vmem:[#allocation3 + $0x38] sm:$0xf] %vm285_vm0, %v3790_v12  ;;  %4156 = vrot.lane.b32.xlu1 %v4072_v60, %s10494_s9  ;;  %4154 = vrot.lane.b32.xlu0 %v4069_v1, %s10494_s9  ;;  %v9790_v12 = vrot.slane %v3672_v4, 11  ;;  %v3762_v60 = vsel %vm11270_vm8, %v9783_v2, %v3761_v63  ;;  %v9807_v1 = vrot.slane %v3947_v49, 9  ;;  %v12487_v63 = vld [vmem:[#allocation2 + $0x154] sm:$0xf]  ;;  %v4093_v22 = vsel %vm10607_vm3, %v4091_v56, %v4092_v57 }
 0x3bc   : > { %3122 = vst.msk [vmem:[#allocation3 + $0x44] sm:$0xf] %vm3104_vm4, %v3043_v43  ;;  %v4097_v43 = vsel %vm10607_vm3, %v9808_v37, %v4096_v20  ;;  %v3953_v26 = vld [vmem:[#allocation2 + $0x21c] sm:$0xe]  ;;  %v3820_v2 = vrot.slane %v3677_v6, 7  ;;  %v3776_v49 = vsel %vm11270_vm8, %v9785_v30, %v3775_v31 }
 0x3bd   : > { %v3023_v34 = vpop.permute.xlu1 %3022  ;;  %v3021_v61 = vpop.permute.xlu0 %3020  ;;  %v3811_v17 = vsel %vm11270_vm8, %v9790_v12, %v3810_v51  ;;  %v4090_v58 = vsel %vm10607_vm3, %v9807_v1, %v4089_v48  ;;  %v3662_v37 = vld [vmem:[#allocation2 + $0x158] sm:$0x7]  ;;  %v3681_v1 = vld [vmem:[#allocation2 + $0x214] sm:$0x8] }
 0x3be   : > { %3112 = vst.msk [vmem:[#allocation3 + $0x1c] sm:$0xf] %vm3104_vm4, %v3023_v34  ;;  %v4106_v34 = vrot.slane %v3955_v62, 5 }
 0x3bf   : > { %v12446_v38 = vld [vmem:[#allocation3 + $0x10] sm:$0xf]  ;;  %3111 = vst.msk [vmem:[#allocation3 + $0x18] sm:$0xf] %vm3104_vm4, %v3021_v61  ;;  %v3952_v61 = vld [vmem:[#allocation2 + $0x208] sm:$0x1] }
 0x3c0   : > { %3886 = vst.msk [vmem:[#allocation3 + $0x10] sm:$0xf] %vm285_vm0, %v3755_v19  ;;  %v10220_v45 = vld [vmem:[#allocation3 + $0x8] sm:$0xf0]  ;;  %4164 = vrot.lane.b32.xlu2 %v4086_v25, %s10494_s9  ;;  %v3817_v19 = vrot.slane %v12475_v47, 7  ;;  %v4099_v39 = vrot.slane %v3952_v61, 5  ;;  %v4107_v57 = vsel %vm10607_vm3, %v4105_v16, %v4106_v34 }
 0x3c1   : > { %3885 = vst.msk [vmem:[#allocation3 + $0xc] sm:$0xf] %vm285_vm0, %v3751_v59  ;;  %v9611_v54 = vor.u32 %v10220_v45, %v12295_v53  ;;  %v3782_v53 = vrot.slane %v12487_v63, 7  ;;  %v10206_v25 = vld [vmem:[%s11238_s14 + $0x18] sm:$0xff]  ;;  %v3771_v59 = vrot.slane %v3656_v7, 7  ;;  %v4110_v63 = vrot.slane %v3957_v10, 5 }
 0x3c2   : > { %v3049_v52 = vpop.permute.xlu2 %3048  ;;  %v3819_v48 = vrot.slane %v3817_v19, 4  ;;  %v3660_v45 = vld [vmem:[#allocation2 + $0x150] sm:$0x8]  ;;  %9767 = vmatmul.msk.bf16.gmra.mxu1 %vm3499_vm6, %v10206_v25  ;;  %v9793_v16 = vrot.slane %v3681_v1, 11  ;;  %v3831_v34 = vrot.slane %v12532_v24, 7 }
 0x3c3   : > { %v12465_v55 = vld [vmem:[#allocation3 + $0x40] sm:$0xf0]  ;;  %4162 = vrot.lane.b32.xlu1 %v4083_v46, %s10494_s9  ;;  %4160 = vrot.lane.b32.xlu0 %v4079_v35, %s10494_s9  ;;  %3125 = vst.msk [vmem:[#allocation3 + $0x50] sm:$0xf] %vm3104_vm4, %v3049_v52  ;;  %v9809_v46 = vrot.slane %v3953_v26, 9  ;;  %v4098_v35 = vrot.slane %v4096_v20, 4  ;;  %v3772_v20 = vsel %vm11270_vm8, %v3770_v28, %v3771_v59 }
 0x3c4   : > { %3899 = vst.msk [vmem:[#allocation3 + $0x44] sm:$0xf] %vm285_vm0, %v3800_v41  ;;  %v3959_v41 = vld [vmem:[#allocation2 + $0x254] sm:$0xe]  ;;  %v3784_v12 = vrot.slane %v3782_v53, 4  ;;  %v3785_v52 = vrot.slane %v3662_v37, 7 }
 0x3c5   : > { %v12478_v32 = vld [vmem:[#allocation3 + $0x18] sm:$0xf0]  ;;  %v3029_v5 = vpop.permute.xlu1 %3028  ;;  %v3027_v11 = vpop.permute.xlu0 %3026  ;;  %v9786_v31 = vrot.slane %v3660_v45, 11  ;;  %v9811_v30 = vrot.slane %v3959_v41, 9  ;;  %v3958_v28 = vld [vmem:[#allocation2 + $0x240] sm:$0x1]  ;;  %v3832_v41 = vsel %vm11270_vm8, %v9793_v16, %v3831_v34 }
 0x3c6   : > { %3889 = vst.msk [vmem:[#allocation3 + $0x1c] sm:$0xf] %vm285_vm0, %v3765_v44  ;;  %v12485_v15 = vld [vmem:[#allocation3 + $0x18] sm:$0xf]  ;;  %v4112_v61 = vrot.slane %v4110_v63, 4  ;;  %v4113_v25 = vrot.slane %v3958_v28, 5 }
 0x3c7   : > { %3888 = vst.msk [vmem:[#allocation3 + $0x18] sm:$0xf] %vm285_vm0, %v3762_v60  ;;  %v12527_v60 = vld [vmem:[#allocation2 + $0x258] sm:$0xf]  ;;  %v3783_v26 = vsel %vm11270_vm8, %v9786_v31, %v3782_v53  ;;  %v4252_v53 = vld [vmem:[#allocation2 + $0xbc] sm:$0x7] }
 0x3c8   : > { %3115 = vst.msk [vmem:[#allocation3 + $0x28] sm:$0xf] %vm3104_vm4, %v3029_v5  ;;  %4170 = vrot.lane.b32.xlu2 %v4097_v43, %s10494_s9  ;;  %v4100_v43 = vsel %vm10607_vm3, %v4098_v35, %v4099_v39  ;;  %v4117_v62 = vrot.slane %v12527_v60, 5  ;;  %v3686_v60 = vld [vmem:[#allocation2 + $0x238] sm:$0x7]  ;;  %v4351_v13 = vrot.slane %v4252_v53, 7 }
 0x3c9   : > { %3114 = vst.msk [vmem:[#allocation3 + $0x24] sm:$0xf] %vm3104_vm4, %v3027_v11  ;;  %9685 = vmatmul.msk.bf16.gmra.mxu0 %vm3281_vm7, %v9611_v54  ;;  %v4104_v11 = vsel %vm10607_vm3, %v9809_v46, %v4103_v23  ;;  %v3956_v54 = vld [vmem:[#allocation2 + $0x238] sm:$0xe]  ;;  %v3786_v23 = vsel %vm11270_vm8, %v3784_v12, %v3785_v52  ;;  %v12568_v46 = vld [vmem:[#allocation2 + $0x234] sm:$0xf]  ;;  %v9615_v12 = vor.u32 %v12319_v9, %v12446_v38 }
 0x3ca   : > { %v12510_v4 = vld [vmem:[#allocation3 + $0x50] sm:$0xf]  ;;  %v3055_v42 = vpop.permute.xlu2 %3054  ;;  %v9810_v59 = vrot.slane %v3956_v54, 9  ;;  %v4118_v45 = vsel %vm10607_vm3, %v9811_v30, %v4117_v62  ;;  %v12581_v52 = vld [vmem:[#allocation2 + $0x1a8] sm:$0xf]  ;;  %v3838_v10 = vrot.slane %v12568_v46, 7 }
 0x3cb   : > { %3902 = vst.msk [vmem:[#allocation3 + $0x50] sm:$0xf] %vm285_vm0, %v3811_v17  ;;  %4168 = vrot.lane.b32.xlu1 %v4093_v22, %s10494_s9  ;;  %4166 = vrot.lane.b32.xlu0 %v4090_v58, %s10494_s9  ;;  %v3821_v17 = vsel %vm11270_vm8, %v3819_v48, %v3820_v2  ;;  %v3666_v22 = vld [vmem:[#allocation2 + $0x188] sm:$0x8]  ;;  %v12551_v58 = vld [vmem:[#allocation2 + $0xb8] sm:$0xf] }
 0x3cc   : > { %3128 = vst.msk [vmem:[#allocation3 + $0x5c] sm:$0xf] %vm3104_vm4, %v3055_v42  ;;  %v9788_v42 = vrot.slane %v3666_v22, 11  ;;  %v4348_v35 = vrot.slane %v12551_v58, 7  ;;  %v4250_v9 = vld [vmem:[#allocation2 + $0xb4] sm:$0x8] }
 0x3cd   : > { %v3035_v44 = vpop.permute.xlu1 %3034  ;;  %v3033_v56 = vpop.permute.xlu0 %3032  ;;  %v3803_v30 = vrot.slane %v12581_v52, 7  ;;  %v9812_v28 = vrot.slane %v4250_v9, 11  ;;  %v3840_v22 = vrot.slane %v3838_v10, 4  ;;  %v3841_v58 = vrot.slane %v3686_v60, 7  ;;  %v12631_v60 = vld [vmem:[#allocation2 + $0x10c] sm:$0xf] }
 0x3ce   : > { %3118 = vst.msk [vmem:[#allocation3 + $0x34] sm:$0xf] %vm3104_vm4, %v3035_v44  ;;  %v3791_v44 = vrot.slane %v3789_v21, 4  ;;  %v4350_v38 = vrot.slane %v4348_v35, 4  ;;  %v3961_v21 = vld [vmem:[#allocation2 + $0x25c] sm:$0x1] }
 0x3cf   : > { %v12534_v5 = vld [vmem:[#allocation3 + $0x28] sm:$0xf]  ;;  %3117 = vst.msk [vmem:[#allocation3 + $0x30] sm:$0xf] %vm3104_vm4, %v3033_v56  ;;  %v4114_v56 = vsel %vm10607_vm3, %v4112_v61, %v4113_v25  ;;  %v4120_v54 = vrot.slane %v3961_v21, 5  ;;  %v4349_v53 = vsel %vm11270_vm8, %v9812_v28, %v4348_v35  ;;  %v3842_v52 = vsel %vm11270_vm8, %v3840_v22, %v3841_v58 }
 0x3d0   : > { %3892 = vst.msk [vmem:[#allocation3 + $0x28] sm:$0xf] %vm285_vm0, %v3776_v49  ;;  %v12538_v7 = vld [vmem:[#allocation3 + $0x20] sm:$0xf0]  ;;  %4176 = vrot.lane.b32.xlu2 %v4107_v57, %s10494_s9  ;;  %v4111_v57 = vsel %vm10607_vm3, %v9810_v59, %v4110_v63  ;;  %v3671_v63 = vld [vmem:[#allocation2 + $0x1ac] sm:$0x7] }
 0x3d1   : > { %3891 = vst.msk [vmem:[#allocation3 + $0x24] sm:$0xf] %vm285_vm0, %v3772_v20  ;;  %v3665_v49 = vld [vmem:[#allocation2 + $0x174] sm:$0x7]  ;;  %v12611_v61 = vld [vmem:[#allocation2 + $0xf0] sm:$0xf] }
 0x3d2   : > { %v3061_v6 = vpop.permute.xlu2 %3060  ;;  %v3792_v1 = vrot.slane %v3665_v49, 7  ;;  %v4254_v25 = vld [vmem:[#allocation2 + $0xd4] sm:$0xf]  ;;  %v3806_v29 = vrot.slane %v3671_v63, 7  ;;  %v4362_v49 = vrot.slane %v12611_v61, 7 }
 0x3d3   : > { %v12553_v50 = vld [vmem:[#allocation3 + $0x58] sm:$0xf0]  ;;  %4174 = vrot.lane.b32.xlu1 %v4104_v11, %s10494_s9  ;;  %4172 = vrot.lane.b32.xlu0 %v4100_v43, %s10494_s9  ;;  %3131 = vst.msk [vmem:[#allocation3 + $0x68] sm:$0xf] %vm3104_vm4, %v3061_v6  ;;  %v4119_v11 = vrot.slane %v4117_v62, 4  ;;  %v10207_v43 = vld [vmem:[%s11238_s14 + $0x20] sm:$0xff]  ;;  %v3797_v62 = vsel %vm11270_vm8, %v9788_v42, %v3796_v27 }
 0x3d4   : > { %3905 = vst.msk [vmem:[#allocation3 + $0x5c] sm:$0xf] %vm285_vm0, %v3821_v17  ;;  %v3669_v17 = vld [vmem:[#allocation2 + $0x1a4] sm:$0x8]  ;;  %v4256_v6 = vld [vmem:[#allocation2 + $0xec] sm:$0x8]  ;;  %9768 = vmatmul.msk.bf16.gmra.mxu1 %vm3499_vm6, %v10207_v43  ;;  %v3793_v59 = vsel %vm11270_vm8, %v3791_v44, %v3792_v1 }
 0x3d5   : > { %v12564_v2 = vld [vmem:[#allocation3 + $0x30] sm:$0xf0]  ;;  %v3041_v37 = vpop.permute.xlu1 %3040  ;;  %v3039_v48 = vpop.permute.xlu0 %3038  ;;  %v9789_v42 = vrot.slane %v3669_v17, 11  ;;  %v4255_v44 = vld [vmem:[#allocation2 + $0xd8] sm:$0x7] }
 0x3d6   : > { %3895 = vst.msk [vmem:[#allocation3 + $0x34] sm:$0xf] %vm285_vm0, %v3786_v23  ;;  %v12572_v39 = vld [vmem:[#allocation3 + $0x30] sm:$0xf]  ;;  %v4358_v1 = vrot.slane %v4255_v44, 7 }
 0x3d7   : > { %3894 = vst.msk [vmem:[#allocation3 + $0x30] sm:$0xf] %vm285_vm0, %v3783_v26  ;;  %v4352_v26 = vsel %vm11270_vm8, %v4350_v38, %v4351_v13  ;;  %v3675_v38 = vld [vmem:[#allocation2 + $0x1dc] sm:$0x8]  ;;  %v3804_v13 = vsel %vm11270_vm8, %v9789_v42, %v3803_v30  ;;  %v4261_v28 = vld [vmem:[#allocation2 + $0x110] sm:$0x7] }
 0x3d8   : > { %3121 = vst.msk [vmem:[#allocation3 + $0x40] sm:$0xf] %vm3104_vm4, %v3041_v37  ;;  %4182 = vrot.lane.b32.xlu2 %v4118_v45, %s10494_s9  ;;  %v3805_v37 = vrot.slane %v3803_v30, 4  ;;  %v3674_v30 = vld [vmem:[#allocation2 + $0x1c8] sm:$0x7]  ;;  %v9791_v58 = vrot.slane %v3675_v38, 11 }
 0x3d9   : > { %3120 = vst.msk [vmem:[#allocation3 + $0x3c] sm:$0xf] %vm3104_vm4, %v3039_v48  ;;  %9686 = vmatmul.msk.bf16.gmra.mxu0 %vm3281_vm7, %v9615_v12  ;;  %v9814_v48 = vrot.slane %v4256_v6, 11  ;;  %v4355_v12 = vrot.slane %v4254_v25, 7  ;;  %v3679_v22 = vld [vmem:[#allocation2 + $0x1fc] sm:$0xf] }
 0x3da   : > { %v12594_v20 = vld [vmem:[#allocation3 + $0x68] sm:$0xf]  ;;  %v3067_v31 = vpop.permute.xlu2 %3066  ;;  %v3807_v35 = vsel %vm11270_vm8, %v3805_v37, %v3806_v29  ;;  %v4259_v61 = vld [vmem:[#allocation2 + $0x108] sm:$0x8]  ;;  %v3813_v37 = vrot.slane %v3674_v30, 7  ;;  %v3824_v42 = vrot.slane %v3679_v22, 7  ;;  %v3818_v33 = vsel %vm11270_vm8, %v9791_v58, %v3817_v19 }
 0x3db   : > { %3908 = vst.msk [vmem:[#allocation3 + $0x68] sm:$0xf] %vm285_vm0, %v3832_v41  ;;  %4180 = vrot.lane.b32.xlu1 %v4114_v56, %s10494_s9  ;;  %4178 = vrot.lane.b32.xlu0 %v4111_v57, %s10494_s9  ;;  %v4121_v41 = vsel %vm10607_vm3, %v4119_v11, %v4120_v54  ;;  %v4253_v56 = vld [vmem:[#allocation2 + $0xd0] sm:$0x8]  ;;  %v4357_v21 = vrot.slane %v4355_v12, 4  ;;  %v4363_v17 = vsel %vm11270_vm8, %v9814_v48, %v4362_v49  ;;  %v4369_v54 = vrot.slane %v12631_v60, 7 }
 0x3dc   : > { %3134 = vst.msk [vmem:[#allocation3 + $0x74] sm:$0xf] %vm3104_vm4, %v3067_v31  ;;  %v9813_v31 = vrot.slane %v4253_v56, 11  ;;  %v3680_v48 = vld [vmem:[#allocation2 + $0x200] sm:$0x7]  ;;  %v3826_v38 = vrot.slane %v3824_v42, 4 }
 0x3dd   : > { %v3047_v23 = vpop.permute.xlu1 %3046  ;;  %v3045_v16 = vpop.permute.xlu0 %3044  ;;  %v4371_v25 = vrot.slane %v4369_v54, 4  ;;  %v4265_v44 = vld [vmem:[#allocation2 + $0x140] sm:$0x8]  ;;  %v12675_v60 = vld [vmem:[#allocation2 + $0x144] sm:$0xf] }
 0x3de   : > { %3124 = vst.msk [vmem:[#allocation3 + $0x4c] sm:$0xf] %vm3104_vm4, %v3047_v23  ;;  %v4359_v23 = vsel %vm11270_vm8, %v4357_v21, %v4358_v1  ;;  %v9817_v19 = vrot.slane %v4265_v44, 11  ;;  %v4262_v30 = vld [vmem:[#allocation2 + $0x124] sm:$0x8] }
 0x3df   : > { %v12616_v27 = vld [vmem:[#allocation3 + $0x40] sm:$0xf]  ;;  %3123 = vst.msk [vmem:[#allocation3 + $0x48] sm:$0xf] %vm3104_vm4, %v3045_v16  ;;  %v4356_v16 = vsel %vm11270_vm8, %v9813_v31, %v4355_v12  ;;  %v9815_v12 = vrot.slane %v4259_v61, 11  ;;  %v9816_v61 = vrot.slane %v4262_v30, 11 }
 0x3e0   : > { %3898 = vst.msk [vmem:[#allocation3 + $0x40] sm:$0xf] %vm285_vm0, %v3797_v62  ;;  %v12620_v45 = vld [vmem:[#allocation3 + $0x38] sm:$0xf0]  ;;  %4460 = vrot.lane.b32.xlu2 %v4352_v26, %s10495_s15  ;;  %v9619_v62 = vor.u32 %v12478_v32, %v12485_v15  ;;  %v4372_v26 = vrot.slane %v4261_v28, 7 }
 0x3e1   : > { %3897 = vst.msk [vmem:[#allocation3 + $0x3c] sm:$0xf] %vm285_vm0, %v3793_v59  ;;  %v4258_v32 = vld [vmem:[#allocation2 + $0xf4] sm:$0x7]  ;;  %v10208_v15 = vld [vmem:[%s11238_s14 + $0x28] sm:$0xff]  ;;  %v3812_v59 = vrot.slane %v3810_v51, 4  ;;  %v4370_v31 = vsel %vm11270_vm8, %v9815_v12, %v4369_v54 }
 0x3e2   : > { %v4123_v57 = vpop.permute.xlu2 %4122  ;;  %v4264_v28 = vld [vmem:[#allocation2 + $0x12c] sm:$0x7]  ;;  %v12693_v22 = vld [vmem:[#allocation2 + $0x160] sm:$0xf]  ;;  %v4275_v30 = vld [vmem:[#allocation2 + $0x198] sm:$0xf] }
 0x3e3   : > { %v12633_v9 = vld [vmem:[#allocation3 + $0x70] sm:$0xf0]  ;;  %4458 = vrot.lane.b32.xlu1 %v4349_v53, %s10495_s15  ;;  %4184 = vrot.lane.b32.xlu0 %v4121_v41, %s10494_s9  ;;  %4218 = vst.msk [vmem:[#allocation3] sm:$0xf] %vm1513_vm12, %v4123_v57  ;;  %v4364_v53 = vrot.slane %v4362_v49, 4  ;;  %v4373_v57 = vsel %vm11270_vm8, %v4371_v25, %v4372_v26  ;;  %v3814_v49 = vsel %vm11270_vm8, %v3812_v59, %v3813_v37  ;;  %v4379_v26 = vrot.slane %v4264_v28, 7 }
 0x3e4   : > { %3911 = vst.msk [vmem:[#allocation3 + $0x74] sm:$0xf] %vm285_vm0, %v3842_v52  ;;  %v3678_v41 = vld [vmem:[#allocation2 + $0x1f8] sm:$0x8]  ;;  %v4365_v52 = vrot.slane %v4258_v32, 7  ;;  %9769 = vmatmul.msk.bf16.gmra.mxu1 %vm3499_vm6, %v10208_v15 }
 0x3e5   : > { %v12643_v11 = vld [vmem:[#allocation3 + $0x48] sm:$0xf0]  ;;  %v3053_v43 = vpop.permute.xlu1 %3052  ;;  %v3051_v63 = vpop.permute.xlu0 %3050  ;;  %v9792_v47 = vrot.slane %v3678_v41, 11  ;;  %v4270_v37 = vld [vmem:[#allocation2 + $0x164] sm:$0x7] }
 0x3e6   : > { %3901 = vst.msk [vmem:[#allocation3 + $0x4c] sm:$0xf] %vm285_vm0, %v3807_v35  ;;  %v12649_v6 = vld [vmem:[#allocation3 + $0x48] sm:$0xf]  ;;  %v4263_v35 = vld [vmem:[#allocation2 + $0x128] sm:$0xf] }
 0x3e7   : > { %3900 = vst.msk [vmem:[#allocation3 + $0x48] sm:$0xf] %vm285_vm0, %v3804_v13  ;;  %v3827_v13 = vrot.slane %v3680_v48, 7  ;;  %v3825_v54 = vsel %vm11270_vm8, %v9792_v47, %v3824_v42  ;;  %v3683_v42 = vld [vmem:[#allocation2 + $0x21c] sm:$0x7] }
 0x3e8   : > { %3127 = vst.msk [vmem:[#allocation3 + $0x58] sm:$0xf] %vm3104_vm4, %v3053_v43  ;;  %4466 = vrot.lane.b32.xlu2 %v4363_v17, %s10495_s15  ;;  %v4366_v43 = vsel %vm11270_vm8, %v4364_v53, %v4365_v52  ;;  %v4376_v17 = vrot.slane %v4263_v35, 7  ;;  %v9623_v53 = vor.u32 %v12538_v7, %v12344_v40  ;;  %v3688_v41 = vld [vmem:[#allocation2 + $0x250] sm:$0xf] }
 0x3e9   : > { %3126 = vst.msk [vmem:[#allocation3 + $0x54] sm:$0xf] %vm3104_vm4, %v3051_v63  ;;  %9687 = vmatmul.msk.bf16.gmra.mxu0 %vm3281_vm7, %v9619_v62  ;;  %v4383_v63 = vrot.slane %v12675_v60, 7  ;;  %v3828_v58 = vsel %vm11270_vm8, %v3826_v38, %v3827_v13  ;;  %v4267_v40 = vld [vmem:[#allocation2 + $0x148] sm:$0x7]  ;;  %v10209_v7 = vld [vmem:[%s11238_s14 + $0x30] sm:$0xff] }
 0x3ea   : > { %v4129_v29 = vpop.permute.xlu2 %4128  ;;  %v4377_v44 = vsel %vm11270_vm8, %v9816_v61, %v4376_v17  ;;  %v3834_v60 = vrot.slane %v3683_v42, 7  ;;  %v3689_v38 = vld [vmem:[#allocation2 + $0x254] sm:$0x7]  ;;  %v3687_v47 = vld [vmem:[#allocation2 + $0x24c] sm:$0x8]  ;;  %v4404_v61 = vrot.slane %v4275_v30, 7 }
 0x3eb   : > { %4464 = vrot.lane.b32.xlu1 %v4359_v23, %s10495_s15  ;;  %4462 = vrot.lane.b32.xlu0 %v4356_v16, %s10495_s15  ;;  %4221 = vst.msk [vmem:[#allocation3 + $0xc] sm:$0xf] %vm1513_vm12, %v4129_v29  ;;  %v3684_v23 = vld [vmem:[#allocation2 + $0x230] sm:$0x8]  ;;  %v4378_v16 = vrot.slane %v4376_v17, 4  ;;  %v4384_v59 = vsel %vm11270_vm8, %v9817_v19, %v4383_v63  ;;  %v4390_v29 = vrot.slane %v12693_v22, 7 }
 0x3ec   : > { %v9794_v12 = vrot.slane %v3684_v23, 11  ;;  %v4385_v13 = vrot.slane %v4383_v63, 4  ;;  %v9795_v46 = vrot.slane %v3687_v47, 11  ;;  %v4278_v42 = vld [vmem:[#allocation2 + $0x1b4] sm:$0xf] }
 0x3ed   : > { %v3059_v51 = vpop.permute.xlu1 %3058  ;;  %v3057_v56 = vpop.permute.xlu0 %3056  ;;  %v4380_v52 = vsel %vm11270_vm8, %v4378_v16, %v4379_v26  ;;  %v4281_v30 = vld [vmem:[#allocation2 + $0x1d0] sm:$0xf] }
 0x3ee   : > { %3130 = vst.msk [vmem:[#allocation3 + $0x64] sm:$0xf] %vm3104_vm4, %v3059_v51  ;;  %v4268_v51 = vld [vmem:[#allocation2 + $0x15c] sm:$0x8]  ;;  %v3839_v24 = vsel %vm11270_vm8, %v9794_v12, %v3838_v10 }
 0x3ef   : > { %v12680_v21 = vld [vmem:[#allocation3 + $0x58] sm:$0xf]  ;;  %3129 = vst.msk [vmem:[#allocation3 + $0x60] sm:$0xf] %vm3104_vm4, %v3057_v56  ;;  %v4392_v56 = vrot.slane %v4390_v29, 4  ;;  %v9818_v19 = vrot.slane %v4268_v51, 11 }
 0x3f0   : > { %3904 = vst.msk [vmem:[#allocation3 + $0x58] sm:$0xf] %vm285_vm0, %v3818_v33  ;;  %v12684_v1 = vld [vmem:[#allocation3 + $0x50] sm:$0xf0]  ;;  %4472 = vrot.lane.b32.xlu2 %v4373_v57, %s10495_s15  ;;  %v4393_v33 = vrot.slane %v4270_v37, 7  ;;  %v3833_v57 = vrot.slane %v3831_v34, 4 }
 0x3f1   : > { %3903 = vst.msk [vmem:[#allocation3 + $0x54] sm:$0xf] %vm285_vm0, %v3814_v49  ;;  %v3845_v49 = vrot.slane %v3688_v41, 7  ;;  %v4391_v16 = vsel %vm11270_vm8, %v9818_v19, %v4390_v29  ;;  %v4276_v19 = vld [vmem:[#allocation2 + $0x19c] sm:$0x7] }
 0x3f2   : > { %v4135_v62 = vpop.permute.xlu2 %4134  ;;  %v4394_v28 = vsel %vm11270_vm8, %v4392_v56, %v4393_v33  ;;  %v3835_v63 = vsel %vm11270_vm8, %v3833_v57, %v3834_v60  ;;  %v9627_v60 = vor.u32 %v12380_v36, %v12534_v5 }
 0x3f3   : > { %4470 = vrot.lane.b32.xlu1 %v4370_v31, %s10495_s15  ;;  %4468 = vrot.lane.b32.xlu0 %v4366_v43, %s10495_s15  ;;  %4224 = vst.msk [vmem:[#allocation3 + $0x18] sm:$0xf] %vm1513_vm12, %v4135_v62  ;;  %v4386_v31 = vrot.slane %v4267_v40, 7  ;;  %v4274_v43 = vld [vmem:[#allocation2 + $0x194] sm:$0x8]  ;;  %v3847_v22 = vrot.slane %v3845_v49, 4  ;;  %v3846_v29 = vsel %vm11270_vm8, %v9795_v46, %v3845_v49 }
 0x3f4   : > { %9770 = vmatmul.msk.bf16.gmra.mxu1 %vm3499_vm6, %v10209_v7  ;;  %v4272_v62 = vld [vmem:[#allocation2 + $0x17c] sm:$0xf]  ;;  %v9820_v10 = vrot.slane %v4274_v43, 11  ;;  %v4279_v40 = vld [vmem:[#allocation2 + $0x1b8] sm:$0x7]  ;;  %v4411_v7 = vrot.slane %v4278_v42, 7 }
 0x3f5   : > { %v12702_v25 = vld [vmem:[#allocation3 + $0x60] sm:$0xf0]  ;;  %v3065_v32 = vpop.permute.xlu1 %3064  ;;  %v3063_v15 = vpop.permute.xlu0 %3062  ;;  %v4387_v26 = vsel %vm11270_vm8, %v4385_v13, %v4386_v31  ;;  %v4277_v13 = vld [vmem:[#allocation2 + $0x1b0] sm:$0x8]  ;;  %v10210_v31 = vld [vmem:[%s11238_s14 + $0x38] sm:$0xff]  ;;  %v4406_v43 = vrot.slane %v4404_v61, 4 }
 0x3f6   : > { %3907 = vst.msk [vmem:[#allocation3 + $0x64] sm:$0xf] %vm285_vm0, %v3828_v58  ;;  %v12708_v48 = vld [vmem:[#allocation3 + $0x60] sm:$0xf]  ;;  %v3848_v58 = vrot.slane %v3689_v38, 7  ;;  %v4405_v56 = vsel %vm11270_vm8, %v9820_v10, %v4404_v61  ;;  %v4414_v38 = vrot.slane %v4279_v40, 7 }
 0x3f7   : > { %3906 = vst.msk [vmem:[#allocation3 + $0x60] sm:$0xf] %vm285_vm0, %v3825_v54  ;;  %v4413_v47 = vrot.slane %v4411_v7, 4  ;;  %v9821_v5 = vrot.slane %v4277_v13, 11  ;;  %v4418_v46 = vrot.slane %v4281_v30, 7 }
 0x3f8   : > { %3133 = vst.msk [vmem:[#allocation3 + $0x70] sm:$0xf] %vm3104_vm4, %v3065_v32  ;;  %4478 = vrot.lane.b32.xlu2 %v4384_v59, %s10495_s15  ;;  %v4397_v32 = vrot.slane %v4272_v62, 7  ;;  %v4271_v59 = vld [vmem:[#allocation2 + $0x178] sm:$0x8] }
 0x3f9   : > { %3132 = vst.msk [vmem:[#allocation3 + $0x6c] sm:$0xf] %vm3104_vm4, %v3063_v15  ;;  %9688 = vmatmul.msk.bf16.gmra.mxu0 %vm3281_vm7, %v9623_v53  ;;  %v4273_v15 = vld [vmem:[#allocation2 + $0x180] sm:$0x7]  ;;  %v3849_v53 = vsel %vm11270_vm8, %v3847_v22, %v3848_v58  ;;  %v4283_v62 = vld [vmem:[#allocation2 + $0x1e8] sm:$0x8]  ;;  %v4412_v22 = vsel %vm11270_vm8, %v9821_v5, %v4411_v7 }
 0x3fa   : > { %v4141_v35 = vpop.permute.xlu2 %4140  ;;  %v4399_v41 = vrot.slane %v4397_v32, 4  ;;  %v4400_v12 = vrot.slane %v4273_v15, 7  ;;  %v9823_v10 = vrot.slane %v4283_v62, 11  ;;  %v4280_v61 = vld [vmem:[#allocation2 + $0x1cc] sm:$0x8] }
 0x3fb   : > { %4476 = vrot.lane.b32.xlu1 %v4380_v52, %s10495_s15  ;;  %4474 = vrot.lane.b32.xlu0 %v4377_v44, %s10495_s15  ;;  %4227 = vst.msk [vmem:[#allocation3 + $0x24] sm:$0xf] %vm1513_vm12, %v4141_v35  ;;  %v9819_v52 = vrot.slane %v4271_v59, 11  ;;  %v4287_v15 = vld [vmem:[#allocation2 + $0x208] sm:$0xf]  ;;  %v4420_v59 = vrot.slane %v4418_v46, 4 }
 0x3fc   : > { %v4401_v35 = vsel %vm11270_vm8, %v4399_v41, %v4400_v12  ;;  %v9822_v42 = vrot.slane %v4280_v61, 11  ;;  %v4288_v12 = vld [vmem:[#allocation2 + $0x20c] sm:$0x7]  ;;  %v4292_v5 = vld [vmem:[#allocation2 + $0x23c] sm:$0x8] }
 0x3fd   : > { %v3071_v34 = vpop.permute.xlu1 %3070  ;;  %v3069_v17 = vpop.permute.xlu0 %3068  ;;  %v4398_v49 = vsel %vm11270_vm8, %v9819_v52, %v4397_v32  ;;  %v4432_v52 = vrot.slane %v4287_v15, 7  ;;  %v4435_v40 = vrot.slane %v4288_v12, 7  ;;  %v4291_v62 = vld [vmem:[#allocation2 + $0x228] sm:$0x7]  ;;  %v4297_v15 = vld [vmem:[#allocation2 + $0x260] sm:$0x7] }
 0x3fe   : > { %3136 = vst.msk [vmem:[#allocation3 + $0x7c] sm:$0xf] %vm3104_vm4, %v3071_v34 }
 0x3ff   : > { %v12737_v54 = vld [vmem:[#allocation3 + $0x70] sm:$0xf]  ;;  %3135 = vst.msk [vmem:[#allocation3 + $0x78] sm:$0xf] %vm3104_vm4, %v3069_v17  ;;  %v4434_v7 = vrot.slane %v4432_v52, 4 }
 0x400   : > { %3910 = vst.msk [vmem:[#allocation3 + $0x70] sm:$0xf] %vm285_vm0, %v3839_v24  ;;  %v12741_v23 = vld [vmem:[#allocation3 + $0x68] sm:$0xf0]  ;;  %4484 = vrot.lane.b32.xlu2 %v4394_v28, %s10495_s15  ;;  %v4407_v24 = vrot.slane %v4276_v19, 7  ;;  %v4415_v28 = vsel %vm11270_vm8, %v4413_v47, %v4414_v38 }
 0x401   : > { %3909 = vst.msk [vmem:[#allocation3 + $0x6c] sm:$0xf] %vm285_vm0, %v3835_v63  ;;  %v4284_v63 = vld [vmem:[#allocation2 + $0x1ec] sm:$0xf] }
 0x402   : > { %v4147_v37 = vpop.permute.xlu2 %4146  ;;  %v4408_v58 = vsel %vm11270_vm8, %v4406_v43, %v4407_v24  ;;  %v4293_v43 = vld [vmem:[#allocation2 + $0x240] sm:$0xf] }
 0x403   : > { %4482 = vrot.lane.b32.xlu1 %v4391_v16, %s10495_s15  ;;  %4480 = vrot.lane.b32.xlu0 %v4387_v26, %s10495_s15  ;;  %4230 = vst.msk [vmem:[#allocation3 + $0x30] sm:$0xf] %vm1513_vm12, %v4147_v37  ;;  %v4425_v16 = vrot.slane %v4284_v63, 7  ;;  %v4282_v26 = vld [vmem:[#allocation2 + $0x1d4] sm:$0x7]  ;;  %v4446_v30 = vrot.slane %v4293_v43, 7 }
 0x404   : > { %9771 = vmatmul.msk.bf16.gmra.mxu1 %vm3499_vm6, %v10210_v31  ;;  %v4421_v37 = vrot.slane %v4282_v26, 7  ;;  %v4436_v31 = vsel %vm11270_vm8, %v4434_v7, %v4435_v40  ;;  %v4289_v63 = vld [vmem:[#allocation2 + $0x220] sm:$0x8]  ;;  %v4586_v43 = vld [vmem:[#allocation2 + $0x1f8] sm:$0x8] }
 0x405   : > { %v12756_v44 = vld [vmem:[#allocation3 + $0x78] sm:$0xf0]  ;;  %v4127_v33 = vpop.permute.xlu1 %4126  ;;  %v4125_v51 = vpop.permute.xlu0 %4124  ;;  %v4426_v41 = vsel %vm11270_vm8, %v9823_v10, %v4425_v16  ;;  %v4442_v10 = vrot.slane %v4291_v62, 7 }
 0x406   : > { %3913 = vst.msk [vmem:[#allocation3 + $0x7c] sm:$0xf] %vm285_vm0, %v3849_v53  ;;  %v12761_v57 = vld [vmem:[#allocation3 + $0x78] sm:$0xf] }
 0x407   : > { %3912 = vst.msk [vmem:[#allocation3 + $0x78] sm:$0xf] %vm285_vm0, %v3846_v29 }
 0x408   : > { %4220 = vst.msk [vmem:[#allocation3 + $0x8] sm:$0xf] %vm1513_vm12, %v4127_v33  ;;  %4490 = vrot.lane.b32.xlu2 %v4405_v56, %s10495_s15  ;;  %v9631_v33 = vor.u32 %v12564_v2, %v12572_v39  ;;  %v4419_v56 = vsel %vm11270_vm8, %v9822_v42, %v4418_v46  ;;  %v4427_v39 = vrot.slane %v4425_v16, 4  ;;  %v9825_v16 = vrot.slane %v4289_v63, 11 }
 0x409   : > { %4219 = vst.msk [vmem:[#allocation3 + $0x4] sm:$0xf] %vm1513_vm12, %v4125_v51  ;;  %9689 = vmatmul.msk.bf16.gmra.mxu0 %vm3281_vm7, %v9627_v60  ;;  %v4422_v51 = vsel %vm11270_vm8, %v4420_v59, %v4421_v37  ;;  %v4286_v60 = vld [vmem:[#allocation2 + $0x204] sm:$0x8]  ;;  %v3561_v37 = vpop.f32.mrf.mxu1  ;;  %v9635_v42 = vor.u32 %v12620_v45, %v12421_v14  ;;  %v4448_v45 = vrot.slane %v4446_v30, 4 }
 0x40a   : > { %v4153_v36 = vpop.permute.xlu2 %4152  ;;  %v9824_v2 = vrot.slane %v4286_v60, 11 }
 0x40b   : > { %4488 = vrot.lane.b32.xlu1 %v4401_v35, %s10495_s15  ;;  %4486 = vrot.lane.b32.xlu0 %v4398_v49, %s10495_s15  ;;  %4233 = vst.msk [vmem:[#allocation3 + $0x3c] sm:$0xf] %vm1513_vm12, %v4153_v36  ;;  %v4285_v35 = vld [vmem:[#allocation2 + $0x1f0] sm:$0x7]  ;;  %v10211_v49 = vld [vmem:[%s11238_s14 + $0x40] sm:$0xff] }
 0x40c   : > { %v4428_v13 = vrot.slane %v4285_v35, 7  ;;  %v4290_v36 = vld [vmem:[#allocation2 + $0x224] sm:$0xf]  ;;  %v4433_v24 = vsel %vm11270_vm8, %v9824_v2, %v4432_v52  ;;  %v4295_v52 = vld [vmem:[#allocation2 + $0x258] sm:$0x8] }
 0x40d   : > { %v4133_v34 = vpop.permute.xlu1 %4132  ;;  %v4131_v17 = vpop.permute.xlu0 %4130  ;;  %v9827_v14 = vrot.slane %v4295_v52, 11  ;;  %v4590_v2 = vld [vmem:[#allocation2 + $0x218] sm:$0xf] }
 0x40e   : > { %4223 = vst.msk [vmem:[#allocation3 + $0x14] sm:$0xf] %vm1513_vm12, %v4133_v34  ;;  %v4429_v34 = vsel %vm11270_vm8, %v4427_v39, %v4428_v13 }
 0x40f   : > { %4222 = vst.msk [vmem:[#allocation3 + $0x10] sm:$0xf] %vm1513_vm12, %v4131_v17  ;;  %v4439_v17 = vrot.slane %v4290_v36, 7  ;;  %v4691_v36 = vrot.slane %v4590_v2, 7 }
 0x410   : > { %4496 = vrot.lane.b32.xlu2 %v4415_v28, %s10495_s15  ;;  %v9826_v28 = vrot.slane %v4292_v5, 11  ;;  %v4588_v5 = vld [vmem:[#allocation2 + $0x200] sm:$0x7] }
 0x411   : > { %v4441_v46 = vrot.slane %v4439_v17, 4 }
 0x412   : > { %v4159_v32 = vpop.permute.xlu2 %4158 }
 0x413   : > { %4494 = vrot.lane.b32.xlu1 %v4412_v22, %s10495_s15  ;;  %4492 = vrot.lane.b32.xlu0 %v4408_v58, %s10495_s15  ;;  %4236 = vst.msk [vmem:[#allocation3 + $0x48] sm:$0xf] %vm1513_vm12, %v4159_v32  ;;  %v4296_v58 = vld [vmem:[#allocation2 + $0x25c] sm:$0xf]  ;;  %v4447_v32 = vsel %vm11270_vm8, %v9826_v28, %v4446_v30  ;;  %v4687_v28 = vrot.slane %v4588_v5, 7  ;;  %v9828_v30 = vrot.slane %v4586_v43, 11 }
 0x414   : > { %9772 = vmatmul.msk.bf16.gmra.mxu1 %vm3499_vm6, %v10211_v49  ;;  %v4453_v59 = vrot.slane %v4296_v58, 7  ;;  %v4587_v49 = vld [vmem:[#allocation2 + $0x1fc] sm:$0xf]  ;;  %v4594_v58 = vld [vmem:[#allocation2 + $0x238] sm:$0x7] }
 0x415   : > { %v4139_v53 = vpop.permute.xlu1 %4138  ;;  %v4137_v29 = vpop.permute.xlu0 %4136 }
 0x416   : > { %4226 = vst.msk [vmem:[#allocation3 + $0x20] sm:$0xf] %vm1513_vm12, %v4139_v53  ;;  %v4443_v53 = vsel %vm11270_vm8, %v4441_v46, %v4442_v10  ;;  %v4455_v12 = vrot.slane %v4453_v59, 4  ;;  %v4454_v39 = vsel %vm11270_vm8, %v9827_v14, %v4453_v59 }
 0x417   : > { %4225 = vst.msk [vmem:[#allocation3 + $0x1c] sm:$0xf] %vm1513_vm12, %v4137_v29  ;;  %v4440_v29 = vsel %vm11270_vm8, %v9825_v16, %v4439_v17 }
 0x418   : > { %4502 = vrot.lane.b32.xlu2 %v4426_v41, %s10495_s15  ;;  %v4456_v41 = vrot.slane %v4297_v15, 7  ;;  %v4701_v15 = vrot.slane %v4594_v58, 7 }
 0x419   : > { %9690 = vmatmul.msk.bf16.gmra.mxu0 %vm3281_vm7, %v9631_v33  ;;  %v4294_v33 = vld [vmem:[#allocation2 + $0x244] sm:$0x7] }
 0x41a   : > { %v4165_v38 = vpop.permute.xlu2 %4164  ;;  %v4449_v40 = vrot.slane %v4294_v33, 7  ;;  %v4457_v35 = vsel %vm11270_vm8, %v4455_v12, %v4456_v41 }
 0x41b   : > { %4500 = vrot.lane.b32.xlu1 %v4422_v51, %s10495_s15  ;;  %4498 = vrot.lane.b32.xlu0 %v4419_v56, %s10495_s15  ;;  %4239 = vst.msk [vmem:[#allocation3 + $0x54] sm:$0xf] %vm1513_vm12, %v4165_v38  ;;  %v10212_v51 = vld [vmem:[%s11238_s14 + $0x48] sm:$0xff]  ;;  %v4589_v38 = vld [vmem:[#allocation2 + $0x214] sm:$0x8] }
 0x41c   : > { %v4450_v13 = vsel %vm11270_vm8, %v4448_v45, %v4449_v40  ;;  %v4598_v45 = vld [vmem:[#allocation2 + $0x268] sm:$0x8]  ;;  %v4599_v40 = vld [vmem:[#allocation2 + $0x26c] sm:$0xf] }
 0x41d   : > { %v4145_v47 = vpop.permute.xlu1 %4144  ;;  %v4143_v19 = vpop.permute.xlu0 %4142  ;;  %v4712_v2 = vrot.slane %v4599_v40, 7 }
 0x41e   : > { %4229 = vst.msk [vmem:[#allocation3 + $0x2c] sm:$0xf] %vm1513_vm12, %v4145_v47  ;;  %v4684_v47 = vrot.slane %v4587_v49, 7 }
 0x41f   : > { %4228 = vst.msk [vmem:[#allocation3 + $0x28] sm:$0xf] %vm1513_vm12, %v4143_v19  ;;  %v3563_v19 = vpop.f32.mrf.mxu1 }
 0x420   : > { %4508 = vrot.lane.b32.xlu2 %v4436_v31, %s10495_s15  ;;  %v9829_v31 = vrot.slane %v4589_v38, 11  ;;  %v4686_v17 = vrot.slane %v4684_v47, 4  ;;  %v9832_v38 = vrot.slane %v4598_v45, 11 }
 0x422   : > { %v4171_v22 = vpop.permute.xlu2 %4170 }
 0x423   : > { %4506 = vrot.lane.b32.xlu1 %v4433_v24, %s10495_s15  ;;  %4504 = vrot.lane.b32.xlu0 %v4429_v34, %s10495_s15  ;;  %4242 = vst.msk [vmem:[#allocation3 + $0x60] sm:$0xf] %vm1513_vm12, %v4171_v22  ;;  %v4593_v34 = vld [vmem:[#allocation2 + $0x234] sm:$0xf]  ;;  %v4692_v22 = vsel %vm11270_vm8, %v9829_v31, %v4691_v36  ;;  %v4602_v31 = vld [vmem:[#allocation2 + $0x288] sm:$0xf] }
 0x424   : > { %9773 = vmatmul.msk.bf16.gmra.mxu1 %vm3499_vm6, %v10212_v51  ;;  %v4698_v46 = vrot.slane %v4593_v34, 7 }
 0x425   : > { %v4151_v26 = vpop.permute.xlu1 %4150  ;;  %v4149_v61 = vpop.permute.xlu0 %4148 }
 0x426   : > { %4232 = vst.msk [vmem:[#allocation3 + $0x38] sm:$0xf] %vm1513_vm12, %v4151_v26  ;;  %v9639_v26 = vor.u32 %v12465_v55, %v12616_v27  ;;  %v4700_v59 = vrot.slane %v4698_v46, 4  ;;  %v4693_v27 = vrot.slane %v4691_v36, 4 }
 0x427   : > { %4231 = vst.msk [vmem:[#allocation3 + $0x34] sm:$0xf] %vm1513_vm12, %v4149_v61  ;;  %v4688_v61 = vsel %vm11270_vm8, %v4686_v17, %v4687_v28  ;;  %v3566_v41 = vpop.f32.mrf.mxu1  ;;  %v4713_v17 = vsel %vm11270_vm8, %v9832_v38, %v4712_v2  ;;  %v4603_v28 = vld [vmem:[#allocation2 + $0x28c] sm:$0x7]  ;;  %v4611_v38 = vld [vmem:[#allocation2 + $0x2dc] sm:$0xf] }
 0x428   : > { %4514 = vrot.lane.b32.xlu2 %v4447_v32, %s10495_s15  ;;  %v4685_v32 = vsel %vm11270_vm8, %v9828_v30, %v4684_v47  ;;  %v4702_v51 = vsel %vm11270_vm8, %v4700_v59, %v4701_v15  ;;  %v4719_v30 = vrot.slane %v4602_v31, 7  ;;  %v10214_v15 = vld [vmem:[%s11238_s14 + $0x58] sm:$0xff] }
 0x429   : > { %9691 = vmatmul.msk.bf16.gmra.mxu0 %vm3281_vm7, %v9635_v42  ;;  %v4592_v42 = vld [vmem:[#allocation2 + $0x230] sm:$0x8] }
 0x42a   : > { %v4177_v56 = vpop.permute.xlu2 %4176  ;;  %v9830_v55 = vrot.slane %v4592_v42, 11 }
 0x42b   : > { %4512 = vrot.lane.b32.xlu1 %v4443_v53, %s10495_s15  ;;  %4510 = vrot.lane.b32.xlu0 %v4440_v29, %s10495_s15  ;;  %4245 = vst.msk [vmem:[#allocation3 + $0x6c] sm:$0xf] %vm1513_vm12, %v4177_v56  ;;  %v10213_v53 = vld [vmem:[%s11238_s14 + $0x50] sm:$0xff] }
 0x42c   : > { %v4596_v56 = vld [vmem:[#allocation2 + $0x250] sm:$0xf] }
 0x42d   : > { %v4157_v7 = vpop.permute.xlu1 %4156  ;;  %v4155_v60 = vpop.permute.xlu0 %4154  ;;  %v4705_v49 = vrot.slane %v4596_v56, 7 }
 0x42e   : > { %4235 = vst.msk [vmem:[#allocation3 + $0x44] sm:$0xf] %vm1513_vm12, %v4157_v7 }
 0x42f   : > { %4234 = vst.msk [vmem:[#allocation3 + $0x40] sm:$0xf] %vm1513_vm12, %v4155_v60  ;;  %v4699_v60 = vsel %vm11270_vm8, %v9830_v55, %v4698_v46  ;;  %v3568_v43 = vpop.f32.mrf.mxu1 }
 0x430   : > { %4520 = vrot.lane.b32.xlu2 %v4457_v35, %s10495_s15 }
 0x432   : > { %v4183_v24 = vpop.permute.xlu2 %4182 }
 0x433   : > { %4518 = vrot.lane.b32.xlu1 %v4454_v39, %s10495_s15  ;;  %4516 = vrot.lane.b32.xlu0 %v4450_v13, %s10495_s15  ;;  %4248 = vst.msk [vmem:[#allocation3 + $0x78] sm:$0xf] %vm1513_vm12, %v4183_v24  ;;  %v4597_v39 = vld [vmem:[#allocation2 + $0x254] sm:$0x7]  ;;  %v4595_v13 = vld [vmem:[#allocation2 + $0x24c] sm:$0x8] }
 0x434   : > { %9774 = vmatmul.msk.bf16.gmra.mxu1 %vm3499_vm6, %v10213_v53  ;;  %v4708_v36 = vrot.slane %v4597_v39, 7  ;;  %v9831_v5 = vrot.slane %v4595_v13, 11 }
 0x435   : > { %v4163_v62 = vpop.permute.xlu1 %4162  ;;  %v4161_v63 = vpop.permute.xlu0 %4160 }
 0x436   : > { %4238 = vst.msk [vmem:[#allocation3 + $0x50] sm:$0xf] %vm1513_vm12, %v4163_v62  ;;  %v3339_v10 = vpop.f32.mrf.mxu0  ;;  %v4706_v46 = vsel %vm11270_vm8, %v9831_v5, %v4705_v49  ;;  %v4740_v5 = vrot.slane %v4611_v38, 7 }
 0x437   : > { %v12852_v16 = vadd.f32 %v3561_v37, %v3339_v10  ;;  %4237 = vst.msk [vmem:[#allocation3 + $0x4c] sm:$0xf] %vm1513_vm12, %v4161_v63  ;;  %v4591_v37 = vld [vmem:[#allocation2 + $0x21c] sm:$0x7]  ;;  %v4722_v10 = vrot.slane %v4603_v28, 7 }
 0x438   : > { %4798 = vrot.lane.b32.xlu2 %v4692_v22, %s10496_s16  ;;  %v4694_v12 = vrot.slane %v4591_v37, 7  ;;  %v9643_v22 = vor.u32 %v12643_v11, %v12649_v6  ;;  %v4714_v6 = vrot.slane %v4712_v2, 4 }
 0x439   : > { %9692 = vmatmul.msk.bf16.gmra.mxu0 %vm3281_vm7, %v9639_v26  ;;  %v4721_v26 = vrot.slane %v4719_v30, 4 }
 0x43a   : > { %v4461_v29 = vpop.permute.xlu2 %4460  ;;  %v4695_v35 = vsel %vm11270_vm8, %v4693_v27, %v4694_v12  ;;  %v3571_v27 = vpop.f32.mrf.mxu1  ;;  %v4607_v12 = vld [vmem:[#allocation2 + $0x2bc] sm:$0x8] }
 0x43b   : > { %4796 = vrot.lane.b32.xlu1 %v4688_v61, %s10496_s16  ;;  %4794 = vrot.lane.b32.xlu0 %v4685_v32, %s10496_s16  ;;  %4555 = vst.msk [vmem:[#allocation3 + $0x4] sm:$0xf] %vm1706_vm13, %v4461_v29  ;;  %v4601_v61 = vld [vmem:[#allocation2 + $0x284] sm:$0x8]  ;;  %v4600_v32 = vld [vmem:[#allocation2 + $0x270] sm:$0x7]  ;;  %v4723_v29 = vsel %vm11270_vm8, %v4721_v26, %v4722_v10 }
 0x43c   : > { %v9833_v11 = vrot.slane %v4601_v61, 11  ;;  %v4715_v42 = vrot.slane %v4600_v32, 7  ;;  %v9835_v45 = vrot.slane %v4607_v12, 11  ;;  %v10215_v10 = vld [vmem:[%s11238_s14 + $0x60] sm:$0xff] }
 0x43d   : > { %v4169_v52 = vpop.permute.xlu1 %4168  ;;  %v4167_v33 = vpop.permute.xlu0 %4166 }
 0x43e   : > { %4241 = vst.msk [vmem:[#allocation3 + $0x5c] sm:$0xf] %vm1513_vm12, %v4169_v52  ;;  %v3341_v14 = vpop.f32.mrf.mxu0  ;;  %v4608_v52 = vld [vmem:[#allocation2 + $0x2c0] sm:$0xf]  ;;  %v4716_v56 = vsel %vm11270_vm8, %v4714_v6, %v4715_v42  ;;  %v4616_v42 = vld [vmem:[#allocation2 + $0x310] sm:$0x8] }
 0x43f   : > { %v12871_v7 = vadd.f32 %v3563_v19, %v3341_v14  ;;  %4240 = vst.msk [vmem:[#allocation3 + $0x58] sm:$0xf] %vm1513_vm12, %v4167_v33  ;;  %v4707_v19 = vrot.slane %v4705_v49, 4  ;;  %v4733_v40 = vrot.slane %v4608_v52, 7  ;;  %v4615_v52 = vld [vmem:[#allocation2 + $0x2fc] sm:$0x7] }
 0x440   : > { %4804 = vrot.lane.b32.xlu2 %v4702_v51, %s10496_s16  ;;  %v4720_v51 = vsel %vm11270_vm8, %v9833_v11, %v4719_v30  ;;  %v4614_v11 = vld [vmem:[#allocation2 + $0x2f8] sm:$0xf] }
 0x441   : > { %v4709_v58 = vsel %vm11270_vm8, %v4707_v19, %v4708_v36  ;;  %v4734_v19 = vsel %vm11270_vm8, %v9835_v45, %v4733_v40  ;;  %v4612_v36 = vld [vmem:[#allocation2 + $0x2e0] sm:$0x7]  ;;  %v4620_v45 = vld [vmem:[#allocation2 + $0x330] sm:$0xf] }
 0x442   : > { %v4467_v47 = vpop.permute.xlu2 %4466  ;;  %v3573_v30 = vpop.f32.mrf.mxu1 }
 0x443   : > { %4802 = vrot.lane.b32.xlu1 %v4699_v60, %s10496_s16  ;;  %4800 = vrot.lane.b32.xlu0 %v4695_v35, %s10496_s16  ;;  %4558 = vst.msk [vmem:[#allocation3 + $0x10] sm:$0xf] %vm1706_vm13, %v4467_v47  ;;  %v4606_v60 = vld [vmem:[#allocation2 + $0x2a8] sm:$0x7]  ;;  %v4604_v35 = vld [vmem:[#allocation2 + $0x2a0] sm:$0x8] }
 0x444   : > { %9775 = vmatmul.msk.bf16.gmra.mxu1 %vm3499_vm6, %v10214_v15  ;;  %v4729_v39 = vrot.slane %v4606_v60, 7  ;;  %v9834_v13 = vrot.slane %v4604_v35, 11  ;;  %v4750_v60 = vrot.slane %v4615_v52, 7 }
 0x445   : > { %v4175_v24 = vpop.permute.xlu1 %4174  ;;  %v4173_v34 = vpop.permute.xlu0 %4172 }
 0x446   : > { %4244 = vst.msk [vmem:[#allocation3 + $0x68] sm:$0xf] %vm1513_vm12, %v4175_v24  ;;  %v3344_v62 = vpop.f32.mrf.mxu0 }
 0x447   : > { %v12885_v63 = vadd.f32 %v3566_v41, %v3344_v62  ;;  %4243 = vst.msk [vmem:[#allocation3 + $0x64] sm:$0xf] %vm1513_vm12, %v4173_v34  ;;  %v4605_v41 = vld [vmem:[#allocation2 + $0x2a4] sm:$0xf]  ;;  %v9647_v34 = vor.u32 %v12684_v1, %v12510_v4  ;;  %v4743_v62 = vrot.slane %v4612_v36, 7  ;;  %v4735_v1 = vrot.slane %v4733_v40, 4 }
 0x448   : > { %4810 = vrot.lane.b32.xlu2 %v4713_v17, %s10496_s16  ;;  %v4726_v14 = vrot.slane %v4605_v41, 7 }
 0x449   : > { %9693 = vmatmul.msk.bf16.gmra.mxu0 %vm3281_vm7, %v9643_v22  ;;  %v4742_v22 = vrot.slane %v4740_v5, 4 }
 0x44a   : > { %v4473_v59 = vpop.permute.xlu2 %4472  ;;  %v4728_v2 = vrot.slane %v4726_v14, 4  ;;  %v4727_v28 = vsel %vm11270_vm8, %v9834_v13, %v4726_v14  ;;  %v4761_v13 = vrot.slane %v4620_v45, 7 }
 0x44b   : > { %4808 = vrot.lane.b32.xlu1 %v4709_v58, %s10496_s16  ;;  %4806 = vrot.lane.b32.xlu0 %v4706_v46, %s10496_s16  ;;  %4561 = vst.msk [vmem:[#allocation3 + $0x1c] sm:$0xf] %vm1706_vm13, %v4473_v59  ;;  %v4610_v58 = vld [vmem:[#allocation2 + $0x2d8] sm:$0x8]  ;;  %v4609_v46 = vld [vmem:[#allocation2 + $0x2c4] sm:$0x7]  ;;  %v4744_v59 = vsel %vm11270_vm8, %v4742_v22, %v4743_v62 }
 0x44c   : > { %v4730_v17 = vsel %vm11270_vm8, %v4728_v2, %v4729_v39  ;;  %v9836_v4 = vrot.slane %v4610_v58, 11  ;;  %v4736_v61 = vrot.slane %v4609_v46, 7  ;;  %v4621_v39 = vld [vmem:[#allocation2 + $0x334] sm:$0x7] }
 0x44d   : > { %v4181_v37 = vpop.permute.xlu1 %4180  ;;  %v4179_v53 = vpop.permute.xlu0 %4178 }
 0x44e   : > { %4247 = vst.msk [vmem:[#allocation3 + $0x74] sm:$0xf] %vm1513_vm12, %v4181_v37  ;;  %v3346_v55 = vpop.f32.mrf.mxu0  ;;  %v4617_v37 = vld [vmem:[#allocation2 + $0x314] sm:$0xf]  ;;  %v4737_v41 = vsel %vm11270_vm8, %v4735_v1, %v4736_v61  ;;  %v4625_v61 = vld [vmem:[#allocation2 + $0x364] sm:$0x8] }
 0x44f   : > { %v12904_v33 = vadd.f32 %v3568_v43, %v3346_v55  ;;  %4246 = vst.msk [vmem:[#allocation3 + $0x70] sm:$0xf] %vm1513_vm12, %v4179_v53  ;;  %v4747_v55 = vrot.slane %v4614_v11, 7  ;;  %v4754_v12 = vrot.slane %v4617_v37, 7 }
 0x450   : > { %4816 = vrot.lane.b32.xlu2 %v4723_v29, %s10496_s16  ;;  %v4741_v29 = vsel %vm11270_vm8, %v9836_v4, %v4740_v5  ;;  %v4623_v4 = vld [vmem:[#allocation2 + $0x34c] sm:$0xf] }
 0x451   : > { %v4749_v40 = vrot.slane %v4747_v55, 4  ;;  %v4756_v22 = vrot.slane %v4754_v12, 4 }
 0x452   : > { %v4479_v49 = vpop.permute.xlu2 %4478 }
 0x453   : > { %4814 = vrot.lane.b32.xlu1 %v4720_v51, %s10496_s16  ;;  %4812 = vrot.lane.b32.xlu0 %v4716_v56, %s10496_s16  ;;  %4564 = vst.msk [vmem:[#allocation3 + $0x28] sm:$0xf] %vm1706_vm13, %v4479_v49  ;;  %v4613_v51 = vld [vmem:[#allocation2 + $0x2f4] sm:$0x8]  ;;  %v3576_v56 = vpop.f32.mrf.mxu1  ;;  %v4751_v36 = vsel %vm11270_vm8, %v4749_v40, %v4750_v60  ;;  %v4630_v40 = vld [vmem:[#allocation2 + $0x388] sm:$0x7] }
 0x454   : > { %9776 = vmatmul.msk.bf16.gmra.mxu1 %vm3499_vm6, %v10215_v10  ;;  %v9837_v35 = vrot.slane %v4613_v51, 11 }
 0x455   : > { %v4459_v47 = vpop.permute.xlu1 %4458  ;;  %v4185_v31 = vpop.permute.xlu0 %4184 }
 0x456   : > { %4554 = vst.msk [vmem:[#allocation3] sm:$0xf] %vm1706_vm13, %v4459_v47  ;;  %v3349_v43 = vpop.f32.mrf.mxu0  ;;  %v4748_v5 = vsel %vm11270_vm8, %v9837_v35, %v4747_v55  ;;  %v9655_v35 = vor.u32 %v12702_v25, %v12708_v48 }
 0x457   : > { %v12918_v24 = vadd.f32 %v3571_v27, %v3349_v43  ;;  %4249 = vst.msk [vmem:[#allocation3 + $0x7c] sm:$0xf] %vm1513_vm12, %v4185_v31  ;;  %v9838_v27 = vrot.slane %v4616_v42, 11  ;;  %v4764_v43 = vrot.slane %v4621_v39, 7  ;;  %v9841_v42 = vrot.slane %v4625_v61, 11 }
 0x458   : > { %4822 = vrot.lane.b32.xlu2 %v4734_v19, %s10496_s16  ;;  %v9651_v19 = vor.u32 %v12553_v50, %v12680_v21 }
 0x459   : > { %9694 = vmatmul.msk.bf16.gmra.mxu0 %vm3281_vm7, %v9647_v34  ;;  %v4755_v2 = vsel %vm11270_vm8, %v9838_v27, %v4754_v12  ;;  %v4763_v34 = vrot.slane %v4761_v13, 4  ;;  %v4629_v27 = vld [vmem:[#allocation2 + $0x384] sm:$0xf] }
 0x45a   : > { %v4485_v26 = vpop.permute.xlu2 %4484  ;;  %v4782_v60 = vrot.slane %v4629_v27, 7 }
 0x45b   : > { %4820 = vrot.lane.b32.xlu1 %v4730_v17, %s10496_s16  ;;  %4818 = vrot.lane.b32.xlu0 %v4727_v28, %s10496_s16  ;;  %4567 = vst.msk [vmem:[#allocation3 + $0x34] sm:$0xf] %vm1706_vm13, %v4485_v26  ;;  %v4619_v17 = vld [vmem:[#allocation2 + $0x32c] sm:$0x8]  ;;  %v4618_v28 = vld [vmem:[#allocation2 + $0x318] sm:$0x7]  ;;  %v3578_v50 = vpop.f32.mrf.mxu1  ;;  %v4765_v26 = vsel %vm11270_vm8, %v4763_v34, %v4764_v43 }
 0x45c   : > { %v9839_v21 = vrot.slane %v4619_v17, 11  ;;  %v4757_v58 = vrot.slane %v4618_v28, 7  ;;  %v4784_v39 = vrot.slane %v4782_v60, 4  ;;  %v4632_v28 = vld [vmem:[#allocation2 + $0x3a0] sm:$0xf] }
 0x45d   : > { %v4465_v32 = vpop.permute.xlu1 %4464  ;;  %v4463_v15 = vpop.permute.xlu0 %4462 }
 0x45e   : > { %4557 = vst.msk [vmem:[#allocation3 + $0xc] sm:$0xf] %vm1706_vm13, %v4465_v32  ;;  %v3351_v6 = vpop.f32.mrf.mxu0  ;;  %v4626_v32 = vld [vmem:[#allocation2 + $0x368] sm:$0xf]  ;;  %v4758_v11 = vsel %vm11270_vm8, %v4756_v22, %v4757_v58  ;;  %v4789_v22 = vrot.slane %v4632_v28, 7 }
 0x45f   : > { %v12937_v53 = vadd.f32 %v3573_v30, %v3351_v6  ;;  %4556 = vst.msk [vmem:[#allocation3 + $0x8] sm:$0xf] %vm1706_vm13, %v4463_v15  ;;  %v10216_v30 = vld [vmem:[%s11238_s14 + $0x68] sm:$0xff]  ;;  %v4768_v6 = vrot.slane %v4623_v4, 7  ;;  %v4775_v37 = vrot.slane %v4626_v32, 7 }
 0x460   : > { %4828 = vrot.lane.b32.xlu2 %v4744_v59, %s10496_s16  ;;  %v4762_v59 = vsel %vm11270_vm8, %v9839_v21, %v4761_v13  ;;  %v4628_v13 = vld [vmem:[#allocation2 + $0x380] sm:$0x8]  ;;  %v4791_v61 = vrot.slane %v4789_v22, 4 }
 0x461   : > { %v4770_v12 = vrot.slane %v4768_v6, 4  ;;  %v4776_v45 = vsel %vm11270_vm8, %v9841_v42, %v4775_v37  ;;  %v9842_v25 = vrot.slane %v4628_v13, 11  ;;  %v4777_v48 = vrot.slane %v4775_v37, 4  ;;  %v4927_v37 = vld [vmem:[#allocation2 + $0x228] sm:$0x7] }
 0x462   : > { %v4491_v14 = vpop.permute.xlu2 %4490 }
 0x463   : > { %4826 = vrot.lane.b32.xlu1 %v4741_v29, %s10496_s16  ;;  %4824 = vrot.lane.b32.xlu0 %v4737_v41, %s10496_s16  ;;  %4570 = vst.msk [vmem:[#allocation3 + $0x40] sm:$0xf] %vm1706_vm13, %v4491_v14  ;;  %v4624_v29 = vld [vmem:[#allocation2 + $0x350] sm:$0x7]  ;;  %v4622_v41 = vld [vmem:[#allocation2 + $0x348] sm:$0x8] }
 0x464   : > { %9777 = vmatmul.msk.bf16.gmra.mxu1 %vm3499_vm6, %v10216_v30  ;;  %v4771_v52 = vrot.slane %v4624_v29, 7  ;;  %v9840_v51 = vrot.slane %v4622_v41, 11  ;;  %v4922_v30 = vld [vmem:[#allocation2 + $0x204] sm:$0x8]  ;;  %v9659_v41 = vor.u32 %v12741_v23, %v12594_v20 }
 0x465   : > { %v4471_v49 = vpop.permute.xlu1 %4470  ;;  %v4469_v38 = vpop.permute.xlu0 %4468  ;;  %v9844_v58 = vrot.slane %v4922_v30, 11 }
 0x466   : > { %4560 = vst.msk [vmem:[#allocation3 + $0x18] sm:$0xf] %vm1706_vm13, %v4471_v49  ;;  %v3354_v47 = vpop.f32.mrf.mxu0  ;;  %v4772_v49 = vsel %vm11270_vm8, %v4770_v12, %v4771_v52  ;;  %v5030_v12 = vrot.slane %v4927_v37, 7 }
 0x467   : > { %v12951_v31 = vadd.f32 %v3576_v56, %v3354_v47  ;;  %4559 = vst.msk [vmem:[#allocation3 + $0x14] sm:$0xf] %vm1706_vm13, %v4469_v38  ;;  %v4769_v38 = vsel %vm11270_vm8, %v9840_v51, %v4768_v6  ;;  %v4627_v47 = vld [vmem:[#allocation2 + $0x36c] sm:$0x7]  ;;  %v4925_v51 = vld [vmem:[#allocation2 + $0x220] sm:$0x8] }
 0x468   : > { %4834 = vrot.lane.b32.xlu2 %v4755_v2, %s10496_s16  ;;  %v4785_v2 = vrot.slane %v4630_v40, 7  ;;  %v9845_v20 = vrot.slane %v4925_v51, 11 }
 0x469   : > { %9695 = vmatmul.msk.bf16.gmra.mxu0 %vm3281_vm7, %v9651_v19  ;;  %v10217_v19 = vld [vmem:[%s11238_s14 + $0x70] sm:$0xff] }
 0x46a   : > { %v4497_v62 = vpop.permute.xlu2 %4496  ;;  %v4786_v17 = vsel %vm11270_vm8, %v4784_v39, %v4785_v2  ;;  %v4931_v2 = vld [vmem:[#allocation2 + $0x258] sm:$0x8]  ;;  %v4932_v39 = vld [vmem:[#allocation2 + $0x25c] sm:$0xf] }
 0x46b   : > { %4832 = vrot.lane.b32.xlu1 %v4751_v36, %s10496_s16  ;;  %4830 = vrot.lane.b32.xlu0 %v4748_v5, %s10496_s16  ;;  %4573 = vst.msk [vmem:[#allocation3 + $0x4c] sm:$0xf] %vm1706_vm13, %v4497_v62  ;;  %v4778_v5 = vrot.slane %v4627_v47, 7  ;;  %v4923_v62 = vld [vmem:[#allocation2 + $0x208] sm:$0xf] }
 0x46d   : > { %v4477_v46 = vpop.permute.xlu1 %4476  ;;  %v4475_v10 = vpop.permute.xlu0 %4474  ;;  %v4779_v21 = vsel %vm11270_vm8, %v4777_v48, %v4778_v5  ;;  %v4930_v48 = vld [vmem:[#allocation2 + $0x244] sm:$0x7]  ;;  %v4928_v5 = vld [vmem:[#allocation2 + $0x23c] sm:$0x8] }
 0x46e   : > { %4563 = vst.msk [vmem:[#allocation3 + $0x24] sm:$0xf] %vm1706_vm13, %v4477_v46  ;;  %v3356_v1 = vpop.f32.mrf.mxu0  ;;  %v5020_v46 = vrot.slane %v4923_v62, 7  ;;  %v5037_v28 = vrot.slane %v4930_v48, 7  ;;  %v9846_v30 = vrot.slane %v4928_v5, 11 }
 0x46f   : > { %v12970_v15 = vadd.f32 %v3578_v50, %v3356_v1  ;;  %4562 = vst.msk [vmem:[#allocation3 + $0x20] sm:$0xf] %vm1706_vm13, %v4475_v10  ;;  %v4783_v50 = vsel %vm11270_vm8, %v9842_v25, %v4782_v60  ;;  %v4633_v10 = vld [vmem:[#allocation2 + $0x3a4] sm:$0x7]  ;;  %v5041_v25 = vrot.slane %v4932_v39, 7 }
 0x470   : > { %4840 = vrot.lane.b32.xlu2 %v4765_v26, %s10496_s16  ;;  %v4631_v26 = vld [vmem:[#allocation2 + $0x39c] sm:$0x8]  ;;  %v4926_v1 = vld [vmem:[#allocation2 + $0x224] sm:$0xf]  ;;  %v4792_v32 = vrot.slane %v4633_v10, 7  ;;  %v5021_v42 = vsel %vm11270_vm8, %v9844_v58, %v5020_v46  ;;  %v5022_v23 = vrot.slane %v5020_v46, 4  ;;  %v9663_v46 = vor.u32 %v12633_v9, %v12737_v54 }
 0x471   : > { %v5027_v29 = vrot.slane %v4926_v1, 7  ;;  %v4936_v58 = vld [vmem:[#allocation2 + $0x27c] sm:$0x7]  ;;  %v5043_v54 = vrot.slane %v5041_v25, 4  ;;  %v4943_v5 = vld [vmem:[#allocation2 + $0x2c8] sm:$0x8] }
 0x472   : > { %v4503_v55 = vpop.permute.xlu2 %4502  ;;  %v5051_v1 = vrot.slane %v4936_v58, 7 }
 0x473   : > { %4838 = vrot.lane.b32.xlu1 %v4762_v59, %s10496_s16  ;;  %4836 = vrot.lane.b32.xlu0 %v4758_v11, %s10496_s16  ;;  %4576 = vst.msk [vmem:[#allocation3 + $0x58] sm:$0xf] %vm1706_vm13, %v4503_v55  ;;  %v9843_v59 = vrot.slane %v4631_v26, 11  ;;  %v4793_v55 = vsel %vm11270_vm8, %v4791_v61, %v4792_v32  ;;  %v5029_v52 = vrot.slane %v5027_v29, 4  ;;  %v5028_v13 = vsel %vm11270_vm8, %v9845_v20, %v5027_v29  ;;  %v4934_v61 = vld [vmem:[#allocation2 + $0x274] sm:$0x8] }
 0x474   : > { %9778 = vmatmul.msk.bf16.gmra.mxu1 %vm3499_vm6, %v10217_v19  ;;  %v4933_v32 = vld [vmem:[#allocation2 + $0x260] sm:$0x7]  ;;  %v9848_v9 = vrot.slane %v4934_v61, 11  ;;  %v4938_v29 = vld [vmem:[#allocation2 + $0x294] sm:$0xf] }
 0x475   : > { %v4483_v56 = vpop.permute.xlu1 %4482  ;;  %v4481_v14 = vpop.permute.xlu0 %4480  ;;  %v4790_v27 = vsel %vm11270_vm8, %v9843_v59, %v4789_v22  ;;  %v4946_v61 = vld [vmem:[#allocation2 + $0x2e4] sm:$0x8] }
 0x476   : > { %4566 = vst.msk [vmem:[#allocation3 + $0x30] sm:$0xf] %vm1706_vm13, %v4483_v56  ;;  %v4924_v56 = vld [vmem:[#allocation2 + $0x20c] sm:$0x7] }
 0x477   : > { %4565 = vst.msk [vmem:[#allocation3 + $0x2c] sm:$0xf] %vm1706_vm13, %v4481_v14  ;;  %v10218_v14 = vld [vmem:[%s11238_s14 + $0x78] sm:$0xff]  ;;  %v5023_v40 = vrot.slane %v4924_v56, 7  ;;  %s283_s14 = scalar_lea.vmem %s15018_s2, %s11218_s10 }
 0x478   : > { %4846 = vrot.lane.b32.xlu2 %v4776_v45, %s10496_s16 }
 0x479   : > { %9696 = vmatmul.msk.bf16.gmra.mxu0 %vm3281_vm7, %v9655_v35  ;;  %v5024_v47 = vsel %vm11270_vm8, %v5022_v23, %v5023_v40  ;;  %v4944_v23 = vld [vmem:[#allocation2 + $0x2cc] sm:$0xf] }
 0x47a   : > { %v4509_v36 = vpop.permute.xlu2 %4508  ;;  %v5069_v39 = vrot.slane %v4944_v23, 7 }
 0x47b   : > { %4844 = vrot.lane.b32.xlu1 %v4772_v49, %s10496_s16  ;;  %4842 = vrot.lane.b32.xlu0 %v4769_v38, %s10496_s16  ;;  %4579 = vst.msk [vmem:[#allocation3 + $0x64] sm:$0xf] %vm1706_vm13, %v4509_v36  ;;  %v5031_v49 = vsel %vm11270_vm8, %v5029_v52, %v5030_v12  ;;  %v4929_v38 = vld [vmem:[#allocation2 + $0x240] sm:$0xf]  ;;  %v9847_v36 = vrot.slane %v4931_v2, 11  ;;  %v5055_v52 = vrot.slane %v4938_v29, 7 }
 0x47c   : > { %v5034_v19 = vrot.slane %v4929_v38, 7 }
 0x47d   : > { %v4489_v43 = vpop.permute.xlu1 %4488  ;;  %v4487_v34 = vpop.permute.xlu0 %4486  ;;  %v5057_v40 = vrot.slane %v5055_v52, 4 }
 0x47e   : > { %4569 = vst.msk [vmem:[#allocation3 + $0x3c] sm:$0xf] %vm1706_vm13, %v4489_v43  ;;  %v5035_v26 = vsel %vm11270_vm8, %v9846_v30, %v5034_v19 }
 0x47f   : > { %4568 = vst.msk [vmem:[#allocation3 + $0x38] sm:$0xf] %vm1706_vm13, %v4487_v34  ;;  %v4935_v34 = vld [vmem:[#allocation2 + $0x278] sm:$0xf] }
 0x480   : > { %4852 = vrot.lane.b32.xlu2 %v4786_v17, %s10496_s16  ;;  %v5036_v17 = vrot.slane %v5034_v19, 4  ;;  %v5048_v22 = vrot.slane %v4935_v34, 7 }
 0x482   : > { %v4515_v4 = vpop.permute.xlu2 %4514  ;;  %v5038_v10 = vsel %vm11270_vm8, %v5036_v17, %v5037_v28 }
 0x483   : > { %4850 = vrot.lane.b32.xlu1 %v4783_v50, %s10496_s16  ;;  %4848 = vrot.lane.b32.xlu0 %v4779_v21, %s10496_s16  ;;  %4582 = vst.msk [vmem:[#allocation3 + $0x70] sm:$0xf] %vm1706_vm13, %v4515_v4  ;;  %v5042_v21 = vsel %vm11270_vm8, %v9847_v36, %v5041_v25  ;;  %v5050_v4 = vrot.slane %v5048_v22, 4  ;;  %v5071_v25 = vrot.slane %v5069_v39, 4 }
 0x484   : > { %9779 = vmatmul.msk.bf16.gmra.mxu1 %vm3499_vm6, %v10218_v14  ;;  %v4939_v14 = vld [vmem:[#allocation2 + $0x298] sm:$0x7] }
 0x485   : > { %v4495_v11 = vpop.permute.xlu1 %4494  ;;  %v4493_v6 = vpop.permute.xlu0 %4492  ;;  %v5052_v37 = vsel %vm11270_vm8, %v5050_v4, %v5051_v1  ;;  %v4948_v1 = vld [vmem:[#allocation2 + $0x2ec] sm:$0x7] }
 0x486   : > { %4572 = vst.msk [vmem:[#allocation3 + $0x48] sm:$0xf] %vm1706_vm13, %v4495_v11  ;;  %v5044_v11 = vrot.slane %v4933_v32, 7 }
 0x487   : > { %4571 = vst.msk [vmem:[#allocation3 + $0x44] sm:$0xf] %vm1706_vm13, %v4493_v6 }
 0x488   : > { %5130 = vrot.lane.b32.xlu2 %v5021_v42, %s10497_s17  ;;  %v5045_v12 = vsel %vm11270_vm8, %v5043_v54, %v5044_v11  ;;  %v5079_v54 = vrot.slane %v4948_v1, 7  ;;  %v9852_v11 = vrot.slane %v4946_v61, 11 }
 0x489   : > { %9697 = vmatmul.msk.bf16.gmra.mxu0 %vm3281_vm7, %v9659_v41  ;;  %v4940_v41 = vld [vmem:[#allocation2 + $0x2ac] sm:$0x8] }
 0x48a   : > { %v4521_v45 = vpop.permute.xlu2 %4520  ;;  %v9850_v51 = vrot.slane %v4940_v41, 11  ;;  %v4954_v41 = vld [vmem:[#allocation2 + $0x324] sm:$0x7] }
 0x48b   : > { %4856 = vrot.lane.b32.xlu1 %v4793_v55, %s10496_s16  ;;  %4854 = vrot.lane.b32.xlu0 %v4790_v27, %s10496_s16  ;;  %4585 = vst.msk [vmem:[#allocation3 + $0x7c] sm:$0xf] %vm1706_vm13, %v4521_v45  ;;  %v4941_v55 = vld [vmem:[#allocation2 + $0x2b0] sm:$0xf]  ;;  %v5049_v27 = vsel %vm11270_vm8, %v9848_v9, %v5048_v22  ;;  %v4950_v22 = vld [vmem:[#allocation2 + $0x304] sm:$0xf] }
 0x48c   : > { %v5062_v56 = vrot.slane %v4941_v55, 7  ;;  %v4937_v45 = vld [vmem:[#allocation2 + $0x290] sm:$0x8]  ;;  %v5083_v4 = vrot.slane %v4950_v22, 7 }
 0x48d   : > { %v4501_v60 = vpop.permute.xlu1 %4500  ;;  %v4499_v35 = vpop.permute.xlu0 %4498 }
 0x48e   : > { %4575 = vst.msk [vmem:[#allocation3 + $0x54] sm:$0xf] %vm1706_vm13, %v4501_v60  ;;  %v5058_v60 = vrot.slane %v4939_v14, 7  ;;  %v5063_v2 = vsel %vm11270_vm8, %v9850_v51, %v5062_v56  ;;  %v4952_v51 = vld [vmem:[#allocation2 + $0x31c] sm:$0x8] }
 0x48f   : > { %4574 = vst.msk [vmem:[#allocation3 + $0x50] sm:$0xf] %vm1706_vm13, %v4499_v35  ;;  %v9849_v35 = vrot.slane %v4937_v45, 11  ;;  %v9854_v45 = vrot.slane %v4952_v51, 11 }
 0x490   : > { %5136 = vrot.lane.b32.xlu2 %v5031_v49, %s10497_s17  ;;  %v5059_v19 = vsel %vm11270_vm8, %v5057_v40, %v5058_v60 }
 0x491   : > { %v5056_v36 = vsel %vm11270_vm8, %v9849_v35, %v5055_v52  ;;  %v5093_v52 = vrot.slane %v4954_v41, 7 }
 0x492   : > { %v4799_v43 = vpop.permute.xlu2 %4798 }
 0x493   : > { %5134 = vrot.lane.b32.xlu1 %v5028_v13, %s10497_s17  ;;  %5132 = vrot.lane.b32.xlu0 %v5024_v47, %s10497_s17  ;;  %4892 = vst.msk [vmem:[#allocation3 + $0x8] sm:$0xf] %vm2043_vm14, %v4799_v43  ;;  %v4945_v13 = vld [vmem:[#allocation2 + $0x2d0] sm:$0x7]  ;;  %v9667_v47 = vor.u32 %v12756_v44, %v12761_v57  ;;  %v4942_v43 = vld [vmem:[#allocation2 + $0x2b4] sm:$0x7] }
 0x494   : > { %v5072_v48 = vrot.slane %v4945_v13, 7  ;;  %v9851_v44 = vrot.slane %v4943_v5, 11  ;;  %v5064_v57 = vrot.slane %v5062_v56, 4  ;;  %v5065_v17 = vrot.slane %v4942_v43, 7  ;;  %v4951_v56 = vld [vmem:[#allocation2 + $0x308] sm:$0x7] }
 0x495   : > { %v4507_v62 = vpop.permute.xlu1 %4506  ;;  %v4505_v50 = vpop.permute.xlu0 %4504  ;;  %v5086_v23 = vrot.slane %v4951_v56, 7  ;;  %v4962_v43 = vld [vmem:[#allocation2 + $0x374] sm:$0xf]  ;;  %v5260_v56 = vld [vmem:[#allocation2 + $0x34c] sm:$0xf] }
 0x496   : > { %4578 = vst.msk [vmem:[#allocation3 + $0x60] sm:$0xf] %vm1706_vm13, %v4507_v62  ;;  %v5073_v62 = vsel %vm11270_vm8, %v5071_v25, %v5072_v48  ;;  %v5070_v58 = vsel %vm11270_vm8, %v9851_v44, %v5069_v39  ;;  %v4957_v25 = vld [vmem:[#allocation2 + $0x340] sm:$0x7]  ;;  %v4955_v48 = vld [vmem:[#allocation2 + $0x338] sm:$0x8] }
 0x497   : > { %4577 = vst.msk [vmem:[#allocation3 + $0x5c] sm:$0xf] %vm1706_vm13, %v4505_v50  ;;  %v4947_v50 = vld [vmem:[#allocation2 + $0x2e8] sm:$0xf]  ;;  %v5100_v44 = vrot.slane %v4957_v25, 7 }
 0x498   : > { %5142 = vrot.lane.b32.xlu2 %v5042_v21, %s10497_s17  ;;  %v4949_v21 = vld [vmem:[#allocation2 + $0x300] sm:$0x8] }
 0x499   : > { %9698 = vmatmul.msk.bf16.gmra.mxu0 %vm3281_vm7, %v9663_v46  ;;  %v5066_v46 = vsel %vm11270_vm8, %v5064_v57, %v5065_v17  ;;  %v9855_v57 = vrot.slane %v4955_v48, 11 }
 0x49a   : > { %v4805_v59 = vpop.permute.xlu2 %4804 }
 0x49b   : > { %5140 = vrot.lane.b32.xlu1 %v5038_v10, %s10497_s17  ;;  %5138 = vrot.lane.b32.xlu0 %v5035_v26, %s10497_s17  ;;  %4895 = vst.msk [vmem:[#allocation3 + $0x14] sm:$0xf] %vm2043_vm14, %v4805_v59  ;;  %v5076_v10 = vrot.slane %v4947_v50, 7  ;;  %v9853_v26 = vrot.slane %v4949_v21, 11  ;;  %v4953_v59 = vld [vmem:[#allocation2 + $0x320] sm:$0xf] }
 0x49c   : > { %v5090_v29 = vrot.slane %v4953_v59, 7  ;;  %v4963_v50 = vld [vmem:[#allocation2 + $0x378] sm:$0x7] }
 0x49d   : > { %v4513_v6 = vpop.permute.xlu1 %4512  ;;  %v4511_v42 = vpop.permute.xlu0 %4510  ;;  %v5078_v9 = vrot.slane %v5076_v10, 4 }
 0x49e   : > { %4581 = vst.msk [vmem:[#allocation3 + $0x6c] sm:$0xf] %vm1706_vm13, %v4513_v6  ;;  %v5091_v39 = vsel %vm11270_vm8, %v9854_v45, %v5090_v29 }
 0x49f   : > { %4580 = vst.msk [vmem:[#allocation3 + $0x68] sm:$0xf] %vm1706_vm13, %v4511_v42  ;;  %v5080_v55 = vsel %vm11270_vm8, %v5078_v9, %v5079_v54 }
 0x4a0   : > { %5148 = vrot.lane.b32.xlu2 %v5052_v37, %s10497_s17  ;;  %v5084_v37 = vsel %vm11270_vm8, %v9853_v26, %v5083_v4  ;;  %v4960_v26 = vld [vmem:[#allocation2 + $0x35c] sm:$0x7] }
 0x4a2   : > { %v4811_v20 = vpop.permute.xlu2 %4810 }
 0x4a3   : > { %5146 = vrot.lane.b32.xlu1 %v5049_v27, %s10497_s17  ;;  %5144 = vrot.lane.b32.xlu0 %v5045_v12, %s10497_s17  ;;  %4898 = vst.msk [vmem:[#allocation3 + $0x20] sm:$0xf] %vm2043_vm14, %v4811_v20  ;;  %v5077_v27 = vsel %vm11270_vm8, %v9852_v11, %v5076_v10  ;;  %v5092_v12 = vrot.slane %v5090_v29, 4  ;;  %v5085_v20 = vrot.slane %v5083_v4, 4  ;;  %v4961_v10 = vld [vmem:[#allocation2 + $0x370] sm:$0x8] }
 0x4a4   : > { %v9857_v1 = vrot.slane %v4961_v10, 11  ;;  %v4965_v11 = vld [vmem:[#allocation2 + $0x390] sm:$0xf] }
 0x4a5   : > { %v4519_v49 = vpop.permute.xlu1 %4518  ;;  %v4517_v38 = vpop.permute.xlu0 %4516  ;;  %v5094_v35 = vsel %vm11270_vm8, %v5092_v12, %v5093_v52  ;;  %v5087_v13 = vsel %vm11270_vm8, %v5085_v20, %v5086_v23  ;;  %v5118_v41 = vrot.slane %v4965_v11, 7  ;;  %v4966_v12 = vld [vmem:[#allocation2 + $0x394] sm:$0x7]  ;;  %v4964_v52 = vld [vmem:[#allocation2 + $0x38c] sm:$0x8] }
 0x4a6   : > { %4584 = vst.msk [vmem:[#allocation3 + $0x78] sm:$0xf] %vm1706_vm13, %v4519_v49  ;;  %v4956_v49 = vld [vmem:[#allocation2 + $0x33c] sm:$0xf]  ;;  %v5121_v45 = vrot.slane %v4966_v12, 7  ;;  %v9858_v20 = vrot.slane %v4964_v52, 11 }
 0x4a7   : > { %4583 = vst.msk [vmem:[#allocation3 + $0x74] sm:$0xf] %vm1706_vm13, %v4517_v38  ;;  %v4958_v38 = vld [vmem:[#allocation2 + $0x354] sm:$0x8]  ;;  %v5270_v11 = vld [vmem:[#allocation2 + $0x3a4] sm:$0x7] }
 0x4a8   : > { %5154 = vrot.lane.b32.xlu2 %v5063_v2, %s10497_s17  ;;  %v4959_v2 = vld [vmem:[#allocation2 + $0x358] sm:$0xf] }
 0x4a9   : > { %9699 = vmatmul.msk.bf16.gmra.mxu0 %vm3281_vm7, %v9667_v47  ;;  %v5097_v47 = vrot.slane %v4956_v49, 7  ;;  %v5261_v49 = vld [vmem:[#allocation2 + $0x350] sm:$0x7] }
 0x4aa   : > { %v4817_v34 = vpop.permute.xlu2 %4816 }
 0x4ab   : > { %5152 = vrot.lane.b32.xlu1 %v5059_v19, %s10497_s17  ;;  %5150 = vrot.lane.b32.xlu0 %v5056_v36, %s10497_s17  ;;  %4901 = vst.msk [vmem:[#allocation3 + $0x2c] sm:$0xf] %vm2043_vm14, %v4817_v34  ;;  %v9856_v19 = vrot.slane %v4958_v38, 11  ;;  %v5104_v36 = vrot.slane %v4959_v2, 7  ;;  %v5099_v34 = vrot.slane %v5097_v47, 4  ;;  %v5098_v22 = vsel %vm11270_vm8, %v9855_v57, %v5097_v47 }
 0x4ac   : > { %v5119_v2 = vsel %vm11270_vm8, %v9858_v20, %v5118_v41  ;;  %v5259_v47 = vld [vmem:[#allocation2 + $0x348] sm:$0x8]  ;;  %v5272_v20 = vld [vmem:[#allocation2 + $0x3bc] sm:$0xf] }
 0x4ad   : > { %v4797_v28 = vpop.permute.xlu1 %4796  ;;  %v4795_v30 = vpop.permute.xlu0 %4794  ;;  %v5101_v21 = vsel %vm11270_vm8, %v5099_v34, %v5100_v44  ;;  %v5106_v61 = vrot.slane %v5104_v36, 4  ;;  %v9860_v25 = vrot.slane %v5259_v47, 11  ;;  %v5263_v57 = vld [vmem:[#allocation2 + $0x368] sm:$0xf] }
 0x4ae   : > { %4891 = vst.msk [vmem:[#allocation3 + $0x4] sm:$0xf] %vm2043_vm14, %v4797_v28 }
 0x4af   : > { %4890 = vst.msk [vmem:[#allocation3] sm:$0xf] %vm2043_vm14, %v4795_v30  ;;  %v5105_v30 = vsel %vm11270_vm8, %v9856_v19, %v5104_v36  ;;  %v4969_v19 = vld [vmem:[#allocation2 + $0x3b0] sm:$0x7] }
 0x4b0   : > { %5160 = vrot.lane.b32.xlu2 %v5073_v62, %s10497_s17  ;;  %v5111_v62 = vrot.slane %v4962_v43, 7 }
 0x4b2   : > { %v4823_v32 = vpop.permute.xlu2 %4822 }
 0x4b3   : > { %5158 = vrot.lane.b32.xlu1 %v5070_v58, %s10497_s17  ;;  %5156 = vrot.lane.b32.xlu0 %v5066_v46, %s10497_s17  ;;  %4904 = vst.msk [vmem:[#allocation3 + $0x38] sm:$0xf] %vm2043_vm14, %v4823_v32  ;;  %v5113_v58 = vrot.slane %v5111_v62, 4  ;;  %v5114_v46 = vrot.slane %v4963_v50, 7  ;;  %v5107_v32 = vrot.slane %v4960_v26, 7  ;;  %v5364_v50 = vrot.slane %v5263_v57, 7 }
 0x4b4   : > { %v5269_v26 = vld [vmem:[#allocation2 + $0x3a0] sm:$0xf]  ;;  %v5279_v57 = vld [vmem:[#allocation2 + $0x3f8] sm:$0x7] }
 0x4b5   : > { %v4803_v6 = vpop.permute.xlu1 %4802  ;;  %v4801_v42 = vpop.permute.xlu0 %4800  ;;  %v5115_v54 = vsel %vm11270_vm8, %v5113_v58, %v5114_v46  ;;  %v5108_v29 = vsel %vm11270_vm8, %v5106_v61, %v5107_v32  ;;  %v5264_v58 = vld [vmem:[#allocation2 + $0x36c] sm:$0x7]  ;;  %v5262_v46 = vld [vmem:[#allocation2 + $0x364] sm:$0x8] }
 0x4b6   : > { %4894 = vst.msk [vmem:[#allocation3 + $0x10] sm:$0xf] %vm2043_vm14, %v4803_v6  ;;  %v4967_v6 = vld [vmem:[#allocation2 + $0x3a8] sm:$0x8]  ;;  %v9861_v61 = vrot.slane %v5262_v46, 11 }
 0x4b7   : > { %4893 = vst.msk [vmem:[#allocation3 + $0xc] sm:$0xf] %vm2043_vm14, %v4801_v42  ;;  %v4968_v42 = vld [vmem:[#allocation2 + $0x3ac] sm:$0xf] }
 0x4b8   : > { %5166 = vrot.lane.b32.xlu2 %v5084_v37, %s10497_s17  ;;  %v5112_v37 = vsel %vm11270_vm8, %v9857_v1, %v5111_v62  ;;  %v5367_v1 = vrot.slane %v5264_v58, 7 }
 0x4ba   : > { %v4829_v14 = vpop.permute.xlu2 %4828 }
 0x4bb   : > { %5164 = vrot.lane.b32.xlu1 %v5080_v55, %s10497_s17  ;;  %5162 = vrot.lane.b32.xlu0 %v5077_v27, %s10497_s17  ;;  %4907 = vst.msk [vmem:[#allocation3 + $0x44] sm:$0xf] %vm2043_vm14, %v4829_v14  ;;  %v9859_v55 = vrot.slane %v4967_v6, 11  ;;  %v5125_v27 = vrot.slane %v4968_v42, 7  ;;  %v5120_v14 = vrot.slane %v5118_v41, 4  ;;  %v5365_v42 = vsel %vm11270_vm8, %v9861_v61, %v5364_v50 }
 0x4bc   : > { %v5268_v41 = vld [vmem:[#allocation2 + $0x39c] sm:$0x8]  ;;  %v5281_v61 = vld [vmem:[#allocation2 + $0x410] sm:$0xf] }
 0x4bd   : > { %v4809_v40 = vpop.permute.xlu1 %4808  ;;  %v4807_v60 = vpop.permute.xlu0 %4806  ;;  %v5122_v38 = vsel %vm11270_vm8, %v5120_v14, %v5121_v45  ;;  %v5127_v48 = vrot.slane %v5125_v27, 4  ;;  %v9863_v12 = vrot.slane %v5268_v41, 11 }
 0x4be   : > { %4897 = vst.msk [vmem:[#allocation3 + $0x1c] sm:$0xf] %vm2043_vm14, %v4809_v40 }
 0x4bf   : > { %4896 = vst.msk [vmem:[#allocation3 + $0x18] sm:$0xf] %vm2043_vm14, %v4807_v60  ;;  %v5126_v60 = vsel %vm11270_vm8, %v9859_v55, %v5125_v27  ;;  %v5267_v55 = vld [vmem:[#allocation2 + $0x388] sm:$0x7] }
 0x4c0   : > { %5172 = vrot.lane.b32.xlu2 %v5094_v35, %s10497_s17  ;;  %v5357_v35 = vrot.slane %v5260_v56, 7 }
 0x4c2   : > { %v4835_v5 = vpop.permute.xlu2 %4834 }
 0x4c3   : > { %5170 = vrot.lane.b32.xlu1 %v5091_v39, %s10497_s17  ;;  %5168 = vrot.lane.b32.xlu0 %v5087_v13, %s10497_s17  ;;  %4910 = vst.msk [vmem:[#allocation3 + $0x50] sm:$0xf] %vm2043_vm14, %v4835_v5  ;;  %v5359_v39 = vrot.slane %v5357_v35, 4  ;;  %v5360_v13 = vrot.slane %v5261_v49, 7  ;;  %v5128_v5 = vrot.slane %v4969_v19, 7  ;;  %v5385_v49 = vrot.slane %v5272_v20, 7 }
 0x4c4   : > { %v5278_v19 = vld [vmem:[#allocation2 + $0x3f4] sm:$0xf]  ;;  %v5288_v20 = vld [vmem:[#allocation2 + $0x44c] sm:$0x7] }
 0x4c5   : > { %v4815_v17 = vpop.permute.xlu1 %4814  ;;  %v4813_v28 = vpop.permute.xlu0 %4812  ;;  %v5361_v44 = vsel %vm11270_vm8, %v5359_v39, %v5360_v13  ;;  %v5129_v62 = vsel %vm11270_vm8, %v5127_v48, %v5128_v5  ;;  %v5273_v39 = vld [vmem:[#allocation2 + $0x3c0] sm:$0x7]  ;;  %v5271_v13 = vld [vmem:[#allocation2 + $0x3b8] sm:$0x8] }
 0x4c6   : > { %4900 = vst.msk [vmem:[#allocation3 + $0x28] sm:$0xf] %vm2043_vm14, %v4815_v17  ;;  %v5265_v17 = vld [vmem:[#allocation2 + $0x380] sm:$0x8]  ;;  %v9864_v48 = vrot.slane %v5271_v13, 11 }
 0x4c7   : > { %4899 = vst.msk [vmem:[#allocation3 + $0x24] sm:$0xf] %vm2043_vm14, %v4813_v28  ;;  %v5266_v28 = vld [vmem:[#allocation2 + $0x384] sm:$0xf] }
 0x4c8   : > { %5178 = vrot.lane.b32.xlu2 %v5105_v30, %s10497_s17  ;;  %v5358_v30 = vsel %vm11270_vm8, %v9860_v25, %v5357_v35  ;;  %v5388_v25 = vrot.slane %v5273_v39, 7 }
 0x4ca   : > { %v4841_v4 = vpop.permute.xlu2 %4840 }
 0x4cb   : > { %5176 = vrot.lane.b32.xlu1 %v5101_v21, %s10497_s17  ;;  %5174 = vrot.lane.b32.xlu0 %v5098_v22, %s10497_s17  ;;  %4913 = vst.msk [vmem:[#allocation3 + $0x5c] sm:$0xf] %vm2043_vm14, %v4841_v4  ;;  %v9862_v21 = vrot.slane %v5265_v17, 11  ;;  %v5371_v22 = vrot.slane %v5266_v28, 7  ;;  %v5366_v4 = vrot.slane %v5364_v50, 4  ;;  %v5386_v28 = vsel %vm11270_vm8, %v9864_v48, %v5385_v49 }
 0x4cc   : > { %v5277_v50 = vld [vmem:[#allocation2 + $0x3f0] sm:$0x8]  ;;  %v5290_v48 = vld [vmem:[#allocation2 + $0x464] sm:$0xf] }
 0x4cd   : > { %v4821_v59 = vpop.permute.xlu1 %4820  ;;  %v4819_v9 = vpop.permute.xlu0 %4818  ;;  %v5368_v6 = vsel %vm11270_vm8, %v5366_v4, %v5367_v1  ;;  %v5373_v52 = vrot.slane %v5371_v22, 4  ;;  %v9866_v58 = vrot.slane %v5277_v50, 11 }
 0x4ce   : > { %4903 = vst.msk [vmem:[#allocation3 + $0x34] sm:$0xf] %vm2043_vm14, %v4821_v59 }
 0x4cf   : > { %4902 = vst.msk [vmem:[#allocation3 + $0x30] sm:$0xf] %vm2043_vm14, %v4819_v9  ;;  %v5372_v9 = vsel %vm11270_vm8, %v9862_v21, %v5371_v22  ;;  %v5276_v21 = vld [vmem:[#allocation2 + $0x3dc] sm:$0x7] }
 0x4d0   : > { %5184 = vrot.lane.b32.xlu2 %v5115_v54, %s10497_s17  ;;  %v5378_v54 = vrot.slane %v5269_v26, 7 }
 0x4d2   : > { %v4847_v51 = vpop.permute.xlu2 %4846 }
 0x4d3   : > { %5182 = vrot.lane.b32.xlu1 %v5112_v37, %s10497_s17  ;;  %5180 = vrot.lane.b32.xlu0 %v5108_v29, %s10497_s17  ;;  %4916 = vst.msk [vmem:[#allocation3 + $0x68] sm:$0xf] %vm2043_vm14, %v4847_v51  ;;  %v5380_v37 = vrot.slane %v5378_v54, 4  ;;  %v5381_v29 = vrot.slane %v5270_v11, 7  ;;  %v5374_v51 = vrot.slane %v5267_v55, 7  ;;  %v5406_v11 = vrot.slane %v5281_v61, 7 }
 0x4d4   : > { %v5287_v55 = vld [vmem:[#allocation2 + $0x448] sm:$0xf]  ;;  %v5297_v61 = vld [vmem:[#allocation2 + $0x4a0] sm:$0x7] }
 0x4d5   : > { %v4827_v23 = vpop.permute.xlu1 %4826  ;;  %v4825_v40 = vpop.permute.xlu0 %4824  ;;  %v5382_v45 = vsel %vm11270_vm8, %v5380_v37, %v5381_v29  ;;  %v5375_v35 = vsel %vm11270_vm8, %v5373_v52, %v5374_v51  ;;  %v5282_v37 = vld [vmem:[#allocation2 + $0x414] sm:$0x7]  ;;  %v5280_v29 = vld [vmem:[#allocation2 + $0x40c] sm:$0x8] }
 0x4d6   : > { %4906 = vst.msk [vmem:[#allocation3 + $0x40] sm:$0xf] %vm2043_vm14, %v4827_v23  ;;  %v5274_v23 = vld [vmem:[#allocation2 + $0x3d4] sm:$0x8]  ;;  %v9867_v52 = vrot.slane %v5280_v29, 11 }
 0x4d7   : > { %4905 = vst.msk [vmem:[#allocation3 + $0x3c] sm:$0xf] %vm2043_vm14, %v4825_v40  ;;  %v5275_v40 = vld [vmem:[#allocation2 + $0x3d8] sm:$0xf] }
 0x4d8   : > { %5190 = vrot.lane.b32.xlu2 %v5126_v60, %s10497_s17  ;;  %v5379_v60 = vsel %vm11270_vm8, %v9863_v12, %v5378_v54  ;;  %v5409_v12 = vrot.slane %v5282_v37, 7 }
 0x4da   : > { %v4853_v36 = vpop.permute.xlu2 %4852 }
 0x4db   : > { %5188 = vrot.lane.b32.xlu1 %v5122_v38, %s10497_s17  ;;  %5186 = vrot.lane.b32.xlu0 %v5119_v2, %s10497_s17  ;;  %4919 = vst.msk [vmem:[#allocation3 + $0x74] sm:$0xf] %vm2043_vm14, %v4853_v36  ;;  %v9865_v38 = vrot.slane %v5274_v23, 11  ;;  %v5392_v2 = vrot.slane %v5275_v40, 7  ;;  %v5387_v36 = vrot.slane %v5385_v49, 4  ;;  %v5407_v40 = vsel %vm11270_vm8, %v9867_v52, %v5406_v11 }
 0x4dc   : > { %v5286_v49 = vld [vmem:[#allocation2 + $0x444] sm:$0x8]  ;;  %v5299_v52 = vld [vmem:[#allocation2 + $0x4b8] sm:$0xf] }
 0x4dd   : > { %v4833_v43 = vpop.permute.xlu1 %4832  ;;  %v4831_v34 = vpop.permute.xlu0 %4830  ;;  %v5389_v17 = vsel %vm11270_vm8, %v5387_v36, %v5388_v25  ;;  %v5394_v46 = vrot.slane %v5392_v2, 4  ;;  %v9869_v39 = vrot.slane %v5286_v49, 11 }
 0x4de   : > { %4909 = vst.msk [vmem:[#allocation3 + $0x4c] sm:$0xf] %vm2043_vm14, %v4833_v43 }
 0x4df   : > { %4908 = vst.msk [vmem:[#allocation3 + $0x48] sm:$0xf] %vm2043_vm14, %v4831_v34  ;;  %v5393_v34 = vsel %vm11270_vm8, %v9865_v38, %v5392_v2  ;;  %v5285_v38 = vld [vmem:[#allocation2 + $0x430] sm:$0x7] }
 0x4e0   : > { %5469 = vrot.lane.b32.xlu2 %v5361_v44, %s10498_s18  ;;  %v5399_v44 = vrot.slane %v5278_v19, 7 }
 0x4e2   : > { %v5131_v10 = vpop.permute.xlu2 %5130 }
 0x4e3   : > { %5467 = vrot.lane.b32.xlu1 %v5358_v30, %s10498_s18  ;;  %5192 = vrot.lane.b32.xlu0 %v5129_v62, %s10497_s17  ;;  %5226 = vst.msk [vmem:[#allocation3] sm:$0xf] %vm2236_vm15, %v5131_v10  ;;  %v5401_v30 = vrot.slane %v5399_v44, 4  ;;  %v5402_v62 = vrot.slane %v5279_v57, 7  ;;  %v5395_v10 = vrot.slane %v5276_v21, 7  ;;  %v5427_v57 = vrot.slane %v5290_v48, 7 }
 0x4e4   : > { %v5296_v21 = vld [vmem:[#allocation2 + $0x49c] sm:$0xf]  ;;  %v5306_v48 = vld [vmem:[#allocation2 + $0x4f4] sm:$0x7] }
 0x4e5   : > { %v4839_v32 = vpop.permute.xlu1 %4838  ;;  %v4837_v59 = vpop.permute.xlu0 %4836  ;;  %v5403_v1 = vsel %vm11270_vm8, %v5401_v30, %v5402_v62  ;;  %v5396_v54 = vsel %vm11270_vm8, %v5394_v46, %v5395_v10  ;;  %v5291_v30 = vld [vmem:[#allocation2 + $0x468] sm:$0x7]  ;;  %v5289_v62 = vld [vmem:[#allocation2 + $0x460] sm:$0x8] }
 0x4e6   : > { %4912 = vst.msk [vmem:[#allocation3 + $0x58] sm:$0xf] %vm2043_vm14, %v4839_v32  ;;  %v5283_v32 = vld [vmem:[#allocation2 + $0x428] sm:$0x8]  ;;  %v9870_v46 = vrot.slane %v5289_v62, 11 }
 0x4e7   : > { %4911 = vst.msk [vmem:[#allocation3 + $0x54] sm:$0xf] %vm2043_vm14, %v4837_v59  ;;  %v5284_v59 = vld [vmem:[#allocation2 + $0x42c] sm:$0xf] }
 0x4e8   : > { %5475 = vrot.lane.b32.xlu2 %v5372_v9, %s10498_s18  ;;  %v5400_v9 = vsel %vm11270_vm8, %v9866_v58, %v5399_v44  ;;  %v5430_v58 = vrot.slane %v5291_v30, 7 }
 0x4ea   : > { %v5137_v27 = vpop.permute.xlu2 %5136 }
 0x4eb   : > { %5473 = vrot.lane.b32.xlu1 %v5368_v6, %s10498_s18  ;;  %5471 = vrot.lane.b32.xlu0 %v5365_v42, %s10498_s18  ;;  %5229 = vst.msk [vmem:[#allocation3 + $0xc] sm:$0xf] %vm2236_vm15, %v5137_v27  ;;  %v9868_v6 = vrot.slane %v5283_v32, 11  ;;  %v5413_v42 = vrot.slane %v5284_v59, 7  ;;  %v5408_v27 = vrot.slane %v5406_v11, 4  ;;  %v5428_v59 = vsel %vm11270_vm8, %v9870_v46, %v5427_v57 }
 0x4ec   : > { %v5295_v11 = vld [vmem:[#allocation2 + $0x498] sm:$0x8]  ;;  %v5596_v46 = vld [vmem:[#allocation2 + $0x354] sm:$0xf] }
 0x4ed   : > { %v4845_v56 = vpop.permute.xlu1 %4844  ;;  %v4843_v14 = vpop.permute.xlu0 %4842  ;;  %v5410_v23 = vsel %vm11270_vm8, %v5408_v27, %v5409_v12  ;;  %v5415_v13 = vrot.slane %v5413_v42, 4  ;;  %v9872_v37 = vrot.slane %v5295_v11, 11 }
 0x4ee   : > { %4915 = vst.msk [vmem:[#allocation3 + $0x64] sm:$0xf] %vm2043_vm14, %v4845_v56 }
 0x4ef   : > { %4914 = vst.msk [vmem:[#allocation3 + $0x60] sm:$0xf] %vm2043_vm14, %v4843_v14  ;;  %v5414_v14 = vsel %vm11270_vm8, %v9868_v6, %v5413_v42  ;;  %v5294_v6 = vld [vmem:[#allocation2 + $0x484] sm:$0x7] }
 0x4f0   : > { %5481 = vrot.lane.b32.xlu2 %v5382_v45, %s10498_s18  ;;  %v5420_v45 = vrot.slane %v5287_v55, 7 }
 0x4f2   : > { %v5143_v47 = vpop.permute.xlu2 %5142 }
 0x4f3   : > { %5479 = vrot.lane.b32.xlu1 %v5379_v60, %s10498_s18  ;;  %5477 = vrot.lane.b32.xlu0 %v5375_v35, %s10498_s18  ;;  %5232 = vst.msk [vmem:[#allocation3 + $0x18] sm:$0xf] %vm2236_vm15, %v5143_v47  ;;  %v5422_v60 = vrot.slane %v5420_v45, 4  ;;  %v5423_v35 = vrot.slane %v5288_v20, 7  ;;  %v5416_v47 = vrot.slane %v5285_v38, 7  ;;  %v5448_v20 = vrot.slane %v5299_v52, 7 }
 0x4f4   : > { %v5305_v38 = vld [vmem:[#allocation2 + $0x4f0] sm:$0xf] }
 0x4f5   : > { %v4851_v5 = vpop.permute.xlu1 %4850  ;;  %v4849_v43 = vpop.permute.xlu0 %4848  ;;  %v5424_v25 = vsel %vm11270_vm8, %v5422_v60, %v5423_v35  ;;  %v5417_v44 = vsel %vm11270_vm8, %v5415_v13, %v5416_v47  ;;  %v5300_v60 = vld [vmem:[#allocation2 + $0x4bc] sm:$0x7]  ;;  %v5298_v35 = vld [vmem:[#allocation2 + $0x4b4] sm:$0x8]  ;;  %v5603_v52 = vld [vmem:[#allocation2 + $0x390] sm:$0x1] }
 0x4f6   : > { %4918 = vst.msk [vmem:[#allocation3 + $0x70] sm:$0xf] %vm2043_vm14, %v4851_v5  ;;  %v5292_v5 = vld [vmem:[#allocation2 + $0x47c] sm:$0x8]  ;;  %v9873_v13 = vrot.slane %v5298_v35, 11 }
 0x4f7   : > { %4917 = vst.msk [vmem:[#allocation3 + $0x6c] sm:$0xf] %vm2043_vm14, %v4849_v43  ;;  %v5293_v43 = vld [vmem:[#allocation2 + $0x480] sm:$0xf] }
 0x4f8   : > { %5487 = vrot.lane.b32.xlu2 %v5393_v34, %s10498_s18  ;;  %v5421_v34 = vsel %vm11270_vm8, %v9869_v39, %v5420_v45  ;;  %v5451_v39 = vrot.slane %v5300_v60, 7 }
 0x4fa   : > { %v5149_v22 = vpop.permute.xlu2 %5148 }
 0x4fb   : > { %5485 = vrot.lane.b32.xlu1 %v5389_v17, %s10498_s18  ;;  %5483 = vrot.lane.b32.xlu0 %v5386_v28, %s10498_s18  ;;  %5235 = vst.msk [vmem:[#allocation3 + $0x24] sm:$0xf] %vm2236_vm15, %v5149_v22  ;;  %v9871_v17 = vrot.slane %v5292_v5, 11  ;;  %v5434_v28 = vrot.slane %v5293_v43, 7  ;;  %v5429_v22 = vrot.slane %v5427_v57, 4  ;;  %v5449_v43 = vsel %vm11270_vm8, %v9873_v13, %v5448_v20 }
 0x4fc   : > { %v5304_v57 = vld [vmem:[#allocation2 + $0x4ec] sm:$0x8]  ;;  %v5605_v13 = vld [vmem:[#allocation2 + $0x3a8] sm:$0xf] }
 0x4fd   : > { %v4857_v26 = vpop.permute.xlu1 %4856  ;;  %v4855_v4 = vpop.permute.xlu0 %4854  ;;  %v5431_v32 = vsel %vm11270_vm8, %v5429_v22, %v5430_v58  ;;  %v5436_v29 = vrot.slane %v5434_v28, 4  ;;  %v9875_v30 = vrot.slane %v5304_v57, 11 }
 0x4fe   : > { %4921 = vst.msk [vmem:[#allocation3 + $0x7c] sm:$0xf] %vm2043_vm14, %v4857_v26 }
 0x4ff   : > { %4920 = vst.msk [vmem:[#allocation3 + $0x78] sm:$0xf] %vm2043_vm14, %v4855_v4  ;;  %v5435_v4 = vsel %vm11270_vm8, %v9871_v17, %v5434_v28  ;;  %v5303_v17 = vld [vmem:[#allocation2 + $0x4d8] sm:$0x7] }
 0x500   : > { %5493 = vrot.lane.b32.xlu2 %v5403_v1, %s10498_s18  ;;  %v5441_v1 = vrot.slane %v5296_v21, 7 }
 0x502   : > { %v5155_v41 = vpop.permute.xlu2 %5154 }
 0x503   : > { %5491 = vrot.lane.b32.xlu1 %v5400_v9, %s10498_s18  ;;  %5489 = vrot.lane.b32.xlu0 %v5396_v54, %s10498_s18  ;;  %5238 = vst.msk [vmem:[#allocation3 + $0x30] sm:$0xf] %vm2236_vm15, %v5155_v41  ;;  %v5443_v9 = vrot.slane %v5441_v1, 4  ;;  %v5444_v54 = vrot.slane %v5297_v61, 7  ;;  %v5437_v41 = vrot.slane %v5294_v6, 7  ;;  %v5693_v61 = vrot.slane %v5596_v46, 5 }
 0x504   : > { %v5602_v6 = vld [vmem:[#allocation2 + $0x38c] sm:$0xf]  ;;  %v5612_v46 = vld [vmem:[#allocation2 + $0x3e4] sm:$0x1] }
 0x505   : > { %v5135_v51 = vpop.permute.xlu1 %5134  ;;  %v5133_v56 = vpop.permute.xlu0 %5132  ;;  %v5445_v12 = vsel %vm11270_vm8, %v5443_v9, %v5444_v54  ;;  %v5438_v45 = vsel %vm11270_vm8, %v5436_v29, %v5437_v41  ;;  %v5597_v9 = vld [vmem:[#allocation2 + $0x358] sm:$0x1]  ;;  %v5595_v54 = vld [vmem:[#allocation2 + $0x350] sm:$0xe] }
 0x506   : > { %5228 = vst.msk [vmem:[#allocation3 + $0x8] sm:$0xf] %vm2236_vm15, %v5135_v51  ;;  %v5301_v51 = vld [vmem:[#allocation2 + $0x4d0] sm:$0x8]  ;;  %v9876_v29 = vrot.slane %v5595_v54, 9 }
 0x507   : > { %5227 = vst.msk [vmem:[#allocation3 + $0x4] sm:$0xf] %vm2236_vm15, %v5133_v56  ;;  %v5302_v56 = vld [vmem:[#allocation2 + $0x4d4] sm:$0xf] }
 0x508   : > { %5499 = vrot.lane.b32.xlu2 %v5414_v14, %s10498_s18  ;;  %v5442_v14 = vsel %vm11270_vm8, %v9872_v37, %v5441_v1  ;;  %v5696_v37 = vrot.slane %v5597_v9, 5 }
 0x50a   : > { %v5161_v2 = vpop.permute.xlu2 %5160 }
 0x50b   : > { %5497 = vrot.lane.b32.xlu1 %v5410_v23, %s10498_s18  ;;  %5495 = vrot.lane.b32.xlu0 %v5407_v40, %s10498_s18  ;;  %5241 = vst.msk [vmem:[#allocation3 + $0x3c] sm:$0xf] %vm2236_vm15, %v5161_v2  ;;  %v9874_v23 = vrot.slane %v5301_v51, 11  ;;  %v5455_v40 = vrot.slane %v5302_v56, 7  ;;  %v5450_v2 = vrot.slane %v5448_v20, 4  ;;  %v5694_v56 = vsel %vm10607_vm3, %v9876_v29, %v5693_v61 }
 0x50c   : > { %v5601_v20 = vld [vmem:[#allocation2 + $0x388] sm:$0xe]  ;;  %v5614_v29 = vld [vmem:[#allocation2 + $0x3fc] sm:$0xf] }
 0x50d   : > { %v5141_v19 = vpop.permute.xlu1 %5140  ;;  %v5139_v36 = vpop.permute.xlu0 %5138  ;;  %v5452_v5 = vsel %vm11270_vm8, %v5450_v2, %v5451_v39  ;;  %v5457_v62 = vrot.slane %v5455_v40, 4  ;;  %v9878_v60 = vrot.slane %v5601_v20, 9 }
 0x50e   : > { %5231 = vst.msk [vmem:[#allocation3 + $0x14] sm:$0xf] %vm2236_vm15, %v5141_v19 }
 0x50f   : > { %5230 = vst.msk [vmem:[#allocation3 + $0x10] sm:$0xf] %vm2236_vm15, %v5139_v36  ;;  %v5456_v36 = vsel %vm11270_vm8, %v9874_v23, %v5455_v40  ;;  %v5600_v23 = vld [vmem:[#allocation2 + $0x374] sm:$0x1] }
 0x510   : > { %5505 = vrot.lane.b32.xlu2 %v5424_v25, %s10498_s18  ;;  %v5462_v25 = vrot.slane %v5305_v38, 7 }
 0x512   : > { %v5167_v50 = vpop.permute.xlu2 %5166 }
 0x513   : > { %5503 = vrot.lane.b32.xlu1 %v5421_v34, %s10498_s18  ;;  %5501 = vrot.lane.b32.xlu0 %v5417_v44, %s10498_s18  ;;  %5244 = vst.msk [vmem:[#allocation3 + $0x48] sm:$0xf] %vm2236_vm15, %v5167_v50  ;;  %v5464_v34 = vrot.slane %v5462_v25, 4  ;;  %v5465_v44 = vrot.slane %v5306_v48, 7  ;;  %v5458_v50 = vrot.slane %v5303_v17, 7  ;;  %v5714_v48 = vrot.slane %v5605_v13, 5 }
 0x514   : > { %v5611_v17 = vld [vmem:[#allocation2 + $0x3e0] sm:$0xf]  ;;  %v5621_v13 = vld [vmem:[#allocation2 + $0x438] sm:$0x1] }
 0x515   : > { %v5147_v10 = vpop.permute.xlu1 %5146  ;;  %v5145_v26 = vpop.permute.xlu0 %5144  ;;  %v5466_v58 = vsel %vm11270_vm8, %v5464_v34, %v5465_v44  ;;  %v5459_v1 = vsel %vm11270_vm8, %v5457_v62, %v5458_v50  ;;  %v5606_v34 = vld [vmem:[#allocation2 + $0x3ac] sm:$0x1]  ;;  %v5604_v44 = vld [vmem:[#allocation2 + $0x3a4] sm:$0xe] }
 0x516   : > { %5234 = vst.msk [vmem:[#allocation3 + $0x20] sm:$0xf] %vm2236_vm15, %v5147_v10  ;;  %v5598_v10 = vld [vmem:[#allocation2 + $0x36c] sm:$0xe]  ;;  %v9879_v62 = vrot.slane %v5604_v44, 9 }
 0x517   : > { %5233 = vst.msk [vmem:[#allocation3 + $0x1c] sm:$0xf] %vm2236_vm15, %v5145_v26  ;;  %v5599_v26 = vld [vmem:[#allocation2 + $0x370] sm:$0xf] }
 0x518   : > { %5511 = vrot.lane.b32.xlu2 %v5435_v4, %s10498_s18  ;;  %v5463_v4 = vsel %vm11270_vm8, %v9875_v30, %v5462_v25  ;;  %v5717_v30 = vrot.slane %v5606_v34, 5 }
 0x51a   : > { %v5173_v42 = vpop.permute.xlu2 %5172 }
 0x51b   : > { %5509 = vrot.lane.b32.xlu1 %v5431_v32, %s10498_s18  ;;  %5507 = vrot.lane.b32.xlu0 %v5428_v59, %s10498_s18  ;;  %5247 = vst.msk [vmem:[#allocation3 + $0x54] sm:$0xf] %vm2236_vm15, %v5173_v42  ;;  %v9877_v32 = vrot.slane %v5598_v10, 9  ;;  %v5700_v59 = vrot.slane %v5599_v26, 5  ;;  %v5695_v42 = vrot.slane %v5693_v61, 4  ;;  %v5715_v26 = vsel %vm10607_vm3, %v9879_v62, %v5714_v48 }
 0x51c   : > { %v5610_v61 = vld [vmem:[#allocation2 + $0x3dc] sm:$0xe]  ;;  %v5623_v62 = vld [vmem:[#allocation2 + $0x450] sm:$0xf] }
 0x51d   : > { %v5153_v55 = vpop.permute.xlu1 %5152  ;;  %v5151_v27 = vpop.permute.xlu0 %5150  ;;  %v5697_v51 = vsel %vm10607_vm3, %v5695_v42, %v5696_v37  ;;  %v5702_v35 = vrot.slane %v5700_v59, 4  ;;  %v9881_v9 = vrot.slane %v5610_v61, 9 }
 0x51e   : > { %5237 = vst.msk [vmem:[#allocation3 + $0x2c] sm:$0xf] %vm2236_vm15, %v5153_v55 }
 0x51f   : > { %5236 = vst.msk [vmem:[#allocation3 + $0x28] sm:$0xf] %vm2236_vm15, %v5151_v27  ;;  %v5701_v27 = vsel %vm10607_vm3, %v9877_v32, %v5700_v59  ;;  %v5609_v32 = vld [vmem:[#allocation2 + $0x3c8] sm:$0x1] }
 0x520   : > { %5517 = vrot.lane.b32.xlu2 %v5445_v12, %s10498_s18  ;;  %v5707_v12 = vrot.slane %v5602_v6, 5 }
 0x522   : > { %v5179_v49 = vpop.permute.xlu2 %5178 }
 0x523   : > { %5515 = vrot.lane.b32.xlu1 %v5442_v14, %s10498_s18  ;;  %5513 = vrot.lane.b32.xlu0 %v5438_v45, %s10498_s18  ;;  %5250 = vst.msk [vmem:[#allocation3 + $0x60] sm:$0xf] %vm2236_vm15, %v5179_v49  ;;  %v5709_v14 = vrot.slane %v5707_v12, 4  ;;  %v5710_v45 = vrot.slane %v5603_v52, 5  ;;  %v5703_v49 = vrot.slane %v5600_v23, 5  ;;  %v5735_v52 = vrot.slane %v5614_v29, 5 }
 0x524   : > { %v5620_v23 = vld [vmem:[#allocation2 + $0x434] sm:$0xf]  ;;  %v5630_v29 = vld [vmem:[#allocation2 + $0x48c] sm:$0x1] }
 0x525   : > { %v5159_v47 = vpop.permute.xlu1 %5158  ;;  %v5157_v19 = vpop.permute.xlu0 %5156  ;;  %v5711_v39 = vsel %vm10607_vm3, %v5709_v14, %v5710_v45  ;;  %v5704_v25 = vsel %vm10607_vm3, %v5702_v35, %v5703_v49  ;;  %v5615_v14 = vld [vmem:[#allocation2 + $0x400] sm:$0x1]  ;;  %v5613_v45 = vld [vmem:[#allocation2 + $0x3f8] sm:$0xe] }
 0x526   : > { %5240 = vst.msk [vmem:[#allocation3 + $0x38] sm:$0xf] %vm2236_vm15, %v5159_v47  ;;  %v5607_v47 = vld [vmem:[#allocation2 + $0x3c0] sm:$0xe]  ;;  %v9882_v35 = vrot.slane %v5613_v45, 9 }
 0x527   : > { %5239 = vst.msk [vmem:[#allocation3 + $0x34] sm:$0xf] %vm2236_vm15, %v5157_v19  ;;  %v5608_v19 = vld [vmem:[#allocation2 + $0x3c4] sm:$0xf] }
 0x528   : > { %5523 = vrot.lane.b32.xlu2 %v5456_v36, %s10498_s18  ;;  %v5708_v36 = vsel %vm10607_vm3, %v9878_v60, %v5707_v12  ;;  %v5738_v60 = vrot.slane %v5615_v14, 5 }
 0x52a   : > { %v5185_v28 = vpop.permute.xlu2 %5184 }
 0x52b   : > { %5521 = vrot.lane.b32.xlu1 %v5452_v5, %s10498_s18  ;;  %5519 = vrot.lane.b32.xlu0 %v5449_v43, %s10498_s18  ;;  %5253 = vst.msk [vmem:[#allocation3 + $0x6c] sm:$0xf] %vm2236_vm15, %v5185_v28  ;;  %v9880_v5 = vrot.slane %v5607_v47, 9  ;;  %v5721_v43 = vrot.slane %v5608_v19, 5  ;;  %v5716_v28 = vrot.slane %v5714_v48, 4  ;;  %v5736_v19 = vsel %vm10607_vm3, %v9882_v35, %v5735_v52 }
 0x52c   : > { %v5619_v48 = vld [vmem:[#allocation2 + $0x430] sm:$0xe]  ;;  %v5632_v35 = vld [vmem:[#allocation2 + $0x4a4] sm:$0xf] }
 0x52d   : > { %v5165_v21 = vpop.permute.xlu1 %5164  ;;  %v5163_v22 = vpop.permute.xlu0 %5162  ;;  %v5718_v10 = vsel %vm10607_vm3, %v5716_v28, %v5717_v30  ;;  %v5723_v54 = vrot.slane %v5721_v43, 4  ;;  %v9884_v34 = vrot.slane %v5619_v48, 9 }
 0x52e   : > { %5243 = vst.msk [vmem:[#allocation3 + $0x44] sm:$0xf] %vm2236_vm15, %v5165_v21 }
 0x52f   : > { %5242 = vst.msk [vmem:[#allocation3 + $0x40] sm:$0xf] %vm2236_vm15, %v5163_v22  ;;  %v5722_v22 = vsel %vm10607_vm3, %v9880_v5, %v5721_v43  ;;  %v5618_v5 = vld [vmem:[#allocation2 + $0x41c] sm:$0x1] }
 0x530   : > { %5529 = vrot.lane.b32.xlu2 %v5466_v58, %s10498_s18  ;;  %v5728_v58 = vrot.slane %v5611_v17, 5 }
 0x532   : > { %v5191_v11 = vpop.permute.xlu2 %5190 }
 0x533   : > { %5527 = vrot.lane.b32.xlu1 %v5463_v4, %s10498_s18  ;;  %5525 = vrot.lane.b32.xlu0 %v5459_v1, %s10498_s18  ;;  %5256 = vst.msk [vmem:[#allocation3 + $0x78] sm:$0xf] %vm2236_vm15, %v5191_v11  ;;  %v5730_v4 = vrot.slane %v5728_v58, 4  ;;  %v5731_v1 = vrot.slane %v5612_v46, 5  ;;  %v5724_v11 = vrot.slane %v5609_v32, 5  ;;  %v5756_v46 = vrot.slane %v5623_v62, 5 }
 0x534   : > { %v5629_v32 = vld [vmem:[#allocation2 + $0x488] sm:$0xf]  ;;  %v5639_v62 = vld [vmem:[#allocation2 + $0x4e0] sm:$0x1] }
 0x535   : > { %v5171_v41 = vpop.permute.xlu1 %5170  ;;  %v5169_v55 = vpop.permute.xlu0 %5168  ;;  %v5732_v37 = vsel %vm10607_vm3, %v5730_v4, %v5731_v1  ;;  %v5725_v12 = vsel %vm10607_vm3, %v5723_v54, %v5724_v11  ;;  %v5624_v4 = vld [vmem:[#allocation2 + $0x454] sm:$0x1]  ;;  %v5622_v1 = vld [vmem:[#allocation2 + $0x44c] sm:$0xe] }
 0x536   : > { %5246 = vst.msk [vmem:[#allocation3 + $0x50] sm:$0xf] %vm2236_vm15, %v5171_v41  ;;  %v5616_v41 = vld [vmem:[#allocation2 + $0x414] sm:$0xe]  ;;  %v9885_v54 = vrot.slane %v5622_v1, 9 }
 0x537   : > { %5245 = vst.msk [vmem:[#allocation3 + $0x4c] sm:$0xf] %vm2236_vm15, %v5169_v55  ;;  %v5617_v55 = vld [vmem:[#allocation2 + $0x418] sm:$0xf] }
 0x538   : > { %5807 = vrot.lane.b32.xlu2 %v5701_v27, %s10499_s19  ;;  %v5729_v27 = vsel %vm10607_vm3, %v9881_v9, %v5728_v58  ;;  %v5759_v9 = vrot.slane %v5624_v4, 5 }
 0x53a   : > { %v5470_v40 = vpop.permute.xlu2 %5469 }
 0x53b   : > { %5805 = vrot.lane.b32.xlu1 %v5697_v51, %s10499_s19  ;;  %5803 = vrot.lane.b32.xlu0 %v5694_v56, %s10499_s19  ;;  %5564 = vst.msk [vmem:[#allocation3 + $0x4] sm:$0xf] %vm2574_vm1, %v5470_v40  ;;  %v9883_v51 = vrot.slane %v5616_v41, 9  ;;  %v5742_v56 = vrot.slane %v5617_v55, 5  ;;  %v5737_v40 = vrot.slane %v5735_v52, 4  ;;  %v5757_v55 = vsel %vm10607_vm3, %v9885_v54, %v5756_v46 }
 0x53c   : > { %v5628_v52 = vld [vmem:[#allocation2 + $0x484] sm:$0xe]  ;;  %v5641_v54 = vld [vmem:[#allocation2 + $0x4f8] sm:$0xf] }
 0x53d   : > { %v5177_v38 = vpop.permute.xlu1 %5176  ;;  %v5175_v2 = vpop.permute.xlu0 %5174  ;;  %v5739_v47 = vsel %vm10607_vm3, %v5737_v40, %v5738_v60  ;;  %v5744_v44 = vrot.slane %v5742_v56, 4  ;;  %v9887_v14 = vrot.slane %v5628_v52, 9 }
 0x53e   : > { %5249 = vst.msk [vmem:[#allocation3 + $0x5c] sm:$0xf] %vm2236_vm15, %v5177_v38 }
 0x53f   : > { %5248 = vst.msk [vmem:[#allocation3 + $0x58] sm:$0xf] %vm2236_vm15, %v5175_v2  ;;  %v5743_v2 = vsel %vm10607_vm3, %v9883_v51, %v5742_v56  ;;  %v5627_v51 = vld [vmem:[#allocation2 + $0x470] sm:$0x1] }
 0x540   : > { %5813 = vrot.lane.b32.xlu2 %v5711_v39, %s10499_s19  ;;  %v5749_v39 = vrot.slane %v5620_v23, 5 }
 0x542   : > { %v5476_v57 = vpop.permute.xlu2 %5475 }
 0x543   : > { %5811 = vrot.lane.b32.xlu1 %v5708_v36, %s10499_s19  ;;  %5809 = vrot.lane.b32.xlu0 %v5704_v25, %s10499_s19  ;;  %5567 = vst.msk [vmem:[#allocation3 + $0x10] sm:$0xf] %vm2574_vm1, %v5476_v57  ;;  %v5751_v36 = vrot.slane %v5749_v39, 4  ;;  %v5752_v25 = vrot.slane %v5621_v13, 5  ;;  %v5745_v57 = vrot.slane %v5618_v5, 5  ;;  %v5777_v13 = vrot.slane %v5632_v35, 5 }
 0x544   : > { %v5638_v5 = vld [vmem:[#allocation2 + $0x4dc] sm:$0xf]  ;;  %v5936_v35 = vld [vmem:[#allocation2 + $0x378] sm:$0x7] }
 0x545   : > { %v5183_v50 = vpop.permute.xlu1 %5182  ;;  %v5181_v21 = vpop.permute.xlu0 %5180  ;;  %v5753_v30 = vsel %vm10607_vm3, %v5751_v36, %v5752_v25  ;;  %v5746_v58 = vsel %vm10607_vm3, %v5744_v44, %v5745_v57  ;;  %v5633_v36 = vld [vmem:[#allocation2 + $0x4a8] sm:$0x1]  ;;  %v5631_v25 = vld [vmem:[#allocation2 + $0x4a0] sm:$0xe] }
 0x546   : > { %5252 = vst.msk [vmem:[#allocation3 + $0x68] sm:$0xf] %vm2236_vm15, %v5183_v50  ;;  %v5625_v50 = vld [vmem:[#allocation2 + $0x468] sm:$0xe]  ;;  %v9888_v44 = vrot.slane %v5631_v25, 9 }
 0x547   : > { %5251 = vst.msk [vmem:[#allocation3 + $0x64] sm:$0xf] %vm2236_vm15, %v5181_v21  ;;  %v5626_v21 = vld [vmem:[#allocation2 + $0x46c] sm:$0xf] }
 0x548   : > { %5819 = vrot.lane.b32.xlu2 %v5722_v22, %s10499_s19  ;;  %v5750_v22 = vsel %vm10607_vm3, %v9884_v34, %v5749_v39  ;;  %v5780_v34 = vrot.slane %v5633_v36, 5 }
 0x54a   : > { %v5482_v59 = vpop.permute.xlu2 %5481 }
 0x54b   : > { %5817 = vrot.lane.b32.xlu1 %v5718_v10, %s10499_s19  ;;  %5815 = vrot.lane.b32.xlu0 %v5715_v26, %s10499_s19  ;;  %5570 = vst.msk [vmem:[#allocation3 + $0x1c] sm:$0xf] %vm2574_vm1, %v5482_v59  ;;  %v9886_v10 = vrot.slane %v5625_v50, 9  ;;  %v5763_v26 = vrot.slane %v5626_v21, 5  ;;  %v5758_v59 = vrot.slane %v5756_v46, 4  ;;  %v5778_v21 = vsel %vm10607_vm3, %v9888_v44, %v5777_v13 }
 0x54c   : > { %v5637_v46 = vld [vmem:[#allocation2 + $0x4d8] sm:$0xe]  ;;  %v5938_v44 = vld [vmem:[#allocation2 + $0x390] sm:$0xf] }
 0x54d   : > { %v5189_v6 = vpop.permute.xlu1 %5188  ;;  %v5187_v42 = vpop.permute.xlu0 %5186  ;;  %v5760_v41 = vsel %vm10607_vm3, %v5758_v59, %v5759_v9  ;;  %v5765_v45 = vrot.slane %v5763_v26, 4  ;;  %v9890_v4 = vrot.slane %v5637_v46, 9 }
 0x54e   : > { %5255 = vst.msk [vmem:[#allocation3 + $0x74] sm:$0xf] %vm2236_vm15, %v5189_v6 }
 0x54f   : > { %5254 = vst.msk [vmem:[#allocation3 + $0x70] sm:$0xf] %vm2236_vm15, %v5187_v42  ;;  %v5764_v42 = vsel %vm10607_vm3, %v9886_v10, %v5763_v26  ;;  %v5636_v10 = vld [vmem:[#allocation2 + $0x4c4] sm:$0x1] }
 0x550   : > { %5825 = vrot.lane.b32.xlu2 %v5732_v37, %s10499_s19  ;;  %v5770_v37 = vrot.slane %v5629_v32, 5 }
 0x552   : > { %v5488_v20 = vpop.permute.xlu2 %5487 }
 0x553   : > { %5823 = vrot.lane.b32.xlu1 %v5729_v27, %s10499_s19  ;;  %5821 = vrot.lane.b32.xlu0 %v5725_v12, %s10499_s19  ;;  %5573 = vst.msk [vmem:[#allocation3 + $0x28] sm:$0xf] %vm2574_vm1, %v5488_v20  ;;  %v5772_v27 = vrot.slane %v5770_v37, 4  ;;  %v5773_v12 = vrot.slane %v5630_v29, 5  ;;  %v5766_v20 = vrot.slane %v5627_v51, 5  ;;  %v5798_v29 = vrot.slane %v5641_v54, 5 }
 0x554   : > { %v5935_v51 = vld [vmem:[#allocation2 + $0x374] sm:$0xf]  ;;  %v5945_v54 = vld [vmem:[#allocation2 + $0x3cc] sm:$0x7] }
 0x555   : > { %v5468_v49 = vpop.permute.xlu1 %5467  ;;  %v5193_v38 = vpop.permute.xlu0 %5192  ;;  %v5774_v60 = vsel %vm10607_vm3, %v5772_v27, %v5773_v12  ;;  %v5767_v39 = vsel %vm10607_vm3, %v5765_v45, %v5766_v20  ;;  %v5642_v27 = vld [vmem:[#allocation2 + $0x4fc] sm:$0x1]  ;;  %v5640_v12 = vld [vmem:[#allocation2 + $0x4f4] sm:$0xe] }
 0x556   : > { %5563 = vst.msk [vmem:[#allocation3] sm:$0xf] %vm2574_vm1, %v5468_v49  ;;  %v5634_v49 = vld [vmem:[#allocation2 + $0x4bc] sm:$0xe]  ;;  %v9891_v45 = vrot.slane %v5640_v12, 9 }
 0x557   : > { %5257 = vst.msk [vmem:[#allocation3 + $0x7c] sm:$0xf] %vm2236_vm15, %v5193_v38  ;;  %v5635_v38 = vld [vmem:[#allocation2 + $0x4c0] sm:$0xf] }
 0x558   : > { %5831 = vrot.lane.b32.xlu2 %v5743_v2, %s10499_s19  ;;  %v5771_v2 = vsel %vm10607_vm3, %v9887_v14, %v5770_v37  ;;  %v5801_v14 = vrot.slane %v5642_v27, 5 }
 0x55a   : > { %v5494_v43 = vpop.permute.xlu2 %5493 }
 0x55b   : > { %5829 = vrot.lane.b32.xlu1 %v5739_v47, %s10499_s19  ;;  %5827 = vrot.lane.b32.xlu0 %v5736_v19, %s10499_s19  ;;  %5576 = vst.msk [vmem:[#allocation3 + $0x34] sm:$0xf] %vm2574_vm1, %v5494_v43  ;;  %v9889_v47 = vrot.slane %v5634_v49, 9  ;;  %v5784_v19 = vrot.slane %v5635_v38, 5  ;;  %v5779_v43 = vrot.slane %v5777_v13, 4  ;;  %v5799_v38 = vsel %vm10607_vm3, %v9891_v45, %v5798_v29 }
 0x55c   : > { %v5934_v13 = vld [vmem:[#allocation2 + $0x370] sm:$0x8]  ;;  %v5947_v45 = vld [vmem:[#allocation2 + $0x3e4] sm:$0xf] }
 0x55d   : > { %v5474_v17 = vpop.permute.xlu1 %5473  ;;  %v5472_v28 = vpop.permute.xlu0 %5471  ;;  %v5781_v50 = vsel %vm10607_vm3, %v5779_v43, %v5780_v34  ;;  %v5786_v1 = vrot.slane %v5784_v19, 4  ;;  %v9893_v36 = vrot.slane %v5934_v13, 11 }
 0x55e   : > { %5566 = vst.msk [vmem:[#allocation3 + $0xc] sm:$0xf] %vm2574_vm1, %v5474_v17 }
 0x55f   : > { %5565 = vst.msk [vmem:[#allocation3 + $0x8] sm:$0xf] %vm2574_vm1, %v5472_v28  ;;  %v5785_v28 = vsel %vm10607_vm3, %v9889_v47, %v5784_v19  ;;  %v5933_v47 = vld [vmem:[#allocation2 + $0x35c] sm:$0x7] }
 0x560   : > { %5837 = vrot.lane.b32.xlu2 %v5753_v30, %s10499_s19  ;;  %v5791_v30 = vrot.slane %v5638_v5, 5 }
 0x562   : > { %v5500_v61 = vpop.permute.xlu2 %5499 }
 0x563   : > { %5835 = vrot.lane.b32.xlu1 %v5750_v22, %s10499_s19  ;;  %5833 = vrot.lane.b32.xlu0 %v5746_v58, %s10499_s19  ;;  %5579 = vst.msk [vmem:[#allocation3 + $0x40] sm:$0xf] %vm2574_vm1, %v5500_v61  ;;  %v5793_v22 = vrot.slane %v5791_v30, 4  ;;  %v5794_v58 = vrot.slane %v5639_v62, 5  ;;  %v5787_v61 = vrot.slane %v5636_v10, 5  ;;  %v6043_v62 = vrot.slane %v5938_v44, 7 }
 0x564   : > { %v5944_v10 = vld [vmem:[#allocation2 + $0x3c8] sm:$0xf]  ;;  %v5954_v44 = vld [vmem:[#allocation2 + $0x420] sm:$0x7] }
 0x565   : > { %v5480_v11 = vpop.permute.xlu1 %5479  ;;  %v5478_v6 = vpop.permute.xlu0 %5477  ;;  %v5795_v9 = vsel %vm10607_vm3, %v5793_v22, %v5794_v58  ;;  %v5788_v37 = vsel %vm10607_vm3, %v5786_v1, %v5787_v61  ;;  %v5939_v22 = vld [vmem:[#allocation2 + $0x394] sm:$0x7]  ;;  %v5937_v58 = vld [vmem:[#allocation2 + $0x38c] sm:$0x8] }
 0x566   : > { %5569 = vst.msk [vmem:[#allocation3 + $0x18] sm:$0xf] %vm2574_vm1, %v5480_v11  ;;  %v5931_v11 = vld [vmem:[#allocation2 + $0x354] sm:$0x8]  ;;  %v9894_v1 = vrot.slane %v5937_v58, 11 }
 0x567   : > { %5568 = vst.msk [vmem:[#allocation3 + $0x14] sm:$0xf] %vm2574_vm1, %v5478_v6  ;;  %v5932_v6 = vld [vmem:[#allocation2 + $0x358] sm:$0xf] }
 0x568   : > { %5843 = vrot.lane.b32.xlu2 %v5764_v42, %s10499_s19  ;;  %v5792_v42 = vsel %vm10607_vm3, %v9890_v4, %v5791_v30  ;;  %v6046_v4 = vrot.slane %v5939_v22, 7 }
 0x56a   : > { %v5506_v56 = vpop.permute.xlu2 %5505 }
 0x56b   : > { %5841 = vrot.lane.b32.xlu1 %v5760_v41, %s10499_s19  ;;  %5839 = vrot.lane.b32.xlu0 %v5757_v55, %s10499_s19  ;;  %5582 = vst.msk [vmem:[#allocation3 + $0x4c] sm:$0xf] %vm2574_vm1, %v5506_v56  ;;  %v9892_v41 = vrot.slane %v5931_v11, 11  ;;  %v6029_v55 = vrot.slane %v5932_v6, 7  ;;  %v5800_v56 = vrot.slane %v5798_v29, 4  ;;  %v6044_v6 = vsel %vm11270_vm8, %v9894_v1, %v6043_v62 }
 0x56c   : > { %v5943_v29 = vld [vmem:[#allocation2 + $0x3c4] sm:$0x8]  ;;  %v5956_v1 = vld [vmem:[#allocation2 + $0x438] sm:$0xf] }
 0x56d   : > { %v5486_v23 = vpop.permute.xlu1 %5485  ;;  %v5484_v40 = vpop.permute.xlu0 %5483  ;;  %v5802_v49 = vsel %vm10607_vm3, %v5800_v56, %v5801_v14  ;;  %v6031_v25 = vrot.slane %v6029_v55, 4  ;;  %v9896_v27 = vrot.slane %v5943_v29, 11 }
 0x56e   : > { %5572 = vst.msk [vmem:[#allocation3 + $0x24] sm:$0xf] %vm2574_vm1, %v5486_v23 }
 0x56f   : > { %5571 = vst.msk [vmem:[#allocation3 + $0x20] sm:$0xf] %vm2574_vm1, %v5484_v40  ;;  %v6030_v40 = vsel %vm11270_vm8, %v9892_v41, %v6029_v55  ;;  %v5942_v41 = vld [vmem:[#allocation2 + $0x3b0] sm:$0x7] }
 0x570   : > { %5849 = vrot.lane.b32.xlu2 %v5774_v60, %s10499_s19  ;;  %v6036_v60 = vrot.slane %v5935_v51, 7 }
 0x572   : > { %v5512_v48 = vpop.permute.xlu2 %5511 }
 0x573   : > { %5847 = vrot.lane.b32.xlu1 %v5771_v2, %s10499_s19  ;;  %5845 = vrot.lane.b32.xlu0 %v5767_v39, %s10499_s19  ;;  %5585 = vst.msk [vmem:[#allocation3 + $0x58] sm:$0xf] %vm2574_vm1, %v5512_v48  ;;  %v6038_v2 = vrot.slane %v6036_v60, 4  ;;  %v6039_v39 = vrot.slane %v5936_v35, 7  ;;  %v6032_v48 = vrot.slane %v5933_v47, 7  ;;  %v6064_v35 = vrot.slane %v5947_v45, 7 }
 0x574   : > { %v5953_v47 = vld [vmem:[#allocation2 + $0x41c] sm:$0xf]  ;;  %v5963_v45 = vld [vmem:[#allocation2 + $0x474] sm:$0x7] }
 0x575   : > { %v5492_v57 = vpop.permute.xlu1 %5491  ;;  %v5490_v17 = vpop.permute.xlu0 %5489  ;;  %v6040_v34 = vsel %vm11270_vm8, %v6038_v2, %v6039_v39  ;;  %v6033_v30 = vsel %vm11270_vm8, %v6031_v25, %v6032_v48  ;;  %v5948_v2 = vld [vmem:[#allocation2 + $0x3e8] sm:$0x7]  ;;  %v5946_v39 = vld [vmem:[#allocation2 + $0x3e0] sm:$0x8] }
 0x576   : > { %5575 = vst.msk [vmem:[#allocation3 + $0x30] sm:$0xf] %vm2574_vm1, %v5492_v57  ;;  %v5940_v57 = vld [vmem:[#allocation2 + $0x3a8] sm:$0x8]  ;;  %v9897_v25 = vrot.slane %v5946_v39, 11 }
 0x577   : > { %5574 = vst.msk [vmem:[#allocation3 + $0x2c] sm:$0xf] %vm2574_vm1, %v5490_v17  ;;  %v5941_v17 = vld [vmem:[#allocation2 + $0x3ac] sm:$0xf] }
 0x578   : > { %5855 = vrot.lane.b32.xlu2 %v5785_v28, %s10499_s19  ;;  %v6037_v28 = vsel %vm11270_vm8, %v9893_v36, %v6036_v60  ;;  %v6067_v36 = vrot.slane %v5948_v2, 7 }
 0x57a   : > { %v5518_v26 = vpop.permute.xlu2 %5517 }
 0x57b   : > { %5853 = vrot.lane.b32.xlu1 %v5781_v50, %s10499_s19  ;;  %5851 = vrot.lane.b32.xlu0 %v5778_v21, %s10499_s19  ;;  %5588 = vst.msk [vmem:[#allocation3 + $0x64] sm:$0xf] %vm2574_vm1, %v5518_v26  ;;  %v9895_v50 = vrot.slane %v5940_v57, 11  ;;  %v6050_v21 = vrot.slane %v5941_v17, 7  ;;  %v6045_v26 = vrot.slane %v6043_v62, 4  ;;  %v6065_v17 = vsel %vm11270_vm8, %v9897_v25, %v6064_v35 }
 0x57c   : > { %v5952_v62 = vld [vmem:[#allocation2 + $0x418] sm:$0x8]  ;;  %v5965_v25 = vld [vmem:[#allocation2 + $0x48c] sm:$0xf] }
 0x57d   : > { %v5498_v32 = vpop.permute.xlu1 %5497  ;;  %v5496_v59 = vpop.permute.xlu0 %5495  ;;  %v6047_v11 = vsel %vm11270_vm8, %v6045_v26, %v6046_v4  ;;  %v6052_v12 = vrot.slane %v6050_v21, 4  ;;  %v9899_v22 = vrot.slane %v5952_v62, 11 }
 0x57e   : > { %5578 = vst.msk [vmem:[#allocation3 + $0x3c] sm:$0xf] %vm2574_vm1, %v5498_v32 }
 0x57f   : > { %5577 = vst.msk [vmem:[#allocation3 + $0x38] sm:$0xf] %vm2574_vm1, %v5496_v59  ;;  %v6051_v59 = vsel %vm11270_vm8, %v9895_v50, %v6050_v21  ;;  %v5951_v50 = vld [vmem:[#allocation2 + $0x404] sm:$0x7] }
 0x580   : > { %5861 = vrot.lane.b32.xlu2 %v5795_v9, %s10499_s19  ;;  %v6057_v9 = vrot.slane %v5944_v10, 7 }
 0x582   : > { %v5524_v52 = vpop.permute.xlu2 %5523 }
 0x583   : > { %5859 = vrot.lane.b32.xlu1 %v5792_v42, %s10499_s19  ;;  %5857 = vrot.lane.b32.xlu0 %v5788_v37, %s10499_s19  ;;  %5591 = vst.msk [vmem:[#allocation3 + $0x70] sm:$0xf] %vm2574_vm1, %v5524_v52  ;;  %v6059_v42 = vrot.slane %v6057_v9, 4  ;;  %v6060_v37 = vrot.slane %v5945_v54, 7  ;;  %v6053_v52 = vrot.slane %v5942_v41, 7  ;;  %v6085_v54 = vrot.slane %v5956_v1, 7 }
 0x584   : > { %v5962_v41 = vld [vmem:[#allocation2 + $0x470] sm:$0xf]  ;;  %v5972_v1 = vld [vmem:[#allocation2 + $0x4c8] sm:$0x7] }
 0x585   : > { %v5504_v20 = vpop.permute.xlu1 %5503  ;;  %v5502_v23 = vpop.permute.xlu0 %5501  ;;  %v6061_v14 = vsel %vm11270_vm8, %v6059_v42, %v6060_v37  ;;  %v6054_v60 = vsel %vm11270_vm8, %v6052_v12, %v6053_v52  ;;  %v5957_v42 = vld [vmem:[#allocation2 + $0x43c] sm:$0x7]  ;;  %v5955_v37 = vld [vmem:[#allocation2 + $0x434] sm:$0x8] }
 0x586   : > { %5581 = vst.msk [vmem:[#allocation3 + $0x48] sm:$0xf] %vm2574_vm1, %v5504_v20  ;;  %v5949_v20 = vld [vmem:[#allocation2 + $0x3fc] sm:$0x8]  ;;  %v9900_v12 = vrot.slane %v5955_v37, 11 }
 0x587   : > { %5580 = vst.msk [vmem:[#allocation3 + $0x44] sm:$0xf] %vm2574_vm1, %v5502_v23  ;;  %v5950_v23 = vld [vmem:[#allocation2 + $0x400] sm:$0xf] }
 0x588   : > { %6139 = vrot.lane.b32.xlu2 %v6030_v40, %s10500_s20  ;;  %v6058_v40 = vsel %vm11270_vm8, %v9896_v27, %v6057_v9  ;;  %v6088_v27 = vrot.slane %v5957_v42, 7 }
 0x58a   : > { %v5530_v19 = vpop.permute.xlu2 %5529 }
 0x58b   : > { %5865 = vrot.lane.b32.xlu1 %v5802_v49, %s10499_s19  ;;  %5863 = vrot.lane.b32.xlu0 %v5799_v38, %s10499_s19  ;;  %5594 = vst.msk [vmem:[#allocation3 + $0x7c] sm:$0xf] %vm2574_vm1, %v5530_v19  ;;  %v9898_v49 = vrot.slane %v5949_v20, 11  ;;  %v6071_v38 = vrot.slane %v5950_v23, 7  ;;  %v6066_v19 = vrot.slane %v6064_v35, 4  ;;  %v6086_v23 = vsel %vm11270_vm8, %v9900_v12, %v6085_v54 }
 0x58c   : > { %v5961_v35 = vld [vmem:[#allocation2 + $0x46c] sm:$0x8]  ;;  %v5974_v12 = vld [vmem:[#allocation2 + $0x4e0] sm:$0xf] }
 0x58d   : > { %v5510_v5 = vpop.permute.xlu1 %5509  ;;  %v5508_v43 = vpop.permute.xlu0 %5507  ;;  %v6068_v57 = vsel %vm11270_vm8, %v6066_v19, %v6067_v36  ;;  %v6073_v58 = vrot.slane %v6071_v38, 4  ;;  %v9902_v2 = vrot.slane %v5961_v35, 11 }
 0x58e   : > { %5584 = vst.msk [vmem:[#allocation3 + $0x54] sm:$0xf] %vm2574_vm1, %v5510_v5 }
 0x58f   : > { %5583 = vst.msk [vmem:[#allocation3 + $0x50] sm:$0xf] %vm2574_vm1, %v5508_v43  ;;  %v6072_v43 = vsel %vm11270_vm8, %v9898_v49, %v6071_v38  ;;  %v5960_v49 = vld [vmem:[#allocation2 + $0x458] sm:$0x7] }
 0x590   : > { %6145 = vrot.lane.b32.xlu2 %v6040_v34, %s10500_s20  ;;  %v6078_v34 = vrot.slane %v5953_v47, 7 }
 0x592   : > { %v5808_v46 = vpop.permute.xlu2 %5807 }
 0x593   : > { %6143 = vrot.lane.b32.xlu1 %v6037_v28, %s10500_s20  ;;  %6141 = vrot.lane.b32.xlu0 %v6033_v30, %s10500_s20  ;;  %5901 = vst.msk [vmem:[#allocation3 + $0x8] sm:$0xf] %vm2911_vm2, %v5808_v46  ;;  %v6080_v28 = vrot.slane %v6078_v34, 4  ;;  %v6081_v30 = vrot.slane %v5954_v44, 7  ;;  %v6074_v46 = vrot.slane %v5951_v50, 7  ;;  %v6106_v44 = vrot.slane %v5965_v25, 7 }
 0x594   : > { %v5971_v50 = vld [vmem:[#allocation2 + $0x4c4] sm:$0xf]  ;;  %v6647_v25 = vld [vmem:[#allocation2 + $0x10] sm:$0x1] }
 0x595   : > { %v5516_v61 = vpop.permute.xlu1 %5515  ;;  %v5514_v32 = vpop.permute.xlu0 %5513  ;;  %v6082_v4 = vsel %vm11270_vm8, %v6080_v28, %v6081_v30  ;;  %v6075_v9 = vsel %vm11270_vm8, %v6073_v58, %v6074_v46  ;;  %v5966_v28 = vld [vmem:[#allocation2 + $0x490] sm:$0x7]  ;;  %v5964_v30 = vld [vmem:[#allocation2 + $0x488] sm:$0x8] }
 0x596   : > { %5587 = vst.msk [vmem:[#allocation3 + $0x60] sm:$0xf] %vm2574_vm1, %v5516_v61  ;;  %v5958_v61 = vld [vmem:[#allocation2 + $0x450] sm:$0x8]  ;;  %v9903_v58 = vrot.slane %v5964_v30, 11 }
 0x597   : > { %5586 = vst.msk [vmem:[#allocation3 + $0x5c] sm:$0xf] %vm2574_vm1, %v5514_v32  ;;  %v5959_v32 = vld [vmem:[#allocation2 + $0x454] sm:$0xf] }
 0x598   : > { %6151 = vrot.lane.b32.xlu2 %v6051_v59, %s10500_s20  ;;  %v6079_v59 = vsel %vm11270_vm8, %v9899_v22, %v6078_v34  ;;  %v6109_v22 = vrot.slane %v5966_v28, 7 }
 0x59a   : > { %v5814_v55 = vpop.permute.xlu2 %5813 }
 0x59b   : > { %6149 = vrot.lane.b32.xlu1 %v6047_v11, %s10500_s20  ;;  %6147 = vrot.lane.b32.xlu0 %v6044_v6, %s10500_s20  ;;  %5904 = vst.msk [vmem:[#allocation3 + $0x14] sm:$0xf] %vm2911_vm2, %v5814_v55  ;;  %v9901_v11 = vrot.slane %v5958_v61, 11  ;;  %v6092_v6 = vrot.slane %v5959_v32, 7  ;;  %v6087_v55 = vrot.slane %v6085_v54, 4  ;;  %v6107_v32 = vsel %vm11270_vm8, %v9903_v58, %v6106_v44 }
 0x59c   : > { %v5970_v54 = vld [vmem:[#allocation2 + $0x4c0] sm:$0x8]  ;;  %v6649_v58 = vld [vmem:[#allocation2 + $0x28] sm:$0xf] }
 0x59d   : > { %v5522_v51 = vpop.permute.xlu1 %5521  ;;  %v5520_v56 = vpop.permute.xlu0 %5519  ;;  %v6089_v20 = vsel %vm11270_vm8, %v6087_v55, %v6088_v27  ;;  %v6094_v39 = vrot.slane %v6092_v6, 4  ;;  %v9905_v42 = vrot.slane %v5970_v54, 11 }
 0x59e   : > { %5590 = vst.msk [vmem:[#allocation3 + $0x6c] sm:$0xf] %vm2574_vm1, %v5522_v51 }
 0x59f   : > { %5589 = vst.msk [vmem:[#allocation3 + $0x68] sm:$0xf] %vm2574_vm1, %v5520_v56  ;;  %v6093_v56 = vsel %vm11270_vm8, %v9901_v11, %v6092_v6  ;;  %v5969_v11 = vld [vmem:[#allocation2 + $0x4ac] sm:$0x7] }
 0x5a0   : > { %6157 = vrot.lane.b32.xlu2 %v6061_v14, %s10500_s20  ;;  %v6099_v14 = vrot.slane %v5962_v41, 7 }
 0x5a2   : > { %v5820_v13 = vpop.permute.xlu2 %5819 }
 0x5a3   : > { %6155 = vrot.lane.b32.xlu1 %v6058_v40, %s10500_s20  ;;  %6153 = vrot.lane.b32.xlu0 %v6054_v60, %s10500_s20  ;;  %5907 = vst.msk [vmem:[#allocation3 + $0x20] sm:$0xf] %vm2911_vm2, %v5820_v13  ;;  %v6101_v40 = vrot.slane %v6099_v14, 4  ;;  %v6102_v60 = vrot.slane %v5963_v45, 7  ;;  %v6095_v13 = vrot.slane %v5960_v49, 7  ;;  %v6127_v45 = vrot.slane %v5974_v12, 7 }
 0x5a4   : > { %v6646_v49 = vld [vmem:[#allocation2 + $0xc] sm:$0xf]  ;;  %v10257_v12 = vld [vmem:[%s15021_s5 + $0x30] sm:$0xff] }
 0x5a5   : > { %v5528_v48 = vpop.permute.xlu1 %5527  ;;  %v5526_v5 = vpop.permute.xlu0 %5525  ;;  %v6103_v36 = vsel %vm11270_vm8, %v6101_v40, %v6102_v60  ;;  %v6096_v34 = vsel %vm11270_vm8, %v6094_v39, %v6095_v13  ;;  %v5975_v40 = vld [vmem:[#allocation2 + $0x4e4] sm:$0x7]  ;;  %v5973_v60 = vld [vmem:[#allocation2 + $0x4dc] sm:$0x8] }
 0x5a6   : > { %5593 = vst.msk [vmem:[#allocation3 + $0x78] sm:$0xf] %vm2574_vm1, %v5528_v48  ;;  %v5967_v48 = vld [vmem:[#allocation2 + $0x4a4] sm:$0x8]  ;;  %v9906_v39 = vrot.slane %v5973_v60, 11 }
 0x5a7   : > { %5592 = vst.msk [vmem:[#allocation3 + $0x74] sm:$0xf] %vm2574_vm1, %v5526_v5  ;;  %v5968_v5 = vld [vmem:[#allocation2 + $0x4a8] sm:$0xf] }
 0x5a8   : > { %6163 = vrot.lane.b32.xlu2 %v6072_v43, %s10500_s20  ;;  %v6100_v43 = vsel %vm11270_vm8, %v9902_v2, %v6099_v14  ;;  %v6130_v2 = vrot.slane %v5975_v40, 7  ;;  %v6653_v40 = vld [vmem:[#allocation2 + $0x48] sm:$0x1] }
 0x5aa   : > { %v5826_v21 = vpop.permute.xlu2 %5825 }
 0x5ab   : > { %6161 = vrot.lane.b32.xlu1 %v6068_v57, %s10500_s20  ;;  %6159 = vrot.lane.b32.xlu0 %v6065_v17, %s10500_s20  ;;  %5910 = vst.msk [vmem:[#allocation3 + $0x2c] sm:$0xf] %vm2911_vm2, %v5826_v21  ;;  %v9904_v57 = vrot.slane %v5967_v48, 11  ;;  %v6113_v17 = vrot.slane %v5968_v5, 7  ;;  %v6108_v21 = vrot.slane %v6106_v44, 4  ;;  %v6128_v5 = vsel %vm11270_vm8, %v9906_v39, %v6127_v45 }
 0x5ac   : > { %v6645_v44 = vld [vmem:[#allocation2 + $0x8] sm:$0xe]  ;;  %v6760_v39 = vrot.slane %v6653_v40, 5 }
 0x5ad   : > { %v5806_v10 = vpop.permute.xlu1 %5805  ;;  %v5804_v26 = vpop.permute.xlu0 %5803  ;;  %v6110_v61 = vsel %vm11270_vm8, %v6108_v21, %v6109_v22  ;;  %v6115_v37 = vrot.slane %v6113_v17, 4  ;;  %v10012_v28 = vrot.slane %v6645_v44, 9 }
 0x5ae   : > { %5900 = vst.msk [vmem:[#allocation3 + $0x4] sm:$0xf] %vm2911_vm2, %v5806_v10 }
 0x5af   : > { %5899 = vst.msk [vmem:[#allocation3] sm:$0xf] %vm2911_vm2, %v5804_v26  ;;  %v6114_v26 = vsel %vm11270_vm8, %v9904_v57, %v6113_v17  ;;  %v5978_v57 = vld [vmem:[#allocation2 + $0x500] sm:$0x7] }
 0x5b0   : > { %6169 = vrot.lane.b32.xlu2 %v6082_v4, %s10500_s20  ;;  %v6120_v4 = vrot.slane %v5971_v50, 7 }
 0x5b2   : > { %v5832_v29 = vpop.permute.xlu2 %5831 }
 0x5b3   : > { %6167 = vrot.lane.b32.xlu1 %v6079_v59, %s10500_s20  ;;  %6165 = vrot.lane.b32.xlu0 %v6075_v9, %s10500_s20  ;;  %5913 = vst.msk [vmem:[#allocation3 + $0x38] sm:$0xf] %vm2911_vm2, %v5832_v29  ;;  %v6122_v59 = vrot.slane %v6120_v4, 4  ;;  %v6123_v9 = vrot.slane %v5972_v1, 7  ;;  %v6116_v29 = vrot.slane %v5969_v11, 7  ;;  %v6750_v1 = vrot.slane %v6649_v58, 5 }
 0x5b4   : > { %v6655_v11 = vld [vmem:[#allocation2 + $0x60] sm:$0xf] }
 0x5b5   : > { %v5812_v52 = vpop.permute.xlu1 %5811  ;;  %v5810_v51 = vpop.permute.xlu0 %5809  ;;  %v6124_v27 = vsel %vm11270_vm8, %v6122_v59, %v6123_v9  ;;  %v6117_v14 = vsel %vm11270_vm8, %v6115_v37, %v6116_v29  ;;  %v6650_v59 = vld [vmem:[#allocation2 + $0x2c] sm:$0x1]  ;;  %v6648_v9 = vld [vmem:[#allocation2 + $0x24] sm:$0xe] }
 0x5b6   : > { %5903 = vst.msk [vmem:[#allocation3 + $0x10] sm:$0xf] %vm2911_vm2, %v5812_v52  ;;  %v5976_v52 = vld [vmem:[#allocation2 + $0x4f8] sm:$0x8]  ;;  %v6753_v8 = vrot.slane %v6650_v59, 5  ;;  %v10013_v37 = vrot.slane %v6648_v9, 9 }
 0x5b7   : > { %5902 = vst.msk [vmem:[#allocation3 + $0xc] sm:$0xf] %vm2911_vm2, %v5810_v51  ;;  %v5977_v51 = vld [vmem:[#allocation2 + $0x4fc] sm:$0xf]  ;;  %v6587_v59 = vld [vmem:[#allocation2 + $0x54] sm:$0xf] }
 0x5b8   : > { %6175 = vrot.lane.b32.xlu2 %v6093_v56, %s10500_s20  ;;  %v6121_v56 = vsel %vm11270_vm8, %v9905_v42, %v6120_v4  ;;  %v6752_v42 = vrot.slane %v6750_v1, 4 }
 0x5ba   : > { %v5838_v38 = vpop.permute.xlu2 %5837 }
 0x5bb   : > { %6173 = vrot.lane.b32.xlu1 %v6089_v20, %s10500_s20  ;;  %6171 = vrot.lane.b32.xlu0 %v6086_v23, %s10500_s20  ;;  %5916 = vst.msk [vmem:[#allocation3 + $0x44] sm:$0xf] %vm2911_vm2, %v5838_v38  ;;  %v9907_v20 = vrot.slane %v5976_v52, 11  ;;  %v6134_v23 = vrot.slane %v5977_v51, 7  ;;  %v6129_v38 = vrot.slane %v6127_v45, 4 }
 0x5bc   : > { %v6656_v52 = vld [vmem:[#allocation2 + $0x64] sm:$0x1]  ;;  %v6581_v51 = vld [vmem:[#allocation2] sm:$0xf] }
 0x5bd   : > { %v5818_v47 = vpop.permute.xlu1 %5817  ;;  %v5816_v19 = vpop.permute.xlu0 %5815  ;;  %v6131_v48 = vsel %vm11270_vm8, %v6129_v38, %v6130_v2  ;;  %v6136_v30 = vrot.slane %v6134_v23, 4 }
 0x5be   : > { %5906 = vst.msk [vmem:[#allocation3 + $0x1c] sm:$0xf] %vm2911_vm2, %v5818_v47 }
 0x5bf   : > { %5905 = vst.msk [vmem:[#allocation3 + $0x18] sm:$0xf] %vm2911_vm2, %v5816_v19  ;;  %v6135_v19 = vsel %vm11270_vm8, %v9907_v20, %v6134_v23  ;;  %v6767_v20 = vrot.slane %v6656_v52, 5  ;;  %v6654_v23 = vld [vmem:[#allocation2 + $0x5c] sm:$0xe] }
 0x5c0   : > { %6181 = vrot.lane.b32.xlu2 %v6103_v36, %s10500_s20  ;;  %v6743_v36 = vrot.slane %v6646_v49, 5  ;;  %v10256_v49 = vld [vmem:[%s15021_s5 + $0x28] sm:$0xff]  ;;  %v10015_v38 = vrot.slane %v6654_v23, 9 }
 0x5c2   : > { %v5844_v62 = vpop.permute.xlu2 %5843 }
 0x5c3   : > { %6179 = vrot.lane.b32.xlu1 %v6100_v43, %s10500_s20  ;;  %6177 = vrot.lane.b32.xlu0 %v6096_v34, %s10500_s20  ;;  %5919 = vst.msk [vmem:[#allocation3 + $0x50] sm:$0xf] %vm2911_vm2, %v5844_v62  ;;  %v6745_v43 = vrot.slane %v6743_v36, 4  ;;  %v6746_v34 = vrot.slane %v6647_v25, 5  ;;  %v6137_v62 = vrot.slane %v5978_v57, 7 }
 0x5c4   : > { %v6660_v25 = vld [vmem:[#allocation2 + $0x94] sm:$0xe] }
 0x5c5   : > { %v5824_v46 = vpop.permute.xlu1 %5823  ;;  %v5822_v10 = vpop.permute.xlu0 %5821  ;;  %v6747_v22 = vsel %vm10607_vm3, %v6745_v43, %v6746_v34  ;;  %v6138_v4 = vsel %vm11270_vm8, %v6136_v30, %v6137_v62  ;;  %v6584_v43 = vld [vmem:[#allocation2 + $0x20] sm:$0xf]  ;;  %v6657_v62 = vld [vmem:[#allocation2 + $0x78] sm:$0xe]  ;;  %vm292_vm8 = vcmask 58368  }
 0x5c6   : > { %5909 = vst.msk [vmem:[#allocation3 + $0x28] sm:$0xf] %vm2911_vm2, %v5824_v46  ;;  %v6651_v46 = vld [vmem:[#allocation2 + $0x40] sm:$0xe]  ;;  %v6659_v30 = vld [vmem:[#allocation2 + $0x80] sm:$0x1] }
 0x5c7   : > { %5908 = vst.msk [vmem:[#allocation3 + $0x24] sm:$0xf] %vm2911_vm2, %v5822_v10  ;;  %v6652_v10 = vld [vmem:[#allocation2 + $0x44] sm:$0xf] }
 0x5c8   : > { %6187 = vrot.lane.b32.xlu2 %v6114_v26, %s10500_s20  ;;  %v6744_v26 = vsel %vm10607_vm3, %v10012_v28, %v6743_v36  ;;  %v6658_v36 = vld [vmem:[#allocation2 + $0x7c] sm:$0xf]  ;;  %293 = vst.msk [vmem:[#allocation2 + $0x18] sm:$0x3] %vm292_vm8, %v10493_v0 }
 0x5c9   : > { %v6771_v57 = vrot.slane %v6658_v36, 5  ;;  %300 = vst.msk [vmem:[#allocation2 + $0x34] sm:$0x3] %vm292_vm8, %v10493_v0 }
 0x5ca   : > { %v5850_v6 = vpop.permute.xlu2 %5849  ;;  %307 = vst.msk [vmem:[#allocation2 + $0x50] sm:$0x3] %vm292_vm8, %v10493_v0 }
 0x5cb   : > { %6185 = vrot.lane.b32.xlu1 %v6110_v61, %s10500_s20  ;;  %6183 = vrot.lane.b32.xlu0 %v6107_v32, %s10500_s20  ;;  %5922 = vst.msk [vmem:[#allocation3 + $0x5c] sm:$0xf] %vm2911_vm2, %v5850_v6  ;;  %v10014_v61 = vrot.slane %v6651_v46, 9  ;;  %v6757_v32 = vrot.slane %v6652_v10, 5  ;;  %v10258_v6 = vld [vmem:[%s15021_s5 + $0x38] sm:$0xff]  ;;  %v6773_v58 = vrot.slane %v6771_v57, 4 }
 0x5cc   : > { %6464 = vmatpush.bf16.msra.mxu2 %v10258_v6  ;;  %v6774_v46 = vrot.slane %v6659_v30, 5  ;;  %v10016_v10 = vrot.slane %v6657_v62, 9  ;;  %v6672_v62 = vld [vmem:[#allocation2 + $0x104] sm:$0xe]  ;;  %314 = vst.msk [vmem:[#allocation2 + $0x6c] sm:$0x3] %vm292_vm8, %v10493_v0 }
 0x5cd   : > { %v5830_v41 = vpop.permute.xlu1 %5829  ;;  %v5828_v55 = vpop.permute.xlu0 %5827  ;;  %v6759_v2 = vrot.slane %v6757_v32, 4  ;;  %321 = vst.msk [vmem:[#allocation2 + $0x88] sm:$0x3] %vm292_vm8, %v10493_v0 }
 0x5ce   : > { %5912 = vst.msk [vmem:[#allocation3 + $0x34] sm:$0xf] %vm2911_vm2, %v5830_v41  ;;  %v6775_v9 = vsel %vm10607_vm3, %v6773_v58, %v6774_v46  ;;  %v6671_v58 = vld [vmem:[#allocation2 + $0xf0] sm:$0x1] }
 0x5cf   : > { %5911 = vst.msk [vmem:[#allocation3 + $0x30] sm:$0xf] %vm2911_vm2, %v5828_v55  ;;  %v6758_v55 = vsel %vm10607_vm3, %v10014_v61, %v6757_v32  ;;  %v6761_v44 = vsel %vm10607_vm3, %v6759_v2, %v6760_v39  ;;  %v6665_v32 = vld [vmem:[#allocation2 + $0xb8] sm:$0x1]  ;;  %v6668_v2 = vld [vmem:[#allocation2 + $0xd4] sm:$0x1] }
 0x5d0   : > { %6193 = vrot.lane.b32.xlu2 %v6124_v27, %s10500_s20  ;;  %v6764_v27 = vrot.slane %v6655_v11, 5  ;;  %6465 = vmatpush.bf16.msra.mxu2 %v10257_v12  ;;  %v6788_v6 = vrot.slane %v6665_v32, 5  ;;  %v6666_v39 = vld [vmem:[#allocation2 + $0xcc] sm:$0xe]  ;;  %v6802_v32 = vrot.slane %v6671_v58, 5 }
 0x5d1   : > { %328 = vst.msk [vmem:[#allocation2 + $0xa4] sm:$0x3] %vm292_vm8, %v10493_v0 }
 0x5d2   : > { %v5856_v35 = vpop.permute.xlu2 %5855  ;;  %v6766_v45 = vrot.slane %v6764_v27, 4  ;;  %v6765_v34 = vsel %vm10607_vm3, %v10015_v38, %v6764_v27  ;;  %335 = vst.msk [vmem:[#allocation2 + $0xc0] sm:$0x3] %vm292_vm8, %v10493_v0 }
 0x5d3   : > { %6191 = vrot.lane.b32.xlu1 %v6121_v56, %s10500_s20  ;;  %6189 = vrot.lane.b32.xlu0 %v6117_v14, %s10500_s20  ;;  %5925 = vst.msk [vmem:[#allocation3 + $0x68] sm:$0xf] %vm2911_vm2, %v5856_v35  ;;  %v6754_v56 = vsel %vm10607_vm3, %v6752_v42, %v6753_v8  ;;  %v6751_v14 = vsel %vm10607_vm3, %v10013_v37, %v6750_v1  ;;  %v6663_v42 = vld [vmem:[#allocation2 + $0xb0] sm:$0xe]  ;;  %v6662_v8 = vld [vmem:[#allocation2 + $0x9c] sm:$0x1] }
 0x5d4   : > { %6466 = vmatpush.bf16.msra.mxu2 %v10256_v49  ;;  %v6781_v27 = vrot.slane %v6662_v8, 5  ;;  %v6679_v8 = vld [vmem:[#allocation2 + $0x140] sm:$0xf]  ;;  %342 = vst.msk [vmem:[#allocation2 + $0xdc] sm:$0x3] %vm292_vm8, %v10493_v0 }
 0x5d5   : > { %v5836_v13 = vpop.permute.xlu1 %5835  ;;  %v5834_v47 = vpop.permute.xlu0 %5833  ;;  %349 = vst.msk [vmem:[#allocation2 + $0xf8] sm:$0x3] %vm292_vm8, %v10493_v0 }
 0x5d6   : > { %5915 = vst.msk [vmem:[#allocation3 + $0x40] sm:$0xf] %vm2911_vm2, %v5836_v13 }
 0x5d7   : > { %5914 = vst.msk [vmem:[#allocation3 + $0x3c] sm:$0xf] %vm2911_vm2, %v5834_v47 }
 0x5d8   : > { %6199 = vrot.lane.b32.xlu2 %v6135_v19, %s10500_s20  ;;  %v6768_v19 = vsel %vm10607_vm3, %v6766_v45, %v6767_v20  ;;  %v6670_v45 = vld [vmem:[#allocation2 + $0xec] sm:$0xf]  ;;  %v6590_v20 = vld [vmem:[#allocation2 + $0x74] sm:$0xf]  ;;  %356 = vst.msk [vmem:[#allocation2 + $0x114] sm:$0x3] %vm292_vm8, %v10493_v0 }
 0x5d9   : > { %v6799_v38 = vrot.slane %v6670_v45, 5  ;;  %v6675_v45 = vld [vmem:[#allocation2 + $0x120] sm:$0xe]  ;;  %363 = vst.msk [vmem:[#allocation2 + $0x130] sm:$0x3] %vm292_vm8, %v10493_v0 }
 0x5da   : > { %v5862_v17 = vpop.permute.xlu2 %5861  ;;  %370 = vst.msk [vmem:[#allocation2 + $0x14c] sm:$0x3] %vm292_vm8, %v10493_v0 }
 0x5db   : > { %6197 = vrot.lane.b32.xlu1 %v6131_v48, %s10500_s20  ;;  %6195 = vrot.lane.b32.xlu0 %v6128_v5, %s10500_s20  ;;  %5928 = vst.msk [vmem:[#allocation3 + $0x74] sm:$0xf] %vm2911_vm2, %v5862_v17  ;;  %v6661_v48 = vld [vmem:[#allocation2 + $0x98] sm:$0xf]  ;;  %v10255_v5 = vld [vmem:[%s15021_s5 + $0x20] sm:$0xff]  ;;  %v10017_v17 = vrot.slane %v6660_v25, 9 }
 0x5dc   : > { %v6778_v28 = vrot.slane %v6661_v48, 5  ;;  %6467 = vmatpush.bf16.msra.mxu2 %v10255_v5  ;;  %v6795_v25 = vrot.slane %v6668_v2, 5  ;;  %v10019_v48 = vrot.slane %v6666_v39, 9  ;;  %v6585_v2 = vld [vmem:[#allocation2 + $0x38] sm:$0xf] }
 0x5dd   : > { %v5842_v50 = vpop.permute.xlu1 %5841  ;;  %v5840_v21 = vpop.permute.xlu0 %5839  ;;  %377 = vst.msk [vmem:[#allocation2 + $0x168] sm:$0x3] %vm292_vm8, %v10493_v0 }
 0x5de   : > { %5918 = vst.msk [vmem:[#allocation3 + $0x4c] sm:$0xf] %vm2911_vm2, %v5842_v50  ;;  %v6779_v1 = vsel %vm10607_vm3, %v10017_v17, %v6778_v28  ;;  %v6593_v17 = vld [vmem:[#allocation2 + $0xa8] sm:$0xf] }
 0x5df   : > { %5917 = vst.msk [vmem:[#allocation3 + $0x48] sm:$0xf] %vm2911_vm2, %v5840_v21  ;;  %v6664_v21 = vld [vmem:[#allocation2 + $0xb4] sm:$0xf] }
 0x5e0   : > { %6855 = vrot.lane.b32.xlu2 %v6747_v22, %s10494_s9  ;;  %v6785_v61 = vrot.slane %v6664_v21, 5  ;;  %384 = vst.msk [vmem:[#allocation2 + $0x184] sm:$0x3] %vm292_vm8, %v10493_v0 }
 0x5e1   : > { %391 = vst.msk [vmem:[#allocation2 + $0x1a0] sm:$0x3] %vm292_vm8, %v10493_v0 }
 0x5e2   : > { %v6140_v54 = vpop.permute.xlu2 %6139  ;;  %v6787_v11 = vrot.slane %v6785_v61, 4  ;;  %398 = vst.msk [vmem:[#allocation2 + $0x1bc] sm:$0x3] %vm292_vm8, %v10493_v0 }
 0x5e3   : > { %6853 = vrot.lane.b32.xlu1 %v6744_v26, %s10494_s9  ;;  %6201 = vrot.lane.b32.xlu0 %v6138_v4, %s10500_s20  ;;  %6235 = vst.msk [vmem:[#allocation3] sm:$0xf] %vm3104_vm4, %v6140_v54  ;;  %v6772_v54 = vsel %vm10607_vm3, %v10016_v10, %v6771_v57  ;;  %v6674_v57 = vld [vmem:[#allocation2 + $0x10c] sm:$0x1]  ;;  %v6583_v10 = vld [vmem:[#allocation2 + $0x1c] sm:$0xf] }
 0x5e4   : > { %v6809_v21 = vrot.slane %v6674_v57, 5  ;;  %419 = vst.msk [vmem:[#allocation2 + $0x210] sm:$0x3] %vm292_vm8, %v10493_v0 }
 0x5e5   : > { %v5848_v29 = vpop.permute.xlu1 %5847  ;;  %v5846_v41 = vpop.permute.xlu0 %5845  ;;  %426 = vst.msk [vmem:[#allocation2 + $0x22c] sm:$0x3] %vm292_vm8, %v10493_v0 }
 0x5e6   : > { %5921 = vst.msk [vmem:[#allocation3 + $0x58] sm:$0xf] %vm2911_vm2, %v5848_v29 }
 0x5e7   : > { %5920 = vst.msk [vmem:[#allocation3 + $0x54] sm:$0xf] %vm2911_vm2, %v5846_v41  ;;  %v10018_v41 = vrot.slane %v6663_v42, 9  ;;  %v6678_v42 = vld [vmem:[#allocation2 + $0x13c] sm:$0xe] }
 0x5e8   : > { %6861 = vrot.lane.b32.xlu2 %v6758_v55, %s10494_s9  ;;  %v6780_v55 = vrot.slane %v6778_v28, 4  ;;  %433 = vst.msk [vmem:[#allocation2 + $0x248] sm:$0x3] %vm292_vm8, %v10493_v0 }
 0x5e9   : > { %v6786_v23 = vsel %vm10607_vm3, %v10018_v41, %v6785_v61  ;;  %v6801_v61 = vrot.slane %v6799_v38, 4  ;;  %v6596_v41 = vld [vmem:[#allocation2 + $0xc8] sm:$0xf]  ;;  %440 = vst.msk [vmem:[#allocation2 + $0x264] sm:$0x3] %vm292_vm8, %v10493_v0 }
 0x5ea   : > { %v13564_v60 = vld [vmem:[#allocation3] sm:$0xf]  ;;  %v6146_v35 = vpop.permute.xlu2 %6145  ;;  %v6782_v40 = vsel %vm10607_vm3, %v6780_v55, %v6781_v27  ;;  %447 = vst.msk [vmem:[#allocation2 + $0x280] sm:$0x3] %vm292_vm8, %v10493_v0 }
 0x5eb   : > { %6613 = vst.msk [vmem:[#allocation3] sm:$0xf] %vm285_vm0, %v6581_v51  ;;  %6859 = vrot.lane.b32.xlu1 %v6754_v56, %s10494_s9  ;;  %6857 = vrot.lane.b32.xlu0 %v6751_v14, %s10494_s9  ;;  %v6789_v51 = vsel %vm10607_vm3, %v6787_v11, %v6788_v6  ;;  %v6667_v56 = vld [vmem:[#allocation2 + $0xd0] sm:$0xf]  ;;  %v6669_v14 = vld [vmem:[#allocation2 + $0xe8] sm:$0xe] }
 0x5ec   : > { %6238 = vst.msk [vmem:[#allocation3 + $0xc] sm:$0xf] %vm3104_vm4, %v6146_v35  ;;  %v6792_v35 = vrot.slane %v6667_v56, 5  ;;  %v10020_v49 = vrot.slane %v6669_v14, 9  ;;  %v6677_v14 = vld [vmem:[#allocation2 + $0x128] sm:$0x1] }
 0x5ed   : > { %v5854_v13 = vpop.permute.xlu1 %5853  ;;  %v5852_v47 = vpop.permute.xlu0 %5851  ;;  %454 = vst.msk [vmem:[#allocation2 + $0x29c] sm:$0x3] %vm292_vm8, %v10493_v0 }
 0x5ee   : > { %5924 = vst.msk [vmem:[#allocation3 + $0x64] sm:$0xf] %vm2911_vm2, %v5854_v13  ;;  %v6794_v36 = vrot.slane %v6792_v35, 4  ;;  %v6793_v30 = vsel %vm10607_vm3, %v10019_v48, %v6792_v35  ;;  %v6816_v35 = vrot.slane %v6677_v14, 5  ;;  %v6683_v48 = vld [vmem:[#allocation2 + $0x160] sm:$0x1] }
 0x5ef   : > { %5923 = vst.msk [vmem:[#allocation3 + $0x60] sm:$0xf] %vm2911_vm2, %v5852_v47  ;;  %v6673_v47 = vld [vmem:[#allocation2 + $0x108] sm:$0xf] }
 0x5f0   : > { %6867 = vrot.lane.b32.xlu2 %v6768_v19, %s10494_s9  ;;  %v6796_v28 = vsel %vm10607_vm3, %v6794_v36, %v6795_v25  ;;  %v6599_v25 = vld [vmem:[#allocation2 + $0xfc] sm:$0xf]  ;;  %461 = vst.msk [vmem:[#allocation2 + $0x2b8] sm:$0x3] %vm292_vm8, %v10493_v0 }
 0x5f1   : > { %468 = vst.msk [vmem:[#allocation2 + $0x2d4] sm:$0x3] %vm292_vm8, %v10493_v0 }
 0x5f2   : > { %v6152_v50 = vpop.permute.xlu2 %6151  ;;  %475 = vst.msk [vmem:[#allocation2 + $0x2f0] sm:$0x3] %vm292_vm8, %v10493_v0 }
 0x5f3   : > { %v13585_v22 = vld [vmem:[#allocation3 + $0x8] sm:$0xf0]  ;;  %6865 = vrot.lane.b32.xlu1 %v6765_v34, %s10494_s9  ;;  %6863 = vrot.lane.b32.xlu0 %v6761_v44, %s10494_s9  ;;  %6241 = vst.msk [vmem:[#allocation3 + $0x18] sm:$0xf] %vm3104_vm4, %v6152_v50  ;;  %v6800_v34 = vsel %vm10607_vm3, %v10020_v49, %v6799_v38  ;;  %v6806_v44 = vrot.slane %v6673_v47, 5  ;;  %v10022_v49 = vrot.slane %v6675_v45, 9 }
 0x5f4   : > { %6616 = vst.msk [vmem:[#allocation3 + $0xc] sm:$0xf] %vm285_vm0, %v6584_v43  ;;  %v6586_v38 = vld [vmem:[#allocation2 + $0x3c] sm:$0xf]  ;;  %v6592_v45 = vld [vmem:[#allocation2 + $0x90] sm:$0xf] }
 0x5f5   : > { %v5860_v26 = vpop.permute.xlu1 %5859  ;;  %v5858_v4 = vpop.permute.xlu0 %5857  ;;  %v6808_v50 = vrot.slane %v6806_v44, 4  ;;  %482 = vst.msk [vmem:[#allocation2 + $0x30c] sm:$0x3] %vm292_vm8, %v10493_v0 }
 0x5f6   : > { %5927 = vst.msk [vmem:[#allocation3 + $0x70] sm:$0xf] %vm2911_vm2, %v5860_v26 }
 0x5f7   : > { %5926 = vst.msk [vmem:[#allocation3 + $0x6c] sm:$0xf] %vm2911_vm2, %v5858_v4  ;;  %v6582_v4 = vld [vmem:[#allocation2 + $0x4] sm:$0xf]  ;;  %v6810_v6 = vsel %vm10607_vm3, %v6808_v50, %v6809_v21  ;;  %v6588_v21 = vld [vmem:[#allocation2 + $0x58] sm:$0xf] }
 0x5f8   : > { %6873 = vrot.lane.b32.xlu2 %v6779_v1, %s10494_s9  ;;  %v10021_v1 = vrot.slane %v6672_v62, 9  ;;  %v6830_v62 = vrot.slane %v6683_v48, 5  ;;  %489 = vst.msk [vmem:[#allocation2 + $0x328] sm:$0x3] %vm292_vm8, %v10493_v0 }
 0x5f9   : > { %496 = vst.msk [vmem:[#allocation2 + $0x344] sm:$0x3] %vm292_vm8, %v10493_v0 }
 0x5fa   : > { %v13600_v37 = vld [vmem:[#allocation3 + $0x18] sm:$0xf]  ;;  %v6158_v29 = vpop.permute.xlu2 %6157  ;;  %v6807_v27 = vsel %vm10607_vm3, %v10021_v1, %v6806_v44  ;;  %v6687_v1 = vld [vmem:[#allocation2 + $0x190] sm:$0xe]  ;;  %503 = vst.msk [vmem:[#allocation2 + $0x360] sm:$0x3] %vm292_vm8, %v10493_v0 }
 0x5fb   : > { %6619 = vst.msk [vmem:[#allocation3 + $0x18] sm:$0xf] %vm285_vm0, %v6587_v59  ;;  %6871 = vrot.lane.b32.xlu1 %v6775_v9, %s10494_s9  ;;  %6869 = vrot.lane.b32.xlu0 %v6772_v54, %s10494_s9  ;;  %v6676_v59 = vld [vmem:[#allocation2 + $0x124] sm:$0xf] }
 0x5fc   : > { %6244 = vst.msk [vmem:[#allocation3 + $0x24] sm:$0xf] %vm3104_vm4, %v6158_v29  ;;  %v6813_v56 = vrot.slane %v6676_v59, 5 }
 0x5fd   : > { %v5866_v12 = vpop.permute.xlu1 %5865  ;;  %v5864_v52 = vpop.permute.xlu0 %5863  ;;  %510 = vst.msk [vmem:[#allocation2 + $0x37c] sm:$0x3] %vm292_vm8, %v10493_v0 }
 0x5fe   : > { %5930 = vst.msk [vmem:[#allocation3 + $0x7c] sm:$0xf] %vm2911_vm2, %v5866_v12  ;;  %v6803_v12 = vsel %vm10607_vm3, %v6801_v61, %v6802_v32  ;;  %v6814_v57 = vsel %vm10607_vm3, %v10022_v49, %v6813_v56  ;;  %v6685_v61 = vld [vmem:[#allocation2 + $0x178] sm:$0xf] }
 0x5ff   : > { %5929 = vst.msk [vmem:[#allocation3 + $0x78] sm:$0xf] %vm2911_vm2, %v5864_v52  ;;  %v10023_v52 = vrot.slane %v6678_v42, 9 }
 0x600   : > { %6879 = vrot.lane.b32.xlu2 %v6789_v51, %s10494_s9  ;;  %v6820_v51 = vrot.slane %v6679_v8, 5  ;;  %v6602_v8 = vld [vmem:[#allocation2 + $0x11c] sm:$0xf]  ;;  %517 = vst.msk [vmem:[#allocation2 + $0x398] sm:$0x3] %vm292_vm8, %v10493_v0 }
 0x601   : > { %524 = vst.msk [vmem:[#allocation2 + $0x3b4] sm:$0x3] %vm292_vm8, %v10493_v0 }
 0x602   : > { %v6164_v13 = vpop.permute.xlu2 %6163  ;;  %v6821_v47 = vsel %vm10607_vm3, %v10023_v52, %v6820_v51  ;;  %v6834_v52 = vrot.slane %v6685_v61, 5  ;;  %v6982_v61 = vld [vmem:[#allocation2 + $0x14] sm:$0xf]  ;;  %545 = vst.msk [vmem:[#allocation2 + $0x408] sm:$0x3] %vm292_vm8, %v10493_v0 }
 0x603   : > { %v13615_v19 = vld [vmem:[#allocation3 + $0x20] sm:$0xf0]  ;;  %6877 = vrot.lane.b32.xlu1 %v6786_v23, %s10494_s9  ;;  %6875 = vrot.lane.b32.xlu0 %v6782_v40, %s10494_s9  ;;  %6247 = vst.msk [vmem:[#allocation3 + $0x30] sm:$0xf] %vm3104_vm4, %v6164_v13  ;;  %v6815_v40 = vrot.slane %v6813_v56, 4 }
 0x604   : > { %6622 = vst.msk [vmem:[#allocation3 + $0x24] sm:$0xf] %vm285_vm0, %v6590_v20  ;;  %v6682_v20 = vld [vmem:[#allocation2 + $0x15c] sm:$0xf]  ;;  %v6684_v56 = vld [vmem:[#allocation2 + $0x174] sm:$0xe] }
 0x605   : > { %v6144_v5 = vpop.permute.xlu1 %6143  ;;  %v6142_v43 = vpop.permute.xlu0 %6141  ;;  %v6827_v36 = vrot.slane %v6682_v20, 5  ;;  %v6817_v44 = vsel %vm10607_vm3, %v6815_v40, %v6816_v35  ;;  %v10025_v40 = vrot.slane %v6684_v56, 9  ;;  %v6591_v35 = vld [vmem:[#allocation2 + $0x8c] sm:$0xf]  ;;  %v7079_v56 = vrot.slane %v6982_v61, 6 }
 0x606   : > { %6237 = vst.msk [vmem:[#allocation3 + $0x8] sm:$0xf] %vm3104_vm4, %v6144_v5  ;;  %v6681_v5 = vld [vmem:[#allocation2 + $0x158] sm:$0xe] }
 0x607   : > { %6236 = vst.msk [vmem:[#allocation3 + $0x4] sm:$0xf] %vm3104_vm4, %v6142_v43 }
 0x608   : > { %6885 = vrot.lane.b32.xlu2 %v6800_v34, %s10494_s9  ;;  %552 = vst.msk [vmem:[#allocation2 + $0x424] sm:$0x3] %vm292_vm8, %v10493_v0 }
 0x609   : > { %559 = vst.msk [vmem:[#allocation2 + $0x440] sm:$0x3] %vm292_vm8, %v10493_v0 }
 0x60a   : > { %v13630_v46 = vld [vmem:[#allocation3 + $0x30] sm:$0xf]  ;;  %v6170_v26 = vpop.permute.xlu2 %6169  ;;  %566 = vst.msk [vmem:[#allocation2 + $0x45c] sm:$0x3] %vm292_vm8, %v10493_v0 }
 0x60b   : > { %6625 = vst.msk [vmem:[#allocation3 + $0x30] sm:$0xf] %vm285_vm0, %v6593_v17  ;;  %6883 = vrot.lane.b32.xlu1 %v6796_v28, %s10494_s9  ;;  %6881 = vrot.lane.b32.xlu0 %v6793_v30, %s10494_s9  ;;  %v6680_v17 = vld [vmem:[#allocation2 + $0x144] sm:$0x1]  ;;  %v6589_v28 = vld [vmem:[#allocation2 + $0x70] sm:$0xf] }
 0x60c   : > { %6250 = vst.msk [vmem:[#allocation3 + $0x3c] sm:$0xf] %vm3104_vm4, %v6170_v26  ;;  %v6829_v30 = vrot.slane %v6827_v36, 4  ;;  %v6822_v26 = vrot.slane %v6820_v51, 4  ;;  %v6686_v51 = vld [vmem:[#allocation2 + $0x17c] sm:$0x1] }
 0x60d   : > { %v13636_v9 = vld [vmem:[#allocation3 + $0x8] sm:$0xf]  ;;  %v6150_v54 = vpop.permute.xlu1 %6149  ;;  %v6148_v11 = vpop.permute.xlu0 %6147  ;;  %v6837_v20 = vrot.slane %v6686_v51, 5  ;;  %573 = vst.msk [vmem:[#allocation2 + $0x478] sm:$0x3] %vm292_vm8, %v10493_v0 }
 0x60e   : > { %6615 = vst.msk [vmem:[#allocation3 + $0x8] sm:$0xf] %vm285_vm0, %v6583_v10  ;;  %v10239_v29 = vld [vmem:[#allocation3] sm:$0xf0]  ;;  %v10024_v10 = vrot.slane %v6681_v5, 9 }
 0x60f   : > { %6614 = vst.msk [vmem:[#allocation3 + $0x4] sm:$0xf] %vm285_vm0, %v6582_v4  ;;  %v9919_v55 = vor.u32 %v10239_v29, %v13564_v60  ;;  %v6823_v4 = vrot.slane %v6680_v17, 5  ;;  %v9923_v29 = vor.u32 %v13585_v22, %v13636_v9  ;;  %v6691_v9 = vld [vmem:[#allocation2 + $0x1b0] sm:$0xf] }
 0x610   : > { %6240 = vst.msk [vmem:[#allocation3 + $0x14] sm:$0xf] %vm3104_vm4, %v6150_v54  ;;  %6891 = vrot.lane.b32.xlu2 %v6810_v6, %s10494_s9  ;;  %v6688_v6 = vld [vmem:[#allocation2 + $0x194] sm:$0xf]  ;;  %v6595_v17 = vld [vmem:[#allocation2 + $0xc4] sm:$0xf] }
 0x611   : > { %6239 = vst.msk [vmem:[#allocation3 + $0x10] sm:$0xf] %vm3104_vm4, %v6148_v11  ;;  %9996 = vmatmul.msk.bf16.vlgmr.msra.gmra.mxu2 %vm3281_vm7, %v9919_v55  ;;  %v6831_v11 = vsel %vm10607_vm3, %v6829_v30, %v6830_v62  ;;  %v6824_v55 = vsel %vm10607_vm3, %v6822_v26, %v6823_v4 }
 0x612   : > { %v6176_v60 = vpop.permute.xlu2 %6175  ;;  %580 = vst.msk [vmem:[#allocation2 + $0x494] sm:$0x3] %vm292_vm8, %v10493_v0 }
 0x613   : > { %v13651_v23 = vld [vmem:[#allocation3 + $0x38] sm:$0xf0]  ;;  %6889 = vrot.lane.b32.xlu1 %v6807_v27, %s10494_s9  ;;  %6887 = vrot.lane.b32.xlu0 %v6803_v12, %s10494_s9  ;;  %6253 = vst.msk [vmem:[#allocation3 + $0x48] sm:$0xf] %vm3104_vm4, %v6176_v60  ;;  %v10026_v27 = vrot.slane %v6687_v1, 9  ;;  %v6841_v12 = vrot.slane %v6688_v6, 5 }
 0x614   : > { %6628 = vst.msk [vmem:[#allocation3 + $0x3c] sm:$0xf] %vm285_vm0, %v6596_v41  ;;  %v6828_v41 = vsel %vm10607_vm3, %v10024_v10, %v6827_v36  ;;  %v6836_v60 = vrot.slane %v6834_v52, 4  ;;  %v6984_v1 = vld [vmem:[#allocation2 + $0x2c] sm:$0xc] }
 0x615   : > { %v6156_v39 = vpop.permute.xlu1 %6155  ;;  %v6154_v13 = vpop.permute.xlu0 %6153  ;;  %v6843_v26 = vrot.slane %v6841_v12, 4  ;;  %587 = vst.msk [vmem:[#allocation2 + $0x4b0] sm:$0x3] %vm292_vm8, %v10493_v0 }
 0x616   : > { %6243 = vst.msk [vmem:[#allocation3 + $0x20] sm:$0xf] %vm3104_vm4, %v6156_v39  ;;  %v6848_v39 = vrot.slane %v6691_v9, 5  ;;  %v6838_v5 = vsel %vm10607_vm3, %v6836_v60, %v6837_v20 }
 0x617   : > { %v13660_v43 = vld [vmem:[#allocation3 + $0x10] sm:$0xf0]  ;;  %6242 = vst.msk [vmem:[#allocation3 + $0x1c] sm:$0xf] %vm3104_vm4, %v6154_v13  ;;  %v6605_v13 = vld [vmem:[#allocation2 + $0x150] sm:$0xf] }
 0x618   : > { %6618 = vst.msk [vmem:[#allocation3 + $0x14] sm:$0xf] %vm285_vm0, %v6586_v38  ;;  %v13664_v34 = vld [vmem:[#allocation3 + $0x10] sm:$0xf]  ;;  %6897 = vrot.lane.b32.xlu2 %v6821_v47, %s10494_s9  ;;  %v6692_v47 = vld [vmem:[#allocation2 + $0x1b4] sm:$0x1] }
 0x619   : > { %6617 = vst.msk [vmem:[#allocation3 + $0x10] sm:$0xf] %vm285_vm0, %v6585_v2  ;;  %v6842_v2 = vsel %vm10607_vm3, %v10026_v27, %v6841_v12  ;;  %v6851_v30 = vrot.slane %v6692_v47, 5  ;;  %v6611_v47 = vld [vmem:[#allocation2 + $0x1a4] sm:$0xf] }
 0x61a   : > { %v13672_v50 = vld [vmem:[#allocation3 + $0x48] sm:$0xf]  ;;  %v6182_v58 = vpop.permute.xlu2 %6181  ;;  %594 = vst.msk [vmem:[#allocation2 + $0x4cc] sm:$0x3] %vm292_vm8, %v10493_v0 }
 0x61b   : > { %6631 = vst.msk [vmem:[#allocation3 + $0x48] sm:$0xf] %vm285_vm0, %v6599_v25  ;;  %6895 = vrot.lane.b32.xlu1 %v6817_v44, %s10494_s9  ;;  %6893 = vrot.lane.b32.xlu0 %v6814_v57, %s10494_s9  ;;  %v6690_v25 = vld [vmem:[#allocation2 + $0x1ac] sm:$0xe]  ;;  %v6835_v44 = vsel %vm10607_vm3, %v10025_v40, %v6834_v52  ;;  %v6689_v57 = vld [vmem:[#allocation2 + $0x198] sm:$0x1] }
 0x61c   : > { %6256 = vst.msk [vmem:[#allocation3 + $0x54] sm:$0xf] %vm3104_vm4, %v6182_v58  ;;  %v10027_v10 = vrot.slane %v6690_v25, 9  ;;  %v6844_v4 = vrot.slane %v6689_v57, 5  ;;  %v10029_v52 = vrot.slane %v6984_v1, 10 }
 0x61d   : > { %v13680_v32 = vld [vmem:[#allocation3 + $0x20] sm:$0xf]  ;;  %v6162_v59 = vpop.permute.xlu1 %6161  ;;  %v6160_v54 = vpop.permute.xlu0 %6159  ;;  %v6598_v40 = vld [vmem:[#allocation2 + $0xe4] sm:$0xf]  ;;  %v6601_v57 = vld [vmem:[#allocation2 + $0x118] sm:$0xf] }
 0x61e   : > { %6621 = vst.msk [vmem:[#allocation3 + $0x20] sm:$0xf] %vm285_vm0, %v6589_v28  ;;  %v13687_v42 = vld [vmem:[#allocation3 + $0x18] sm:$0xf0]  ;;  %v6850_v28 = vrot.slane %v6848_v39, 4  ;;  %v6849_v27 = vsel %vm10607_vm3, %v10027_v10, %v6848_v39  ;;  %v6845_v12 = vsel %vm10607_vm3, %v6843_v26, %v6844_v4 }
 0x61f   : > { %6620 = vst.msk [vmem:[#allocation3 + $0x1c] sm:$0xf] %vm285_vm0, %v6588_v21  ;;  %v6594_v21 = vld [vmem:[#allocation2 + $0xac] sm:$0xf]  ;;  %v6989_v4 = vld [vmem:[#allocation2 + $0x50] sm:$0x3] }
 0x620   : > { %6246 = vst.msk [vmem:[#allocation3 + $0x2c] sm:$0xf] %vm3104_vm4, %v6162_v59  ;;  %6903 = vrot.lane.b32.xlu2 %v6831_v11, %s10494_s9  ;;  %v6852_v6 = vsel %vm10607_vm3, %v6850_v28, %v6851_v30  ;;  %v6988_v10 = vld [vmem:[#allocation2 + $0x4c] sm:$0xf]  ;;  %v6987_v1 = vld [vmem:[#allocation2 + $0x48] sm:$0xc] }
 0x621   : > { %6245 = vst.msk [vmem:[#allocation3 + $0x28] sm:$0xf] %vm3104_vm4, %v6160_v54  ;;  %9997 = vmatmul.msk.bf16.gmra.mxu2 %vm3281_vm7, %v9923_v29  ;;  %v7093_v26 = vrot.slane %v6988_v10, 6 }
 0x622   : > { %v6188_v22 = vpop.permute.xlu2 %6187  ;;  %601 = vst.msk [vmem:[#allocation2 + $0x4e8] sm:$0x3] %vm292_vm8, %v10493_v0 }
 0x623   : > { %v13702_v14 = vld [vmem:[#allocation3 + $0x50] sm:$0xf0]  ;;  %6901 = vrot.lane.b32.xlu1 %v6828_v41, %s10494_s9  ;;  %6899 = vrot.lane.b32.xlu0 %v6824_v55, %s10494_s9  ;;  %6259 = vst.msk [vmem:[#allocation3 + $0x60] sm:$0xf] %vm3104_vm4, %v6188_v22  ;;  %v6608_v41 = vld [vmem:[#allocation2 + $0x170] sm:$0xf]  ;;  %v9927_v55 = vor.u32 %v13660_v43, %v13664_v34 }
 0x624   : > { %6634 = vst.msk [vmem:[#allocation3 + $0x54] sm:$0xf] %vm285_vm0, %v6602_v8  ;;  %v13737_v8 = vld [vmem:[#allocation2 + $0x30] sm:$0xf]  ;;  %v6983_v22 = vld [vmem:[#allocation2 + $0x18] sm:$0x3] }
 0x625   : > { %v6168_v49 = vpop.permute.xlu1 %6167  ;;  %v6166_v38 = vpop.permute.xlu0 %6165  ;;  %v7086_v51 = vrot.slane %v13737_v8, 6  ;;  %v6981_v43 = vld [vmem:[#allocation2 + $0x10] sm:$0xc]  ;;  %v7082_v60 = vrot.slane %v6983_v22, 6  ;;  %v7095_v61 = vrot.slane %v7093_v26, 4 }
 0x626   : > { %6249 = vst.msk [vmem:[#allocation3 + $0x38] sm:$0xf] %vm3104_vm4, %v6168_v49  ;;  %v10028_v20 = vrot.slane %v6981_v43, 10  ;;  %v6993_v43 = vld [vmem:[#allocation2 + $0x80] sm:$0xc] }
 0x627   : > { %v13713_v36 = vld [vmem:[#allocation3 + $0x28] sm:$0xf0]  ;;  %6248 = vst.msk [vmem:[#allocation3 + $0x34] sm:$0xf] %vm3104_vm4, %v6166_v38  ;;  %v7087_v38 = vsel %vm11412_vm11, %v10029_v52, %v7086_v51  ;;  %v9935_v52 = vor.u32 %v13615_v19, %v13680_v32 }
 0x628   : > { %6624 = vst.msk [vmem:[#allocation3 + $0x2c] sm:$0xf] %vm285_vm0, %v6592_v45  ;;  %v13717_v48 = vld [vmem:[#allocation3 + $0x28] sm:$0xf]  ;;  %6909 = vrot.lane.b32.xlu2 %v6842_v2, %s10494_s9  ;;  %v7081_v45 = vrot.slane %v7079_v56, 4 }
 0x629   : > { %6623 = vst.msk [vmem:[#allocation3 + $0x28] sm:$0xf] %vm285_vm0, %v6591_v35  ;;  %v6597_v2 = vld [vmem:[#allocation2 + $0xe0] sm:$0xf] }
 0x62a   : > { %v13725_v62 = vld [vmem:[#allocation3 + $0x60] sm:$0xf]  ;;  %v6194_v58 = vpop.permute.xlu2 %6193  ;;  %v7083_v25 = vsel %vm11412_vm11, %v7081_v45, %v7082_v60  ;;  %v10032_v45 = vrot.slane %v6993_v43, 10  ;;  %608 = vst.msk [vmem:[#allocation2 + $0x504] sm:$0x3] %vm292_vm8, %v10493_v0 }
 0x62b   : > { %6637 = vst.msk [vmem:[#allocation3 + $0x60] sm:$0xf] %vm285_vm0, %v6605_v13  ;;  %6907 = vrot.lane.b32.xlu1 %v6838_v5, %s10494_s9  ;;  %6905 = vrot.lane.b32.xlu0 %v6835_v44, %s10494_s9  ;;  %v7080_v5 = vsel %vm11412_vm11, %v10028_v20, %v7079_v56  ;;  %v6992_v20 = vld [vmem:[#allocation2 + $0x6c] sm:$0x3] }
 0x62c   : > { %6262 = vst.msk [vmem:[#allocation3 + $0x6c] sm:$0xf] %vm3104_vm4, %v6194_v58 }
 0x62d   : > { %v13733_v59 = vld [vmem:[#allocation3 + $0x38] sm:$0xf]  ;;  %v6174_v54 = vpop.permute.xlu1 %6173  ;;  %v6172_v11 = vpop.permute.xlu0 %6171  ;;  %615 = vst.msk [vmem:[#allocation2 + $0x520] sm:$0x3] %vm292_vm8, %v10493_v0 }
 0x62e   : > { %6627 = vst.msk [vmem:[#allocation3 + $0x38] sm:$0xf] %vm285_vm0, %v6595_v17  ;;  %v13742_v29 = vld [vmem:[#allocation3 + $0x30] sm:$0xf0]  ;;  %v6600_v17 = vld [vmem:[#allocation2 + $0x100] sm:$0xf] }
 0x62f   : > { %6626 = vst.msk [vmem:[#allocation3 + $0x34] sm:$0xf] %vm285_vm0, %v6594_v21  ;;  %v9931_v21 = vor.u32 %v13687_v42, %v13600_v37 }
 0x630   : > { %6252 = vst.msk [vmem:[#allocation3 + $0x44] sm:$0xf] %vm3104_vm4, %v6174_v54  ;;  %6915 = vrot.lane.b32.xlu2 %v6852_v6, %s10494_s9  ;;  %v7096_v54 = vrot.slane %v6989_v4, 6  ;;  %v7088_v6 = vrot.slane %v7086_v51, 4  ;;  %v6991_v51 = vld [vmem:[#allocation2 + $0x68] sm:$0xf] }
 0x631   : > { %6251 = vst.msk [vmem:[#allocation3 + $0x40] sm:$0xf] %vm3104_vm4, %v6172_v11  ;;  %9998 = vmatmul.msk.bf16.gmra.mxu2 %vm3281_vm7, %v9927_v55  ;;  %v10030_v11 = vrot.slane %v6987_v1, 10  ;;  %v7100_v22 = vrot.slane %v6991_v51, 6  ;;  %v6996_v1 = vld [vmem:[#allocation2 + $0x9c] sm:$0xc] }
 0x632   : > { %v6200_v34 = vpop.permute.xlu2 %6199  ;;  %v7097_v55 = vsel %vm11412_vm11, %v7095_v61, %v7096_v54  ;;  %v7003_v51 = vld [vmem:[#allocation2 + $0xd8] sm:$0xf]  ;;  %622 = vst.msk [vmem:[#allocation2 + $0x53c] sm:$0x3] %vm292_vm8, %v10493_v0 }
 0x633   : > { %v13758_v9 = vld [vmem:[#allocation3 + $0x68] sm:$0xf0]  ;;  %6913 = vrot.lane.b32.xlu1 %v6849_v27, %s10494_s9  ;;  %6911 = vrot.lane.b32.xlu0 %v6845_v12, %s10494_s9  ;;  %6265 = vst.msk [vmem:[#allocation3 + $0x78] sm:$0xf] %vm3104_vm4, %v6200_v34  ;;  %v7094_v27 = vsel %vm11412_vm11, %v10030_v11, %v7093_v26  ;;  %v6994_v34 = vld [vmem:[#allocation2 + $0x84] sm:$0xf] }
 0x634   : > { %6640 = vst.msk [vmem:[#allocation3 + $0x6c] sm:$0xf] %vm285_vm0, %v6608_v41  ;;  %v6986_v41 = vld [vmem:[#allocation2 + $0x34] sm:$0x3]  ;;  %v7107_v60 = vrot.slane %v6994_v34, 6  ;;  %v10033_v11 = vrot.slane %v6996_v1, 10 }
 0x635   : > { %v6180_v35 = vpop.permute.xlu1 %6179  ;;  %v6178_v49 = vpop.permute.xlu0 %6177  ;;  %v7089_v12 = vrot.slane %v6986_v41, 6  ;;  %v7128_v34 = vrot.slane %v7003_v51, 6  ;;  %629 = vst.msk [vmem:[#allocation2 + $0x558] sm:$0x3] %vm292_vm8, %v10493_v0 }
 0x636   : > { %6255 = vst.msk [vmem:[#allocation3 + $0x50] sm:$0xf] %vm3104_vm4, %v6180_v35  ;;  %v7108_v35 = vsel %vm11412_vm11, %v10032_v45, %v7107_v60  ;;  %v7109_v61 = vrot.slane %v7107_v60, 4  ;;  %v7000_v45 = vld [vmem:[#allocation2 + $0xbc] sm:$0xf] }
 0x637   : > { %v13771_v39 = vld [vmem:[#allocation3 + $0x40] sm:$0xf0]  ;;  %6254 = vst.msk [vmem:[#allocation3 + $0x4c] sm:$0xf] %vm3104_vm4, %v6178_v49  ;;  %v7090_v8 = vsel %vm11412_vm11, %v7088_v6, %v7089_v12  ;;  %v7103_v49 = vrot.slane %v6992_v20, 6  ;;  %v9939_v12 = vor.u32 %v13713_v36, %v13717_v48  ;;  %v7121_v20 = vrot.slane %v7000_v45, 6 }
 0x638   : > { %6630 = vst.msk [vmem:[#allocation3 + $0x44] sm:$0xf] %vm285_vm0, %v6598_v40  ;;  %v13775_v13 = vld [vmem:[#allocation3 + $0x40] sm:$0xf]  ;;  %7193 = vrot.lane.b32.xlu2 %v7087_v38, %s10495_s15  ;;  %v7102_v40 = vrot.slane %v7100_v22, 4 }
 0x639   : > { %6629 = vst.msk [vmem:[#allocation3 + $0x40] sm:$0xf] %vm285_vm0, %v6597_v2  ;;  %v6990_v38 = vld [vmem:[#allocation2 + $0x64] sm:$0xc]  ;;  %v6995_v6 = vld [vmem:[#allocation2 + $0x88] sm:$0x3] }
 0x63a   : > { %v13783_v44 = vld [vmem:[#allocation3 + $0x78] sm:$0xf]  ;;  %v13817_v37 = vpop.permute.xlu2 %6855  ;;  %v10031_v2 = vrot.slane %v6990_v38, 10  ;;  %v7110_v41 = vrot.slane %v6995_v6, 6  ;;  %v7002_v48 = vld [vmem:[#allocation2 + $0xd4] sm:$0xc] }
 0x63b   : > { %6643 = vst.msk [vmem:[#allocation3 + $0x78] sm:$0xf] %vm285_vm0, %v6611_v47  ;;  %7191 = vrot.lane.b32.xlu1 %v7083_v25, %s10495_s15  ;;  %7189 = vrot.lane.b32.xlu0 %v7080_v5, %s10495_s15  ;;  %v7104_v47 = vsel %vm11412_vm11, %v7102_v40, %v7103_v49  ;;  %v6997_v25 = vld [vmem:[#allocation2 + $0xa0] sm:$0xf]  ;;  %v10035_v43 = vrot.slane %v7002_v48, 10  ;;  %v7123_v38 = vrot.slane %v7121_v20, 4 }
 0x63c   : > { %v7101_v5 = vsel %vm11412_vm11, %v10031_v2, %v7100_v22  ;;  %v7114_v10 = vrot.slane %v6997_v25, 6  ;;  %v7001_v60 = vld [vmem:[#allocation2 + $0xc0] sm:$0x3]  ;;  %v6999_v49 = vld [vmem:[#allocation2 + $0xb8] sm:$0xc] }
 0x63d   : > { %v13792_v28 = vld [vmem:[#allocation3 + $0x50] sm:$0xf]  ;;  %v13819_v42 = vpop.permute.xlu1 %6185  ;;  %v13823_v58 = vpop.permute.xlu0 %6183  ;;  %v7129_v40 = vsel %vm11412_vm11, %v10035_v43, %v7128_v34  ;;  %636 = vst.msk [vmem:[#allocation2 + $0x574] sm:$0x3] %vm292_vm8, %v10493_v0  ;;  %v10034_v2 = vrot.slane %v6999_v49, 10 }
 0x63e   : > { %6633 = vst.msk [vmem:[#allocation3 + $0x50] sm:$0xf] %vm285_vm0, %v6601_v57  ;;  %v13797_v30 = vld [vmem:[#allocation3 + $0x48] sm:$0xf0]  ;;  %v7116_v54 = vrot.slane %v7114_v10, 4 }
 0x63f   : > { %6632 = vst.msk [vmem:[#allocation3 + $0x4c] sm:$0xf] %vm285_vm0, %v6600_v17  ;;  %v7007_v25 = vld [vmem:[#allocation2 + $0xf8] sm:$0x3]  ;;  %v6603_v48 = vld [vmem:[#allocation2 + $0x134] sm:$0xf] }
 0x640   : > { %7199 = vrot.lane.b32.xlu2 %v7097_v55, %s10495_s15  ;;  %643 = vst.msk [vmem:[#allocation2 + $0x590] sm:$0x3] %vm292_vm8, %v10493_v0  ;;  %v6607_v43 = vld [vmem:[#allocation2 + $0x16c] sm:$0xf] }
 0x641   : > { %9999 = vmatmul.msk.bf16.gmra.mxu2 %vm3281_vm7, %v9931_v21  ;;  %v6998_v21 = vld [vmem:[#allocation2 + $0xa4] sm:$0x3]  ;;  %650 = vst.msk [vmem:[#allocation2 + $0x5ac] sm:$0x3] %vm292_vm8, %v10493_v0  ;;  %v6610_v49 = vld [vmem:[#allocation2 + $0x18c] sm:$0xf] }
 0x642   : > { %v13857_v19 = vpop.permute.xlu2 %6861  ;;  %v7117_v4 = vrot.slane %v6998_v21, 6  ;;  %6950 = vst.msk [vmem:[#allocation3 + $0x4] sm:$0xf] %vm1513_vm12, %v13817_v37 }
 0x643   : > { %7197 = vrot.lane.b32.xlu1 %v7094_v27, %s10495_s15  ;;  %7195 = vrot.lane.b32.xlu0 %v7090_v8, %s10495_s15  ;;  %v7115_v27 = vsel %vm11412_vm11, %v10033_v11, %v7114_v10  ;;  %v7122_v10 = vsel %vm11412_vm11, %v10034_v2, %v7121_v20  ;;  %6258 = vst.msk [vmem:[#allocation3 + $0x5c] sm:$0xf] %vm3104_vm4, %v13819_v42  ;;  %v7009_v42 = vld [vmem:[#allocation2 + $0x110] sm:$0xf]  ;;  %v6606_v20 = vld [vmem:[#allocation2 + $0x154] sm:$0xf] }
 0x644   : > { %v7118_v55 = vsel %vm11412_vm11, %v7116_v54, %v7117_v4  ;;  %v7005_v4 = vld [vmem:[#allocation2 + $0xf0] sm:$0xc]  ;;  %v7004_v54 = vld [vmem:[#allocation2 + $0xdc] sm:$0x3]  ;;  %6257 = vst.msk [vmem:[#allocation3 + $0x58] sm:$0xf] %vm3104_vm4, %v13823_v58 }
 0x645   : > { %v13859_v32 = vpop.permute.xlu1 %6191  ;;  %v13863_v56 = vpop.permute.xlu0 %6189  ;;  %v10036_v37 = vrot.slane %v7005_v4, 10  ;;  %6953 = vst.msk [vmem:[#allocation3 + $0x10] sm:$0xf] %vm1513_vm12, %v13857_v19  ;;  %v6604_v58 = vld [vmem:[#allocation2 + $0x138] sm:$0xf]  ;;  %v7142_v51 = vrot.slane %v7009_v42, 6 }
 0x646   : > { %6261 = vst.msk [vmem:[#allocation3 + $0x68] sm:$0xf] %vm3104_vm4, %v13859_v32  ;;  %v9943_v32 = vor.u32 %v13742_v29, %v13630_v46  ;;  %v7008_v46 = vld [vmem:[#allocation2 + $0x10c] sm:$0xc]  ;;  %v6609_v4 = vld [vmem:[#allocation2 + $0x188] sm:$0xf] }
 0x647   : > { %6260 = vst.msk [vmem:[#allocation3 + $0x64] sm:$0xf] %vm3104_vm4, %v13863_v56  ;;  %v7144_v2 = vrot.slane %v7142_v51, 4 }
 0x648   : > { %7205 = vrot.lane.b32.xlu2 %v7108_v35, %s10495_s15  ;;  %v7124_v35 = vrot.slane %v7001_v60, 6 }
 0x64a   : > { %v13883_v57 = vpop.permute.xlu2 %6867  ;;  %v7125_v21 = vsel %vm11412_vm11, %v7123_v38, %v7124_v35  ;;  %v13979_v60 = vld [vmem:[#allocation3 + $0x58] sm:$0xf0]  ;;  %v7015_v35 = vld [vmem:[#allocation2 + $0x148] sm:$0xf] }
 0x64b   : > { %7203 = vrot.lane.b32.xlu1 %v7104_v47, %s10495_s15  ;;  %7201 = vrot.lane.b32.xlu0 %v7101_v5, %s10495_s15  ;;  %v7006_v47 = vld [vmem:[#allocation2 + $0xf4] sm:$0xf]  ;;  %6956 = vst.msk [vmem:[#allocation3 + $0x1c] sm:$0xf] %vm1513_vm12, %v13883_v57  ;;  %v13985_v29 = vld [vmem:[#allocation3 + $0x58] sm:$0xf] }
 0x64c   : > { %v7135_v5 = vrot.slane %v7006_v47, 6  ;;  %v7010_v57 = vld [vmem:[#allocation2 + $0x114] sm:$0x3]  ;;  %6636 = vst.msk [vmem:[#allocation3 + $0x5c] sm:$0xf] %vm285_vm0, %v6604_v58 }
 0x64d   : > { %v13885_v17 = vpop.permute.xlu1 %6197  ;;  %v13890_v26 = vpop.permute.xlu0 %6195  ;;  %6635 = vst.msk [vmem:[#allocation3 + $0x58] sm:$0xf] %vm285_vm0, %v6603_v48  ;;  %v13990_v47 = vld [vmem:[#allocation3 + $0x68] sm:$0xf] }
 0x64e   : > { %v7137_v1 = vrot.slane %v7135_v5, 4  ;;  %v7136_v19 = vsel %vm11412_vm11, %v10036_v37, %v7135_v5  ;;  %6264 = vst.msk [vmem:[#allocation3 + $0x74] sm:$0xf] %vm3104_vm4, %v13885_v17  ;;  %v13995_v5 = vld [vmem:[#allocation3 + $0x60] sm:$0xf0] }
 0x64f   : > { %6263 = vst.msk [vmem:[#allocation3 + $0x70] sm:$0xf] %vm3104_vm4, %v13890_v26  ;;  %v7145_v26 = vrot.slane %v7010_v57, 6 }
 0x650   : > { %7211 = vrot.lane.b32.xlu2 %v7118_v55, %s10495_s15  ;;  %v7131_v55 = vrot.slane %v7004_v54, 6  ;;  %6639 = vst.msk [vmem:[#allocation3 + $0x68] sm:$0xf] %vm285_vm0, %v6607_v43  ;;  %v7021_v43 = vld [vmem:[#allocation2 + $0x180] sm:$0xf] }
 0x651   : > { %10000 = vmatmul.msk.bf16.gmra.mxu2 %vm3281_vm7, %v9935_v52  ;;  %v7111_v52 = vsel %vm11412_vm11, %v7109_v61, %v7110_v41  ;;  %v7138_v61 = vrot.slane %v7007_v25, 6  ;;  %v7130_v41 = vrot.slane %v7128_v34, 4  ;;  %v10037_v25 = vrot.slane %v7008_v46, 10  ;;  %6638 = vst.msk [vmem:[#allocation3 + $0x64] sm:$0xf] %vm285_vm0, %v6606_v20 }
 0x652   : > { %v13917_v8 = vpop.permute.xlu2 %6873  ;;  %v7170_v57 = vrot.slane %v7021_v43, 6  ;;  %v7019_v20 = vld [vmem:[#allocation2 + $0x168] sm:$0x3]  ;;  %v7028_v43 = vld [vmem:[#allocation2 + $0x1bc] sm:$0x3] }
 0x653   : > { %7209 = vrot.lane.b32.xlu1 %v7115_v27, %s10495_s15  ;;  %7207 = vrot.lane.b32.xlu0 %v7111_v52, %s10495_s15  ;;  %v7139_v27 = vsel %vm11412_vm11, %v7137_v1, %v7138_v61  ;;  %v13963_v52 = vld [vmem:[#allocation2 + $0x12c] sm:$0xf]  ;;  %v7132_v56 = vsel %vm11412_vm11, %v7130_v41, %v7131_v55  ;;  %6959 = vst.msk [vmem:[#allocation3 + $0x28] sm:$0xf] %vm1513_vm12, %v13917_v8  ;;  %v7014_v41 = vld [vmem:[#allocation2 + $0x144] sm:$0xc] }
 0x654   : > { %v7149_v45 = vrot.slane %v13963_v52, 6  ;;  %v7016_v1 = vld [vmem:[#allocation2 + $0x14c] sm:$0x3]  ;;  %v7146_v8 = vsel %vm11412_vm11, %v7144_v2, %v7145_v26  ;;  %v7143_v37 = vsel %vm11412_vm11, %v10037_v25, %v7142_v51  ;;  %v10039_v58 = vrot.slane %v7014_v41, 10  ;;  %v7018_v51 = vld [vmem:[#allocation2 + $0x164] sm:$0xf] }
 0x655   : > { %v13919_v36 = vpop.permute.xlu1 %6853  ;;  %v13924_v22 = vpop.permute.xlu0 %6201  ;;  %v14000_v61 = vld [vmem:[#allocation3 + $0x70] sm:$0xf0]  ;;  %v7159_v42 = vrot.slane %v7016_v1, 6  ;;  %v7023_v1 = vld [vmem:[#allocation2 + $0x198] sm:$0xc] }
 0x656   : > { %6949 = vst.msk [vmem:[#allocation3] sm:$0xf] %vm1513_vm12, %v13919_v36  ;;  %v14007_v54 = vld [vmem:[#allocation3 + $0x70] sm:$0xf]  ;;  %v7151_v48 = vrot.slane %v7149_v45, 4 }
 0x657   : > { %6642 = vst.msk [vmem:[#allocation3 + $0x74] sm:$0xf] %vm285_vm0, %v6610_v49  ;;  %v7022_v41 = vld [vmem:[#allocation2 + $0x184] sm:$0x3] }
 0x658   : > { %7217 = vrot.lane.b32.xlu2 %v7129_v40, %s10495_s15  ;;  %6641 = vst.msk [vmem:[#allocation3 + $0x70] sm:$0xf] %vm285_vm0, %v6609_v4 }
 0x659   : > { %6266 = vst.msk [vmem:[#allocation3 + $0x7c] sm:$0xf] %vm3104_vm4, %v13924_v22 }
 0x65a   : > { %v13948_v0 = vpop.permute.xlu2 %6879 }
 0x65b   : > { %7215 = vrot.lane.b32.xlu1 %v7125_v21, %s10495_s15  ;;  %7213 = vrot.lane.b32.xlu0 %v7122_v10, %s10495_s15  ;;  %v7156_v10 = vrot.slane %v7015_v35, 6  ;;  %6962 = vst.msk [vmem:[#allocation3 + $0x34] sm:$0xf] %vm1513_vm12, %v13948_v0  ;;  %v6612_v0 = vld [vmem:[#allocation2 + $0x1a8] sm:$0xf] }
 0x65d   : > { %v13950_v11 = vpop.permute.xlu1 %6859  ;;  %v13955_v6 = vpop.permute.xlu0 %6857  ;;  %v7158_v55 = vrot.slane %v7156_v10, 4 }
 0x65e   : > { %6952 = vst.msk [vmem:[#allocation3 + $0xc] sm:$0xf] %vm1513_vm12, %v13950_v11  ;;  %v7163_v11 = vrot.slane %v7018_v51, 6 }
 0x65f   : > { %6951 = vst.msk [vmem:[#allocation3 + $0x8] sm:$0xf] %vm1513_vm12, %v13955_v6  ;;  %v7160_v22 = vsel %vm11412_vm11, %v7158_v55, %v7159_v42 }
 0x660   : > { %7223 = vrot.lane.b32.xlu2 %v7139_v27, %s10495_s15  ;;  %v7013_v27 = vld [vmem:[#allocation2 + $0x130] sm:$0x3]  ;;  %v14035_v46 = vld [vmem:[#allocation3 + $0x78] sm:$0xf0]  ;;  %v7165_v49 = vrot.slane %v7163_v11, 4 }
 0x661   : > { %10001 = vmatmul.msk.bf16.gmra.mxu2 %vm3281_vm7, %v9939_v12  ;;  %v7011_v12 = vld [vmem:[#allocation2 + $0x128] sm:$0xc]  ;;  %6644 = vst.msk [vmem:[#allocation3 + $0x7c] sm:$0xf] %vm285_vm0, %v6612_v0  ;;  %v7026_v0 = vld [vmem:[#allocation2 + $0x1b4] sm:$0xc] }
 0x662   : > { %v10038_v34 = vrot.slane %v7011_v12, 10  ;;  %v6886_v17 = vpop.permute.xlu2 %6885 }
 0x663   : > { %7221 = vrot.lane.b32.xlu1 %v7136_v19, %s10495_s15  ;;  %7219 = vrot.lane.b32.xlu0 %v7132_v56, %s10495_s15  ;;  %v7152_v19 = vrot.slane %v7013_v27, 6  ;;  %6965 = vst.msk [vmem:[#allocation3 + $0x40] sm:$0xf] %vm1513_vm12, %v6886_v17  ;;  %v7157_v56 = vsel %vm11412_vm11, %v10039_v58, %v7156_v10  ;;  %v7017_v17 = vld [vmem:[#allocation2 + $0x160] sm:$0xc] }
 0x664   : > { %v7150_v21 = vsel %vm11412_vm11, %v10038_v34, %v7149_v45  ;;  %v9947_v34 = vor.u32 %v13651_v23, %v13733_v59  ;;  %v10040_v2 = vrot.slane %v7017_v17, 10  ;;  %v7027_v58 = vld [vmem:[#allocation2 + $0x1b8] sm:$0xf] }
 0x665   : > { %v6866_v40 = vpop.permute.xlu1 %6865  ;;  %v6864_v38 = vpop.permute.xlu0 %6863  ;;  %v7153_v6 = vsel %vm11412_vm11, %v7151_v48, %v7152_v19  ;;  %v7184_v51 = vrot.slane %v7027_v58, 6 }
 0x666   : > { %6955 = vst.msk [vmem:[#allocation3 + $0x18] sm:$0xf] %vm1513_vm12, %v6866_v40  ;;  %v7024_v40 = vld [vmem:[#allocation2 + $0x19c] sm:$0xf]  ;;  %v7164_v4 = vsel %vm11412_vm11, %v10040_v2, %v7163_v11  ;;  %v7319_v2 = vld [vmem:[#allocation2 + $0x214] sm:$0xf] }
 0x667   : > { %6954 = vst.msk [vmem:[#allocation3 + $0x14] sm:$0xf] %vm1513_vm12, %v6864_v38  ;;  %v7166_v38 = vrot.slane %v7019_v20, 6  ;;  %v7177_v25 = vrot.slane %v7024_v40, 6 }
 0x668   : > { %7229 = vrot.lane.b32.xlu2 %v7150_v21, %s10495_s15  ;;  %v7025_v21 = vld [vmem:[#allocation2 + $0x1a0] sm:$0x3] }
 0x669   : > { %v7167_v10 = vsel %vm11412_vm11, %v7165_v49, %v7166_v38  ;;  %v7320_v49 = vld [vmem:[#allocation2 + $0x218] sm:$0xf] }
 0x66a   : > { %v6892_v36 = vpop.permute.xlu2 %6891 }
 0x66b   : > { %7227 = vrot.lane.b32.xlu1 %v7146_v8, %s10495_s15  ;;  %7225 = vrot.lane.b32.xlu0 %v7143_v37, %s10495_s15  ;;  %6968 = vst.msk [vmem:[#allocation3 + $0x4c] sm:$0xf] %vm1513_vm12, %v6892_v36  ;;  %v7179_v8 = vrot.slane %v7177_v25, 4  ;;  %v7180_v37 = vrot.slane %v7025_v21, 6  ;;  %v10042_v36 = vrot.slane %v7023_v1, 10 }
 0x66c   : > { %v7322_v1 = vld [vmem:[#allocation2 + $0x234] sm:$0xf] }
 0x66d   : > { %v6872_v12 = vpop.permute.xlu1 %6871  ;;  %v6870_v52 = vpop.permute.xlu0 %6869  ;;  %v7181_v48 = vsel %vm11412_vm11, %v7179_v8, %v7180_v37  ;;  %v7178_v19 = vsel %vm11412_vm11, %v10042_v36, %v7177_v25  ;;  %v7318_v25 = vld [vmem:[#allocation2 + $0x1fc] sm:$0xf]  ;;  %v7321_v8 = vld [vmem:[#allocation2 + $0x230] sm:$0xf]  ;;  %v7325_v36 = vld [vmem:[#allocation2 + $0x268] sm:$0xf] }
 0x66e   : > { %6958 = vst.msk [vmem:[#allocation3 + $0x24] sm:$0xf] %vm1513_vm12, %v6872_v12  ;;  %v7172_v12 = vrot.slane %v7170_v57, 4 }
 0x66f   : > { %6957 = vst.msk [vmem:[#allocation3 + $0x20] sm:$0xf] %vm1513_vm12, %v6870_v52  ;;  %v7173_v52 = vrot.slane %v7022_v41, 6 }
 0x670   : > { %7235 = vrot.lane.b32.xlu2 %v7160_v22, %s10495_s15  ;;  %v9951_v22 = vor.u32 %v13771_v39, %v13775_v13  ;;  %v7187_v39 = vrot.slane %v7028_v43, 6  ;;  %v10043_v13 = vrot.slane %v7026_v0, 10 }
 0x671   : > { %10002 = vmatmul.msk.bf16.gmra.mxu2 %vm3281_vm7, %v9943_v32  ;;  %v7020_v32 = vld [vmem:[#allocation2 + $0x17c] sm:$0xc] }
 0x672   : > { %v10041_v45 = vrot.slane %v7020_v32, 10  ;;  %v6898_v23 = vpop.permute.xlu2 %6897  ;;  %v7174_v32 = vsel %vm11412_vm11, %v7172_v12, %v7173_v52  ;;  %v9959_v12 = vor.u32 %v13702_v14, %v13792_v28  ;;  %v7324_v52 = vld [vmem:[#allocation2 + $0x250] sm:$0xf]  ;;  %v7329_v14 = vld [vmem:[#allocation2 + $0x2a0] sm:$0xf] }
 0x673   : > { %7233 = vrot.lane.b32.xlu1 %v7157_v56, %s10495_s15  ;;  %7231 = vrot.lane.b32.xlu0 %v7153_v6, %s10495_s15  ;;  %6971 = vst.msk [vmem:[#allocation3 + $0x58] sm:$0xf] %vm1513_vm12, %v6898_v23  ;;  %v7186_v6 = vrot.slane %v7184_v51, 4  ;;  %v7185_v23 = vsel %vm11412_vm11, %v10043_v13, %v7184_v51  ;;  %v7328_v51 = vld [vmem:[#allocation2 + $0x288] sm:$0xf] }
 0x674   : > { %v7171_v26 = vsel %vm11412_vm11, %v10041_v45, %v7170_v57  ;;  %v7317_v57 = vld [vmem:[#allocation2 + $0x1f8] sm:$0xf] }
 0x675   : > { %v6878_v59 = vpop.permute.xlu1 %6877  ;;  %v6876_v35 = vpop.permute.xlu0 %6875  ;;  %v7188_v17 = vsel %vm11412_vm11, %v7186_v6, %v7187_v39  ;;  %v9963_v6 = vor.u32 %v13979_v60, %v13985_v29  ;;  %v7330_v39 = vld [vmem:[#allocation2 + $0x2a4] sm:$0xf]  ;;  %v7335_v60 = vld [vmem:[#allocation2 + $0x2f4] sm:$0xf] }
 0x676   : > { %6961 = vst.msk [vmem:[#allocation3 + $0x30] sm:$0xf] %vm1513_vm12, %v6878_v59 }
 0x677   : > { %6960 = vst.msk [vmem:[#allocation3 + $0x2c] sm:$0xf] %vm1513_vm12, %v6876_v35 }
 0x678   : > { %7241 = vrot.lane.b32.xlu2 %v7171_v26, %s10495_s15  ;;  %v9955_v26 = vor.u32 %v13797_v30, %v13672_v50  ;;  %v7323_v50 = vld [vmem:[#allocation2 + $0x24c] sm:$0xf] }
 0x67a   : > { %v6904_v55 = vpop.permute.xlu2 %6903 }
 0x67b   : > { %7239 = vrot.lane.b32.xlu1 %v7167_v10, %s10495_s15  ;;  %7237 = vrot.lane.b32.xlu0 %v7164_v4, %s10495_s15  ;;  %6974 = vst.msk [vmem:[#allocation3 + $0x64] sm:$0xf] %vm1513_vm12, %v6904_v55 }
 0x67d   : > { %v6884_v42 = vpop.permute.xlu1 %6883  ;;  %v6882_v27 = vpop.permute.xlu0 %6881 }
 0x67e   : > { %6964 = vst.msk [vmem:[#allocation3 + $0x3c] sm:$0xf] %vm1513_vm12, %v6884_v42 }
 0x67f   : > { %6963 = vst.msk [vmem:[#allocation3 + $0x38] sm:$0xf] %vm1513_vm12, %v6882_v27 }
 0x680   : > { %7247 = vrot.lane.b32.xlu2 %v7181_v48, %s10495_s15 }
 0x681   : > { %10003 = vmatmul.msk.bf16.gmra.mxu2 %vm3281_vm7, %v9947_v34 }
 0x682   : > { %v6910_v56 = vpop.permute.xlu2 %6909 }
 0x683   : > { %7245 = vrot.lane.b32.xlu1 %v7178_v19, %s10495_s15  ;;  %7243 = vrot.lane.b32.xlu0 %v7174_v32, %s10495_s15  ;;  %6977 = vst.msk [vmem:[#allocation3 + $0x70] sm:$0xf] %vm1513_vm12, %v6910_v56 }
 0x685   : > { %v6890_v11 = vpop.permute.xlu1 %6889  ;;  %v6888_v34 = vpop.permute.xlu0 %6887 }
 0x686   : > { %6967 = vst.msk [vmem:[#allocation3 + $0x48] sm:$0xf] %vm1513_vm12, %v6890_v11 }
 0x687   : > { %6966 = vst.msk [vmem:[#allocation3 + $0x44] sm:$0xf] %vm1513_vm12, %v6888_v34  ;;  %v7331_v34 = vld [vmem:[#allocation2 + $0x2bc] sm:$0xf] }
 0x688   : > { %7381 = vrot.lane.b32.xlu2 %v7317_v57, %s10496_s16 }
 0x68a   : > { %v6916_v59 = vpop.permute.xlu2 %6915 }
 0x68b   : > { %7251 = vrot.lane.b32.xlu1 %v7188_v17, %s10495_s15  ;;  %7249 = vrot.lane.b32.xlu0 %v7185_v23, %s10495_s15  ;;  %6980 = vst.msk [vmem:[#allocation3 + $0x7c] sm:$0xf] %vm1513_vm12, %v6916_v59  ;;  %v7334_v17 = vld [vmem:[#allocation2 + $0x2dc] sm:$0xf]  ;;  %v7333_v23 = vld [vmem:[#allocation2 + $0x2d8] sm:$0xf] }
 0x68d   : > { %v6896_v40 = vpop.permute.xlu1 %6895  ;;  %v6894_v35 = vpop.permute.xlu0 %6893 }
 0x68e   : > { %6970 = vst.msk [vmem:[#allocation3 + $0x54] sm:$0xf] %vm1513_vm12, %v6896_v40 }
 0x68f   : > { %6969 = vst.msk [vmem:[#allocation3 + $0x50] sm:$0xf] %vm1513_vm12, %v6894_v35 }
 0x690   : > { %7387 = vrot.lane.b32.xlu2 %v7320_v49, %s10496_s16  ;;  %v7338_v49 = vld [vmem:[#allocation2 + $0x314] sm:$0xf] }
 0x691   : > { %10004 = vmatmul.msk.bf16.gmra.mxu2 %vm3281_vm7, %v9951_v22  ;;  %v7327_v22 = vld [vmem:[#allocation2 + $0x284] sm:$0xf] }
 0x692   : > { %v7194_v21 = vpop.permute.xlu2 %7193 }
 0x693   : > { %7385 = vrot.lane.b32.xlu1 %v7319_v2, %s10496_s16  ;;  %7383 = vrot.lane.b32.xlu0 %v7318_v25, %s10496_s16  ;;  %7287 = vst.msk [vmem:[#allocation3 + $0x8] sm:$0xf] %vm1706_vm13, %v7194_v21  ;;  %v7337_v2 = vld [vmem:[#allocation2 + $0x310] sm:$0xf]  ;;  %v7336_v25 = vld [vmem:[#allocation2 + $0x2f8] sm:$0xf] }
 0x694   : > { %v6469_v45 = vpop.f32.mrf.mxu2 }
 0x695   : > { %v14075_v20 = vadd.f32 %v6469_v45, %v12852_v16  ;;  %v6902_v10 = vpop.permute.xlu1 %6901  ;;  %v6900_v4 = vpop.permute.xlu0 %6899 }
 0x696   : > { %6973 = vst.msk [vmem:[#allocation3 + $0x60] sm:$0xf] %vm1513_vm12, %v6902_v10 }
 0x697   : > { %6972 = vst.msk [vmem:[#allocation3 + $0x5c] sm:$0xf] %vm1513_vm12, %v6900_v4  ;;  %v7341_v4 = vld [vmem:[#allocation2 + $0x348] sm:$0xf] }
 0x698   : > { %7393 = vrot.lane.b32.xlu2 %v7323_v50, %s10496_s16 }
 0x69a   : > { %v7200_v37 = vpop.permute.xlu2 %7199 }
 0x69b   : > { %7391 = vrot.lane.b32.xlu1 %v7322_v1, %s10496_s16  ;;  %7389 = vrot.lane.b32.xlu0 %v7321_v8, %s10496_s16  ;;  %7290 = vst.msk [vmem:[#allocation3 + $0x14] sm:$0xf] %vm1706_vm13, %v7200_v37  ;;  %v7344_v8 = vld [vmem:[#allocation2 + $0x368] sm:$0xf]  ;;  %v7343_v37 = vld [vmem:[#allocation2 + $0x364] sm:$0xf] }
 0x69c   : > { %v6471_v16 = vpop.f32.mrf.mxu2 }
 0x69d   : > { %v14088_v38 = vadd.f32 %v6471_v16, %v12871_v7  ;;  %v6908_v41 = vpop.permute.xlu1 %6907  ;;  %v6906_v55 = vpop.permute.xlu0 %6905 }
 0x69e   : > { %6976 = vst.msk [vmem:[#allocation3 + $0x6c] sm:$0xf] %vm1513_vm12, %v6908_v41  ;;  %v9971_v41 = vor.u32 %v13758_v9, %v13990_v47  ;;  %v7511_v9 = vld [vmem:[#allocation2 + $0x210] sm:$0x3]  ;;  %v7346_v47 = vld [vmem:[#allocation2 + $0x384] sm:$0xf] }
 0x69f   : > { %6975 = vst.msk [vmem:[#allocation3 + $0x68] sm:$0xf] %vm1513_vm12, %v6906_v55  ;;  %v7342_v55 = vld [vmem:[#allocation2 + $0x34c] sm:$0xf] }
 0x6a1   : > { %10005 = vmatmul.msk.bf16.gmra.mxu2 %vm3281_vm7, %v9955_v26  ;;  %v9967_v26 = vor.u32 %v13995_v5, %v13725_v62  ;;  %v7340_v62 = vld [vmem:[#allocation2 + $0x330] sm:$0xf]  ;;  %v7339_v5 = vld [vmem:[#allocation2 + $0x32c] sm:$0xf] }
 0x6a2   : > { %v7206_v58 = vpop.permute.xlu2 %7205 }
 0x6a3   : > { %7397 = vrot.lane.b32.xlu1 %v7325_v36, %s10496_s16  ;;  %7395 = vrot.lane.b32.xlu0 %v7324_v52, %s10496_s16  ;;  %7293 = vst.msk [vmem:[#allocation3 + $0x20] sm:$0xf] %vm1706_vm13, %v7206_v58  ;;  %v7347_v52 = vld [vmem:[#allocation2 + $0x39c] sm:$0xf] }
 0x6a4   : > { %v6474_v7 = vpop.f32.mrf.mxu2 }
 0x6a5   : > { %v14100_v30 = vadd.f32 %v6474_v7, %v12885_v63  ;;  %v7326_v63 = vld [vmem:[#allocation2 + $0x26c] sm:$0xf]  ;;  %v6914_v48 = vpop.permute.xlu1 %6913  ;;  %v6912_v19 = vpop.permute.xlu0 %6911 }
 0x6a6   : > { %7399 = vrot.lane.b32.xlu2 %v7326_v63, %s10496_s16  ;;  %6979 = vst.msk [vmem:[#allocation3 + $0x78] sm:$0xf] %vm1513_vm12, %v6914_v48  ;;  %v7510_v63 = vld [vmem:[#allocation2 + $0x20c] sm:$0xf]  ;;  %v7345_v48 = vld [vmem:[#allocation2 + $0x380] sm:$0xf] }
 0x6a7   : > { %6978 = vst.msk [vmem:[#allocation3 + $0x74] sm:$0xf] %vm1513_vm12, %v6912_v19  ;;  %v7607_v58 = vrot.slane %v7510_v63, 6  ;;  %v7509_v19 = vld [vmem:[#allocation2 + $0x208] sm:$0xc] }
 0x6a8   : > { %v7525_v63 = vld [vmem:[#allocation2 + $0x298] sm:$0xf] }
 0x6aa   : > { %v7212_v32 = vpop.permute.xlu2 %7211 }
 0x6ab   : > { %7403 = vrot.lane.b32.xlu1 %v7328_v51, %s10496_s16  ;;  %7401 = vrot.lane.b32.xlu0 %v7327_v22, %s10496_s16  ;;  %7296 = vst.msk [vmem:[#allocation3 + $0x2c] sm:$0xf] %vm1706_vm13, %v7212_v32  ;;  %v10044_v22 = vrot.slane %v7509_v19, 10  ;;  %v7521_v19 = vld [vmem:[#allocation2 + $0x278] sm:$0xc] }
 0x6ac   : > { %v6476_v42 = vpop.f32.mrf.mxu2 }
 0x6ad   : > { %v14109_v27 = vadd.f32 %v6476_v42, %v12904_v33  ;;  %v7192_v43 = vpop.permute.xlu1 %7191  ;;  %v7190_v0 = vpop.permute.xlu0 %7189 }
 0x6ae   : > { %7405 = vrot.lane.b32.xlu2 %v7329_v14, %s10496_s16  ;;  %7286 = vst.msk [vmem:[#allocation3 + $0x4] sm:$0xf] %vm1706_vm13, %v7192_v43  ;;  %v7610_v14 = vrot.slane %v7511_v9, 6  ;;  %v7513_v43 = vld [vmem:[#allocation2 + $0x228] sm:$0xf] }
 0x6af   : > { %7285 = vst.msk [vmem:[#allocation3] sm:$0xf] %vm1706_vm13, %v7190_v0  ;;  %v7523_v9 = vld [vmem:[#allocation2 + $0x280] sm:$0x3] }
 0x6b1   : > { %10006 = vmatmul.msk.bf16.gmra.mxu2 %vm3281_vm7, %v9959_v12 }
 0x6b2   : > { %v7218_v13 = vpop.permute.xlu2 %7217 }
 0x6b3   : > { %7409 = vrot.lane.b32.xlu1 %v7331_v34, %s10496_s16  ;;  %7407 = vrot.lane.b32.xlu0 %v7330_v39, %s10496_s16  ;;  %7299 = vst.msk [vmem:[#allocation3 + $0x38] sm:$0xf] %vm1706_vm13, %v7218_v13  ;;  %v7516_v34 = vld [vmem:[#allocation2 + $0x244] sm:$0xf]  ;;  %v7614_v39 = vrot.slane %v7513_v43, 6  ;;  %v9975_v13 = vor.u32 %v14000_v61, %v14007_v54 }
 0x6b4   : > { %v6479_v33 = vpop.f32.mrf.mxu2 }
 0x6b5   : > { %v14121_v28 = vadd.f32 %v6479_v33, %v12918_v24  ;;  %v7332_v24 = vld [vmem:[#allocation2 + $0x2c0] sm:$0xf]  ;;  %v7198_v45 = vpop.permute.xlu1 %7197  ;;  %v7609_v33 = vrot.slane %v7607_v58, 4 }
 0x6b6   : > { %7411 = vrot.lane.b32.xlu2 %v7332_v24, %s10496_s16  ;;  %7289 = vst.msk [vmem:[#allocation3 + $0x10] sm:$0xf] %vm1706_vm13, %v7198_v45  ;;  %v7515_v24 = vld [vmem:[#allocation2 + $0x240] sm:$0xc] }
 0x6b7   : > { %v7348_v45 = vld [vmem:[#allocation2 + $0x3a0] sm:$0xf] }
 0x6ba   : > { %v7224_v59 = vpop.permute.xlu2 %7223 }
 0x6bb   : > { %7415 = vrot.lane.b32.xlu1 %v7334_v17, %s10496_s16  ;;  %7413 = vrot.lane.b32.xlu0 %v7333_v23, %s10496_s16  ;;  %7302 = vst.msk [vmem:[#allocation3 + $0x44] sm:$0xf] %vm1706_vm13, %v7224_v59  ;;  %v7512_v17 = vld [vmem:[#allocation2 + $0x224] sm:$0xc]  ;;  %v7519_v59 = vld [vmem:[#allocation2 + $0x260] sm:$0xf] }
 0x6bc   : > { %v6481_v56 = vpop.f32.mrf.mxu2  ;;  %v10045_v54 = vrot.slane %v7512_v17, 10 }
 0x6bd   : > { %v14130_v11 = vadd.f32 %v6481_v56, %v12937_v53  ;;  %v7196_v53 = vpop.permute.xlu0 %7195  ;;  %v7204_v40 = vpop.permute.xlu1 %7203  ;;  %v7611_v56 = vsel %vm11412_vm11, %v7609_v33, %v7610_v14  ;;  %v7528_v14 = vld [vmem:[#allocation2 + $0x2b4] sm:$0xf] }
 0x6be   : > { %7288 = vst.msk [vmem:[#allocation3 + $0xc] sm:$0xf] %vm1706_vm13, %v7196_v53  ;;  %7417 = vrot.lane.b32.xlu2 %v7335_v60, %s10496_s16  ;;  %v7514_v53 = vld [vmem:[#allocation2 + $0x22c] sm:$0x3]  ;;  %v7621_v60 = vrot.slane %v7516_v34, 6 }
 0x6bf   : > { %7292 = vst.msk [vmem:[#allocation3 + $0x1c] sm:$0xf] %vm1706_vm13, %v7204_v40  ;;  %v7616_v40 = vrot.slane %v7614_v39, 4 }
 0x6c1   : > { %10007 = vmatmul.msk.bf16.gmra.mxu2 %vm3281_vm7, %v9963_v6  ;;  %v7608_v6 = vsel %vm11412_vm11, %v10044_v22, %v7607_v58  ;;  %v10048_v22 = vrot.slane %v7521_v19, 10 }
 0x6c2   : > { %v7230_v21 = vpop.permute.xlu2 %7229 }
 0x6c3   : > { %7421 = vrot.lane.b32.xlu1 %v7337_v2, %s10496_s16  ;;  %7419 = vrot.lane.b32.xlu0 %v7336_v25, %s10496_s16  ;;  %7305 = vst.msk [vmem:[#allocation3 + $0x50] sm:$0xf] %vm1706_vm13, %v7230_v21  ;;  %v7628_v2 = vrot.slane %v7519_v59, 6  ;;  %v7615_v21 = vsel %vm11412_vm11, %v10045_v54, %v7614_v39  ;;  %v7531_v59 = vld [vmem:[#allocation2 + $0x2d0] sm:$0xf] }
 0x6c4   : > { %v6484_v57 = vpop.f32.mrf.mxu2  ;;  %v7534_v54 = vld [vmem:[#allocation2 + $0x2ec] sm:$0xf] }
 0x6c5   : > { %v14142_v29 = vadd.f32 %v6484_v57, %v12951_v31  ;;  %v7202_v16 = vpop.permute.xlu0 %7201  ;;  %v10046_v57 = vrot.slane %v7515_v24, 10 }
 0x6c6   : > { %7291 = vst.msk [vmem:[#allocation3 + $0x18] sm:$0xf] %vm1706_vm13, %v7202_v16  ;;  %7423 = vrot.lane.b32.xlu2 %v7338_v49, %s10496_s16 }
 0x6c7   : > { %v7622_v49 = vsel %vm11412_vm11, %v10046_v57, %v7621_v60 }
 0x6ca   : > { %v7236_v7 = vpop.permute.xlu2 %7235 }
 0x6cb   : > { %7427 = vrot.lane.b32.xlu1 %v7340_v62, %s10496_s16  ;;  %7425 = vrot.lane.b32.xlu0 %v7339_v5, %s10496_s16  ;;  %7308 = vst.msk [vmem:[#allocation3 + $0x5c] sm:$0xf] %vm1706_vm13, %v7236_v7  ;;  %v7517_v62 = vld [vmem:[#allocation2 + $0x248] sm:$0x3] }
 0x6cc   : > { %v6486_v35 = vpop.f32.mrf.mxu2 }
 0x6cd   : > { %v14150_v31 = vadd.f32 %v6486_v35, %v12970_v15  ;;  %v7210_v15 = vpop.permute.xlu1 %7209  ;;  %v7208_v10 = vpop.permute.xlu0 %7207  ;;  %v7617_v35 = vrot.slane %v7514_v53, 6 }
 0x6ce   : > { %7295 = vst.msk [vmem:[#allocation3 + $0x28] sm:$0xf] %vm1706_vm13, %v7210_v15  ;;  %7429 = vrot.lane.b32.xlu2 %v7341_v4, %s10496_s16  ;;  %v7518_v15 = vld [vmem:[#allocation2 + $0x25c] sm:$0xc] }
 0x6cf   : > { %7294 = vst.msk [vmem:[#allocation3 + $0x24] sm:$0xf] %vm1706_vm13, %v7208_v10  ;;  %v7618_v25 = vsel %vm11412_vm11, %v7616_v40, %v7617_v35  ;;  %v7630_v10 = vrot.slane %v7628_v2, 4  ;;  %v10047_v7 = vrot.slane %v7518_v15, 10  ;;  %v7530_v15 = vld [vmem:[#allocation2 + $0x2cc] sm:$0xc] }
 0x6d1   : > { %10008 = vmatmul.msk.bf16.gmra.mxu2 %vm3281_vm7, %v9967_v26  ;;  %v7520_v26 = vld [vmem:[#allocation2 + $0x264] sm:$0x3] }
 0x6d2   : > { %v7242_v42 = vpop.permute.xlu2 %7241  ;;  %v7631_v4 = vrot.slane %v7520_v26, 6  ;;  %v7532_v26 = vld [vmem:[#allocation2 + $0x2d4] sm:$0x3] }
 0x6d3   : > { %7433 = vrot.lane.b32.xlu1 %v7343_v37, %s10496_s16  ;;  %7431 = vrot.lane.b32.xlu0 %v7342_v55, %s10496_s16  ;;  %7311 = vst.msk [vmem:[#allocation3 + $0x68] sm:$0xf] %vm1706_vm13, %v7242_v42  ;;  %v7522_v37 = vld [vmem:[#allocation2 + $0x27c] sm:$0xf]  ;;  %v7524_v42 = vld [vmem:[#allocation2 + $0x294] sm:$0xc] }
 0x6d4   : > { %v7632_v55 = vsel %vm11412_vm11, %v7630_v10, %v7631_v4  ;;  %v7537_v4 = vld [vmem:[#allocation2 + $0x308] sm:$0xf] }
 0x6d5   : > { %v7216_v50 = vpop.permute.xlu1 %7215  ;;  %v7214_v1 = vpop.permute.xlu0 %7213 }
 0x6d6   : > { %7298 = vst.msk [vmem:[#allocation3 + $0x34] sm:$0xf] %vm1706_vm13, %v7216_v50  ;;  %7435 = vrot.lane.b32.xlu2 %v7344_v8, %s10496_s16  ;;  %v7624_v8 = vrot.slane %v7517_v62, 6 }
 0x6d7   : > { %7297 = vst.msk [vmem:[#allocation3 + $0x30] sm:$0xf] %vm1706_vm13, %v7214_v1  ;;  %v7623_v1 = vrot.slane %v7621_v60, 4 }
 0x6d9   : > { %v7625_v58 = vsel %vm11412_vm11, %v7623_v1, %v7624_v8 }
 0x6da   : > { %v7248_v51 = vpop.permute.xlu2 %7247 }
 0x6db   : > { %7439 = vrot.lane.b32.xlu1 %v7346_v47, %s10496_s16  ;;  %7437 = vrot.lane.b32.xlu0 %v7345_v48, %s10496_s16  ;;  %7314 = vst.msk [vmem:[#allocation3 + $0x74] sm:$0xf] %vm1706_vm13, %v7248_v51  ;;  %v10049_v47 = vrot.slane %v7524_v42, 10  ;;  %v7642_v48 = vrot.slane %v7525_v63, 6  ;;  %v7536_v63 = vld [vmem:[#allocation2 + $0x304] sm:$0xc] }
 0x6dd   : > { %v7222_v36 = vpop.permute.xlu1 %7221  ;;  %v7220_v12 = vpop.permute.xlu0 %7219  ;;  %v7643_v43 = vsel %vm11412_vm11, %v10049_v47, %v7642_v48  ;;  %v7644_v17 = vrot.slane %v7642_v48, 4 }
 0x6de   : > { %7301 = vst.msk [vmem:[#allocation3 + $0x40] sm:$0xf] %vm1706_vm13, %v7222_v36  ;;  %7441 = vrot.lane.b32.xlu2 %v7347_v52, %s10496_s16  ;;  %v7629_v36 = vsel %vm11412_vm11, %v10047_v7, %v7628_v2  ;;  %v9979_v52 = vor.u32 %v14035_v46, %v13783_v44  ;;  %v7638_v46 = vrot.slane %v7523_v9, 6  ;;  %v10053_v9 = vrot.slane %v7536_v63, 10 }
 0x6df   : > { %7300 = vst.msk [vmem:[#allocation3 + $0x3c] sm:$0xf] %vm1706_vm13, %v7220_v12  ;;  %v7635_v12 = vrot.slane %v7522_v37, 6  ;;  %v7670_v37 = vrot.slane %v7537_v4, 6 }
 0x6e1   : > { %10009 = vmatmul.msk.bf16.gmra.mxu2 %vm3281_vm7, %v9971_v41  ;;  %v7637_v44 = vrot.slane %v7635_v12, 4  ;;  %v7636_v34 = vsel %vm11412_vm11, %v10048_v22, %v7635_v12  ;;  %v7671_v22 = vsel %vm11412_vm11, %v10053_v9, %v7670_v37 }
 0x6e2   : > { %v7382_v23 = vpop.permute.xlu2 %7381 }
 0x6e3   : > { %7717 = vrot.lane.b32.xlu1 %v7608_v6, %s10497_s17  ;;  %7443 = vrot.lane.b32.xlu0 %v7348_v45, %s10496_s16  ;;  %7477 = vst.msk [vmem:[#allocation3] sm:$0xf] %vm2043_vm14, %v7382_v23  ;;  %v7639_v24 = vsel %vm11412_vm11, %v7637_v44, %v7638_v46  ;;  %v7527_v6 = vld [vmem:[#allocation2 + $0x2b0] sm:$0xc]  ;;  %v7526_v45 = vld [vmem:[#allocation2 + $0x29c] sm:$0x3] }
 0x6e4   : > { %v10050_v57 = vrot.slane %v7527_v6, 10  ;;  %v7645_v23 = vrot.slane %v7526_v45, 6  ;;  %v7542_v46 = vld [vmem:[#allocation2 + $0x33c] sm:$0xc] }
 0x6e5   : > { %v7228_v32 = vpop.permute.xlu1 %7227  ;;  %v7226_v0 = vpop.permute.xlu0 %7225 }
 0x6e6   : > { %7304 = vst.msk [vmem:[#allocation3 + $0x4c] sm:$0xf] %vm1706_vm13, %v7228_v32  ;;  %7719 = vrot.lane.b32.xlu2 %v7611_v56, %s10497_s17  ;;  %v7529_v56 = vld [vmem:[#allocation2 + $0x2b8] sm:$0x3]  ;;  %v7646_v2 = vsel %vm11412_vm11, %v7644_v17, %v7645_v23 }
 0x6e7   : > { %7303 = vst.msk [vmem:[#allocation3 + $0x48] sm:$0xf] %vm1706_vm13, %v7226_v0  ;;  %v7649_v0 = vrot.slane %v7528_v14, 6 }
 0x6e9   : > { %v7651_v39 = vrot.slane %v7649_v0, 4 }
 0x6ea   : > { %v7388_v5 = vpop.permute.xlu2 %7387 }
 0x6eb   : > { %7723 = vrot.lane.b32.xlu1 %v7618_v25, %s10497_s17  ;;  %7721 = vrot.lane.b32.xlu0 %v7615_v21, %s10497_s17  ;;  %7480 = vst.msk [vmem:[#allocation3 + $0xc] sm:$0xf] %vm2043_vm14, %v7388_v5  ;;  %v7663_v21 = vrot.slane %v7534_v54, 6  ;;  %v7659_v5 = vrot.slane %v7532_v26, 6 }
 0x6ed   : > { %v7234_v61 = vpop.permute.xlu1 %7233  ;;  %v7232_v16 = vpop.permute.xlu0 %7231  ;;  %v7665_v48 = vrot.slane %v7663_v21, 4 }
 0x6ee   : > { %7307 = vst.msk [vmem:[#allocation3 + $0x58] sm:$0xf] %vm1706_vm13, %v7234_v61  ;;  %7725 = vrot.lane.b32.xlu2 %v7622_v49, %s10497_s17  ;;  %v7533_v61 = vld [vmem:[#allocation2 + $0x2e8] sm:$0xc]  ;;  %v7656_v49 = vrot.slane %v7531_v59, 6 }
 0x6ef   : > { %7306 = vst.msk [vmem:[#allocation3 + $0x54] sm:$0xf] %vm1706_vm13, %v7232_v16  ;;  %v7650_v16 = vsel %vm11412_vm11, %v10050_v57, %v7649_v0  ;;  %v10052_v25 = vrot.slane %v7533_v61, 10  ;;  %v7541_v0 = vld [vmem:[#allocation2 + $0x328] sm:$0x3] }
 0x6f0   : > { %v7658_v62 = vrot.slane %v7656_v49, 4  ;;  %v7680_v45 = vrot.slane %v7541_v0, 6  ;;  %v7547_v59 = vld [vmem:[#allocation2 + $0x360] sm:$0x3]  ;;  %v7545_v61 = vld [vmem:[#allocation2 + $0x358] sm:$0xc] }
 0x6f1   : > { %10010 = vmatmul.msk.bf16.gmra.mxu2 %vm3281_vm7, %v9975_v13  ;;  %v7652_v13 = vrot.slane %v7529_v56, 6  ;;  %v7664_v8 = vsel %vm11412_vm11, %v10052_v25, %v7663_v21  ;;  %v10055_v56 = vrot.slane %v7542_v46, 10  ;;  %v10056_v26 = vrot.slane %v7545_v61, 10  ;;  %v7554_v46 = vld [vmem:[#allocation2 + $0x3ac] sm:$0xc] }
 0x6f2   : > { %v7394_v33 = vpop.permute.xlu2 %7393  ;;  %v10059_v0 = vrot.slane %v7554_v46, 10 }
 0x6f3   : > { %7729 = vrot.lane.b32.xlu1 %v7629_v36, %s10497_s17  ;;  %7727 = vrot.lane.b32.xlu0 %v7625_v58, %s10497_s17  ;;  %7483 = vst.msk [vmem:[#allocation3 + $0x18] sm:$0xf] %vm2043_vm14, %v7394_v33  ;;  %v7653_v35 = vsel %vm11412_vm11, %v7651_v39, %v7652_v13  ;;  %v7672_v36 = vrot.slane %v7670_v37, 4  ;;  %v7540_v33 = vld [vmem:[#allocation2 + $0x324] sm:$0xf] }
 0x6f4   : > { %v7546_v39 = vld [vmem:[#allocation2 + $0x35c] sm:$0xf] }
 0x6f5   : > { %v7240_v50 = vpop.permute.xlu1 %7239  ;;  %v7238_v41 = vpop.permute.xlu0 %7237  ;;  %v7691_v23 = vrot.slane %v7546_v39, 6  ;;  %v7550_v37 = vld [vmem:[#allocation2 + $0x37c] sm:$0x3] }
 0x6f6   : > { %7310 = vst.msk [vmem:[#allocation3 + $0x64] sm:$0xf] %vm1706_vm13, %v7240_v50  ;;  %7731 = vrot.lane.b32.xlu2 %v7632_v55, %s10497_s17  ;;  %v10051_v50 = vrot.slane %v7530_v15, 10  ;;  %v7660_v55 = vsel %vm11412_vm11, %v7658_v62, %v7659_v5  ;;  %v7551_v5 = vld [vmem:[#allocation2 + $0x390] sm:$0xc] }
 0x6f7   : > { %7309 = vst.msk [vmem:[#allocation3 + $0x60] sm:$0xf] %vm1706_vm13, %v7238_v41  ;;  %v7538_v41 = vld [vmem:[#allocation2 + $0x30c] sm:$0x3]  ;;  %v7693_v54 = vrot.slane %v7691_v23, 4 }
 0x6f8   : > { %v7657_v42 = vsel %vm11412_vm11, %v10051_v50, %v7656_v49  ;;  %v7673_v12 = vrot.slane %v7538_v41, 6  ;;  %v7544_v49 = vld [vmem:[#allocation2 + $0x344] sm:$0x3]  ;;  %v7692_v50 = vsel %vm11412_vm11, %v10056_v26, %v7691_v23  ;;  %v10058_v41 = vrot.slane %v7551_v5, 10  ;;  %v7847_v23 = vld [vmem:[#allocation2 + $0x3f4] sm:$0xf] }
 0x6f9   : > { %v7687_v15 = vrot.slane %v7544_v49, 6  ;;  %v7849_v49 = vld [vmem:[#allocation2 + $0x410] sm:$0xf] }
 0x6fa   : > { %v7674_v44 = vsel %vm11412_vm11, %v7672_v36, %v7673_v12  ;;  %v7555_v36 = vld [vmem:[#allocation2 + $0x3b0] sm:$0xf] }
 0x6fb   : > { %7735 = vrot.lane.b32.xlu1 %v7639_v24, %s10497_s17  ;;  %7733 = vrot.lane.b32.xlu0 %v7636_v34, %s10497_s17  ;;  %v7539_v34 = vld [vmem:[#allocation2 + $0x320] sm:$0xc] }
 0x6fc   : > { %v10054_v57 = vrot.slane %v7539_v34, 10 }
 0x6fd   : > { %v7246_v51 = vpop.permute.xlu1 %7245  ;;  %v7244_v32 = vpop.permute.xlu0 %7243 }
 0x6fe   : > { %7313 = vst.msk [vmem:[#allocation3 + $0x70] sm:$0xf] %vm1706_vm13, %v7246_v51  ;;  %7737 = vrot.lane.b32.xlu2 %v7643_v43, %s10497_s17  ;;  %v7543_v51 = vld [vmem:[#allocation2 + $0x340] sm:$0xf] }
 0x6ff   : > { %7312 = vst.msk [vmem:[#allocation3 + $0x6c] sm:$0xf] %vm1706_vm13, %v7244_v32  ;;  %v7677_v32 = vrot.slane %v7540_v33, 6  ;;  %v7684_v24 = vrot.slane %v7543_v51, 6  ;;  %v7556_v33 = vld [vmem:[#allocation2 + $0x3b4] sm:$0x3] }
 0x700   : > { %v7400_v53 = vpop.permute.xlu2 %7399 }
 0x701   : > { %10011 = vmatmul.msk.bf16.gmra.mxu2 %vm3281_vm7, %v9979_v52  ;;  %7486 = vst.msk [vmem:[#allocation3 + $0x24] sm:$0xf] %vm2043_vm14, %v7400_v53  ;;  %v7535_v52 = vld [vmem:[#allocation2 + $0x2f0] sm:$0x3]  ;;  %v7679_v13 = vrot.slane %v7677_v32, 4  ;;  %v7685_v17 = vsel %vm11412_vm11, %v10055_v56, %v7684_v24  ;;  %v7686_v21 = vrot.slane %v7684_v24, 4 }
 0x702   : > { %v7666_v19 = vrot.slane %v7535_v52, 6  ;;  %v7701_v52 = vrot.slane %v7550_v37, 6  ;;  %v7856_v37 = vld [vmem:[#allocation2 + $0x47c] sm:$0xf] }
 0x703   : > { %7741 = vrot.lane.b32.xlu1 %v7650_v16, %s10497_s17  ;;  %7739 = vrot.lane.b32.xlu0 %v7646_v2, %s10497_s17  ;;  %v7694_v16 = vrot.slane %v7547_v59, 6  ;;  %v7846_v59 = vld [vmem:[#allocation2 + $0x3f0] sm:$0xf] }
 0x704   : > { %v7667_v43 = vsel %vm11412_vm11, %v7665_v48, %v7666_v19  ;;  %v7712_v19 = vrot.slane %v7555_v36, 6 }
 0x705   : > { %v7252_v60 = vpop.permute.xlu1 %7251  ;;  %v7250_v40 = vpop.permute.xlu0 %7249  ;;  %v7695_v62 = vsel %vm11412_vm11, %v7693_v54, %v7694_v16  ;;  %v7851_v54 = vld [vmem:[#allocation2 + $0x42c] sm:$0xf]  ;;  %v7850_v16 = vld [vmem:[#allocation2 + $0x428] sm:$0xf] }
 0x706   : > { %7316 = vst.msk [vmem:[#allocation3 + $0x7c] sm:$0xf] %vm1706_vm13, %v7252_v60  ;;  %7743 = vrot.lane.b32.xlu2 %v7653_v35, %s10497_s17  ;;  %v7678_v35 = vsel %vm11412_vm11, %v10054_v57, %v7677_v32  ;;  %v7714_v51 = vrot.slane %v7712_v19, 4  ;;  %v7553_v32 = vld [vmem:[#allocation2 + $0x398] sm:$0x3] }
 0x707   : > { %7315 = vst.msk [vmem:[#allocation3 + $0x78] sm:$0xf] %vm1706_vm13, %v7250_v40  ;;  %v7681_v40 = vsel %vm11412_vm11, %v7679_v13, %v7680_v45  ;;  %v7708_v34 = vrot.slane %v7553_v32, 6  ;;  %v7713_v13 = vsel %vm11412_vm11, %v10059_v0, %v7712_v19 }
 0x708   : > { %v7406_v10 = vpop.permute.xlu2 %7405 }
 0x709   : > { %7489 = vst.msk [vmem:[#allocation3 + $0x30] sm:$0xf] %vm2043_vm14, %v7406_v10  ;;  %v7549_v10 = vld [vmem:[#allocation2 + $0x378] sm:$0xf] }
 0x70b   : > { %7747 = vrot.lane.b32.xlu1 %v7660_v55, %s10497_s17  ;;  %7745 = vrot.lane.b32.xlu0 %v7657_v42, %s10497_s17  ;;  %v7548_v42 = vld [vmem:[#allocation2 + $0x374] sm:$0xc] }
 0x70c   : > { %v10057_v9 = vrot.slane %v7548_v42, 10 }
 0x70d   : > { %v7386_v7 = vpop.permute.xlu1 %7385  ;;  %v7384_v1 = vpop.permute.xlu0 %7383 }
 0x70e   : > { %7479 = vst.msk [vmem:[#allocation3 + $0x8] sm:$0xf] %vm2043_vm14, %v7386_v7  ;;  %7749 = vrot.lane.b32.xlu2 %v7664_v8, %s10497_s17  ;;  %v7552_v7 = vld [vmem:[#allocation2 + $0x394] sm:$0xf]  ;;  %v7688_v8 = vsel %vm11412_vm11, %v7686_v21, %v7687_v15  ;;  %v7854_v21 = vld [vmem:[#allocation2 + $0x460] sm:$0xf] }
 0x70f   : > { %7478 = vst.msk [vmem:[#allocation3 + $0x4] sm:$0xf] %vm2043_vm14, %v7384_v1  ;;  %v7698_v1 = vrot.slane %v7549_v10, 6  ;;  %v7705_v55 = vrot.slane %v7552_v7, 6  ;;  %v7853_v15 = vld [vmem:[#allocation2 + $0x448] sm:$0xf] }
 0x710   : > { %v7412_v58 = vpop.permute.xlu2 %7411  ;;  %v7852_v10 = vld [vmem:[#allocation2 + $0x444] sm:$0xf] }
 0x711   : > { %7492 = vst.msk [vmem:[#allocation3 + $0x3c] sm:$0xf] %vm2043_vm14, %v7412_v58  ;;  %v7700_v12 = vrot.slane %v7698_v1, 4  ;;  %v7706_v48 = vsel %vm11412_vm11, %v10058_v41, %v7705_v55  ;;  %v7707_v24 = vrot.slane %v7705_v55, 4  ;;  %v7855_v41 = vld [vmem:[#allocation2 + $0x464] sm:$0xf] }
 0x712   : > { %v8038_v55 = vld [vmem:[#allocation2 + $0x3f8] sm:$0xe] }
 0x713   : > { %7753 = vrot.lane.b32.xlu1 %v7671_v22, %s10497_s17  ;;  %7751 = vrot.lane.b32.xlu0 %v7667_v43, %s10497_s17  ;;  %v7715_v22 = vrot.slane %v7556_v33, 6  ;;  %v7709_v45 = vsel %vm11412_vm11, %v7707_v24, %v7708_v34  ;;  %v7858_v33 = vld [vmem:[#allocation2 + $0x498] sm:$0xf]  ;;  %v7859_v24 = vld [vmem:[#allocation2 + $0x49c] sm:$0xf] }
 0x715   : > { %v7392_v47 = vpop.permute.xlu1 %7391  ;;  %v7390_v14 = vpop.permute.xlu0 %7389  ;;  %v7716_v39 = vsel %vm11412_vm11, %v7714_v51, %v7715_v22  ;;  %v8042_v51 = vld [vmem:[#allocation2 + $0x418] sm:$0xf] }
 0x716   : > { %7482 = vst.msk [vmem:[#allocation3 + $0x14] sm:$0xf] %vm2043_vm14, %v7392_v47  ;;  %7755 = vrot.lane.b32.xlu2 %v7674_v44, %s10497_s17  ;;  %v7699_v44 = vsel %vm11412_vm11, %v10057_v9, %v7698_v1  ;;  %v8143_v34 = vrot.slane %v8042_v51, 5 }
 0x717   : > { %7481 = vst.msk [vmem:[#allocation3 + $0x10] sm:$0xf] %vm2043_vm14, %v7390_v14  ;;  %v7702_v14 = vsel %vm11412_vm11, %v7700_v12, %v7701_v52  ;;  %v10060_v12 = vrot.slane %v8038_v55, 9 }
 0x718   : > { %v7418_v6 = vpop.permute.xlu2 %7417 }
 0x719   : > { %7495 = vst.msk [vmem:[#allocation3 + $0x48] sm:$0xf] %vm2043_vm14, %v7418_v6 }
 0x71b   : > { %7759 = vrot.lane.b32.xlu1 %v7681_v40, %s10497_s17  ;;  %7757 = vrot.lane.b32.xlu0 %v7678_v35, %s10497_s17 }
 0x71d   : > { %v7398_v53 = vpop.permute.xlu1 %7397  ;;  %v7396_v60 = vpop.permute.xlu0 %7395 }
 0x71e   : > { %7485 = vst.msk [vmem:[#allocation3 + $0x20] sm:$0xf] %vm2043_vm14, %v7398_v53  ;;  %7761 = vrot.lane.b32.xlu2 %v7685_v17, %s10497_s17  ;;  %v7848_v17 = vld [vmem:[#allocation2 + $0x40c] sm:$0xf] }
 0x71f   : > { %7484 = vst.msk [vmem:[#allocation3 + $0x1c] sm:$0xf] %vm2043_vm14, %v7396_v60 }
 0x720   : > { %v7424_v2 = vpop.permute.xlu2 %7423 }
 0x721   : > { %7498 = vst.msk [vmem:[#allocation3 + $0x54] sm:$0xf] %vm2043_vm14, %v7424_v2 }
 0x723   : > { %7765 = vrot.lane.b32.xlu1 %v7692_v50, %s10497_s17  ;;  %7763 = vrot.lane.b32.xlu0 %v7688_v8, %s10497_s17  ;;  %v7857_v50 = vld [vmem:[#allocation2 + $0x480] sm:$0xf] }
 0x724   : > { %v8040_v8 = vld [vmem:[#allocation2 + $0x400] sm:$0x1] }
 0x725   : > { %v7404_v25 = vpop.permute.xlu1 %7403  ;;  %v7402_v4 = vpop.permute.xlu0 %7401 }
 0x726   : > { %7488 = vst.msk [vmem:[#allocation3 + $0x2c] sm:$0xf] %vm2043_vm14, %v7404_v25  ;;  %7767 = vrot.lane.b32.xlu2 %v7695_v62, %s10497_s17  ;;  %v8039_v62 = vld [vmem:[#allocation2 + $0x3fc] sm:$0xf] }
 0x727   : > { %7487 = vst.msk [vmem:[#allocation3 + $0x28] sm:$0xf] %vm2043_vm14, %v7402_v4  ;;  %v8136_v1 = vrot.slane %v8039_v62, 5 }
 0x728   : > { %v7430_v63 = vpop.permute.xlu2 %7429 }
 0x729   : > { %7501 = vst.msk [vmem:[#allocation3 + $0x60] sm:$0xf] %vm2043_vm14, %v7430_v63  ;;  %v8138_v42 = vrot.slane %v8136_v1, 4  ;;  %v8139_v63 = vrot.slane %v8040_v8, 5 }
 0x72b   : > { %7771 = vrot.lane.b32.xlu1 %v7702_v14, %s10497_s17  ;;  %7769 = vrot.lane.b32.xlu0 %v7699_v44, %s10497_s17  ;;  %v8376_v14 = vld [vmem:[#allocation2 + $0x408] sm:$0x3]  ;;  %v8374_v44 = vld [vmem:[#allocation2 + $0x400] sm:$0xc] }
 0x72c   : > { %v8475_v32 = vrot.slane %v8376_v14, 6  ;;  %v10076_v0 = vrot.slane %v8374_v44, 10 }
 0x72d   : > { %v7410_v58 = vpop.permute.xlu1 %7409  ;;  %v7408_v47 = vpop.permute.xlu0 %7407 }
 0x72e   : > { %7491 = vst.msk [vmem:[#allocation3 + $0x38] sm:$0xf] %vm2043_vm14, %v7410_v58  ;;  %7773 = vrot.lane.b32.xlu2 %v7706_v48, %s10497_s17  ;;  %v8375_v58 = vld [vmem:[#allocation2 + $0x404] sm:$0xf]  ;;  %v8137_v48 = vsel %vm10607_vm3, %v10060_v12, %v8136_v1 }
 0x72f   : > { %7490 = vst.msk [vmem:[#allocation3 + $0x34] sm:$0xf] %vm2043_vm14, %v7408_v47  ;;  %v8140_v47 = vsel %vm10607_vm3, %v8138_v42, %v8139_v63  ;;  %v8472_v19 = vrot.slane %v8375_v58, 6  ;;  %v8044_v63 = vld [vmem:[#allocation2 + $0x430] sm:$0xe] }
 0x730   : > { %v7436_v43 = vpop.permute.xlu2 %7435 }
 0x731   : > { %7504 = vst.msk [vmem:[#allocation3 + $0x6c] sm:$0xf] %vm2043_vm14, %v7436_v43  ;;  %v8474_v22 = vrot.slane %v8472_v19, 4 }
 0x733   : > { %7777 = vrot.lane.b32.xlu1 %v7713_v13, %s10497_s17  ;;  %7775 = vrot.lane.b32.xlu0 %v7709_v45, %s10497_s17  ;;  %v8473_v13 = vsel %vm11412_vm11, %v10076_v0, %v8472_v19  ;;  %v8041_v45 = vld [vmem:[#allocation2 + $0x414] sm:$0xe]  ;;  %v8047_v19 = vld [vmem:[#allocation2 + $0x44c] sm:$0xe] }
 0x735   : > { %v7416_v56 = vpop.permute.xlu1 %7415  ;;  %v7414_v6 = vpop.permute.xlu0 %7413 }
 0x736   : > { %7494 = vst.msk [vmem:[#allocation3 + $0x44] sm:$0xf] %vm2043_vm14, %v7416_v56  ;;  %7779 = vrot.lane.b32.xlu2 %v7716_v39, %s10497_s17  ;;  %v8476_v39 = vsel %vm11412_vm11, %v8474_v22, %v8475_v32  ;;  %v8382_v22 = vld [vmem:[#allocation2 + $0x440] sm:$0x3]  ;;  %s10449_s17 = scalar_lea.hbm %s15022_s6, 256 }
 0x737   : > { %7493 = vst.msk [vmem:[#allocation3 + $0x40] sm:$0xf] %vm2043_vm14, %v7414_v6  ;;  %v8043_v6 = vld [vmem:[#allocation2 + $0x41c] sm:$0x1] }
 0x738   : > { %v7442_v53 = vpop.permute.xlu2 %7441 }
 0x739   : > { %7507 = vst.msk [vmem:[#allocation3 + $0x78] sm:$0xf] %vm2043_vm14, %v7442_v53  ;;  %v8145_v53 = vrot.slane %v8143_v34, 4 }
 0x73b   : > { %7912 = vrot.lane.b32.xlu1 %v7847_v23, %s10498_s18  ;;  %7910 = vrot.lane.b32.xlu0 %v7846_v59, %s10498_s18  ;;  %v8378_v59 = vld [vmem:[#allocation2 + $0x420] sm:$0xf] }
 0x73d   : > { %v7422_v57 = vpop.permute.xlu1 %7421  ;;  %v7420_v60 = vpop.permute.xlu0 %7419 }
 0x73e   : > { %7497 = vst.msk [vmem:[#allocation3 + $0x50] sm:$0xf] %vm2043_vm14, %v7422_v57  ;;  %7914 = vrot.lane.b32.xlu2 %v7848_v17, %s10498_s18  ;;  %v8146_v57 = vrot.slane %v8043_v6, 5  ;;  %v10061_v17 = vrot.slane %v8041_v45, 9  ;;  %v7862_v45 = vld [vmem:[#allocation2 + $0x4d0] sm:$0xf] }
 0x73f   : > { %7496 = vst.msk [vmem:[#allocation3 + $0x4c] sm:$0xf] %vm2043_vm14, %v7420_v60 }
 0x740   : > { %v7720_v40 = vpop.permute.xlu2 %7719 }
 0x741   : > { %7814 = vst.msk [vmem:[#allocation3 + $0x4] sm:$0xf] %vm2236_vm15, %v7720_v40 }
 0x743   : > { %7918 = vrot.lane.b32.xlu1 %v7850_v16, %s10498_s18  ;;  %7916 = vrot.lane.b32.xlu0 %v7849_v49, %s10498_s18  ;;  %v7860_v16 = vld [vmem:[#allocation2 + $0x4b4] sm:$0xf]  ;;  %v8379_v49 = vld [vmem:[#allocation2 + $0x424] sm:$0x3] }
 0x745   : > { %v7428_v35 = vpop.permute.xlu1 %7427  ;;  %v7426_v61 = vpop.permute.xlu0 %7425 }
 0x746   : > { %7500 = vst.msk [vmem:[#allocation3 + $0x5c] sm:$0xf] %vm2043_vm14, %v7428_v35  ;;  %7920 = vrot.lane.b32.xlu2 %v7851_v54, %s10498_s18  ;;  %v8147_v35 = vsel %vm10607_vm3, %v8145_v53, %v8146_v57  ;;  %v8479_v54 = vrot.slane %v8378_v59, 6  ;;  %v8383_v57 = vld [vmem:[#allocation2 + $0x454] sm:$0xc] }
 0x747   : > { %7499 = vst.msk [vmem:[#allocation3 + $0x58] sm:$0xf] %vm2043_vm14, %v7426_v61  ;;  %v8144_v61 = vsel %vm10607_vm3, %v10061_v17, %v8143_v34 }
 0x748   : > { %v7726_v2 = vpop.permute.xlu2 %7725 }
 0x749   : > { %7817 = vst.msk [vmem:[#allocation3 + $0x10] sm:$0xf] %vm2236_vm15, %v7726_v2  ;;  %v8377_v2 = vld [vmem:[#allocation2 + $0x41c] sm:$0xc] }
 0x74b   : > { %7924 = vrot.lane.b32.xlu1 %v7853_v15, %s10498_s18  ;;  %7922 = vrot.lane.b32.xlu0 %v7852_v10, %s10498_s18  ;;  %v10077_v10 = vrot.slane %v8377_v2, 10  ;;  %v8050_v2 = vld [vmem:[#allocation2 + $0x468] sm:$0xe] }
 0x74d   : > { %v7434_v26 = vpop.permute.xlu1 %7433  ;;  %v7432_v25 = vpop.permute.xlu0 %7431 }
 0x74e   : > { %7503 = vst.msk [vmem:[#allocation3 + $0x68] sm:$0xf] %vm2043_vm14, %v7434_v26  ;;  %7926 = vrot.lane.b32.xlu2 %v7854_v21, %s10498_s18  ;;  %v8482_v21 = vrot.slane %v8379_v49, 6 }
 0x74f   : > { %7502 = vst.msk [vmem:[#allocation3 + $0x64] sm:$0xf] %vm2043_vm14, %v7432_v25  ;;  %v8481_v25 = vrot.slane %v8479_v54, 4 }
 0x750   : > { %v7732_v4 = vpop.permute.xlu2 %7731 }
 0x751   : > { %7820 = vst.msk [vmem:[#allocation3 + $0x1c] sm:$0xf] %vm2236_vm15, %v7732_v4  ;;  %v8045_v4 = vld [vmem:[#allocation2 + $0x434] sm:$0xf]  ;;  %v8483_v1 = vsel %vm11412_vm11, %v8481_v25, %v8482_v21 }
 0x752   : > { %v8150_v8 = vrot.slane %v8045_v4, 5 }
 0x753   : > { %7930 = vrot.lane.b32.xlu1 %v7856_v37, %s10498_s18  ;;  %7928 = vrot.lane.b32.xlu0 %v7855_v41, %s10498_s18  ;;  %v8480_v37 = vsel %vm11412_vm11, %v10077_v10, %v8479_v54  ;;  %v8046_v41 = vld [vmem:[#allocation2 + $0x438] sm:$0x1] }
 0x754   : > { %v8152_v12 = vrot.slane %v8150_v8, 4 }
 0x755   : > { %v7440_v5 = vpop.permute.xlu1 %7439  ;;  %v7438_v7 = vpop.permute.xlu0 %7437 }
 0x756   : > { %7506 = vst.msk [vmem:[#allocation3 + $0x74] sm:$0xf] %vm2043_vm14, %v7440_v5  ;;  %7932 = vrot.lane.b32.xlu2 %v7857_v50, %s10498_s18  ;;  %v7861_v5 = vld [vmem:[#allocation2 + $0x4b8] sm:$0xf]  ;;  %v8381_v50 = vld [vmem:[#allocation2 + $0x43c] sm:$0xf] }
 0x757   : > { %7505 = vst.msk [vmem:[#allocation3 + $0x70] sm:$0xf] %vm2043_vm14, %v7438_v7  ;;  %v8380_v7 = vld [vmem:[#allocation2 + $0x438] sm:$0xc]  ;;  %v8486_v42 = vrot.slane %v8381_v50, 6 }
 0x758   : > { %v7738_v36 = vpop.permute.xlu2 %7737  ;;  %v10078_v55 = vrot.slane %v8380_v7, 10 }
 0x759   : > { %7823 = vst.msk [vmem:[#allocation3 + $0x28] sm:$0xf] %vm2236_vm15, %v7738_v36 }
 0x75b   : > { %8246 = vrot.lane.b32.xlu1 %v8137_v48, %s10499_s19  ;;  %7934 = vrot.lane.b32.xlu0 %v7858_v33, %s10498_s18  ;;  %v8487_v48 = vsel %vm11412_vm11, %v10078_v55, %v8486_v42  ;;  %v8048_v33 = vld [vmem:[#allocation2 + $0x450] sm:$0xf] }
 0x75c   : > { %v8157_v51 = vrot.slane %v8048_v33, 5  ;;  %v8386_v55 = vld [vmem:[#allocation2 + $0x470] sm:$0xc] }
 0x75d   : > { %v7718_v52 = vpop.permute.xlu1 %7717  ;;  %v7444_v9 = vpop.permute.xlu0 %7443 }
 0x75e   : > { %7813 = vst.msk [vmem:[#allocation3] sm:$0xf] %vm2236_vm15, %v7718_v52  ;;  %8248 = vrot.lane.b32.xlu2 %v8140_v47, %s10499_s19  ;;  %v8153_v52 = vrot.slane %v8046_v41, 5  ;;  %v7863_v41 = vld [vmem:[#allocation2 + $0x4d4] sm:$0xf] }
 0x75f   : > { %7508 = vst.msk [vmem:[#allocation3 + $0x7c] sm:$0xf] %vm2043_vm14, %v7444_v9  ;;  %v10062_v9 = vrot.slane %v8044_v63, 9 }
 0x760   : > { %v7744_v46 = vpop.permute.xlu2 %7743  ;;  %v8154_v14 = vsel %vm10607_vm3, %v8152_v12, %v8153_v52  ;;  %v8054_v52 = vld [vmem:[#allocation2 + $0x488] sm:$0xf] }
 0x761   : > { %7826 = vst.msk [vmem:[#allocation3 + $0x34] sm:$0xf] %vm2236_vm15, %v7744_v46  ;;  %v8151_v44 = vsel %vm10607_vm3, %v10062_v9, %v8150_v8  ;;  %v10063_v46 = vrot.slane %v8047_v19, 9  ;;  %v8388_v8 = vld [vmem:[#allocation2 + $0x478] sm:$0x3] }
 0x762   : > { %v8503_v63 = vrot.slane %v8388_v8, 6 }
 0x763   : > { %8584 = vrot.lane.b32.xlu1 %v8476_v39, %s10500_s20  ;;  %8582 = vrot.lane.b32.xlu0 %v8473_v13, %s10500_s20  ;;  %v8158_v6 = vsel %vm10607_vm3, %v10063_v46, %v8157_v51  ;;  %v8385_v13 = vld [vmem:[#allocation2 + $0x45c] sm:$0x3] }
 0x764   : > { %v8496_v17 = vrot.slane %v8385_v13, 6 }
 0x765   : > { %v7724_v43 = vpop.permute.xlu1 %7723  ;;  %v7722_v56 = vpop.permute.xlu0 %7721 }
 0x766   : > { %7816 = vst.msk [vmem:[#allocation3 + $0xc] sm:$0xf] %vm2236_vm15, %v7724_v43  ;;  %7936 = vrot.lane.b32.xlu2 %v7859_v24, %s10498_s18  ;;  %v8384_v43 = vld [vmem:[#allocation2 + $0x458] sm:$0xf]  ;;  %v8489_v24 = vrot.slane %v8382_v22, 6 }
 0x767   : > { %7815 = vst.msk [vmem:[#allocation3 + $0x8] sm:$0xf] %vm2236_vm15, %v7722_v56  ;;  %v8488_v56 = vrot.slane %v8486_v42, 4  ;;  %v8493_v39 = vrot.slane %v8384_v43, 6  ;;  %v8053_v22 = vld [vmem:[#allocation2 + $0x484] sm:$0xe] }
 0x768   : > { %v7750_v60 = vpop.permute.xlu2 %7749 }
 0x769   : > { %7829 = vst.msk [vmem:[#allocation3 + $0x40] sm:$0xf] %vm2236_vm15, %v7750_v60  ;;  %v8490_v53 = vsel %vm11412_vm11, %v8488_v56, %v8489_v24  ;;  %v8495_v60 = vrot.slane %v8493_v39, 4  ;;  %v10065_v56 = vrot.slane %v8053_v22, 9 }
 0x76b   : > { %8250 = vrot.lane.b32.xlu1 %v8144_v61, %s10499_s19  ;;  %7938 = vrot.lane.b32.xlu0 %v7860_v16, %s10498_s18  ;;  %v8159_v61 = vrot.slane %v8157_v51, 4  ;;  %v8497_v49 = vsel %vm11412_vm11, %v8495_v60, %v8496_v17  ;;  %v8389_v60 = vld [vmem:[#allocation2 + $0x48c] sm:$0xc] }
 0x76d   : > { %v7730_v23 = vpop.permute.xlu1 %7729  ;;  %v7728_v40 = vpop.permute.xlu0 %7727 }
 0x76e   : > { %7819 = vst.msk [vmem:[#allocation3 + $0x18] sm:$0xf] %vm2236_vm15, %v7730_v23  ;;  %8252 = vrot.lane.b32.xlu2 %v8147_v35, %s10499_s19  ;;  %v8049_v23 = vld [vmem:[#allocation2 + $0x454] sm:$0x1] }
 0x76f   : > { %7818 = vst.msk [vmem:[#allocation3 + $0x14] sm:$0xf] %vm2236_vm15, %v7728_v40  ;;  %v10079_v40 = vrot.slane %v8383_v57, 10  ;;  %v8160_v54 = vrot.slane %v8049_v23, 5  ;;  %v8391_v57 = vld [vmem:[#allocation2 + $0x494] sm:$0x3] }
 0x770   : > { %v7756_v26 = vpop.permute.xlu2 %7755 }
 0x771   : > { %7832 = vst.msk [vmem:[#allocation3 + $0x4c] sm:$0xf] %vm2236_vm15, %v7756_v26  ;;  %v8051_v26 = vld [vmem:[#allocation2 + $0x46c] sm:$0xf]  ;;  %v8494_v25 = vsel %vm11412_vm11, %v10079_v40, %v8493_v39  ;;  %v8161_v21 = vsel %vm10607_vm3, %v8159_v61, %v8160_v54  ;;  %v8057_v61 = vld [vmem:[#allocation2 + $0x4a4] sm:$0xf] }
 0x772   : > { %v8164_v10 = vrot.slane %v8051_v26, 5 }
 0x773   : > { %8588 = vrot.lane.b32.xlu1 %v8483_v1, %s10500_s20  ;;  %8586 = vrot.lane.b32.xlu0 %v8480_v37, %s10500_s20  ;;  %v7864_v37 = vld [vmem:[#allocation2 + $0x4ec] sm:$0xf] }
 0x775   : > { %v7736_v15 = vpop.permute.xlu1 %7735  ;;  %v7734_v62 = vpop.permute.xlu0 %7733 }
 0x776   : > { %7822 = vst.msk [vmem:[#allocation3 + $0x24] sm:$0xf] %vm2236_vm15, %v7736_v15  ;;  %7940 = vrot.lane.b32.xlu2 %v7861_v5, %s10498_s18  ;;  %v10064_v15 = vrot.slane %v8050_v2, 9  ;;  %v8393_v2 = vld [vmem:[#allocation2 + $0x4ac] sm:$0xf] }
 0x777   : > { %7821 = vst.msk [vmem:[#allocation3 + $0x20] sm:$0xf] %vm2236_vm15, %v7734_v62  ;;  %v8387_v62 = vld [vmem:[#allocation2 + $0x474] sm:$0xf] }
 0x778   : > { %v7762_v36 = vpop.permute.xlu2 %7761  ;;  %v8165_v50 = vsel %vm10607_vm3, %v10064_v15, %v8164_v10  ;;  %v8500_v1 = vrot.slane %v8387_v62, 6  ;;  %v8058_v15 = vld [vmem:[#allocation2 + $0x4a8] sm:$0x1]  ;;  %v8056_v62 = vld [vmem:[#allocation2 + $0x4a0] sm:$0xe] }
 0x779   : > { %7835 = vst.msk [vmem:[#allocation3 + $0x58] sm:$0xf] %vm2236_vm15, %v7762_v36  ;;  %v8052_v36 = vld [vmem:[#allocation2 + $0x470] sm:$0x1]  ;;  %v10066_v8 = vrot.slane %v8056_v62, 9 }
 0x77a   : > { %v8502_v42 = vrot.slane %v8500_v1, 4  ;;  %v7869_v62 = vld [vmem:[#allocation2 + $0x528] sm:$0xf] }
 0x77b   : > { %8256 = vrot.lane.b32.xlu1 %v8154_v14, %s10499_s19  ;;  %8254 = vrot.lane.b32.xlu0 %v8151_v44, %s10499_s19  ;;  %v8171_v14 = vrot.slane %v8054_v52, 5  ;;  %v8055_v44 = vld [vmem:[#allocation2 + $0x48c] sm:$0x1]  ;;  %v10277_v52 = vld [vmem:[%s15021_s5 + $0x50] sm:$0xff] }
 0x77c   : > { %v8504_v33 = vsel %vm11412_vm11, %v8502_v42, %v8503_v63  ;;  %v8174_v43 = vrot.slane %v8055_v44, 5  ;;  %v8396_v44 = vld [vmem:[#allocation2 + $0x4c8] sm:$0xf] }
 0x77d   : > { %v7742_v58 = vpop.permute.xlu1 %7741  ;;  %v7740_v47 = vpop.permute.xlu0 %7739  ;;  %v8172_v13 = vsel %vm10607_vm3, %v10065_v56, %v8171_v14  ;;  %v8521_v56 = vrot.slane %v8396_v44, 6 }
 0x77e   : > { %7825 = vst.msk [vmem:[#allocation3 + $0x30] sm:$0xf] %vm2236_vm15, %v7742_v58  ;;  %8590 = vrot.lane.b32.xlu2 %v8487_v48, %s10500_s20  ;;  %v10080_v58 = vrot.slane %v8386_v55, 10  ;;  %v8167_v48 = vrot.slane %v8052_v36, 5  ;;  %v10278_v55 = vld [vmem:[%s15021_s5 + $0x58] sm:$0xff] }
 0x77f   : > { %7824 = vst.msk [vmem:[#allocation3 + $0x2c] sm:$0xf] %vm2236_vm15, %v7740_v47  ;;  %v8166_v47 = vrot.slane %v8164_v10, 4  ;;  %8907 = vmatpush.bf16.msra.mxu3 %v10278_v55  ;;  %v8394_v36 = vld [vmem:[#allocation2 + $0x4b0] sm:$0x3] }
 0x780   : > { %v7768_v32 = vpop.permute.xlu2 %7767  ;;  %v8501_v46 = vsel %vm11412_vm11, %v10080_v58, %v8500_v1 }
 0x781   : > { %7838 = vst.msk [vmem:[#allocation3 + $0x64] sm:$0xf] %vm2236_vm15, %v7768_v32  ;;  %v8168_v51 = vsel %vm10607_vm3, %v8166_v47, %v8167_v48  ;;  %v8173_v32 = vrot.slane %v8171_v14, 4  ;;  %v8517_v47 = vrot.slane %v8394_v36, 6  ;;  %v8060_v48 = vld [vmem:[#allocation2 + $0x4c0] sm:$0xf] }
 0x782   : > { %v8395_v14 = vld [vmem:[#allocation2 + $0x4c4] sm:$0xc]  ;;  %v8185_v22 = vrot.slane %v8060_v48, 5 }
 0x783   : > { %7942 = vrot.lane.b32.xlu1 %v7862_v45, %s10498_s18  ;;  %8592 = vrot.lane.b32.xlu0 %v8490_v53, %s10500_s20  ;;  %v8175_v39 = vsel %vm10607_vm3, %v8173_v32, %v8174_v43  ;;  %v7865_v53 = vld [vmem:[#allocation2 + $0x4f0] sm:$0xf]  ;;  %v8061_v43 = vld [vmem:[#allocation2 + $0x4c4] sm:$0x1] }
 0x784   : > { %8908 = vmatpush.bf16.msra.mxu3 %v10277_v52 }
 0x785   : > { %v7748_v0 = vpop.permute.xlu1 %7747  ;;  %v7746_v34 = vpop.permute.xlu0 %7745 }
 0x786   : > { %7828 = vst.msk [vmem:[#allocation3 + $0x3c] sm:$0xf] %vm2236_vm15, %v7748_v0  ;;  %8258 = vrot.lane.b32.xlu2 %v8158_v6, %s10499_s19 }
 0x787   : > { %7827 = vst.msk [vmem:[#allocation3 + $0x38] sm:$0xf] %vm2236_vm15, %v7746_v34  ;;  %v8390_v34 = vld [vmem:[#allocation2 + $0x490] sm:$0xf] }
 0x788   : > { %v7774_v59 = vpop.permute.xlu2 %7773  ;;  %v8507_v45 = vrot.slane %v8390_v34, 6 }
 0x789   : > { %7841 = vst.msk [vmem:[#allocation3 + $0x70] sm:$0xf] %vm2236_vm15, %v7774_v59  ;;  %v8510_v59 = vrot.slane %v8391_v57, 6 }
 0x78a   : > { %v8509_v23 = vrot.slane %v8507_v45, 4 }
 0x78b   : > { %8594 = vrot.lane.b32.xlu1 %v8494_v25, %s10500_s20  ;;  %8260 = vrot.lane.b32.xlu0 %v8161_v21, %s10499_s19  ;;  %v8178_v25 = vrot.slane %v8057_v61, 5 }
 0x78c   : > { %v8511_v26 = vsel %vm11412_vm11, %v8509_v23, %v8510_v59  ;;  %v8063_v23 = vld [vmem:[#allocation2 + $0x4dc] sm:$0xf] }
 0x78d   : > { %v7754_v35 = vpop.permute.xlu1 %7753  ;;  %v7752_v16 = vpop.permute.xlu0 %7751  ;;  %v8179_v63 = vsel %vm10607_vm3, %v10066_v8, %v8178_v25  ;;  %v8192_v61 = vrot.slane %v8063_v23, 5  ;;  %v8064_v8 = vld [vmem:[#allocation2 + $0x4e0] sm:$0x1] }
 0x78e   : > { %7831 = vst.msk [vmem:[#allocation3 + $0x48] sm:$0xf] %vm2236_vm15, %v7754_v35  ;;  %8596 = vrot.lane.b32.xlu2 %v8497_v49, %s10500_s20  ;;  %v10081_v35 = vrot.slane %v8389_v60, 10  ;;  %v8392_v49 = vld [vmem:[#allocation2 + $0x4a8] sm:$0xc]  ;;  %v8195_v36 = vrot.slane %v8064_v8, 5 }
 0x78f   : > { %7830 = vst.msk [vmem:[#allocation3 + $0x44] sm:$0xf] %vm2236_vm15, %v7752_v16  ;;  %v7866_v16 = vld [vmem:[#allocation2 + $0x508] sm:$0xf]  ;;  %v10082_v10 = vrot.slane %v8392_v49, 10 }
 0x790   : > { %v7780_v4 = vpop.permute.xlu2 %7779  ;;  %v8508_v21 = vsel %vm11412_vm11, %v10081_v35, %v8507_v45  ;;  %v8399_v49 = vld [vmem:[#allocation2 + $0x4e4] sm:$0xf] }
 0x791   : > { %7844 = vst.msk [vmem:[#allocation3 + $0x7c] sm:$0xf] %vm2236_vm15, %v7780_v4  ;;  %v8514_v4 = vrot.slane %v8393_v2, 6 }
 0x793   : > { %7946 = vrot.lane.b32.xlu1 %v7864_v37, %s10498_s18  ;;  %7944 = vrot.lane.b32.xlu0 %v7863_v41, %s10498_s18  ;;  %v8515_v41 = vsel %vm11412_vm11, %v10082_v10, %v8514_v4  ;;  %v8528_v10 = vrot.slane %v8399_v49, 6 }
 0x795   : > { %v7760_v5 = vpop.permute.xlu1 %7759  ;;  %v7758_v7 = vpop.permute.xlu0 %7757 }
 0x796   : > { %7834 = vst.msk [vmem:[#allocation3 + $0x54] sm:$0xf] %vm2236_vm15, %v7760_v5  ;;  %8262 = vrot.lane.b32.xlu2 %v8165_v50, %s10499_s19  ;;  %v8181_v50 = vrot.slane %v8058_v15, 5 }
 0x797   : > { %7833 = vst.msk [vmem:[#allocation3 + $0x50] sm:$0xf] %vm2236_vm15, %v7758_v7  ;;  %v8180_v7 = vrot.slane %v8178_v25, 4 }
 0x798   : > { %v7915_v12 = vpop.permute.xlu2 %7914 }
 0x799   : > { %8008 = vst.msk [vmem:[#allocation3 + $0x8] sm:$0xf] %vm2574_vm1, %v7915_v12  ;;  %v8182_v42 = vsel %vm10607_vm3, %v8180_v7, %v8181_v50  ;;  %v8398_v7 = vld [vmem:[#allocation2 + $0x4e0] sm:$0xc]  ;;  %v8530_v50 = vrot.slane %v8528_v10, 4 }
 0x79a   : > { %v10084_v55 = vrot.slane %v8398_v7, 10  ;;  %v7872_v7 = vld [vmem:[#allocation2 + $0x55c] sm:$0xf] }
 0x79b   : > { %8598 = vrot.lane.b32.xlu1 %v8501_v46, %s10500_s20  ;;  %8264 = vrot.lane.b32.xlu0 %v8168_v51, %s10499_s19  ;;  %v10276_v46 = vld [vmem:[%s15021_s5 + $0x48] sm:$0xff] }
 0x79c   : > { %v7867_v51 = vld [vmem:[#allocation2 + $0x50c] sm:$0xf]  ;;  %8909 = vmatpush.bf16.msra.mxu3 %v10276_v46 }
 0x79d   : > { %v7766_v9 = vpop.permute.xlu1 %7765  ;;  %v7764_v19 = vpop.permute.xlu0 %7763 }
 0x79e   : > { %7837 = vst.msk [vmem:[#allocation3 + $0x60] sm:$0xf] %vm2236_vm15, %v7766_v9  ;;  %8600 = vrot.lane.b32.xlu2 %v8504_v33, %s10500_s20  ;;  %v8516_v9 = vrot.slane %v8514_v4, 4  ;;  %v7868_v33 = vld [vmem:[#allocation2 + $0x524] sm:$0xf] }
 0x79f   : > { %7836 = vst.msk [vmem:[#allocation3 + $0x5c] sm:$0xf] %vm2236_vm15, %v7764_v19  ;;  %v8400_v4 = vld [vmem:[#allocation2 + $0x4e8] sm:$0x3] }
 0x7a0   : > { %v7921_v0 = vpop.permute.xlu2 %7920  ;;  %v8518_v32 = vsel %vm11412_vm11, %v8516_v9, %v8517_v47  ;;  %v8067_v9 = vld [vmem:[#allocation2 + $0x4fc] sm:$0x1]  ;;  %v8529_v47 = vsel %vm11412_vm11, %v10084_v55, %v8528_v10 }
 0x7a1   : > { %8011 = vst.msk [vmem:[#allocation3 + $0x14] sm:$0xf] %vm2574_vm1, %v7921_v0  ;;  %v10083_v0 = vrot.slane %v8395_v14, 10  ;;  %v8202_v14 = vrot.slane %v8067_v9, 5  ;;  %v8408_v9 = vld [vmem:[#allocation2 + $0x538] sm:$0xf] }
 0x7a3   : > { %8266 = vrot.lane.b32.xlu1 %v8172_v13, %s10499_s19  ;;  %7948 = vrot.lane.b32.xlu0 %v7865_v53, %s10498_s18  ;;  %v10275_v13 = vld [vmem:[%s15021_s5 + $0x40] sm:$0xff]  ;;  %v8522_v60 = vsel %vm11412_vm11, %v10083_v0, %v8521_v56 }
 0x7a4   : > { %8910 = vmatpush.bf16.msra.mxu3 %v10275_v13  ;;  %v8069_v13 = vld [vmem:[#allocation2 + $0x514] sm:$0xf] }
 0x7a5   : > { %v7772_v24 = vpop.permute.xlu1 %7771  ;;  %v7770_v6 = vpop.permute.xlu0 %7769 }
 0x7a6   : > { %7840 = vst.msk [vmem:[#allocation3 + $0x6c] sm:$0xf] %vm2236_vm15, %v7772_v24  ;;  %8268 = vrot.lane.b32.xlu2 %v8175_v39, %s10499_s19  ;;  %v8059_v24 = vld [vmem:[#allocation2 + $0x4bc] sm:$0xe]  ;;  %v8188_v39 = vrot.slane %v8061_v43, 5 }
 0x7a7   : > { %7839 = vst.msk [vmem:[#allocation3 + $0x68] sm:$0xf] %vm2236_vm15, %v7770_v6  ;;  %v8187_v6 = vrot.slane %v8185_v22, 4  ;;  %v10067_v53 = vrot.slane %v8059_v24, 9  ;;  %v7870_v24 = vld [vmem:[#allocation2 + $0x540] sm:$0xf] }
 0x7a8   : > { %v7927_v17 = vpop.permute.xlu2 %7926 }
 0x7a9   : > { %8014 = vst.msk [vmem:[#allocation3 + $0x20] sm:$0xf] %vm2574_vm1, %v7927_v17  ;;  %v8062_v17 = vld [vmem:[#allocation2 + $0x4d8] sm:$0xe]  ;;  %v8189_v59 = vsel %vm10607_vm3, %v8187_v6, %v8188_v39  ;;  %v8401_v6 = vld [vmem:[#allocation2 + $0x4fc] sm:$0xc] }
 0x7aa   : > { %v10068_v35 = vrot.slane %v8062_v17, 9 }
 0x7ab   : > { %8604 = vrot.lane.b32.xlu1 %v8511_v26, %s10500_s20  ;;  %8602 = vrot.lane.b32.xlu0 %v8508_v21, %s10500_s20  ;;  %v8523_v26 = vrot.slane %v8521_v56, 4 }
 0x7ac   : > { %v8193_v15 = vsel %vm10607_vm3, %v10068_v35, %v8192_v61  ;;  %v8070_v35 = vld [vmem:[#allocation2 + $0x518] sm:$0x1] }
 0x7ad   : > { %v7778_v40 = vpop.permute.xlu1 %7777  ;;  %v7776_v54 = vpop.permute.xlu0 %7775 }
 0x7ae   : > { %7843 = vst.msk [vmem:[#allocation3 + $0x78] sm:$0xf] %vm2236_vm15, %v7778_v40  ;;  %7950 = vrot.lane.b32.xlu2 %v7866_v16, %s10498_s18  ;;  %v8186_v40 = vsel %vm10607_vm3, %v10067_v53, %v8185_v22  ;;  %v8402_v22 = vld [vmem:[#allocation2 + $0x500] sm:$0xf] }
 0x7af   : > { %7842 = vst.msk [vmem:[#allocation3 + $0x74] sm:$0xf] %vm2236_vm15, %v7776_v54  ;;  %v8397_v54 = vld [vmem:[#allocation2 + $0x4cc] sm:$0x3]  ;;  %v8535_v56 = vrot.slane %v8402_v22, 6 }
 0x7b0   : > { %v7933_v5 = vpop.permute.xlu2 %7932  ;;  %v8524_v25 = vrot.slane %v8397_v54, 6 }
 0x7b1   : > { %8017 = vst.msk [vmem:[#allocation3 + $0x2c] sm:$0xf] %vm2574_vm1, %v7933_v5 }
 0x7b2   : > { %v8525_v5 = vsel %vm11412_vm11, %v8523_v26, %v8524_v25 }
 0x7b3   : > { %8272 = vrot.lane.b32.xlu1 %v8182_v42, %s10499_s19  ;;  %8270 = vrot.lane.b32.xlu0 %v8179_v63, %s10499_s19  ;;  %v8194_v63 = vrot.slane %v8192_v61, 4 }
 0x7b5   : > { %v7913_v1 = vpop.permute.xlu1 %7912  ;;  %v7911_v37 = vpop.permute.xlu0 %7910  ;;  %v8196_v48 = vsel %vm10607_vm3, %v8194_v63, %v8195_v36  ;;  %v8072_v63 = vld [vmem:[#allocation2 + $0x530] sm:$0xf] }
 0x7b6   : > { %8007 = vst.msk [vmem:[#allocation3 + $0x4] sm:$0xf] %vm2574_vm1, %v7913_v1  ;;  %8606 = vrot.lane.b32.xlu2 %v8515_v41, %s10500_s20  ;;  %v8531_v1 = vrot.slane %v8400_v4, 6  ;;  %v8066_v41 = vld [vmem:[#allocation2 + $0x4f8] sm:$0xf] }
 0x7b7   : > { %8006 = vst.msk [vmem:[#allocation3] sm:$0xf] %vm2574_vm1, %v7911_v37 }
 0x7b8   : > { %v8249_v12 = vpop.permute.xlu2 %8248  ;;  %v8532_v52 = vsel %vm11412_vm11, %v8530_v50, %v8531_v1  ;;  %v8406_v50 = vld [vmem:[#allocation2 + $0x520] sm:$0x3]  ;;  %v8404_v1 = vld [vmem:[#allocation2 + $0x518] sm:$0xc] }
 0x7b9   : > { %8343 = vst.msk [vmem:[#allocation3 + $0x4] sm:$0xf] %vm2911_vm2, %v8249_v12 }
 0x7bb   : > { %7952 = vrot.lane.b32.xlu1 %v7867_v51, %s10498_s18  ;;  %8608 = vrot.lane.b32.xlu0 %v8518_v32, %s10500_s20 }
 0x7bd   : > { %v7919_v58 = vpop.permute.xlu1 %7918  ;;  %v7917_v19 = vpop.permute.xlu0 %7916 }
 0x7be   : > { %8010 = vst.msk [vmem:[#allocation3 + $0x10] sm:$0xf] %vm2574_vm1, %v7919_v58  ;;  %7954 = vrot.lane.b32.xlu2 %v7868_v33, %s10498_s18  ;;  %v8199_v58 = vrot.slane %v8066_v41, 5  ;;  %v8545_v41 = vrot.slane %v8406_v50, 6 }
 0x7bf   : > { %8009 = vst.msk [vmem:[#allocation3 + $0xc] sm:$0xf] %vm2574_vm1, %v7917_v19  ;;  %v8065_v19 = vld [vmem:[#allocation2 + $0x4f4] sm:$0xe] }
 0x7c0   : > { %v7937_v34 = vpop.permute.xlu2 %7936  ;;  %v8201_v33 = vrot.slane %v8199_v58, 4  ;;  %v10069_v46 = vrot.slane %v8065_v19, 9 }
 0x7c1   : > { %8019 = vst.msk [vmem:[#allocation3 + $0x34] sm:$0xf] %vm2574_vm1, %v7937_v34  ;;  %v8403_v34 = vld [vmem:[#allocation2 + $0x504] sm:$0x3] }
 0x7c2   : > { %v8203_v43 = vsel %vm10607_vm3, %v8201_v33, %v8202_v14  ;;  %v8200_v0 = vsel %vm10607_vm3, %v10069_v46, %v8199_v58  ;;  %v8538_v53 = vrot.slane %v8403_v34, 6  ;;  %v8407_v58 = vld [vmem:[#allocation2 + $0x534] sm:$0xc]  ;;  %v8073_v33 = vld [vmem:[#allocation2 + $0x534] sm:$0x1]  ;;  %v8549_v46 = vrot.slane %v8408_v9, 6 }
 0x7c3   : > { %8276 = vrot.lane.b32.xlu1 %v8189_v59, %s10499_s19  ;;  %8274 = vrot.lane.b32.xlu0 %v8186_v40, %s10499_s19  ;;  %v7871_v59 = vld [vmem:[#allocation2 + $0x544] sm:$0xf]  ;;  %v8206_v40 = vrot.slane %v8069_v13, 5  ;;  %v10087_v14 = vrot.slane %v8407_v58, 10  ;;  %v8074_v34 = vld [vmem:[#allocation2 + $0x548] sm:$0xe] }
 0x7c5   : > { %v7925_v45 = vpop.permute.xlu1 %7924  ;;  %v7923_v57 = vpop.permute.xlu0 %7922  ;;  %v8208_v49 = vrot.slane %v8206_v40, 4 }
 0x7c6   : > { %8013 = vst.msk [vmem:[#allocation3 + $0x1c] sm:$0xf] %vm2574_vm1, %v7925_v45  ;;  %8610 = vrot.lane.b32.xlu2 %v8522_v60, %s10500_s20  ;;  %v8537_v45 = vrot.slane %v8535_v56, 4  ;;  %v10085_v60 = vrot.slane %v8401_v6, 10  ;;  %v8075_v6 = vld [vmem:[#allocation2 + $0x54c] sm:$0xf] }
 0x7c7   : > { %8012 = vst.msk [vmem:[#allocation3 + $0x18] sm:$0xf] %vm2574_vm1, %v7923_v57 }
 0x7c8   : > { %v8253_v16 = vpop.permute.xlu2 %8252  ;;  %v8539_v61 = vsel %vm11412_vm11, %v8537_v45, %v8538_v53  ;;  %v8536_v54 = vsel %vm11412_vm11, %v10085_v60, %v8535_v56  ;;  %v10072_v45 = vrot.slane %v8074_v34, 9  ;;  %v8220_v53 = vrot.slane %v8075_v6, 5 }
 0x7c9   : > { %8345 = vst.msk [vmem:[#allocation3 + $0xc] sm:$0xf] %vm2911_vm2, %v8253_v16  ;;  %v8068_v16 = vld [vmem:[#allocation2 + $0x510] sm:$0xe] }
 0x7ca   : > { %v10070_v25 = vrot.slane %v8068_v16, 9 }
 0x7cb   : > { %7956 = vrot.lane.b32.xlu1 %v7869_v62, %s10498_s18  ;;  %8612 = vrot.lane.b32.xlu0 %v8525_v5, %s10500_s20 }
 0x7cc   : > { %v8207_v62 = vsel %vm10607_vm3, %v10070_v25, %v8206_v40 }
 0x7cd   : > { %v7931_v2 = vpop.permute.xlu1 %7930  ;;  %v7929_v21 = vpop.permute.xlu0 %7928 }
 0x7ce   : > { %8016 = vst.msk [vmem:[#allocation3 + $0x28] sm:$0xf] %vm2574_vm1, %v7931_v2  ;;  %8278 = vrot.lane.b32.xlu2 %v8193_v15, %s10499_s19  ;;  %v8209_v2 = vrot.slane %v8070_v35, 5  ;;  %v8405_v15 = vld [vmem:[#allocation2 + $0x51c] sm:$0xf] }
 0x7cf   : > { %8015 = vst.msk [vmem:[#allocation3 + $0x24] sm:$0xf] %vm2574_vm1, %v7929_v21  ;;  %v8542_v5 = vrot.slane %v8405_v15, 6 }
 0x7d0   : > { %v7941_v37 = vpop.permute.xlu2 %7940  ;;  %v8210_v4 = vsel %vm10607_vm3, %v8208_v49, %v8209_v2  ;;  %v8412_v49 = vld [vmem:[#allocation2 + $0x558] sm:$0x3] }
 0x7d1   : > { %8021 = vst.msk [vmem:[#allocation3 + $0x3c] sm:$0xf] %vm2574_vm1, %v7941_v37  ;;  %v8544_v37 = vrot.slane %v8542_v5, 4  ;;  %v7874_v2 = vld [vmem:[#allocation2 + $0x578] sm:$0xf] }
 0x7d3   : > { %8614 = vrot.lane.b32.xlu1 %v8529_v47, %s10500_s20  ;;  %8280 = vrot.lane.b32.xlu0 %v8196_v48, %s10499_s19  ;;  %v8546_v47 = vsel %vm11412_vm11, %v8544_v37, %v8545_v41  ;;  %v8213_v48 = vrot.slane %v8072_v63, 5  ;;  %v8077_v37 = vld [vmem:[#allocation2 + $0x564] sm:$0xe]  ;;  %v8078_v41 = vld [vmem:[#allocation2 + $0x568] sm:$0xf] }
 0x7d4   : > { %v10073_v63 = vrot.slane %v8077_v37, 9 }
 0x7d5   : > { %v8247_v42 = vpop.permute.xlu1 %8246  ;;  %v7935_v12 = vpop.permute.xlu0 %7934 }
 0x7d6   : > { %8342 = vst.msk [vmem:[#allocation3] sm:$0xf] %vm2911_vm2, %v8247_v42  ;;  %8616 = vrot.lane.b32.xlu2 %v8532_v52, %s10500_s20  ;;  %v10086_v42 = vrot.slane %v8404_v1, 10  ;;  %v7873_v52 = vld [vmem:[#allocation2 + $0x560] sm:$0xf] }
 0x7d7   : > { %8018 = vst.msk [vmem:[#allocation3 + $0x30] sm:$0xf] %vm2574_vm1, %v7935_v12 }
 0x7d8   : > { %v14519_v44 = vpop.permute.xlu2 %8590  ;;  %v8543_v19 = vsel %vm11412_vm11, %v10086_v42, %v8542_v5 }
 0x7db   : > { %8282 = vrot.lane.b32.xlu1 %v8200_v0, %s10499_s19  ;;  %7958 = vrot.lane.b32.xlu0 %v7870_v24, %s10498_s18  ;;  %v8550_v24 = vsel %vm11412_vm11, %v10087_v14, %v8549_v46  ;;  %v7876_v14 = vld [vmem:[#allocation2 + $0x594] sm:$0xf] }
 0x7dd   : > { %v8585_v51 = vpop.permute.xlu1 %8584  ;;  %v8583_v32 = vpop.permute.xlu0 %8582 }
 0x7de   : > { %8679 = vst.msk [vmem:[#allocation3 + $0x4] sm:$0xf] %vm3104_vm4, %v8585_v51  ;;  %8284 = vrot.lane.b32.xlu2 %v8203_v43, %s10499_s19  ;;  %v8071_v51 = vld [vmem:[#allocation2 + $0x52c] sm:$0xe] }
 0x7df   : > { %8678 = vst.msk [vmem:[#allocation3] sm:$0xf] %vm3104_vm4, %v8583_v32  ;;  %v8216_v32 = vrot.slane %v8073_v33, 5  ;;  %v10071_v0 = vrot.slane %v8071_v51, 9  ;;  %v8415_v33 = vld [vmem:[#allocation2 + $0x574] sm:$0x3] }
 0x7e0   : > { %v8259_v39 = vpop.permute.xlu2 %8258  ;;  %v8413_v51 = vld [vmem:[#allocation2 + $0x56c] sm:$0xc] }
 0x7e1   : > { %8348 = vst.msk [vmem:[#allocation3 + $0x18] sm:$0xf] %vm2911_vm2, %v8259_v39  ;;  %v8214_v13 = vsel %vm10607_vm3, %v10071_v0, %v8213_v48 }
 0x7e3   : > { %8620 = vrot.lane.b32.xlu1 %v8539_v61, %s10500_s20  ;;  %8618 = vrot.lane.b32.xlu0 %v8536_v54, %s10500_s20  ;;  %v8221_v54 = vsel %vm10607_vm3, %v10072_v45, %v8220_v53 }
 0x7e5   : > { %v8251_v57 = vpop.permute.xlu1 %8250  ;;  %v7939_v17 = vpop.permute.xlu0 %7938 }
 0x7e6   : > { %8344 = vst.msk [vmem:[#allocation3 + $0x8] sm:$0xf] %vm2911_vm2, %v8251_v57  ;;  %v10259_v23 = vld [vmem:[#allocation3] sm:$0xff]  ;;  %7960 = vrot.lane.b32.xlu2 %v7871_v59, %s10498_s18  ;;  %v8409_v57 = vld [vmem:[#allocation2 + $0x53c] sm:$0x3]  ;;  %v8551_v59 = vrot.slane %v8549_v46, 4 }
 0x7e7   : > { %8020 = vst.msk [vmem:[#allocation3 + $0x38] sm:$0xf] %vm2574_vm1, %v7939_v17  ;;  %10180 = vmatmul.msk.bf16.vlgmr.msra.gmra.mxu3 %vm3281_vm7, %v10259_v23  ;;  %v8411_v17 = vld [vmem:[#allocation2 + $0x554] sm:$0xf]  ;;  %v8552_v40 = vrot.slane %v8409_v57, 6 }
 0x7e8   : > { %v14545_v26 = vpop.permute.xlu2 %8596  ;;  %v8556_v16 = vrot.slane %v8411_v17, 6  ;;  %v7875_v46 = vld [vmem:[#allocation2 + $0x57c] sm:$0xf]  ;;  %v8080_v17 = vld [vmem:[#allocation2 + $0x580] sm:$0xe] }
 0x7e9   : > { %v8553_v25 = vsel %vm11412_vm11, %v8551_v59, %v8552_v40 }
 0x7ea   : > { %v8558_v15 = vrot.slane %v8556_v16, 4 }
 0x7eb   : > { %8286 = vrot.lane.b32.xlu1 %v8207_v62, %s10499_s19  ;;  %7962 = vrot.lane.b32.xlu0 %v7872_v7, %s10498_s18  ;;  %v8222_v7 = vrot.slane %v8220_v53, 4  ;;  %v8082_v53 = vld [vmem:[#allocation2 + $0x588] sm:$0x1] }
 0x7ec   : > { %v8237_v59 = vrot.slane %v8082_v53, 5 }
 0x7ed   : > { %v8589_v21 = vpop.permute.xlu1 %8588  ;;  %v8587_v10 = vpop.permute.xlu0 %8586 }
 0x7ee   : > { %8681 = vst.msk [vmem:[#allocation3 + $0xc] sm:$0xf] %vm3104_vm4, %v8589_v21  ;;  %8288 = vrot.lane.b32.xlu2 %v8210_v4, %s10499_s19  ;;  %v8410_v21 = vld [vmem:[#allocation2 + $0x550] sm:$0xc]  ;;  %v8076_v4 = vld [vmem:[#allocation2 + $0x550] sm:$0x1] }
 0x7ef   : > { %8680 = vst.msk [vmem:[#allocation3 + $0x8] sm:$0xf] %vm3104_vm4, %v8587_v10  ;;  %v8559_v10 = vrot.slane %v8412_v49, 6  ;;  %v8223_v50 = vrot.slane %v8076_v4, 5  ;;  %v7877_v4 = vld [vmem:[#allocation2 + $0x598] sm:$0xf] }
 0x7f0   : > { %v8263_v8 = vpop.permute.xlu2 %8262 }
 0x7f1   : > { %8350 = vst.msk [vmem:[#allocation3 + $0x20] sm:$0xf] %vm2911_vm2, %v8263_v8  ;;  %v8560_v8 = vsel %vm11412_vm11, %v8558_v15, %v8559_v10  ;;  %v8224_v42 = vsel %vm10607_vm3, %v8222_v7, %v8223_v50  ;;  %v8416_v7 = vld [vmem:[#allocation2 + $0x588] sm:$0xc] }
 0x7f3   : > { %8624 = vrot.lane.b32.xlu1 %v8546_v47, %s10500_s20  ;;  %8622 = vrot.lane.b32.xlu0 %v8543_v19, %s10500_s20 }
 0x7f5   : > { %v8257_v55 = vpop.permute.xlu1 %8256  ;;  %v8255_v36 = vpop.permute.xlu0 %8254 }
 0x7f6   : > { %8347 = vst.msk [vmem:[#allocation3 + $0x14] sm:$0xf] %vm2911_vm2, %v8257_v55  ;;  %v10260_v12 = vld [vmem:[#allocation3 + $0x8] sm:$0xff]  ;;  %7964 = vrot.lane.b32.xlu2 %v7873_v52, %s10498_s18  ;;  %v8414_v52 = vld [vmem:[#allocation2 + $0x570] sm:$0xf] }
 0x7f7   : > { %8346 = vst.msk [vmem:[#allocation3 + $0x10] sm:$0xf] %vm2911_vm2, %v8255_v36  ;;  %10181 = vmatmul.msk.bf16.gmra.mxu3 %vm3281_vm7, %v10260_v12  ;;  %v8227_v36 = vrot.slane %v8078_v41, 5  ;;  %v8563_v19 = vrot.slane %v8414_v52, 6  ;;  %v8421_v52 = vld [vmem:[#allocation2 + $0x5ac] sm:$0x3] }
 0x7f8   : > { %8682 = vst.msk [vmem:[#allocation3 + $0x10] sm:$0xf] %vm3104_vm4, %v14519_v44  ;;  %v14569_v22 = vpop.permute.xlu2 %8600  ;;  %v8215_v44 = vrot.slane %v8213_v48, 4 }
 0x7f9   : > { %v8228_v48 = vsel %vm10607_vm3, %v10073_v63, %v8227_v36  ;;  %v8229_v34 = vrot.slane %v8227_v36, 4 }
 0x7fa   : > { %v8217_v39 = vsel %vm10607_vm3, %v8215_v44, %v8216_v32  ;;  %v8565_v44 = vrot.slane %v8563_v19, 4  ;;  %v8566_v32 = vrot.slane %v8415_v33, 6  ;;  %v8085_v33 = vld [vmem:[#allocation2 + $0x5a4] sm:$0x1] }
 0x7fb   : > { %8292 = vrot.lane.b32.xlu1 %v8217_v39, %s10499_s19  ;;  %8290 = vrot.lane.b32.xlu0 %v8214_v13, %s10499_s19 }
 0x7fc   : > { %v8567_v13 = vsel %vm11412_vm11, %v8565_v44, %v8566_v32  ;;  %v8244_v32 = vrot.slane %v8085_v33, 5 }
 0x7fd   : > { %v7943_v43 = vpop.permute.xlu1 %7942  ;;  %v8593_v56 = vpop.permute.xlu0 %8592 }
 0x7fe   : > { %8022 = vst.msk [vmem:[#allocation3 + $0x40] sm:$0xf] %vm2574_vm1, %v7943_v43  ;;  %8626 = vrot.lane.b32.xlu2 %v8550_v24, %s10500_s20  ;;  %v8079_v43 = vld [vmem:[#allocation2 + $0x56c] sm:$0x1]  ;;  %v10089_v24 = vrot.slane %v8413_v51, 10 }
 0x7ff   : > { %8683 = vst.msk [vmem:[#allocation3 + $0x14] sm:$0xf] %vm3104_vm4, %v8593_v56  ;;  %v8081_v56 = vld [vmem:[#allocation2 + $0x584] sm:$0xf]  ;;  %v8230_v6 = vrot.slane %v8079_v43, 5 }
 0x800   : > { %v8269_v60 = vpop.permute.xlu2 %8268  ;;  %v8234_v45 = vrot.slane %v8081_v56, 5  ;;  %v8564_v57 = vsel %vm11412_vm11, %v10089_v24, %v8563_v19  ;;  %v8580_v19 = vrot.slane %v8421_v52, 6 }
 0x801   : > { %8353 = vst.msk [vmem:[#allocation3 + $0x2c] sm:$0xf] %vm2911_vm2, %v8269_v60  ;;  %v8231_v60 = vsel %vm10607_vm3, %v8229_v34, %v8230_v6 }
 0x803   : > { %7966 = vrot.lane.b32.xlu1 %v7874_v2, %s10498_s18  ;;  %8628 = vrot.lane.b32.xlu0 %v8553_v25, %s10500_s20  ;;  %v8083_v25 = vld [vmem:[#allocation2 + $0x59c] sm:$0xe] }
 0x805   : > { %v8595_v23 = vpop.permute.xlu1 %8594  ;;  %v8261_v35 = vpop.permute.xlu0 %8260 }
 0x806   : > { %8684 = vst.msk [vmem:[#allocation3 + $0x18] sm:$0xf] %vm3104_vm4, %v8595_v23  ;;  %v10261_v61 = vld [vmem:[#allocation3 + $0x10] sm:$0xff]  ;;  %8294 = vrot.lane.b32.xlu2 %v8221_v54, %s10499_s19  ;;  %v8236_v23 = vrot.slane %v8234_v45, 4 }
 0x807   : > { %8349 = vst.msk [vmem:[#allocation3 + $0x1c] sm:$0xf] %vm2911_vm2, %v8261_v35  ;;  %10182 = vmatmul.msk.bf16.gmra.mxu3 %vm3281_vm7, %v10261_v61  ;;  %v10074_v61 = vrot.slane %v8080_v17, 9 }
 0x808   : > { %8685 = vst.msk [vmem:[#allocation3 + $0x1c] sm:$0xf] %vm3104_vm4, %v14545_v26  ;;  %v7951_v62 = vpop.permute.xlu2 %7950  ;;  %v10088_v26 = vrot.slane %v8410_v21, 10  ;;  %v8238_v2 = vsel %vm10607_vm3, %v8236_v23, %v8237_v59  ;;  %v8084_v21 = vld [vmem:[#allocation2 + $0x5a0] sm:$0xf] }
 0x809   : > { %8026 = vst.msk [vmem:[#allocation3 + $0x50] sm:$0xf] %vm2574_vm1, %v7951_v62  ;;  %v8235_v15 = vsel %vm10607_vm3, %v10074_v61, %v8234_v45  ;;  %v8418_v62 = vld [vmem:[#allocation2 + $0x590] sm:$0x3] }
 0x80a   : > { %v8557_v55 = vsel %vm11412_vm11, %v10088_v26, %v8556_v16  ;;  %v8417_v16 = vld [vmem:[#allocation2 + $0x58c] sm:$0xf]  ;;  %v10075_v26 = vrot.slane %v8083_v25, 9  ;;  %v8573_v37 = vrot.slane %v8418_v62, 6 }
 0x80b   : > { %8630 = vrot.lane.b32.xlu1 %v8557_v55, %s10500_s20  ;;  %8296 = vrot.lane.b32.xlu0 %v8224_v42, %s10499_s19  ;;  %v8570_v10 = vrot.slane %v8417_v16, 6  ;;  %v10090_v55 = vrot.slane %v8416_v7, 10 }
 0x80d   : > { %v7947_v5 = vpop.permute.xlu1 %7946  ;;  %v7945_v1 = vpop.permute.xlu0 %7944 }
 0x80e   : > { %8024 = vst.msk [vmem:[#allocation3 + $0x48] sm:$0xf] %vm2574_vm1, %v7947_v5  ;;  %8632 = vrot.lane.b32.xlu2 %v8560_v8, %s10500_s20  ;;  %v8241_v5 = vrot.slane %v8084_v21, 5  ;;  %v8572_v8 = vrot.slane %v8570_v10, 4 }
 0x80f   : > { %8023 = vst.msk [vmem:[#allocation3 + $0x44] sm:$0xf] %vm2574_vm1, %v7945_v1  ;;  %v10262_v58 = vld [vmem:[#allocation3 + $0x18] sm:$0xff] }
 0x810   : > { %v14607_v12 = vpop.permute.xlu2 %8606  ;;  %v8420_v1 = vld [vmem:[#allocation2 + $0x5a8] sm:$0xf]  ;;  %v8242_v63 = vsel %vm10607_vm3, %v10075_v26, %v8241_v5  ;;  %v8243_v44 = vrot.slane %v8241_v5, 4 }
 0x811   : > { %v8577_v36 = vrot.slane %v8420_v1, 6 }
 0x812   : > { %v8245_v24 = vsel %vm10607_vm3, %v8243_v44, %v8244_v32  ;;  %v14730_v32 = vpop.f32.mrf.mxu0 }
 0x813   : > { %7970 = vrot.lane.b32.xlu1 %v7876_v14, %s10498_s18  ;;  %7968 = vrot.lane.b32.xlu0 %v7875_v46, %s10498_s18 }
 0x815   : > { %v8599_v9 = vpop.permute.xlu1 %8598  ;;  %v8265_v47 = vpop.permute.xlu0 %8264 }
 0x816   : > { %8686 = vst.msk [vmem:[#allocation3 + $0x20] sm:$0xf] %vm3104_vm4, %v8599_v9  ;;  %8298 = vrot.lane.b32.xlu2 %v8228_v48, %s10499_s19  ;;  %v8571_v9 = vsel %vm11412_vm11, %v10090_v55, %v8570_v10  ;;  %v8579_v48 = vrot.slane %v8577_v36, 4 }
 0x817   : > { %8351 = vst.msk [vmem:[#allocation3 + $0x24] sm:$0xf] %vm2911_vm2, %v8265_v47  ;;  %10183 = vmatmul.msk.bf16.gmra.mxu3 %vm3281_vm7, %v10262_v58  ;;  %v8574_v58 = vsel %vm11412_vm11, %v8572_v8, %v8573_v37  ;;  %v8419_v47 = vld [vmem:[#allocation2 + $0x5a4] sm:$0xc] }
 0x818   : > { %8687 = vst.msk [vmem:[#allocation3 + $0x24] sm:$0xf] %vm3104_vm4, %v14569_v22  ;;  %v7955_v0 = vpop.permute.xlu2 %7954 }
 0x819   : > { %8028 = vst.msk [vmem:[#allocation3 + $0x58] sm:$0xf] %vm2574_vm1, %v7955_v0  ;;  %v8581_v0 = vsel %vm11412_vm11, %v8579_v48, %v8580_v19 }
 0x81b   : > { %8634 = vrot.lane.b32.xlu1 %v8564_v57, %s10500_s20  ;;  %8300 = vrot.lane.b32.xlu0 %v8231_v60, %s10499_s19 }
 0x81d   : > { %v8267_v22 = vpop.permute.xlu1 %8266  ;;  %v7949_v39 = vpop.permute.xlu0 %7948 }
 0x81e   : > { %8352 = vst.msk [vmem:[#allocation3 + $0x28] sm:$0xf] %vm2911_vm2, %v8267_v22  ;;  %8636 = vrot.lane.b32.xlu2 %v8567_v13, %s10500_s20 }
 0x81f   : > { %8025 = vst.msk [vmem:[#allocation3 + $0x4c] sm:$0xf] %vm2574_vm1, %v7949_v39  ;;  %v10263_v35 = vld [vmem:[#allocation3 + $0x20] sm:$0xff] }
 0x820   : > { %v14631_v40 = vpop.permute.xlu2 %8610 }
 0x823   : > { %8302 = vrot.lane.b32.xlu1 %v8235_v15, %s10499_s19  ;;  %7972 = vrot.lane.b32.xlu0 %v7877_v4, %s10498_s18  ;;  %s10202_s18 = sshll.u32 %s11218_s10, 8  ;;  %s268_s10 = sand.u32 1, %s10483_s22  }
 0x824   : > { %s14673_s16 = scalar_lea.vmem %s15017_s1, %s10202_s18  ;;  %s9519_s13 = sshll.u32 %s268_s10, 7 }
 0x825   : > { %v8605_v54 = vpop.permute.xlu1 %8604  ;;  %v8603_v49 = vpop.permute.xlu0 %8602  ;;  %v9062_v34 = vld [vmem:[%s14673_s16 + $0x10] sm:$0xff]  ;;  %v9061_v6 = vld [vmem:[%s14673_s16 + $0x8] sm:$0xff]  ;;  %v9060_v39 = vld [vmem:[%s14673_s16] sm:$0xff]  ;;  %s14865_s26 = scalar_lea.vmem [#allocation4], %s9519_s13  ;;  %s9417_s25 = scalar_lea.sflag [#allocation5], %s268_s10 }
 0x826   : > { %8689 = vst.msk [vmem:[#allocation3 + $0x2c] sm:$0xf] %vm3104_vm4, %v8605_v54  ;;  %8304 = vrot.lane.b32.xlu2 %v8238_v2, %s10499_s19  ;;  %v9064_v60 = vld [vmem:[%s14673_s16 + $0x20] sm:$0xff]  ;;  %v9063_v17 = vld [vmem:[%s14673_s16 + $0x18] sm:$0xff]  ;;  %v9065_v23 = vld [vmem:[%s14673_s16 + $0x28] sm:$0xff]  ;;  %s9429_s18 = sshll.u32 %s14865_s26, 4  ;;  %s9430_s18 = int_to_ptr.vmem [resolvable:$true] %s9429_s18 }
 0x827   : > { %8688 = vst.msk [vmem:[#allocation3 + $0x28] sm:$0xf] %vm3104_vm4, %v8603_v49  ;;  %10184 = vmatmul.msk.bf16.gmra.mxu3 %vm3281_vm7, %v10263_v35  ;;  %v9067_v61 = vld [vmem:[%s14673_s16 + $0x38] sm:$0xff]  ;;  %v9066_v54 = vld [vmem:[%s14673_s16 + $0x30] sm:$0xff]  ;;  %v9068_v16 = vld [vmem:[%s14673_s16 + $0x40] sm:$0xff] }
 0x828   : > { %v8279_v50 = vpop.permute.xlu2 %8278  ;;  %v9070_v15 = vld [vmem:[%s14673_s16 + $0x50] sm:$0xff]  ;;  %v9069_v10 = vld [vmem:[%s14673_s16 + $0x48] sm:$0xff]  ;;  %v9071_v4 = vld [vmem:[%s14673_s16 + $0x58] sm:$0xff] }
 0x829   : > { %8358 = vst.msk [vmem:[#allocation3 + $0x40] sm:$0xf] %vm2911_vm2, %v8279_v50  ;;  %v9073_v7 = vld [vmem:[%s14673_s16 + $0x68] sm:$0xff]  ;;  %v9072_v50 = vld [vmem:[%s14673_s16 + $0x60] sm:$0xff]  ;;  %v9074_v1 = vld [vmem:[%s14673_s16 + $0x70] sm:$0xff] }
 0x82a   : > { %v9078_v48 = vld [vmem:[%s14673_s16 + $0x90] sm:$0xff]  ;;  %v9076_v19 = vld [vmem:[%s14673_s16 + $0x80] sm:$0xff] }
 0x82b   : > { %8640 = vrot.lane.b32.xlu1 %v8574_v58, %s10500_s20  ;;  %8638 = vrot.lane.b32.xlu0 %v8571_v9, %s10500_s20  ;;  %v9080_v33 = vld [vmem:[%s14673_s16 + $0xa0] sm:$0xff] }
 0x82d   : > { %v8273_v41 = vpop.permute.xlu1 %8272  ;;  %v8271_v42 = vpop.permute.xlu0 %8270 }
 0x82e   : > { %8355 = vst.msk [vmem:[#allocation3 + $0x34] sm:$0xf] %vm2911_vm2, %v8273_v41  ;;  %8306 = vrot.lane.b32.xlu2 %v8242_v63, %s10499_s19  ;;  %v10264_v46 = vld [vmem:[#allocation3 + $0x28] sm:$0xff]  ;;  %v9077_v63 = vld [vmem:[%s14673_s16 + $0x88] sm:$0xff] }
 0x82f   : > { %8354 = vst.msk [vmem:[#allocation3 + $0x30] sm:$0xf] %vm2911_vm2, %v8271_v42  ;;  %v9075_v42 = vld [vmem:[%s14673_s16 + $0x78] sm:$0xff] }
 0x830   : > { %8690 = vst.msk [vmem:[#allocation3 + $0x30] sm:$0xf] %vm3104_vm4, %v14607_v12  ;;  %v8617_v14 = vpop.permute.xlu2 %8616  ;;  %v10091_v12 = vrot.slane %v8419_v47, 10 }
 0x832   : > { %v8578_v56 = vsel %vm11412_vm11, %v10091_v12, %v8577_v36  ;;  %v14724_v12 = vpop.f32.mrf.mxu1 }
 0x833   : > { %8642 = vrot.lane.b32.xlu1 %v8578_v56, %s10500_s20  ;;  %8308 = vrot.lane.b32.xlu0 %v8245_v24, %s10499_s19  ;;  %v9079_v56 = vld [vmem:[%s14673_s16 + $0x98] sm:$0xff] }
 0x834   : > { %v9083_v24 = vld [vmem:[%s14673_s16 + $0xb8] sm:$0xff] }
 0x835   : > { %v7953_v51 = vpop.permute.xlu1 %7952  ;;  %v8609_v43 = vpop.permute.xlu0 %8608 }
 0x836   : > { %8027 = vst.msk [vmem:[#allocation3 + $0x54] sm:$0xf] %vm2574_vm1, %v7953_v51  ;;  %8644 = vrot.lane.b32.xlu2 %v8581_v0, %s10500_s20  ;;  %v14734_v0 = vpop.f32.mrf.mxu2 }
 0x837   : > { %8691 = vst.msk [vmem:[#allocation3 + $0x34] sm:$0xf] %vm3104_vm4, %v8609_v43  ;;  %10185 = vmatmul.msk.bf16.gmra.mxu3 %vm3281_vm7, %v10264_v46 }
 0x838   : > { %v8285_v22 = vpop.permute.xlu2 %8284 }
 0x839   : > { %8361 = vst.msk [vmem:[#allocation3 + $0x4c] sm:$0xf] %vm2911_vm2, %v8285_v22 }
 0x83b   : > { %9100 = vperm.xlu1 %10425, %v9061_v6   ;;  %9095 = vperm.xlu0 %10424, %v9060_v39   ;;  %v14744_v6 = vpop.f32.mrf.mxu1 }
 0x83d   : > { %v8277_v18 = vpop.permute.xlu1 %8276  ;;  %v8275_v3 = vpop.permute.xlu0 %8274 }
 0x83e   : > { %8357 = vst.msk [vmem:[#allocation3 + $0x3c] sm:$0xf] %vm2911_vm2, %v8277_v18  ;;  %9105 = vperm.xlu2 %10426, %v9062_v34   ;;  %v10265_v45 = vld [vmem:[#allocation3 + $0x30] sm:$0xff] }
 0x83f   : > { %8356 = vst.msk [vmem:[#allocation3 + $0x38] sm:$0xf] %vm2911_vm2, %v8275_v3 }
 0x840   : > { %8692 = vst.msk [vmem:[#allocation3 + $0x38] sm:$0xf] %vm3104_vm4, %v14631_v40  ;;  %v7961_v13 = vpop.permute.xlu2 %7960 }
 0x841   : > { %8031 = vst.msk [vmem:[#allocation3 + $0x64] sm:$0xf] %vm2574_vm1, %v7961_v13  ;;  %v14748_v13 = vpop.f32.mrf.mxu0 }
 0x843   : > { %9110 = vperm.xlu1 %10425, %v9063_v17   ;;  %9120 = vperm.xlu0 %10424, %v9065_v23  }
 0x845   : > { %v7957_v53 = vpop.permute.xlu1 %7956  ;;  %v8613_v57 = vpop.permute.xlu0 %8612 }
 0x846   : > { %8029 = vst.msk [vmem:[#allocation3 + $0x5c] sm:$0xf] %vm2574_vm1, %v7957_v53  ;;  %9115 = vperm.xlu2 %10426, %v9064_v60   ;;  %v9082_v53 = vld [vmem:[%s14673_s16 + $0xb0] sm:$0xff]  ;;  %v14753_v60 = vpop.f32.mrf.mxu2 }
 0x847   : > { %8693 = vst.msk [vmem:[#allocation3 + $0x3c] sm:$0xf] %vm3104_vm4, %v8613_v57  ;;  %10186 = vmatmul.msk.bf16.gmra.mxu3 %vm3281_vm7, %v10265_v45  ;;  %v9084_v45 = vld [vmem:[%s14673_s16 + $0xc0] sm:$0xff]  ;;  %v9086_v57 = vld [vmem:[%s14673_s16 + $0xd0] sm:$0xff] }
 0x848   : > { %v8289_v59 = vpop.permute.xlu2 %8288 }
 0x849   : > { %8363 = vst.msk [vmem:[#allocation3 + $0x54] sm:$0xf] %vm2911_vm2, %v8289_v59 }
 0x84b   : > { %9125 = vperm.xlu1 %10425, %v9066_v54   ;;  %9135 = vperm.xlu0 %10424, %v9068_v16   ;;  %v9085_v54 = vld [vmem:[%s14673_s16 + $0xc8] sm:$0xff] }
 0x84c   : > { %v9089_v16 = vld [vmem:[%s14673_s16 + $0xe8] sm:$0xff] }
 0x84d   : > { %v8615_v40 = vpop.permute.xlu1 %8614  ;;  %v8281_v35 = vpop.permute.xlu0 %8280 }
 0x84e   : > { %8694 = vst.msk [vmem:[#allocation3 + $0x40] sm:$0xf] %vm3104_vm4, %v8615_v40  ;;  %9130 = vperm.xlu2 %10426, %v9067_v61   ;;  %v10266_v2 = vld [vmem:[#allocation3 + $0x38] sm:$0xff]  ;;  %v9087_v61 = vld [vmem:[%s14673_s16 + $0xd8] sm:$0xff] }
 0x84f   : > { %8359 = vst.msk [vmem:[#allocation3 + $0x44] sm:$0xf] %vm2911_vm2, %v8281_v35  ;;  %v14759_v35 = vpop.f32.mrf.mxu1 }
 0x850   : > { %8695 = vst.msk [vmem:[#allocation3 + $0x44] sm:$0xf] %vm3104_vm4, %v8617_v14  ;;  %v7965_v49 = vpop.permute.xlu2 %7964 }
 0x851   : > { %8033 = vst.msk [vmem:[#allocation3 + $0x6c] sm:$0xf] %vm2574_vm1, %v7965_v49  ;;  %v14766_v49 = vpop.f32.mrf.mxu0 }
 0x853   : > { %9140 = vperm.xlu1 %10425, %v9069_v10   ;;  %9150 = vperm.xlu0 %10424, %v9071_v4   ;;  %v9090_v4 = vld [vmem:[%s14673_s16 + $0xf0] sm:$0xff] }
 0x855   : > { %v8283_v25 = vpop.permute.xlu1 %8282  ;;  %v7959_v21 = vpop.permute.xlu0 %7958 }
 0x856   : > { %8360 = vst.msk [vmem:[#allocation3 + $0x48] sm:$0xf] %vm2911_vm2, %v8283_v25  ;;  %9145 = vperm.xlu2 %10426, %v9070_v15   ;;  %v14770_v25 = vpop.f32.mrf.mxu2 }
 0x857   : > { %8030 = vst.msk [vmem:[#allocation3 + $0x60] sm:$0xf] %vm2574_vm1, %v7959_v21  ;;  %10187 = vmatmul.msk.bf16.gmra.mxu3 %vm3281_vm7, %v10266_v2  ;;  %v10267_v37 = vld [vmem:[#allocation3 + $0x40] sm:$0xff] }
 0x858   : > { %v8627_v62 = vpop.permute.xlu2 %8626 }
 0x85b   : > { %9155 = vperm.xlu1 %10425, %v9072_v50   ;;  %9165 = vperm.xlu0 %10424, %v9074_v1  }
 0x85d   : > { %v8621_v26 = vpop.permute.xlu1 %8620  ;;  %v8619_v5 = vpop.permute.xlu0 %8618 }
 0x85e   : > { %8697 = vst.msk [vmem:[#allocation3 + $0x4c] sm:$0xf] %vm3104_vm4, %v8621_v26  ;;  %9160 = vperm.xlu2 %10426, %v9073_v7   ;;  %v14778_v26 = vpop.f32.mrf.mxu1  ;;  %v14782_v7 = vpop.f32.mrf.mxu0 }
 0x85f   : > { %8696 = vst.msk [vmem:[#allocation3 + $0x48] sm:$0xf] %vm3104_vm4, %v8619_v5 }
 0x860   : > { %v8295_v8 = vpop.permute.xlu2 %8294 }
 0x861   : > { %8366 = vst.msk [vmem:[#allocation3 + $0x60] sm:$0xf] %vm2911_vm2, %v8295_v8  ;;  %v14784_v8 = vpop.f32.mrf.mxu2 }
 0x863   : > { %9170 = vperm.xlu1 %10425, %v9075_v42   ;;  %9180 = vperm.xlu0 %10424, %v9077_v63  }
 0x865   : > { %v8287_v41 = vpop.permute.xlu1 %8286  ;;  %v7963_v55 = vpop.permute.xlu0 %7962 }
 0x866   : > { %8362 = vst.msk [vmem:[#allocation3 + $0x50] sm:$0xf] %vm2911_vm2, %v8287_v41  ;;  %9175 = vperm.xlu2 %10426, %v9076_v19   ;;  %v10268_v51 = vld [vmem:[#allocation3 + $0x48] sm:$0xff]  ;;  %v14794_v63 = vpop.f32.mrf.mxu0 }
 0x867   : > { %8032 = vst.msk [vmem:[#allocation3 + $0x68] sm:$0xf] %vm2574_vm1, %v7963_v55  ;;  %10188 = vmatmul.msk.bf16.gmra.mxu3 %vm3281_vm7, %v10267_v37  ;;  %v14792_v55 = vpop.f32.mrf.mxu1 }
 0x868   : > { %v8633_v52 = vpop.permute.xlu2 %8632 }
 0x86a   : > { %v8912_v36 = vpop.f32.mrf.mxu3 }
 0x86b   : > { %v14717_v58 = vadd.f32 %v8912_v36, %v14075_v20  ;;  %9185 = vperm.xlu1 %10425, %v9078_v48   ;;  %9195 = vperm.xlu0 %10424, %v9080_v33  }
 0x86d   : > { %v8625_v9 = vpop.permute.xlu1 %8624  ;;  %v8623_v47 = vpop.permute.xlu0 %8622 }
 0x86e   : > { %8699 = vst.msk [vmem:[#allocation3 + $0x54] sm:$0xf] %vm3104_vm4, %v8625_v9  ;;  %9190 = vperm.xlu2 %10426, %v9079_v56   ;;  %v14799_v9 = vpop.f32.mrf.mxu2 }
 0x86f   : > { %8698 = vst.msk [vmem:[#allocation3 + $0x50] sm:$0xf] %vm3104_vm4, %v8623_v47 }
 0x870   : > { %v8299_v46 = vpop.permute.xlu2 %8298 }
 0x871   : > { %8368 = vst.msk [vmem:[#allocation3 + $0x68] sm:$0xf] %vm2911_vm2, %v8299_v46 }
 0x872   : > { %v8914_v14 = vpop.f32.mrf.mxu3 }
 0x873   : > { %v14727_v20 = vadd.f32 %v8914_v14, %v14088_v38  ;;  %v9081_v38 = vld [vmem:[%s14673_s16 + $0xa8] sm:$0xff]  ;;  %9210 = vperm.xlu0 %10424, %v9083_v24   ;;  %v14801_v14 = vpop.f32.mrf.mxu1 }
 0x874   : > { %9200 = vperm.xlu1 %10425, %v9081_v38  }
 0x875   : > { %v8293_v44 = vpop.permute.xlu1 %8292  ;;  %v8291_v43 = vpop.permute.xlu0 %8290 }
 0x876   : > { %8365 = vst.msk [vmem:[#allocation3 + $0x5c] sm:$0xf] %vm2911_vm2, %v8293_v44  ;;  %9205 = vperm.xlu2 %10426, %v9082_v53   ;;  %v10269_v23 = vld [vmem:[#allocation3 + $0x50] sm:$0xff]  ;;  %v14808_v44 = vpop.f32.mrf.mxu2 }
 0x877   : > { %8364 = vst.msk [vmem:[#allocation3 + $0x58] sm:$0xf] %vm2911_vm2, %v8291_v43  ;;  %10189 = vmatmul.msk.bf16.gmra.mxu3 %vm3281_vm7, %v10268_v51  ;;  %v14805_v51 = vpop.f32.mrf.mxu0  ;;  %v14833_v53 = vld [vmem:[%s15019_s3] ss:$0 sm:$0xff] }
 0x878   : > { %8700 = vst.msk [vmem:[#allocation3 + $0x58] sm:$0xf] %vm3104_vm4, %v8627_v62  ;;  %v8637_v18 = vpop.permute.xlu2 %8636  ;;  %v9088_v62 = vld [vmem:[%s14673_s16 + $0xe0] sm:$0xff] }
 0x87a   : > { %v8917_v22 = vpop.f32.mrf.mxu3 }
 0x87b   : > { %v14742_v3 = vadd.f32 %v8917_v22, %v14100_v30  ;;  %9225 = vperm.xlu0 %10424, %v9086_v57   ;;  %v14814_v22 = vpop.f32.mrf.mxu1 }
 0x87c   : > { %9215 = vperm.xlu1 %10425, %v9084_v45  }
 0x87d   : > { %v7967_v34 = vpop.permute.xlu1 %7966  ;;  %v8629_v39 = vpop.permute.xlu0 %8628 }
 0x87e   : > { %8034 = vst.msk [vmem:[#allocation3 + $0x70] sm:$0xf] %vm2574_vm1, %v7967_v34  ;;  %9220 = vperm.xlu2 %10426, %v9085_v54   ;;  %v14824_v34 = vld [vmem:[%s283_s14] ss:$0 sm:$0xff]  ;;  %v14828_v45 = vpop.f32.mrf.mxu2  ;;  %s9428_s14 = scalar_lea.hbm %s15022_s6, %s10279_s28 }
 0x87f   : > { %8701 = vst.msk [vmem:[#allocation3 + $0x5c] sm:$0xf] %vm3104_vm4, %v8629_v39  ;;  %v9028_v54 = vadd.f32 %v14824_v34, %v14717_v58  ;;  %s9431_s9 = sshll.u32 %s9428_s14, 4  ;;  %s9432_s9 = int_to_ptr.hbm [resolvable:$true] %s9431_s9 }
 0x880   : > { %v8305_v17 = vpop.permute.xlu2 %8304  ;;  %s10443_s15 = sshra.s32 %s9432_s9, 4  ;;  %s10444_s15 = int_to_ptr.hbm [resolvable:$true] %s10443_s15 }
 0x881   : > { %p10450_p0 = scmp.lt.s32.totalorder %s10444_s15, %s15022_s6 }
 0x882   : > { %v14755_v30 = vpop.f32.mrf.mxu3 }
 0x883   : > { %9240 = vperm.xlu0 %10424, %v9089_v16  }
 0x884   : > { %9230 = vperm.xlu1 %10425, %v9087_v61  }
 0x885   : > { %v8631_v59 = vpop.permute.xlu1 %8630  ;;  %v8297_v40 = vpop.permute.xlu0 %8296 }
 0x886   : > { %8702 = vst.msk [vmem:[#allocation3 + $0x60] sm:$0xf] %vm3104_vm4, %v8631_v59  ;;  %9235 = vperm.xlu2 %10426, %v9088_v62   ;;  %v10270_v50 = vld [vmem:[#allocation3 + $0x58] sm:$0xff]  ;;  %v9029_v59 = vadd.f32 %v14824_v34, %v14727_v20  ;;  %v8995_v20 = vadd.f32 %v14755_v30, %v14109_v27  ;;  %v14860_v27 = vpop.f32.mrf.mxu2 }
 0x887   : > { %8367 = vst.msk [vmem:[#allocation3 + $0x64] sm:$0xf] %vm2911_vm2, %v8297_v40  ;;  %10190 = vmatmul.msk.bf16.gmra.mxu3 %vm3281_vm7, %v10269_v23 }
 0x888   : > { %8703 = vst.msk [vmem:[#allocation3 + $0x64] sm:$0xf] %vm3104_vm4, %v8633_v52  ;;  %v8307_v15 = vpop.permute.xlu2 %8306  ;;  %v9091_v52 = vld [vmem:[%s14673_s16 + $0xf8] sm:$0xff]  ;;  %v9031_v30 = vadd.f32 %v14824_v34, %v8995_v20  ;;  %s10445_s16 = scalar_lea.hbm %s10444_s15, 128 }
 0x889   : > { %p10446_p11 = scmp.ne.s32.totalorder %s10444_s15, %s10445_s16  ;;  %p10451_p1 = scmp.lt.s32.totalorder %s10449_s17, %s10445_s16 }
 0x88a   : > { %v14768_v2 = vpop.f32.mrf.mxu3 }
 0x88b   : > { %p10447_p12 = pnand %p10446_p11, %p10576_p5  ;;  %p10452_p2 = por %p10451_p1, %p10450_p0 }
 0x88c   : > { %9245 = vperm.xlu1 %10425, %v9090_v4   ;;  %v14847_v4 = vpop.f32.mrf.mxu1 }
 0x88d   : > { %v7971_v21 = vpop.permute.xlu1 %7970  ;;  %v7969_v10 = vpop.permute.xlu0 %7968  ;;  %p10448_p13 = pneg %p10447_p12 }
 0x88e   : > { %8036 = vst.msk [vmem:[#allocation3 + $0x78] sm:$0xf] %vm2574_vm1, %v7971_v21  ;;  %9250 = vperm.xlu2 %10426, %v9091_v52  }
 0x88f   : > { %8372 = vst.msk [vmem:[#allocation3 + $0x78] sm:$0xf] %vm2911_vm2, %v8307_v15  ;;  %v10271_v19 = vld [vmem:[#allocation3 + $0x60] sm:$0xff]  ;;  %v8996_v15 = vadd.f32 %v14768_v2, %v14121_v28  ;;  %v9030_v28 = vadd.f32 %v14824_v34, %v14742_v3  ;;  %p10453_p3 = pnand %p10452_p2, %p10448_p13 }
 0x890   : > { %8035 = vst.msk [vmem:[#allocation3 + $0x74] sm:$0xf] %vm2574_vm1, %v7969_v10  ;;  %v8645_v47 = vpop.permute.xlu2 %8644 }
 0x891   : > { %8371 = vst.msk [vmem:[#allocation3 + $0x74] sm:$0xf] %vm2911_vm2, %v8305_v17  ;;  %v9032_v2 = vadd.f32 %v14824_v34, %v8996_v15  ;;  %v3582_v15 = vadd.f32 %v14724_v12, %v14730_v32 }
 0x892   : > { %v14780_v5 = vpop.f32.mrf.mxu3 }
 0x893   : > { %v8997_v58 = vadd.f32 %v14780_v5, %v14130_v11 }
 0x895   : > { %v8635_v1 = vpop.permute.xlu1 %8634  ;;  %v8301_v37 = vpop.permute.xlu0 %8300 }
 0x896   : > { %8704 = vst.msk [vmem:[#allocation3 + $0x68] sm:$0xf] %vm3104_vm4, %v8635_v1 }
 0x897   : > { %8369 = vst.msk [vmem:[#allocation3 + $0x6c] sm:$0xf] %vm2911_vm2, %v8301_v37  ;;  %10191 = vmatmul.msk.bf16.gmra.mxu3 %vm3281_vm7, %v10270_v50 }
 0x898   : > { %8705 = vst.msk [vmem:[#allocation3 + $0x6c] sm:$0xf] %vm3104_vm4, %v8637_v18  ;;  %v9106_v43 = vpop.permute.xlu2 %9105  ;;  %v14817_v18 = vpop.f32.mrf.mxu0 }
 0x899   : > { %v9258_v62 = vmul.f32 %v14833_v53, %v9106_v43 }
 0x89a   : > { %v14790_v41 = vpop.f32.mrf.mxu3 }
 0x89d   : > { %v8303_v42 = vpop.permute.xlu1 %8302  ;;  %v7973_v36 = vpop.permute.xlu0 %7972 }
 0x89e   : > { %8370 = vst.msk [vmem:[#allocation3 + $0x70] sm:$0xf] %vm2911_vm2, %v8303_v42 }
 0x89f   : > { %8037 = vst.msk [vmem:[#allocation3 + $0x7c] sm:$0xf] %vm2574_vm1, %v7973_v36  ;;  %v10272_v57 = vld [vmem:[#allocation3 + $0x68] sm:$0xff] }
 0x8a0   : > { %v9116_v17 = vpop.permute.xlu2 %9115  ;;  %v14855_v36 = vpop.f32.mrf.mxu0 }
 0x8a1   : > { %v9260_v1 = vmul.f32 %v14833_v53, %v9116_v17  ;;  %v8998_v17 = vadd.f32 %v14790_v41, %v14142_v29 }
 0x8a2   : > { %v8929_v48 = vpop.f32.mrf.mxu3 }
 0x8a3   : > { %v9034_v12 = vadd.f32 %v14824_v34, %v8998_v17 }
 0x8a5   : > { %v8641_v33 = vpop.permute.xlu1 %8640  ;;  %v8639_v46 = vpop.permute.xlu0 %8638 }
 0x8a6   : > { %8707 = vst.msk [vmem:[#allocation3 + $0x74] sm:$0xf] %vm3104_vm4, %v8641_v33  ;;  %v9033_v33 = vadd.f32 %v14824_v34, %v8997_v58 }
 0x8a7   : > { %8706 = vst.msk [vmem:[#allocation3 + $0x70] sm:$0xf] %vm3104_vm4, %v8639_v46  ;;  %10192 = vmatmul.msk.bf16.gmra.mxu3 %vm3281_vm7, %v10271_v19  ;;  %v9290_v19 = vadd.f32 %v9258_v62, %v9030_v28  ;;  %v9292_v46 = vadd.f32 %v9260_v1, %v9032_v2 }
 0x8a8   : > { %v9131_v43 = vpop.permute.xlu2 %9130  ;;  %v14883_v62 = vpop.f32.mrf.mxu0 }
 0x8aa   : > { %v14810_v38 = vpop.f32.mrf.mxu3 }
 0x8ad   : > { %v8643_v56 = vpop.permute.xlu1 %8642  ;;  %v8309_v24 = vpop.permute.xlu0 %8308 }
 0x8ae   : > { %8708 = vst.msk [vmem:[#allocation3 + $0x78] sm:$0xf] %vm3104_vm4, %v8643_v56  ;;  %v8999_v56 = vadd.f32 %v8929_v48, %v14150_v31  ;;  %v14877_v31 = vpop.f32.mrf.mxu1  ;;  %v10273_v41 = vld [vmem:[#allocation3 + $0x70] sm:$0xff] }
 0x8af   : > { %8373 = vst.msk [vmem:[#allocation3 + $0x7c] sm:$0xf] %vm2911_vm2, %v8309_v24 }
 0x8b0   : > { %8709 = vst.msk [vmem:[#allocation3 + $0x7c] sm:$0xf] %vm3104_vm4, %v8645_v47  ;;  %v9035_v48 = vadd.f32 %v14824_v34, %v8999_v56  ;;  %v9146_v2 = vpop.permute.xlu2 %9145 }
 0x8b2   : > { %v14826_v39 = vpop.f32.mrf.mxu3 }
 0x8b5   : > { %v9101_v23 = vpop.permute.xlu1 %9100  ;;  %v9096_v61 = vpop.permute.xlu0 %9095 }
 0x8b6   : > { %v9257_v40 = vmul.f32 %v14833_v53, %v9101_v23  ;;  %v9256_v16 = vmul.f32 %v14833_v53, %v9096_v61  ;;  %v9322_v23 = vmax.f32 %v9290_v19, 0.0  ;;  %v3587_v61 = vadd.f32 %v14759_v35, %v14766_v49 }
 0x8b7   : > { %10193 = vmatmul.msk.bf16.gmra.mxu3 %vm3281_vm7, %v10272_v57 }
 0x8b8   : > { %v9289_v21 = vadd.f32 %v9257_v40, %v9029_v59  ;;  %v9288_v10 = vadd.f32 %v9256_v16, %v9028_v54  ;;  %v9263_v59 = vmul.f32 %v14833_v53, %v9131_v43  ;;  %v9324_v54 = vmax.f32 %v9292_v46, 0.0 }
 0x8b9   : > { %v6559_v20 = vadd.f32 %v14770_v25, %v3587_v61  ;;  %v3592_v46 = vadd.f32 %v14792_v55, %v14794_v63  ;;  %v9161_v61 = vpop.permute.xlu2 %9160 }
 0x8ba   : > { %v9321_v50 = vmax.f32 %v9289_v21, 0.0  ;;  %v9320_v37 = vmax.f32 %v9288_v10, 0.0  ;;  %v8937_v42 = vpop.f32.mrf.mxu3  ;;  %v3584_v10 = vadd.f32 %v14744_v6, %v14748_v13  ;;  %v9295_v32 = vadd.f32 %v9263_v59, %v9035_v48  ;;  %v14893_v13 = vpop.f32.mrf.mxu2 }
 0x8bb   : > { %v9002_v28 = vadd.f32 %v8937_v42, %v6559_v20  ;;  %v14914_v59 = vpop.f32.mrf.mxu0  ;;  %v6561_v55 = vadd.f32 %v14799_v9, %v3592_v46 }
 0x8bc   : > { %v10283_v52 = vpack.c.bf16 %v9321_v50, %v9320_v37  ;;  %v6557_v50 = vadd.f32 %v14734_v0, %v3582_v15  ;;  %v3589_v37 = vadd.f32 %v14778_v26, %v14782_v7  ;;  %v6558_v6 = vadd.f32 %v14753_v60, %v3584_v10 }
 0x8bd   : > { %v9111_v47 = vpop.permute.xlu1 %9110  ;;  %v9121_v5 = vpop.permute.xlu0 %9120  ;;  %v9038_v7 = vadd.f32 %v14824_v34, %v9002_v28  ;;  %v9266_v60 = vmul.f32 %v14833_v53, %v9146_v2 }
 0x8be   : > { %v9259_v11 = vmul.f32 %v14833_v53, %v9111_v47  ;;  %10284 = vst [vmem:[%s14865_s26] sm:$0xff] %v10283_v52   ;;  %v9261_v3 = vmul.f32 %v14833_v53, %v9121_v5  ;;  %v9000_v25 = vadd.f32 %v14810_v38, %v6557_v50  ;;  %v6560_v52 = vadd.f32 %v14784_v8, %v3589_v37  ;;  %v14905_v8 = vpop.f32.mrf.mxu1 }
 0x8bf   : > { %v9327_v47 = vmax.f32 %v9295_v32, 0.0  ;;  %v3597_v37 = vadd.f32 %v14814_v22, %v14817_v18 }
 0x8c0   : > { %v9291_v24 = vadd.f32 %v9259_v11, %v9031_v30  ;;  %v9293_v57 = vadd.f32 %v9261_v3, %v9033_v33  ;;  %v9001_v30 = vadd.f32 %v14826_v39, %v6558_v6  ;;  %v9036_v38 = vadd.f32 %v14824_v34, %v9000_v25 }
 0x8c2   : > { %v9323_v40 = vmax.f32 %v9291_v24, 0.0  ;;  %v9325_v16 = vmax.f32 %v9293_v57, 0.0  ;;  %v8939_v21 = vpop.f32.mrf.mxu3  ;;  %v9037_v39 = vadd.f32 %v14824_v34, %v9001_v30  ;;  %v9298_v24 = vadd.f32 %v9266_v60, %v9038_v7 }
 0x8c3   : > { %v9003_v42 = vadd.f32 %v8939_v21, %v6560_v52  ;;  %v3384_v28 = vpop.f32.mrf.mxu0 }
 0x8c4   : > { %v10288_v29 = vpack.c.bf16 %v9323_v40, %v9322_v23  ;;  %v10293_v35 = vpack.c.bf16 %v9325_v16, %v9324_v54  ;;  %v3594_v23 = vadd.f32 %v14801_v14, %v14805_v51  ;;  %v6511_v16 = vpop.f32.mrf.mxu2  ;;  %v9269_v51 = vmul.f32 %v14833_v53, %v9161_v61 }
 0x8c5   : > { %v9126_v49 = vpop.permute.xlu1 %9125  ;;  %v9136_v1 = vpop.permute.xlu0 %9135  ;;  %v9039_v57 = vadd.f32 %v14824_v34, %v9003_v42 }
 0x8c6   : > { %10360 = vst [vmem:[%s14865_s26 + $0x8] sm:$0xff] %v10288_v29   ;;  %v9262_v58 = vmul.f32 %v14833_v53, %v9126_v49  ;;  %v9264_v26 = vmul.f32 %v14833_v53, %v9136_v1  ;;  %v6562_v54 = vadd.f32 %v14808_v44, %v3594_v23  ;;  %v9330_v29 = vmax.f32 %v9298_v24, 0.0  ;;  %v3606_v32 = vpop.f32.mrf.mxu1 }
 0x8c7   : > { %10361 = vst [vmem:[%s14865_s26 + $0x10] sm:$0xff] %v10293_v35   ;;  %10194 = vmatmul.msk.bf16.gmra.mxu3 %vm3281_vm7, %v10273_v41  ;;  %v10274_v35 = vld [vmem:[#allocation3 + $0x78] sm:$0xff] }
 0x8c8   : > { %v9294_v0 = vadd.f32 %v9262_v58, %v9034_v12  ;;  %v9296_v43 = vadd.f32 %v9264_v26, %v9036_v38  ;;  %v3599_v26 = vadd.f32 %v14847_v4, %v14855_v36  ;;  %v3602_v4 = vadd.f32 %v14877_v31, %v14883_v62 }
 0x8ca   : > { %v9326_v19 = vmax.f32 %v9294_v0, 0.0  ;;  %v8942_v11 = vpop.f32.mrf.mxu3  ;;  %v9328_v21 = vmax.f32 %v9296_v43, 0.0  ;;  %v6563_v0 = vadd.f32 %v14828_v45, %v3597_v37  ;;  %v6564_v42 = vadd.f32 %v14860_v27, %v3599_v26 }
 0x8cb   : > { %v9004_v15 = vadd.f32 %v8942_v11, %v6561_v55  ;;  %v3386_v38 = vpop.f32.mrf.mxu0  ;;  %v6565_v24 = vadd.f32 %v14893_v13, %v3602_v4  ;;  %v9176_v55 = vpop.permute.xlu2 %9175 }
 0x8cc   : > { %v10298_v5 = vpack.c.bf16 %v9327_v47, %v9326_v19  ;;  %v6514_v52 = vpop.f32.mrf.mxu2  ;;  %v9272_v31 = vmul.f32 %v14833_v53, %v9176_v55 }
 0x8cd   : > { %v9141_v33 = vpop.permute.xlu1 %9140  ;;  %v9151_v56 = vpop.permute.xlu0 %9150  ;;  %v9040_v50 = vadd.f32 %v14824_v34, %v9004_v15 }
 0x8ce   : > { %10362 = vst [vmem:[%s14865_s26 + $0x18] sm:$0xff] %v10298_v5   ;;  %v9265_v3 = vmul.f32 %v14833_v53, %v9141_v33  ;;  %v9267_v17 = vmul.f32 %v14833_v53, %v9151_v56  ;;  %v3608_v60 = vpop.f32.mrf.mxu1 }
 0x8d0   : > { %v9297_v63 = vadd.f32 %v9265_v3, %v9037_v39  ;;  %v9299_v40 = vadd.f32 %v9267_v17, %v9039_v57 }
 0x8d2   : > { %v9329_v48 = vmax.f32 %v9297_v63, 0.0  ;;  %v9331_v41 = vmax.f32 %v9299_v40, 0.0  ;;  %v8944_v10 = vpop.f32.mrf.mxu3  ;;  %v3604_v63 = vadd.f32 %v14905_v8, %v14914_v59 }
 0x8d3   : > { %v9005_v14 = vadd.f32 %v8944_v10, %v6562_v54  ;;  %v3389_v17 = vpop.f32.mrf.mxu0 }
 0x8d4   : > { %v10303_v20 = vpack.c.bf16 %v9329_v48, %v9328_v21  ;;  %v10308_v9 = vpack.c.bf16 %v9331_v41, %v9330_v29  ;;  %v6516_v33 = vpop.f32.mrf.mxu2  ;;  %v6566_v54 = vadd.f32 %v6511_v16, %v3604_v63 }
 0x8d5   : > { %v9156_v49 = vpop.permute.xlu1 %9155  ;;  %v9041_v44 = vadd.f32 %v14824_v34, %v9005_v14  ;;  %v9166_v19 = vpop.permute.xlu0 %9165  ;;  %v3607_v14 = vadd.f32 %v3606_v32, %v3384_v28 }
 0x8d6   : > { %10363 = vst [vmem:[%s14865_s26 + $0x20] sm:$0xff] %v10303_v20   ;;  %v9268_v12 = vmul.f32 %v14833_v53, %v9156_v49  ;;  %v9270_v18 = vmul.f32 %v14833_v53, %v9166_v19  ;;  %v3611_v56 = vpop.f32.mrf.mxu1 }
 0x8d7   : > { %10364 = vst [vmem:[%s14865_s26 + $0x28] sm:$0xff] %v10308_v9   ;;  %v9301_v58 = vadd.f32 %v9269_v51, %v9041_v44  ;;  %10195 = vmatmul.msk.bf16.gmra.mxu3 %vm3281_vm7, %v10274_v35  ;;  %v6567_v35 = vadd.f32 %v6514_v52, %v3607_v14  ;;  %v3612_v19 = vadd.f32 %v3611_v56, %v3389_v17 }
 0x8d8   : > { %v9300_v1 = vadd.f32 %v9268_v12, %v9040_v50  ;;  %v3609_v50 = vadd.f32 %v3608_v60, %v3386_v38 }
 0x8d9   : > { %v9333_v6 = vmax.f32 %v9301_v58, 0.0 }
 0x8da   : > { %v9332_v25 = vmax.f32 %v9300_v1, 0.0  ;;  %v8947_v2 = vpop.f32.mrf.mxu3  ;;  %v6568_v1 = vadd.f32 %v6516_v33, %v3609_v50 }
 0x8db   : > { %v9006_v30 = vadd.f32 %v8947_v2, %v6563_v0  ;;  %v3391_v10 = vpop.f32.mrf.mxu0 }
 0x8dc   : > { %v10313_v47 = vpack.c.bf16 %v9333_v6, %v9332_v25  ;;  %v6519_v40 = vpop.f32.mrf.mxu2  ;;  %v9191_v25 = vpop.permute.xlu2 %9190 }
 0x8dd   : > { %v9171_v7 = vpop.permute.xlu1 %9170  ;;  %v9042_v22 = vadd.f32 %v14824_v34, %v9006_v30  ;;  %v9181_v61 = vpop.permute.xlu0 %9180  ;;  %v9275_v28 = vmul.f32 %v14833_v53, %v9191_v25 }
 0x8de   : > { %10365 = vst [vmem:[%s14865_s26 + $0x30] sm:$0xff] %v10313_v47   ;;  %v9271_v5 = vmul.f32 %v14833_v53, %v9171_v7  ;;  %v9273_v13 = vmul.f32 %v14833_v53, %v9181_v61  ;;  %v3613_v48 = vpop.f32.mrf.mxu1 }
 0x8df   : > { %v9302_v46 = vadd.f32 %v9270_v18, %v9042_v22  ;;  %v6569_v18 = vadd.f32 %v6519_v40, %v3612_v19 }
 0x8e1   : > { %v9334_v36 = vmax.f32 %v9302_v46, 0.0 }
 0x8e2   : > { %v8949_v11 = vpop.f32.mrf.mxu3 }
 0x8e3   : > { %v9007_v45 = vadd.f32 %v8949_v11, %v6564_v42  ;;  %v3394_v58 = vpop.f32.mrf.mxu0 }
 0x8e4   : > { %v6521_v8 = vpop.f32.mrf.mxu2 }
 0x8e5   : > { %v9043_v39 = vadd.f32 %v14824_v34, %v9007_v45  ;;  %v9186_v12 = vpop.permute.xlu1 %9185  ;;  %v9196_v33 = vpop.permute.xlu0 %9195 }
 0x8e6   : > { %v3616_v44 = vpop.f32.mrf.mxu1  ;;  %v9274_v37 = vmul.f32 %v14833_v53, %v9186_v12 }
 0x8e7   : > { %v9303_v43 = vadd.f32 %v9271_v5, %v9043_v39  ;;  %v3614_v5 = vadd.f32 %v3613_v48, %v3391_v10  ;;  %v9276_v39 = vmul.f32 %v14833_v53, %v9196_v33  ;;  %v3617_v63 = vadd.f32 %v3616_v44, %v3394_v58 }
 0x8e9   : > { %v9335_v27 = vmax.f32 %v9303_v43, 0.0  ;;  %v6570_v46 = vadd.f32 %v6521_v8, %v3614_v5 }
 0x8ea   : > { %v8952_v3 = vpop.f32.mrf.mxu3 }
 0x8eb   : > { %v10318_v57 = vpack.c.bf16 %v9335_v27, %v9334_v36  ;;  %v9008_v23 = vadd.f32 %v8952_v3, %v6565_v24  ;;  %v3396_v22 = vpop.f32.mrf.mxu0 }
 0x8ec   : > { %v6524_v32 = vpop.f32.mrf.mxu2 }
 0x8ed   : > { %10366 = vst [vmem:[%s14865_s26 + $0x38] sm:$0xff] %v10318_v57   ;;  %v9044_v21 = vadd.f32 %v14824_v34, %v9008_v23  ;;  %v9201_v4 = vpop.permute.xlu1 %9200 }
 0x8ee   : > { %v3618_v26 = vpop.f32.mrf.mxu1  ;;  %v9277_v3 = vmul.f32 %v14833_v53, %v9201_v4 }
 0x8ef   : > { %v9304_v29 = vadd.f32 %v9272_v31, %v9044_v21  ;;  %v6571_v21 = vadd.f32 %v6524_v32, %v3617_v63 }
 0x8f1   : > { %v9336_v59 = vmax.f32 %v9304_v29, 0.0 }
 0x8f2   : > { %v8954_v62 = vpop.f32.mrf.mxu3 }
 0x8f3   : > { %v9009_v15 = vadd.f32 %v8954_v62, %v6566_v54  ;;  %v3399_v24 = vpop.f32.mrf.mxu0 }
 0x8f4   : > { %v6526_v38 = vpop.f32.mrf.mxu2 }
 0x8f5   : > { %v9045_v41 = vadd.f32 %v14824_v34, %v9009_v15 }
 0x8f6   : > { %v3621_v27 = vpop.f32.mrf.mxu1 }
 0x8f7   : > { %v9305_v20 = vadd.f32 %v9273_v13, %v9045_v41  ;;  %v3619_v13 = vadd.f32 %v3618_v26, %v3396_v22  ;;  %v3622_v44 = vadd.f32 %v3621_v27, %v3399_v24 }
 0x8f9   : > { %v9337_v51 = vmax.f32 %v9305_v20, 0.0  ;;  %v6572_v29 = vadd.f32 %v6526_v38, %v3619_v13  ;;  %v9206_v20 = vpop.permute.xlu2 %9205 }
 0x8fa   : > { %v8957_v16 = vpop.f32.mrf.mxu3  ;;  %v9278_v8 = vmul.f32 %v14833_v53, %v9206_v20 }
 0x8fb   : > { %v10323_v9 = vpack.c.bf16 %v9337_v51, %v9336_v59  ;;  %v9010_v49 = vadd.f32 %v8957_v16, %v6567_v35  ;;  %v3401_v48 = vpop.f32.mrf.mxu0  ;;  %v9211_v51 = vpop.permute.xlu0 %9210 }
 0x8fc   : > { %v6529_v23 = vpop.f32.mrf.mxu2  ;;  %v9279_v16 = vmul.f32 %v14833_v53, %v9211_v51 }
 0x8fd   : > { %10367 = vst [vmem:[%s14865_s26 + $0x40] sm:$0xff] %v10323_v9   ;;  %v9046_v6 = vadd.f32 %v14824_v34, %v9010_v49 }
 0x8fe   : > { %v3623_v62 = vpop.f32.mrf.mxu1 }
 0x8ff   : > { %v9306_v52 = vadd.f32 %v9274_v37, %v9046_v6  ;;  %v6573_v6 = vadd.f32 %v6529_v23, %v3622_v44 }
 0x901   : > { %v9338_v7 = vmax.f32 %v9306_v52, 0.0 }
 0x902   : > { %v8959_v2 = vpop.f32.mrf.mxu3 }
 0x903   : > { %v9011_v0 = vadd.f32 %v8959_v2, %v6568_v1  ;;  %v3404_v12 = vpop.f32.mrf.mxu0  ;;  %v9226_v23 = vpop.permute.xlu0 %9225 }
 0x904   : > { %v6531_v41 = vpop.f32.mrf.mxu2  ;;  %v9282_v63 = vmul.f32 %v14833_v53, %v9226_v23 }
 0x905   : > { %v9047_v47 = vadd.f32 %v14824_v34, %v9011_v0 }
 0x906   : > { %v3626_v49 = vpop.f32.mrf.mxu1 }
 0x907   : > { %v9307_v30 = vadd.f32 %v9275_v28, %v9047_v47  ;;  %v3624_v28 = vadd.f32 %v3623_v62, %v3401_v48  ;;  %v3627_v5 = vadd.f32 %v3626_v49, %v3404_v12 }
 0x909   : > { %v9339_v60 = vmax.f32 %v9307_v30, 0.0  ;;  %v6574_v52 = vadd.f32 %v6531_v41, %v3624_v28  ;;  %v9216_v30 = vpop.permute.xlu1 %9215 }
 0x90a   : > { %v8962_v42 = vpop.f32.mrf.mxu3 }
 0x90b   : > { %v10328_v11 = vpack.c.bf16 %v9339_v60, %v9338_v7  ;;  %v9012_v45 = vadd.f32 %v8962_v42, %v6569_v18  ;;  %v3406_v26 = vpop.f32.mrf.mxu0  ;;  %v9280_v7 = vmul.f32 %v14833_v53, %v9216_v30  ;;  %v9221_v42 = vpop.permute.xlu2 %9220 }
 0x90c   : > { %v6534_v2 = vpop.f32.mrf.mxu2  ;;  %v9281_v22 = vmul.f32 %v14833_v53, %v9221_v42  ;;  %v9241_v44 = vpop.permute.xlu0 %9240 }
 0x90d   : > { %10368 = vst [vmem:[%s14865_s26 + $0x48] sm:$0xff] %v10328_v11   ;;  %v9048_v43 = vadd.f32 %v14824_v34, %v9012_v45 }
 0x90e   : > { %v3628_v0 = vpop.f32.mrf.mxu1 }
 0x90f   : > { %v9308_v57 = vadd.f32 %v9276_v39, %v9048_v43  ;;  %v6575_v43 = vadd.f32 %v6534_v2, %v3627_v5 }
 0x911   : > { %v9340_v40 = vmax.f32 %v9308_v57, 0.0 }
 0x912   : > { %v8964_v36 = vpop.f32.mrf.mxu3 }
 0x913   : > { %v9013_v56 = vadd.f32 %v8964_v36, %v6570_v46  ;;  %v3409_v27 = vpop.f32.mrf.mxu0  ;;  %v9236_v49 = vpop.permute.xlu2 %9235 }
 0x914   : > { %v6536_v38 = vpop.f32.mrf.mxu2 }
 0x915   : > { %v9049_v17 = vadd.f32 %v14824_v34, %v9013_v56  ;;  %v3629_v56 = vadd.f32 %v3628_v0, %v3406_v26 }
 0x916   : > { %v3631_v36 = vpop.f32.mrf.mxu1 }
 0x917   : > { %v9309_v55 = vadd.f32 %v9277_v3, %v9049_v17  ;;  %v6576_v57 = vadd.f32 %v6536_v38, %v3629_v56  ;;  %v3632_v48 = vadd.f32 %v3631_v36, %v3409_v27 }
 0x919   : > { %v9341_v61 = vmax.f32 %v9309_v55, 0.0 }
 0x91a   : > { %v8967_v54 = vpop.f32.mrf.mxu3 }
 0x91b   : > { %v10333_v31 = vpack.c.bf16 %v9341_v61, %v9340_v40  ;;  %v9014_v15 = vadd.f32 %v8967_v54, %v6571_v21  ;;  %v9231_v61 = vpop.permute.xlu1 %9230 }
 0x91c   : > { %v6539_v24 = vpop.f32.mrf.mxu2  ;;  %v9283_v54 = vmul.f32 %v14833_v53, %v9231_v61 }
 0x91d   : > { %10369 = vst [vmem:[%s14865_s26 + $0x50] sm:$0xff] %v10333_v31   ;;  %v9050_v10 = vadd.f32 %v14824_v34, %v9014_v15  ;;  %v3411_v15 = vpop.f32.mrf.mxu0 }
 0x91e   : > { %v3633_v62 = vpop.f32.mrf.mxu1 }
 0x91f   : > { %v9310_v35 = vadd.f32 %v9278_v8, %v9050_v10  ;;  %v3634_v51 = vadd.f32 %v3633_v62, %v3411_v15 }
 0x921   : > { %v9342_v58 = vmax.f32 %v9310_v35, 0.0 }
 0x922   : > { %v8969_v14 = vpop.f32.mrf.mxu3 }
 0x923   : > { %v9015_v59 = vadd.f32 %v8969_v14, %v6572_v29  ;;  %v6577_v14 = vadd.f32 %v6539_v24, %v3632_v48 }
 0x924   : > { %v6541_v10 = vpop.f32.mrf.mxu2 }
 0x925   : > { %v9051_v9 = vadd.f32 %v14824_v34, %v9015_v59  ;;  %v3414_v35 = vpop.f32.mrf.mxu0 }
 0x927   : > { %v9311_v50 = vadd.f32 %v9279_v16, %v9051_v9  ;;  %v3636_v16 = vpop.f32.mrf.mxu1  ;;  %v6578_v9 = vadd.f32 %v6541_v10, %v3634_v51 }
 0x928   : > { %v3637_v28 = vadd.f32 %v3636_v16, %v3414_v35 }
 0x929   : > { %v9343_v1 = vmax.f32 %v9311_v50, 0.0 }
 0x92a   : > { %v8972_v37 = vpop.f32.mrf.mxu3 }
 0x92b   : > { %v10338_v25 = vpack.c.bf16 %v9343_v1, %v9342_v58  ;;  %v9016_v32 = vadd.f32 %v8972_v37, %v6573_v6  ;;  %v9284_v58 = vmul.f32 %v14833_v53, %v9236_v49  ;;  %v9285_v6 = vmul.f32 %v14833_v53, %v9241_v44 }
 0x92c   : > { %v6544_v37 = vpop.f32.mrf.mxu2 }
 0x92d   : > { %10370 = vst [vmem:[%s14865_s26 + $0x58] sm:$0xff] %v10338_v25   ;;  %v9052_v47 = vadd.f32 %v14824_v34, %v9016_v32  ;;  %v6579_v30 = vadd.f32 %v6544_v37, %v3637_v28 }
 0x92f   : > { %v9312_v18 = vadd.f32 %v9280_v7, %v9052_v47  ;;  %v3638_v26 = vpop.f32.mrf.mxu1  ;;  %v3416_v7 = vpop.f32.mrf.mxu0 }
 0x931   : > { %v9344_v33 = vmax.f32 %v9312_v18, 0.0  ;;  %v9246_v18 = vpop.permute.xlu1 %9245 }
 0x932   : > { %v8974_v19 = vpop.f32.mrf.mxu3 }
 0x933   : > { %v9017_v60 = vadd.f32 %v8974_v19, %v6574_v52 }
 0x934   : > { %v6546_v42 = vpop.f32.mrf.mxu2 }
 0x935   : > { %v9053_v11 = vadd.f32 %v14824_v34, %v9017_v60 }
 0x937   : > { %v9313_v45 = vadd.f32 %v9281_v22, %v9053_v11  ;;  %v3639_v22 = vadd.f32 %v3638_v26, %v3416_v7 }
 0x939   : > { %v9345_v46 = vmax.f32 %v9313_v45, 0.0  ;;  %v6580_v11 = vadd.f32 %v6546_v42, %v3639_v22  ;;  %v9251_v45 = vpop.permute.xlu2 %9250 }
 0x93a   : > { %v8977_v39 = vpop.f32.mrf.mxu3 }
 0x93b   : > { %v10343_v4 = vpack.c.bf16 %v9345_v46, %v9344_v33  ;;  %v9018_v3 = vadd.f32 %v8977_v39, %v6575_v43  ;;  %v9286_v33 = vmul.f32 %v14833_v53, %v9246_v18  ;;  %v9287_v39 = vmul.f32 %v14833_v53, %v9251_v45 }
 0x93d   : > { %10371 = vst [vmem:[%s14865_s26 + $0x60] sm:$0xff] %v10343_v4   ;;  %v9054_v17 = vadd.f32 %v14824_v34, %v9018_v3 }
 0x93f   : > { %v9314_v21 = vadd.f32 %v9282_v63, %v9054_v17 }
 0x941   : > { %v9346_v29 = vmax.f32 %v9314_v21, 0.0 }
 0x942   : > { %v8979_v55 = vpop.f32.mrf.mxu3 }
 0x943   : > { %v9019_v40 = vadd.f32 %v8979_v55, %v6576_v57 }
 0x945   : > { %v9055_v31 = vadd.f32 %v14824_v34, %v9019_v40 }
 0x947   : > { %v9315_v13 = vadd.f32 %v9283_v54, %v9055_v31 }
 0x949   : > { %v9347_v41 = vmax.f32 %v9315_v13, 0.0 }
 0x94a   : > { %v8982_v20 = vpop.f32.mrf.mxu3 }
 0x94b   : > { %v10348_v8 = vpack.c.bf16 %v9347_v41, %v9346_v29  ;;  %v9020_v59 = vadd.f32 %v8982_v20, %v6577_v14 }
 0x94d   : > { %10372 = vst [vmem:[%s14865_s26 + $0x68] sm:$0xff] %v10348_v8   ;;  %v9056_v50 = vadd.f32 %v14824_v34, %v9020_v59 }
 0x94f   : > { %v9316_v25 = vadd.f32 %v9284_v58, %v9056_v50 }
 0x951   : > { %v9348_v0 = vmax.f32 %v9316_v25, 0.0 }
 0x952   : > { %v8984_v12 = vpop.f32.mrf.mxu3 }
 0x953   : > { %v9021_v1 = vadd.f32 %v8984_v12, %v6578_v9 }
 0x955   : > { %v9057_v2 = vadd.f32 %v14824_v34, %v9021_v1 }
 0x957   : > { %v9317_v32 = vadd.f32 %v9285_v6, %v9057_v2 }
 0x959   : > { %v9349_v52 = vmax.f32 %v9317_v32, 0.0 }
 0x95a   : > { %v8987_v47 = vpop.f32.mrf.mxu3 }
 0x95b   : > { %v10353_v19 = vpack.c.bf16 %v9349_v52, %v9348_v0  ;;  %v9022_v60 = vadd.f32 %v8987_v47, %v6579_v30 }
 0x95d   : > { %10373 = vst [vmem:[%s14865_s26 + $0x70] sm:$0xff] %v10353_v19   ;;  %v9058_v38 = vadd.f32 %v14824_v34, %v9022_v60 }
 0x95f   : > { %v9318_v43 = vadd.f32 %v9286_v33, %v9058_v38 }
 0x961   : > { %v9350_v27 = vmax.f32 %v9318_v43, 0.0 }
 0x962   : > { %v8989_v5 = vpop.f32.mrf.mxu3 }
 0x963   : > { %v9023_v46 = vadd.f32 %v8989_v5, %v6580_v11 }
 0x965   : > { %v9059_v4 = vadd.f32 %v14824_v34, %v9023_v46 }
 0x967   : > { %v9319_v36 = vadd.f32 %v9287_v39, %v9059_v4 }
 0x969   : > { %v9351_v3 = vmax.f32 %v9319_v36, 0.0 }
 0x96b   : > { %v10358_v56 = vpack.c.bf16 %v9351_v3, %v9350_v27 }
 0x96d   : > { %10374 = vst [vmem:[%s14865_s26 + $0x78] sm:$0xff] %v10358_v56  }
 0x96e   : > { %10456 = shalt.err (!%p10453_p3)
}
 0x96f   : > { %s10501_s10 = smov 64   ;;  %s10502_s26 = smov 4  }
 0x970   : > { %10375 = dma.vmem_to_hbm [thread:$0]  (%p10576_p5), %s9430_s18, 2048, %s9432_s9, %s9417_s25, %s10501_s10, %s10501_s10, %s10502_s26  }
 0x971 PF: > { %p10381_p4 = scmp.ge.s32.totalorder %s10491_s24, 2  ;;  %s9446_s28 = sand.u32 1, %s10479_s21  }
 0x972   : > { %s9447_s29 = scalar_lea.sflag [#allocation5], %s9446_s28 }
 0x973   : > { %p10378_p7 = pnand %p10381_p4, %p10580_p6 }
 0x975   : > { %p10379_p8 = pneg %p10378_p7 }
 0x977   : > { %10474 = dma.done.wait (%p10379_p8), %s9447_s29, 2048  }
 0x978   : > { %10476 = vsyncadd (%p10379_p8), %s9447_s29, 4294965248  ;;  %p16_p9 = scmp.ge.s32.totalorder %s10563_s27, 4   ;;  %s15031_s21 = smov %s10483_s22 }
 0x979   : > { %s15032_s22 = smov %s10487_s23  ;;  %s15033_s23 = smov %s10574_s30 }
 0x97a   : > { %s15034_s24 = smov %s10563_s27  ;;  %18 = sbr.rel (!%p16_p9) target bundleno = 3 (0x3), region = 93 }
 0x97f   :  { %9453 = vsyncpa [#allocation5], 1 }
 0x980   :  { %9455 = vsyncpa [#allocation5 + $0x1], 1 }

</bundles_post_ra>
